<compile_context>
chip_gen: v7x
topology: tpu7x:2x2x1
jax: 0.10.0
libtpu: 0.0.40
codegen_flags: <defaults>
</compile_context>

<pallas_src>
import math

import jax
import jax.numpy as jnp
from jax.experimental import pallas as pl
from jax.experimental.pallas import tpu as pltpu

# Exact f32 matmuls for the reference and the wrapper-side weight folding so
# the kernel (exact f32 everywhere) can be compared tightly.
jax.config.update("jax_default_matmul_precision", "highest")

H = 4            # number of heads
D = 32           # d_model
DFF = 64         # d_ff
DH = D // H      # head dim
HD = H * D       # width of the folded V@Wo projection
LN_EPS = 1e-5    # torch.nn.LayerNorm default
NEG_INF = -1e9


# ----------------------------- kernel helpers -----------------------------

def _attend(Qp, Kp, VOp, bias, need_cov):
    """Batched multi-head attention on 3-D tiles.

    Qp: (BB, Lq, D)   Kp: (BB, Lk, D)   VOp: (BB, Lk, H*D)  (Wo pre-folded)
    bias: broadcastable to (BB, Lq, Lk) additive mask bias.
    The 1/sqrt(DH) scale is pre-folded into Qp (via Wq / b_q).
    Returns out (BB, Lq, D) and head-averaged coverage (BB, Lq, Lk).
    """
    BB, Lq, _ = Qp.shape
    Lk = Kp.shape[1]
    o = jnp.zeros((BB, Lq, D), jnp.float32)
    cov = jnp.zeros((BB, Lq, Lk), jnp.float32)
    for h in range(H):          # short unrolled loop; every op is batched over BB
        hs = slice(h * DH, (h + 1) * DH)
        s = jnp.einsum("bqd,bkd->bqk", Qp[..., hs], Kp[..., hs],
                       preferred_element_type=jnp.float32) + bias
        s = s - jnp.max(s, axis=-1, keepdims=True)
        e = jnp.exp(s)
        p = e / jnp.sum(e, axis=-1, keepdims=True)      # exact softmax
        if need_cov:
            cov = cov + p
        o = o + jnp.einsum("bqk,bkd->bqd", p, VOp[..., h * D:(h + 1) * D],
                           preferred_element_type=jnp.float32)
    return o, cov * (1.0 / H)


def _make_kernel(BB, LQ, LS, col, row):
    """Build the decoder-layer kernel for static tile sizes and pack offsets."""

    def kernel(x_ref, ctx_ref, msrc_ref, wmat_ref, w2_ref, vrow_ref,
               out_ref, cov_ref):
        x = x_ref[...]                          # (BB, LQ, D)
        ctx = ctx_ref[...]                      # (BB, LS, D)
        sbias = msrc_ref[...]                   # (BB, 1, LS)  already * NEG_INF
        wm = wmat_ref[...]                      # (D+1, WC)
        W, Wb = wm[0:D, :], wm[D:D + 1, :]
        vr = vrow_ref[...]                      # (NV, WV)

        pete = vr[row["pe"]:row["pe"] + LQ, 0:D]          # (LQ, D) pos+time enc
        tbias = vr[row["tm"]:row["tm"] + LQ, 0:LQ]        # (LQ, LQ) target bias

        def ln(v, i):
            g = vr[2 * i:2 * i + 1, 0:D]
            b = vr[2 * i + 1:2 * i + 2, 0:D]
            mu = jnp.mean(v, axis=-1, keepdims=True)
            var = jnp.mean(jnp.square(v - mu), axis=-1, keepdims=True)
            return (v - mu) * jax.lax.rsqrt(var + LN_EPS) * g + b

        # ---- 1. self attention: LN > (+pos/time enc) > fused MHA > residual
        q2 = (ln(x, 0) + pete).reshape(BB * LQ, D)
        pr = jnp.dot(q2, W[:, col["qs"]:col["qc"]],
                     preferred_element_type=jnp.float32) + Wb[:, col["qs"]:col["qc"]]
        o, _ = _attend(pr[:, 0:D].reshape(BB, LQ, D),
                       pr[:, D:2 * D].reshape(BB, LQ, D),
                       pr[:, 2 * D:2 * D + HD].reshape(BB, LQ, HD),
                       tbias, need_cov=False)
        x = x + o + vr[row["bo_s"]:row["bo_s"] + 1, 0:D]

        # ---- 2. encoder-decoder attention: LN > MHA(context) > residual
        q2 = ln(x, 1).reshape(BB * LQ, D)
        qc = jnp.dot(q2, W[:, col["qc"]:col["kc"]],
                     preferred_element_type=jnp.float32) + Wb[:, col["qc"]:col["kc"]]
        kv = jnp.dot(ctx.reshape(BB * LS, D), W[:, col["kc"]:col["f1"]],
                     preferred_element_type=jnp.float32) + Wb[:, col["kc"]:col["f1"]]
        o, cov = _attend(qc.reshape(BB, LQ, D),
                         kv[:, 0:D].reshape(BB, LS, D),
                         kv[:, D:D + HD].reshape(BB, LS, HD),
                         sbias, need_cov=True)
        x = x + o + vr[row["bo_c"]:row["bo_c"] + 1, 0:D]

        # ---- 3. feed forward: LN > linear > relu > linear > residual
        q2 = ln(x, 2).reshape(BB * LQ, D)
        hid = jnp.maximum(
            jnp.dot(q2, W[:, col["f1"]:col["end"]],
                    preferred_element_type=jnp.float32) + Wb[:, col["f1"]:col["end"]],
            0.0)
        y = jnp.dot(hid, w2_ref[...], preferred_element_type=jnp.float32) \
            + vr[row["bf2"]:row["bf2"] + 1, 0:D]
        x = x + y.reshape(BB, LQ, D)

        out_ref[...] = x
        cov_ref[...] = cov

    return kernel


# -------------------------------- wrapper ----------------------------------

def _default_batch_block(batch):
    kind = ""
    try:
        kind = jax.devices()[0].device_kind.lower()
    except Exception:
        pass
    # Multi-TensorCore chips (v7x, megacore v3/v4/v5p): keep >= 2 parallel grid
    # steps.  Single-TC chips (v5e/v6e): fold the whole batch into one tile
    # (the per-grid-step fixed cost dominates at these sizes).
    if batch % 2 == 0 and any(t in kind for t in ("v7", "v4", "v3", "v5p")):
        return batch // 2
    return batch


def universal_decoder_layer(x, ctx, pe_q, te, mask_tgt, mask_src, params,
                            *, batch_block=None):
    B, Lq, d_model = x.shape
    Ls = ctx.shape[1]
    assert d_model == D
    if batch_block is None:
        batch_block = _default_batch_block(B)
    assert B % batch_block == 0, "batch must be divisible by batch_block"
    BB = batch_block
    G = B // BB
    f32 = jnp.float32
    scale = 1.0 / math.sqrt(DH)

    ws, bs = params["w_self"], params["b_self"]
    wc, bc = params["w_cross"], params["b_cross"]

    # ---- fold Wo into the V projection (per head); fold 1/sqrt(dh) into Wq.
    def fold_vo(wv, bv, wo):
        wvo = jnp.concatenate(
            [wv[:, h * DH:(h + 1) * DH] @ wo[h * DH:(h + 1) * DH, :]
             for h in range(H)], axis=1)                          # (D, H*D)
        bvo = jnp.concatenate(
            [bv[h * DH:(h + 1) * DH] @ wo[h * DH:(h + 1) * DH, :]
             for h in range(H)], axis=0)                          # (H*D,)
        return wvo, bvo

    wvo_s, bvo_s = fold_vo(ws[2], bs[2], ws[3])
    wvo_c, bvo_c = fold_vo(wc[2], bc[2], wc[3])

    # ---- pack all projection matrices (+ a bias row) into one array.
    # column layout: [Wq_s | Wk_s | Wvo_s | Wq_c | Wk_c | Wvo_c | W_ff1]
    col = dict(qs=0, qc=2 * D + HD, kc=3 * D + HD, f1=4 * D + 2 * HD,
               end=4 * D + 2 * HD + DFF)
    wcols = [ws[0] * scale, ws[1], wvo_s, wc[0] * scale, wc[1], wvo_c,
             params["w_ff1"]]
    bcols = [bs[0] * scale, bs[1], bvo_s, bc[0] * scale, bc[1], bvo_c,
             params["b_ff1"].reshape(-1)]
    wmat = jnp.concatenate(
        [jnp.concatenate(wcols, axis=1),
         jnp.concatenate(bcols)[None, :]], axis=0).astype(f32)    # (D+1, WC)

    # ---- pack row vectors: LN params, output biases, pos/time enc, tgt bias.
    WV = max(D, Lq)
    pete = (pe_q + te).astype(f32)                                # (Lq, D)
    # target mask: shared across batch (causal mask), converted to bias once.
    # TODO(synk): genuinely per-batch target masks are collapsed to batch 0.
    tbias = mask_tgt.reshape(-1, Lq, Lq)[0].astype(f32) * NEG_INF  # (Lq, Lq)

    def padrow(v):
        v = jnp.asarray(v, f32).reshape(1, -1)
        return jnp.pad(v, ((0, 0), (0, WV - v.shape[1])))

    g, be = params["ln_g"], params["ln_b"]
    rows = [padrow(g[0]), padrow(be[0]), padrow(g[1]), padrow(be[1]),
            padrow(g[2]), padrow(be[2]),
            padrow(bs[3]), padrow(bc[3]), padrow(params["b_ff2"].reshape(-1)),
            jnp.pad(pete, ((0, 0), (0, WV - D))),
            jnp.pad(tbias, ((0, 0), (0, WV - Lq)))]
    row = dict(bo_s=6, bo_c=7, bf2=8, pe=9, tm=9 + Lq)
    vrow = jnp.concatenate(rows, axis=0)                          # (9+2Lq, WV)

    # source mask: per-batch padding row, broadcast-added to scores in-kernel.
    # TODO(synk): per-query (B, Lq, Ls) source masks are collapsed to the
    # first query row (the module is used with (B, 1, Ls) padding masks).
    msrc_bias = mask_src.reshape(B, -1, Ls)[:, :1, :].astype(f32) * NEG_INF

    w2 = params["w_ff2"].astype(f32)

    def batched(shape):
        n = len(shape)
        return pl.BlockSpec((BB,) + tuple(shape),
                            lambda gi, n=n: (gi,) + (0,) * n)

    def shared(arr):
        n = arr.ndim
        return pl.BlockSpec(arr.shape, lambda gi, n=n: (0,) * n)

    kernel = _make_kernel(BB, Lq, Ls, col, row)
    out, cov = pl.pallas_call(
        kernel,
        grid=(G,),
        in_specs=[batched((Lq, D)), batched((Ls, D)), batched((1, Ls)),
                  shared(wmat), shared(w2), shared(vrow)],
        out_specs=[batched((Lq, D)), batched((Lq, Ls))],
        out_shape=[jax.ShapeDtypeStruct((B, Lq, D), f32),
                   jax.ShapeDtypeStruct((B, Lq, Ls), f32)],
        compiler_params=pltpu.CompilerParams(
            dimension_semantics=("parallel",)),
    )(x.astype(f32), ctx.astype(f32), msrc_bias, wmat, w2, vrow)
    return out, cov


# ----------------------------- pure-JAX reference ---------------------------

def reference(x, ctx, pe_q, te, mask_tgt, mask_src, params):
    B, Lq, _ = x.shape
    Ls = ctx.shape[1]
    bias_tgt = jnp.broadcast_to(mask_tgt.astype(jnp.float32) * NEG_INF, (B, Lq, Lq))
    bias_src = jnp.broadcast_to(mask_src.astype(jnp.float32) * NEG_INF, (B, Lq, Ls))

    def ln(v, g, b):
        mu = v.mean(-1, keepdims=True)
        var = ((v - mu) ** 2).mean(-1, keepdims=True)
        return (v - mu) / jnp.sqrt(var + LN_EPS) * g + b

    def mha(q, kv, w, b, bias):
        Bq, Lq_, _ = q.shape
        Lk_ = kv.shape[1]
        Q = (q @ w[0] + b[0]).reshape(Bq, Lq_, H, DH)
        K = (kv @ w[1] + b[1]).reshape(Bq, Lk_, H, DH)
        V = (kv @ w[2] + b[2]).reshape(Bq, Lk_, H, DH)
        s = jnp.einsum("bqhd,bkhd->bhqk", Q, K) / (DH ** 0.5)
        s = s + bias[:, None, :, :]
        p = jax.nn.softmax(s, axis=-1)
        o = jnp.einsum("bhqk,bkhd->bqhd", p, V).reshape(Bq, Lq_, D)
        return o @ w[3] + b[3], p.mean(axis=1)

    g, bb = params["ln_g"], params["ln_b"]
    q = ln(x, g[0], bb[0]) + pe_q[None] + te[None]
    a, _ = mha(q, q, params["w_self"], params["b_self"], bias_tgt)
    x1 = x + a
    q = ln(x1, g[1], bb[1])
    a, cov = mha(q, ctx, params["w_cross"], params["b_cross"], bias_src)
    x2 = x1 + a
    q = ln(x2, g[2], bb[2])
    f = jax.nn.relu(q @ params["w_ff1"] + params["b_ff1"][0]) @ params["w_ff2"] + params["b_ff2"][0]
    return x2 + f, cov


def sinusoid_pe(length, d_model):
    pos = jnp.arange(length, dtype=jnp.float32)[:, None]
    i = jnp.arange(d_model // 2, dtype=jnp.float32)
    inv_freq = jnp.exp(-jnp.log(10000.0) * (2.0 * i) / d_model)
    ang = pos * inv_freq
    return jnp.concatenate([jnp.sin(ang), jnp.cos(ang)], axis=-1)


# ---------------------------------- main ------------------------------------

if __name__ == "__main__":
    key = jax.random.PRNGKey(0)
    B, Lq, Ls, t = 4, 8, 8, 3
    ks = jax.random.split(key, 12)
    wscale = 1.0 / (D ** 0.5)
    init = lambda k, shape: wscale * jax.random.normal(k, shape, jnp.float32)

    params = dict(
        ln_g=jnp.ones((3, D), jnp.float32),
        ln_b=jnp.zeros((3, D), jnp.float32),
        w_self=init(ks[0], (4, D, D)),
        b_self=init(ks[1], (4, D)),
        w_cross=init(ks[2], (4, D, D)),
        b_cross=init(ks[3], (4, D)),
        w_ff1=init(ks[4], (D, DFF)),
        b_ff1=init(ks[5], (1, DFF)),
        w_ff2=init(ks[6], (DFF, D)),
        b_ff2=init(ks[7], (1, D)),
    )

    x = jax.random.normal(ks[8], (B, Lq, D), jnp.float32)       # decoder input
    ctx = jax.random.normal(ks[9], (B, Ls, D), jnp.float32)     # encoder context

    pe_full = sinusoid_pe(64, D)
    pe_q = pe_full[:Lq]          # position_encoder contribution
    te = pe_full[t:t + 1]        # time_encoder(t) contribution

    # causal target mask (1 = masked future position)
    mask_tgt = jnp.triu(jnp.ones((1, Lq, Lq), jnp.float32), k=1)
    # source padding mask rows (1 = padded source position), per batch element
    src_pad = jnp.array([[0.0] * Ls,
                         [0.0] * (Ls - 2) + [1.0, 1.0],
                         [0.0] * (Ls - 1) + [1.0],
                         [0.0] * (Ls - 3) + [1.0, 1.0, 1.0]], jnp.float32)
    mask_src = src_pad[:, None, :]                               # (B,1,Ls)

    out, cov = universal_decoder_layer(x, ctx, pe_q, te, mask_tgt, mask_src, params)
    jax.block_until_ready((out, cov))

    ref_out, ref_cov = reference(x, ctx, pe_q, te, mask_tgt, mask_src, params)
    assert out.shape == (B, Lq, D) and cov.shape == (B, Lq, Ls)
    assert jnp.allclose(out, ref_out, atol=2e-3, rtol=2e-3), \
        f"max |dout| = {float(jnp.max(jnp.abs(out - ref_out)))}"
    assert jnp.allclose(cov, ref_cov, atol=2e-3, rtol=2e-3), \
        f"max |dcov| = {float(jnp.max(jnp.abs(cov - ref_cov)))}"
    print("KERNEL_OK")
</pallas_src>

<mosaic_0001>
module attributes {stable_mosaic.version = 11 : i64} {
  func.func @kernel(%arg0: i32, %arg1: memref<4x8x32xf32, #tpu.memory_space<vmem>>, %arg2: memref<4x8x32xf32, #tpu.memory_space<vmem>>, %arg3: memref<4x1x8xf32, #tpu.memory_space<vmem>>, %arg4: memref<33x448xf32, #tpu.memory_space<vmem>>, %arg5: memref<64x32xf32, #tpu.memory_space<vmem>>, %arg6: memref<25x32xf32, #tpu.memory_space<vmem>>, %arg7: memref<4x8x32xf32, #tpu.memory_space<vmem>>, %arg8: memref<4x8x8xf32, #tpu.memory_space<vmem>>) attributes {dimension_semantics = [#tpu.dimension_semantics<parallel>], iteration_bounds = array<i64: 1>, scalar_prefetch = 0 : i64, scratch_operands = 0 : i64, tpu.core_type = #tpu.core_type<tc>, window_params = [{transform_indices = @transform_0, window_bounds = array<i64: 4, 8, 32>}, {transform_indices = @transform_1, window_bounds = array<i64: 4, 8, 32>}, {transform_indices = @transform_2, window_bounds = array<i64: 4, 1, 8>}, {pipeline_mode = #tpu.pipeline_mode<synchronous>, transform_indices = @transform_3, window_bounds = array<i64: 33, 448>}, {pipeline_mode = #tpu.pipeline_mode<synchronous>, transform_indices = @transform_4, window_bounds = array<i64: 64, 32>}, {pipeline_mode = #tpu.pipeline_mode<synchronous>, transform_indices = @transform_5, window_bounds = array<i64: 25, 32>}, {transform_indices = @transform_6, window_bounds = array<i64: 4, 8, 32>}, {transform_indices = @transform_7, window_bounds = array<i64: 4, 8, 8>}]} {
    %c0 = arith.constant 0 : index
    %c0_0 = arith.constant 0 : index
    %c0_1 = arith.constant 0 : index
    %0 = vector.load %arg1[%c0, %c0_0, %c0_1] : memref<4x8x32xf32, #tpu.memory_space<vmem>>, vector<4x8x32xf32>
    %c0_2 = arith.constant 0 : index
    %c0_3 = arith.constant 0 : index
    %c0_4 = arith.constant 0 : index
    %1 = vector.load %arg2[%c0_2, %c0_3, %c0_4] : memref<4x8x32xf32, #tpu.memory_space<vmem>>, vector<4x8x32xf32>
    %c0_5 = arith.constant 0 : index
    %c0_6 = arith.constant 0 : index
    %c0_7 = arith.constant 0 : index
    %2 = vector.load %arg3[%c0_5, %c0_6, %c0_7] : memref<4x1x8xf32, #tpu.memory_space<vmem>>, vector<4x1x8xf32>
    %c0_8 = arith.constant 0 : index
    %c0_9 = arith.constant 0 : index
    %3 = vector.load %arg4[%c0_8, %c0_9] : memref<33x448xf32, #tpu.memory_space<vmem>>, vector<33x448xf32>
    %4 = vector.extract_strided_slice %3 {offsets = [0, 0], sizes = [32, 448], strides = [1, 1]} : vector<33x448xf32> to vector<32x448xf32>
    %5 = vector.extract_strided_slice %3 {offsets = [32, 0], sizes = [1, 448], strides = [1, 1]} : vector<33x448xf32> to vector<1x448xf32>
    %c0_10 = arith.constant 0 : index
    %c0_11 = arith.constant 0 : index
    %6 = vector.load %arg6[%c0_10, %c0_11] : memref<25x32xf32, #tpu.memory_space<vmem>>, vector<25x32xf32>
    %7 = vector.extract_strided_slice %6 {offsets = [9, 0], sizes = [8, 32], strides = [1, 1]} : vector<25x32xf32> to vector<8x32xf32>
    %8 = vector.extract_strided_slice %6 {offsets = [17, 0], sizes = [8, 8], strides = [1, 1]} : vector<25x32xf32> to vector<8x8xf32>
    %9 = vector.extract_strided_slice %6 {offsets = [0, 0], sizes = [1, 32], strides = [1, 1]} : vector<25x32xf32> to vector<1x32xf32>
    %10 = vector.extract_strided_slice %6 {offsets = [1, 0], sizes = [1, 32], strides = [1, 1]} : vector<25x32xf32> to vector<1x32xf32>
    %cst = arith.constant dense<0.000000e+00> : vector<4x8xf32>
    %11 = vector.multi_reduction <add>, %0, %cst [2] : vector<4x8x32xf32> to vector<4x8xf32>
    %12 = vector.shape_cast %11 : vector<4x8xf32> to vector<4x8x1xf32>
    %cst_12 = arith.constant 3.200000e+01 : f32
    %13 = vector.broadcast %cst_12 : f32 to vector<4x8x1xf32>
    %14 = arith.divf %12, %13 : vector<4x8x1xf32>
    %15 = vector.broadcast %14 : vector<4x8x1xf32> to vector<4x8x32xf32>
    %16 = arith.subf %0, %15 : vector<4x8x32xf32>
    %17 = arith.mulf %16, %16 : vector<4x8x32xf32>
    %cst_13 = arith.constant dense<0.000000e+00> : vector<4x8xf32>
    %18 = vector.multi_reduction <add>, %17, %cst_13 [2] : vector<4x8x32xf32> to vector<4x8xf32>
    %19 = vector.shape_cast %18 : vector<4x8xf32> to vector<4x8x1xf32>
    %cst_14 = arith.constant 3.200000e+01 : f32
    %20 = vector.broadcast %cst_14 : f32 to vector<4x8x1xf32>
    %21 = arith.divf %19, %20 : vector<4x8x1xf32>
    %22 = vector.broadcast %14 : vector<4x8x1xf32> to vector<4x8x32xf32>
    %23 = arith.subf %0, %22 : vector<4x8x32xf32>
    %cst_15 = arith.constant 9.99999974E-6 : f32
    %24 = vector.broadcast %cst_15 : f32 to vector<4x8x1xf32>
    %25 = arith.addf %21, %24 : vector<4x8x1xf32>
    %26 = math.rsqrt %25 : vector<4x8x1xf32>
    %27 = vector.broadcast %26 : vector<4x8x1xf32> to vector<4x8x32xf32>
    %28 = arith.mulf %23, %27 : vector<4x8x32xf32>
    %29 = vector.shape_cast %9 : vector<1x32xf32> to vector<1x1x32xf32>
    %30 = vector.broadcast %29 : vector<1x1x32xf32> to vector<4x8x32xf32>
    %31 = arith.mulf %28, %30 : vector<4x8x32xf32>
    %32 = vector.shape_cast %10 : vector<1x32xf32> to vector<1x1x32xf32>
    %33 = vector.broadcast %32 : vector<1x1x32xf32> to vector<4x8x32xf32>
    %34 = arith.addf %31, %33 : vector<4x8x32xf32>
    %35 = vector.shape_cast %7 : vector<8x32xf32> to vector<1x8x32xf32>
    %36 = vector.broadcast %35 : vector<1x8x32xf32> to vector<4x8x32xf32>
    %37 = arith.addf %34, %36 : vector<4x8x32xf32>
    %38 = vector.shape_cast %37 : vector<4x8x32xf32> to vector<32x32xf32>
    %39 = vector.extract_strided_slice %4 {offsets = [0, 0], sizes = [32, 192], strides = [1, 1]} : vector<32x448xf32> to vector<32x192xf32>
    %cst_16 = arith.constant dense<0.000000e+00> : vector<32x192xf32>
    %40 = tpu.matmul %38, %39, %cst_16 {dimension_numbers = #tpu.dot_dimension_numbers<[1], [0], [0], [1], [0, 0, 1, 1], [], []>, precision = #tpu.contract_precision<fp32>} : vector<32x32xf32>, vector<32x192xf32>, vector<32x192xf32> -> vector<32x192xf32>
    %41 = vector.extract_strided_slice %5 {offsets = [0, 0], sizes = [1, 192], strides = [1, 1]} : vector<1x448xf32> to vector<1x192xf32>
    %42 = vector.broadcast %41 : vector<1x192xf32> to vector<32x192xf32>
    %43 = arith.addf %40, %42 : vector<32x192xf32>
    %44 = vector.extract_strided_slice %43 {offsets = [0, 0], sizes = [32, 32], strides = [1, 1]} : vector<32x192xf32> to vector<32x32xf32>
    %45 = vector.shape_cast %44 : vector<32x32xf32> to vector<4x8x32xf32>
    %46 = vector.extract_strided_slice %43 {offsets = [0, 32], sizes = [32, 32], strides = [1, 1]} : vector<32x192xf32> to vector<32x32xf32>
    %47 = vector.shape_cast %46 : vector<32x32xf32> to vector<4x8x32xf32>
    %48 = vector.extract_strided_slice %43 {offsets = [0, 64], sizes = [32, 128], strides = [1, 1]} : vector<32x192xf32> to vector<32x128xf32>
    %49 = vector.shape_cast %48 : vector<32x128xf32> to vector<4x8x128xf32>
    %cst_17 = arith.constant 0.000000e+00 : f32
    %50 = vector.broadcast %cst_17 : f32 to vector<4x8x32xf32>
    %51 = vector.extract_strided_slice %45 {offsets = [0, 0, 0], sizes = [4, 8, 8], strides = [1, 1, 1]} : vector<4x8x32xf32> to vector<4x8x8xf32>
    %52 = vector.extract_strided_slice %47 {offsets = [0, 0, 0], sizes = [4, 8, 8], strides = [1, 1, 1]} : vector<4x8x32xf32> to vector<4x8x8xf32>
    "tpu.trace_start"() <{level = 10 : i32, message = "bqd,bkd->bqk"}> : () -> ()
    %cst_18 = arith.constant dense<0.000000e+00> : vector<4x8x8xf32>
    %53 = tpu.matmul %51, %52, %cst_18 {dimension_numbers = #tpu.dot_dimension_numbers<[2], [2], [1], [1], [0, 0, 0, 1, 1, 1], [0], [0]>, precision = #tpu.contract_precision<fp32>} : vector<4x8x8xf32>, vector<4x8x8xf32>, vector<4x8x8xf32> -> vector<4x8x8xf32>
    "tpu.trace_stop"() : () -> ()
    %54 = vector.shape_cast %8 : vector<8x8xf32> to vector<1x8x8xf32>
    %55 = vector.broadcast %54 : vector<1x8x8xf32> to vector<4x8x8xf32>
    %56 = arith.addf %53, %55 : vector<4x8x8xf32>
    %cst_19 = arith.constant dense<0xFF800000> : vector<4x8xf32>
    %57 = vector.multi_reduction <maximumf>, %56, %cst_19 [2] : vector<4x8x8xf32> to vector<4x8xf32>
    %58 = vector.shape_cast %57 : vector<4x8xf32> to vector<4x8x1xf32>
    %59 = vector.broadcast %58 : vector<4x8x1xf32> to vector<4x8x8xf32>
    %60 = arith.subf %56, %59 : vector<4x8x8xf32>
    %61 = math.exp %60 : vector<4x8x8xf32>
    %cst_20 = arith.constant dense<0.000000e+00> : vector<4x8xf32>
    %62 = vector.multi_reduction <add>, %61, %cst_20 [2] : vector<4x8x8xf32> to vector<4x8xf32>
    %63 = vector.shape_cast %62 : vector<4x8xf32> to vector<4x8x1xf32>
    %64 = vector.broadcast %63 : vector<4x8x1xf32> to vector<4x8x8xf32>
    %65 = arith.divf %61, %64 : vector<4x8x8xf32>
    %66 = vector.extract_strided_slice %49 {offsets = [0, 0, 0], sizes = [4, 8, 32], strides = [1, 1, 1]} : vector<4x8x128xf32> to vector<4x8x32xf32>
    "tpu.trace_start"() <{level = 10 : i32, message = "bqk,bkd->bqd"}> : () -> ()
    %cst_21 = arith.constant dense<0.000000e+00> : vector<4x8x32xf32>
    %67 = tpu.matmul %65, %66, %cst_21 {dimension_numbers = #tpu.dot_dimension_numbers<[2], [1], [1], [2], [0, 0, 0, 1, 1, 2], [0], [0]>, precision = #tpu.contract_precision<fp32>} : vector<4x8x8xf32>, vector<4x8x32xf32>, vector<4x8x32xf32> -> vector<4x8x32xf32>
    "tpu.trace_stop"() : () -> ()
    %68 = arith.addf %50, %67 : vector<4x8x32xf32>
    %69 = vector.extract_strided_slice %45 {offsets = [0, 0, 8], sizes = [4, 8, 8], strides = [1, 1, 1]} : vector<4x8x32xf32> to vector<4x8x8xf32>
    %70 = vector.extract_strided_slice %47 {offsets = [0, 0, 8], sizes = [4, 8, 8], strides = [1, 1, 1]} : vector<4x8x32xf32> to vector<4x8x8xf32>
    "tpu.trace_start"() <{level = 10 : i32, message = "bqd,bkd->bqk"}> : () -> ()
    %cst_22 = arith.constant dense<0.000000e+00> : vector<4x8x8xf32>
    %71 = tpu.matmul %69, %70, %cst_22 {dimension_numbers = #tpu.dot_dimension_numbers<[2], [2], [1], [1], [0, 0, 0, 1, 1, 1], [0], [0]>, precision = #tpu.contract_precision<fp32>} : vector<4x8x8xf32>, vector<4x8x8xf32>, vector<4x8x8xf32> -> vector<4x8x8xf32>
    "tpu.trace_stop"() : () -> ()
    %72 = vector.shape_cast %8 : vector<8x8xf32> to vector<1x8x8xf32>
    %73 = vector.broadcast %72 : vector<1x8x8xf32> to vector<4x8x8xf32>
    %74 = arith.addf %71, %73 : vector<4x8x8xf32>
    %cst_23 = arith.constant dense<0xFF800000> : vector<4x8xf32>
    %75 = vector.multi_reduction <maximumf>, %74, %cst_23 [2] : vector<4x8x8xf32> to vector<4x8xf32>
    %76 = vector.shape_cast %75 : vector<4x8xf32> to vector<4x8x1xf32>
    %77 = vector.broadcast %76 : vector<4x8x1xf32> to vector<4x8x8xf32>
    %78 = arith.subf %74, %77 : vector<4x8x8xf32>
    %79 = math.exp %78 : vector<4x8x8xf32>
    %cst_24 = arith.constant dense<0.000000e+00> : vector<4x8xf32>
    %80 = vector.multi_reduction <add>, %79, %cst_24 [2] : vector<4x8x8xf32> to vector<4x8xf32>
    %81 = vector.shape_cast %80 : vector<4x8xf32> to vector<4x8x1xf32>
    %82 = vector.broadcast %81 : vector<4x8x1xf32> to vector<4x8x8xf32>
    %83 = arith.divf %79, %82 : vector<4x8x8xf32>
    %84 = vector.extract_strided_slice %49 {offsets = [0, 0, 32], sizes = [4, 8, 32], strides = [1, 1, 1]} : vector<4x8x128xf32> to vector<4x8x32xf32>
    "tpu.trace_start"() <{level = 10 : i32, message = "bqk,bkd->bqd"}> : () -> ()
    %cst_25 = arith.constant dense<0.000000e+00> : vector<4x8x32xf32>
    %85 = tpu.matmul %83, %84, %cst_25 {dimension_numbers = #tpu.dot_dimension_numbers<[2], [1], [1], [2], [0, 0, 0, 1, 1, 2], [0], [0]>, precision = #tpu.contract_precision<fp32>} : vector<4x8x8xf32>, vector<4x8x32xf32>, vector<4x8x32xf32> -> vector<4x8x32xf32>
    "tpu.trace_stop"() : () -> ()
    %86 = arith.addf %68, %85 : vector<4x8x32xf32>
    %87 = vector.extract_strided_slice %45 {offsets = [0, 0, 16], sizes = [4, 8, 8], strides = [1, 1, 1]} : vector<4x8x32xf32> to vector<4x8x8xf32>
    %88 = vector.extract_strided_slice %47 {offsets = [0, 0, 16], sizes = [4, 8, 8], strides = [1, 1, 1]} : vector<4x8x32xf32> to vector<4x8x8xf32>
    "tpu.trace_start"() <{level = 10 : i32, message = "bqd,bkd->bqk"}> : () -> ()
    %cst_26 = arith.constant dense<0.000000e+00> : vector<4x8x8xf32>
    %89 = tpu.matmul %87, %88, %cst_26 {dimension_numbers = #tpu.dot_dimension_numbers<[2], [2], [1], [1], [0, 0, 0, 1, 1, 1], [0], [0]>, precision = #tpu.contract_precision<fp32>} : vector<4x8x8xf32>, vector<4x8x8xf32>, vector<4x8x8xf32> -> vector<4x8x8xf32>
    "tpu.trace_stop"() : () -> ()
    %90 = vector.shape_cast %8 : vector<8x8xf32> to vector<1x8x8xf32>
    %91 = vector.broadcast %90 : vector<1x8x8xf32> to vector<4x8x8xf32>
    %92 = arith.addf %89, %91 : vector<4x8x8xf32>
    %cst_27 = arith.constant dense<0xFF800000> : vector<4x8xf32>
    %93 = vector.multi_reduction <maximumf>, %92, %cst_27 [2] : vector<4x8x8xf32> to vector<4x8xf32>
    %94 = vector.shape_cast %93 : vector<4x8xf32> to vector<4x8x1xf32>
    %95 = vector.broadcast %94 : vector<4x8x1xf32> to vector<4x8x8xf32>
    %96 = arith.subf %92, %95 : vector<4x8x8xf32>
    %97 = math.exp %96 : vector<4x8x8xf32>
    %cst_28 = arith.constant dense<0.000000e+00> : vector<4x8xf32>
    %98 = vector.multi_reduction <add>, %97, %cst_28 [2] : vector<4x8x8xf32> to vector<4x8xf32>
    %99 = vector.shape_cast %98 : vector<4x8xf32> to vector<4x8x1xf32>
    %100 = vector.broadcast %99 : vector<4x8x1xf32> to vector<4x8x8xf32>
    %101 = arith.divf %97, %100 : vector<4x8x8xf32>
    %102 = vector.extract_strided_slice %49 {offsets = [0, 0, 64], sizes = [4, 8, 32], strides = [1, 1, 1]} : vector<4x8x128xf32> to vector<4x8x32xf32>
    "tpu.trace_start"() <{level = 10 : i32, message = "bqk,bkd->bqd"}> : () -> ()
    %cst_29 = arith.constant dense<0.000000e+00> : vector<4x8x32xf32>
    %103 = tpu.matmul %101, %102, %cst_29 {dimension_numbers = #tpu.dot_dimension_numbers<[2], [1], [1], [2], [0, 0, 0, 1, 1, 2], [0], [0]>, precision = #tpu.contract_precision<fp32>} : vector<4x8x8xf32>, vector<4x8x32xf32>, vector<4x8x32xf32> -> vector<4x8x32xf32>
    "tpu.trace_stop"() : () -> ()
    %104 = arith.addf %86, %103 : vector<4x8x32xf32>
    %105 = vector.extract_strided_slice %45 {offsets = [0, 0, 24], sizes = [4, 8, 8], strides = [1, 1, 1]} : vector<4x8x32xf32> to vector<4x8x8xf32>
    %106 = vector.extract_strided_slice %47 {offsets = [0, 0, 24], sizes = [4, 8, 8], strides = [1, 1, 1]} : vector<4x8x32xf32> to vector<4x8x8xf32>
    "tpu.trace_start"() <{level = 10 : i32, message = "bqd,bkd->bqk"}> : () -> ()
    %cst_30 = arith.constant dense<0.000000e+00> : vector<4x8x8xf32>
    %107 = tpu.matmul %105, %106, %cst_30 {dimension_numbers = #tpu.dot_dimension_numbers<[2], [2], [1], [1], [0, 0, 0, 1, 1, 1], [0], [0]>, precision = #tpu.contract_precision<fp32>} : vector<4x8x8xf32>, vector<4x8x8xf32>, vector<4x8x8xf32> -> vector<4x8x8xf32>
    "tpu.trace_stop"() : () -> ()
    %108 = vector.shape_cast %8 : vector<8x8xf32> to vector<1x8x8xf32>
    %109 = vector.broadcast %108 : vector<1x8x8xf32> to vector<4x8x8xf32>
    %110 = arith.addf %107, %109 : vector<4x8x8xf32>
    %cst_31 = arith.constant dense<0xFF800000> : vector<4x8xf32>
    %111 = vector.multi_reduction <maximumf>, %110, %cst_31 [2] : vector<4x8x8xf32> to vector<4x8xf32>
    %112 = vector.shape_cast %111 : vector<4x8xf32> to vector<4x8x1xf32>
    %113 = vector.broadcast %112 : vector<4x8x1xf32> to vector<4x8x8xf32>
    %114 = arith.subf %110, %113 : vector<4x8x8xf32>
    %115 = math.exp %114 : vector<4x8x8xf32>
    %cst_32 = arith.constant dense<0.000000e+00> : vector<4x8xf32>
    %116 = vector.multi_reduction <add>, %115, %cst_32 [2] : vector<4x8x8xf32> to vector<4x8xf32>
    %117 = vector.shape_cast %116 : vector<4x8xf32> to vector<4x8x1xf32>
    %118 = vector.broadcast %117 : vector<4x8x1xf32> to vector<4x8x8xf32>
    %119 = arith.divf %115, %118 : vector<4x8x8xf32>
    %120 = vector.extract_strided_slice %49 {offsets = [0, 0, 96], sizes = [4, 8, 32], strides = [1, 1, 1]} : vector<4x8x128xf32> to vector<4x8x32xf32>
    "tpu.trace_start"() <{level = 10 : i32, message = "bqk,bkd->bqd"}> : () -> ()
    %cst_33 = arith.constant dense<0.000000e+00> : vector<4x8x32xf32>
    %121 = tpu.matmul %119, %120, %cst_33 {dimension_numbers = #tpu.dot_dimension_numbers<[2], [1], [1], [2], [0, 0, 0, 1, 1, 2], [0], [0]>, precision = #tpu.contract_precision<fp32>} : vector<4x8x8xf32>, vector<4x8x32xf32>, vector<4x8x32xf32> -> vector<4x8x32xf32>
    "tpu.trace_stop"() : () -> ()
    %122 = arith.addf %104, %121 : vector<4x8x32xf32>
    %123 = arith.addf %0, %122 : vector<4x8x32xf32>
    %124 = vector.extract_strided_slice %6 {offsets = [6, 0], sizes = [1, 32], strides = [1, 1]} : vector<25x32xf32> to vector<1x32xf32>
    %125 = vector.shape_cast %124 : vector<1x32xf32> to vector<1x1x32xf32>
    %126 = vector.broadcast %125 : vector<1x1x32xf32> to vector<4x8x32xf32>
    %127 = arith.addf %123, %126 : vector<4x8x32xf32>
    %128 = vector.extract_strided_slice %6 {offsets = [2, 0], sizes = [1, 32], strides = [1, 1]} : vector<25x32xf32> to vector<1x32xf32>
    %129 = vector.extract_strided_slice %6 {offsets = [3, 0], sizes = [1, 32], strides = [1, 1]} : vector<25x32xf32> to vector<1x32xf32>
    %cst_34 = arith.constant dense<0.000000e+00> : vector<4x8xf32>
    %130 = vector.multi_reduction <add>, %127, %cst_34 [2] : vector<4x8x32xf32> to vector<4x8xf32>
    %131 = vector.shape_cast %130 : vector<4x8xf32> to vector<4x8x1xf32>
    %cst_35 = arith.constant 3.200000e+01 : f32
    %132 = vector.broadcast %cst_35 : f32 to vector<4x8x1xf32>
    %133 = arith.divf %131, %132 : vector<4x8x1xf32>
    %134 = vector.broadcast %133 : vector<4x8x1xf32> to vector<4x8x32xf32>
    %135 = arith.subf %127, %134 : vector<4x8x32xf32>
    %136 = arith.mulf %135, %135 : vector<4x8x32xf32>
    %cst_36 = arith.constant dense<0.000000e+00> : vector<4x8xf32>
    %137 = vector.multi_reduction <add>, %136, %cst_36 [2] : vector<4x8x32xf32> to vector<4x8xf32>
    %138 = vector.shape_cast %137 : vector<4x8xf32> to vector<4x8x1xf32>
    %cst_37 = arith.constant 3.200000e+01 : f32
    %139 = vector.broadcast %cst_37 : f32 to vector<4x8x1xf32>
    %140 = arith.divf %138, %139 : vector<4x8x1xf32>
    %141 = vector.broadcast %133 : vector<4x8x1xf32> to vector<4x8x32xf32>
    %142 = arith.subf %127, %141 : vector<4x8x32xf32>
    %cst_38 = arith.constant 9.99999974E-6 : f32
    %143 = vector.broadcast %cst_38 : f32 to vector<4x8x1xf32>
    %144 = arith.addf %140, %143 : vector<4x8x1xf32>
    %145 = math.rsqrt %144 : vector<4x8x1xf32>
    %146 = vector.broadcast %145 : vector<4x8x1xf32> to vector<4x8x32xf32>
    %147 = arith.mulf %142, %146 : vector<4x8x32xf32>
    %148 = vector.shape_cast %128 : vector<1x32xf32> to vector<1x1x32xf32>
    %149 = vector.broadcast %148 : vector<1x1x32xf32> to vector<4x8x32xf32>
    %150 = arith.mulf %147, %149 : vector<4x8x32xf32>
    %151 = vector.shape_cast %129 : vector<1x32xf32> to vector<1x1x32xf32>
    %152 = vector.broadcast %151 : vector<1x1x32xf32> to vector<4x8x32xf32>
    %153 = arith.addf %150, %152 : vector<4x8x32xf32>
    %154 = vector.shape_cast %153 : vector<4x8x32xf32> to vector<32x32xf32>
    %155 = vector.extract_strided_slice %4 {offsets = [0, 192], sizes = [32, 32], strides = [1, 1]} : vector<32x448xf32> to vector<32x32xf32>
    %cst_39 = arith.constant dense<0.000000e+00> : vector<32x32xf32>
    %156 = tpu.matmul %154, %155, %cst_39 {dimension_numbers = #tpu.dot_dimension_numbers<[1], [0], [0], [1], [0, 0, 1, 1], [], []>, precision = #tpu.contract_precision<fp32>} : vector<32x32xf32>, vector<32x32xf32>, vector<32x32xf32> -> vector<32x32xf32>
    %157 = vector.extract_strided_slice %5 {offsets = [0, 192], sizes = [1, 32], strides = [1, 1]} : vector<1x448xf32> to vector<1x32xf32>
    %158 = vector.broadcast %157 : vector<1x32xf32> to vector<32x32xf32>
    %159 = arith.addf %156, %158 : vector<32x32xf32>
    %160 = vector.shape_cast %1 : vector<4x8x32xf32> to vector<32x32xf32>
    %161 = vector.extract_strided_slice %4 {offsets = [0, 224], sizes = [32, 160], strides = [1, 1]} : vector<32x448xf32> to vector<32x160xf32>
    %cst_40 = arith.constant dense<0.000000e+00> : vector<32x160xf32>
    %162 = tpu.matmul %160, %161, %cst_40 {dimension_numbers = #tpu.dot_dimension_numbers<[1], [0], [0], [1], [0, 0, 1, 1], [], []>, precision = #tpu.contract_precision<fp32>} : vector<32x32xf32>, vector<32x160xf32>, vector<32x160xf32> -> vector<32x160xf32>
    %163 = vector.extract_strided_slice %5 {offsets = [0, 224], sizes = [1, 160], strides = [1, 1]} : vector<1x448xf32> to vector<1x160xf32>
    %164 = vector.broadcast %163 : vector<1x160xf32> to vector<32x160xf32>
    %165 = arith.addf %162, %164 : vector<32x160xf32>
    %166 = vector.shape_cast %159 : vector<32x32xf32> to vector<4x8x32xf32>
    %167 = vector.extract_strided_slice %165 {offsets = [0, 0], sizes = [32, 32], strides = [1, 1]} : vector<32x160xf32> to vector<32x32xf32>
    %168 = vector.shape_cast %167 : vector<32x32xf32> to vector<4x8x32xf32>
    %169 = vector.extract_strided_slice %165 {offsets = [0, 32], sizes = [32, 128], strides = [1, 1]} : vector<32x160xf32> to vector<32x128xf32>
    %170 = vector.shape_cast %169 : vector<32x128xf32> to vector<4x8x128xf32>
    %cst_41 = arith.constant 0.000000e+00 : f32
    %171 = vector.broadcast %cst_41 : f32 to vector<4x8x32xf32>
    %cst_42 = arith.constant 0.000000e+00 : f32
    %172 = vector.broadcast %cst_42 : f32 to vector<4x8x8xf32>
    %173 = vector.extract_strided_slice %166 {offsets = [0, 0, 0], sizes = [4, 8, 8], strides = [1, 1, 1]} : vector<4x8x32xf32> to vector<4x8x8xf32>
    %174 = vector.extract_strided_slice %168 {offsets = [0, 0, 0], sizes = [4, 8, 8], strides = [1, 1, 1]} : vector<4x8x32xf32> to vector<4x8x8xf32>
    "tpu.trace_start"() <{level = 10 : i32, message = "bqd,bkd->bqk"}> : () -> ()
    %cst_43 = arith.constant dense<0.000000e+00> : vector<4x8x8xf32>
    %175 = tpu.matmul %173, %174, %cst_43 {dimension_numbers = #tpu.dot_dimension_numbers<[2], [2], [1], [1], [0, 0, 0, 1, 1, 1], [0], [0]>, precision = #tpu.contract_precision<fp32>} : vector<4x8x8xf32>, vector<4x8x8xf32>, vector<4x8x8xf32> -> vector<4x8x8xf32>
    "tpu.trace_stop"() : () -> ()
    %176 = vector.broadcast %2 : vector<4x1x8xf32> to vector<4x8x8xf32>
    %177 = arith.addf %175, %176 : vector<4x8x8xf32>
    %cst_44 = arith.constant dense<0xFF800000> : vector<4x8xf32>
    %178 = vector.multi_reduction <maximumf>, %177, %cst_44 [2] : vector<4x8x8xf32> to vector<4x8xf32>
    %179 = vector.shape_cast %178 : vector<4x8xf32> to vector<4x8x1xf32>
    %180 = vector.broadcast %179 : vector<4x8x1xf32> to vector<4x8x8xf32>
    %181 = arith.subf %177, %180 : vector<4x8x8xf32>
    %182 = math.exp %181 : vector<4x8x8xf32>
    %cst_45 = arith.constant dense<0.000000e+00> : vector<4x8xf32>
    %183 = vector.multi_reduction <add>, %182, %cst_45 [2] : vector<4x8x8xf32> to vector<4x8xf32>
    %184 = vector.shape_cast %183 : vector<4x8xf32> to vector<4x8x1xf32>
    %185 = vector.broadcast %184 : vector<4x8x1xf32> to vector<4x8x8xf32>
    %186 = arith.divf %182, %185 : vector<4x8x8xf32>
    %187 = arith.addf %172, %186 : vector<4x8x8xf32>
    %188 = vector.extract_strided_slice %170 {offsets = [0, 0, 0], sizes = [4, 8, 32], strides = [1, 1, 1]} : vector<4x8x128xf32> to vector<4x8x32xf32>
    "tpu.trace_start"() <{level = 10 : i32, message = "bqk,bkd->bqd"}> : () -> ()
    %cst_46 = arith.constant dense<0.000000e+00> : vector<4x8x32xf32>
    %189 = tpu.matmul %186, %188, %cst_46 {dimension_numbers = #tpu.dot_dimension_numbers<[2], [1], [1], [2], [0, 0, 0, 1, 1, 2], [0], [0]>, precision = #tpu.contract_precision<fp32>} : vector<4x8x8xf32>, vector<4x8x32xf32>, vector<4x8x32xf32> -> vector<4x8x32xf32>
    "tpu.trace_stop"() : () -> ()
    %190 = arith.addf %171, %189 : vector<4x8x32xf32>
    %191 = vector.extract_strided_slice %166 {offsets = [0, 0, 8], sizes = [4, 8, 8], strides = [1, 1, 1]} : vector<4x8x32xf32> to vector<4x8x8xf32>
    %192 = vector.extract_strided_slice %168 {offsets = [0, 0, 8], sizes = [4, 8, 8], strides = [1, 1, 1]} : vector<4x8x32xf32> to vector<4x8x8xf32>
    "tpu.trace_start"() <{level = 10 : i32, message = "bqd,bkd->bqk"}> : () -> ()
    %cst_47 = arith.constant dense<0.000000e+00> : vector<4x8x8xf32>
    %193 = tpu.matmul %191, %192, %cst_47 {dimension_numbers = #tpu.dot_dimension_numbers<[2], [2], [1], [1], [0, 0, 0, 1, 1, 1], [0], [0]>, precision = #tpu.contract_precision<fp32>} : vector<4x8x8xf32>, vector<4x8x8xf32>, vector<4x8x8xf32> -> vector<4x8x8xf32>
    "tpu.trace_stop"() : () -> ()
    %194 = vector.broadcast %2 : vector<4x1x8xf32> to vector<4x8x8xf32>
    %195 = arith.addf %193, %194 : vector<4x8x8xf32>
    %cst_48 = arith.constant dense<0xFF800000> : vector<4x8xf32>
    %196 = vector.multi_reduction <maximumf>, %195, %cst_48 [2] : vector<4x8x8xf32> to vector<4x8xf32>
    %197 = vector.shape_cast %196 : vector<4x8xf32> to vector<4x8x1xf32>
    %198 = vector.broadcast %197 : vector<4x8x1xf32> to vector<4x8x8xf32>
    %199 = arith.subf %195, %198 : vector<4x8x8xf32>
    %200 = math.exp %199 : vector<4x8x8xf32>
    %cst_49 = arith.constant dense<0.000000e+00> : vector<4x8xf32>
    %201 = vector.multi_reduction <add>, %200, %cst_49 [2] : vector<4x8x8xf32> to vector<4x8xf32>
    %202 = vector.shape_cast %201 : vector<4x8xf32> to vector<4x8x1xf32>
    %203 = vector.broadcast %202 : vector<4x8x1xf32> to vector<4x8x8xf32>
    %204 = arith.divf %200, %203 : vector<4x8x8xf32>
    %205 = arith.addf %187, %204 : vector<4x8x8xf32>
    %206 = vector.extract_strided_slice %170 {offsets = [0, 0, 32], sizes = [4, 8, 32], strides = [1, 1, 1]} : vector<4x8x128xf32> to vector<4x8x32xf32>
    "tpu.trace_start"() <{level = 10 : i32, message = "bqk,bkd->bqd"}> : () -> ()
    %cst_50 = arith.constant dense<0.000000e+00> : vector<4x8x32xf32>
    %207 = tpu.matmul %204, %206, %cst_50 {dimension_numbers = #tpu.dot_dimension_numbers<[2], [1], [1], [2], [0, 0, 0, 1, 1, 2], [0], [0]>, precision = #tpu.contract_precision<fp32>} : vector<4x8x8xf32>, vector<4x8x32xf32>, vector<4x8x32xf32> -> vector<4x8x32xf32>
    "tpu.trace_stop"() : () -> ()
    %208 = arith.addf %190, %207 : vector<4x8x32xf32>
    %209 = vector.extract_strided_slice %166 {offsets = [0, 0, 16], sizes = [4, 8, 8], strides = [1, 1, 1]} : vector<4x8x32xf32> to vector<4x8x8xf32>
    %210 = vector.extract_strided_slice %168 {offsets = [0, 0, 16], sizes = [4, 8, 8], strides = [1, 1, 1]} : vector<4x8x32xf32> to vector<4x8x8xf32>
    "tpu.trace_start"() <{level = 10 : i32, message = "bqd,bkd->bqk"}> : () -> ()
    %cst_51 = arith.constant dense<0.000000e+00> : vector<4x8x8xf32>
    %211 = tpu.matmul %209, %210, %cst_51 {dimension_numbers = #tpu.dot_dimension_numbers<[2], [2], [1], [1], [0, 0, 0, 1, 1, 1], [0], [0]>, precision = #tpu.contract_precision<fp32>} : vector<4x8x8xf32>, vector<4x8x8xf32>, vector<4x8x8xf32> -> vector<4x8x8xf32>
    "tpu.trace_stop"() : () -> ()
    %212 = vector.broadcast %2 : vector<4x1x8xf32> to vector<4x8x8xf32>
    %213 = arith.addf %211, %212 : vector<4x8x8xf32>
    %cst_52 = arith.constant dense<0xFF800000> : vector<4x8xf32>
    %214 = vector.multi_reduction <maximumf>, %213, %cst_52 [2] : vector<4x8x8xf32> to vector<4x8xf32>
    %215 = vector.shape_cast %214 : vector<4x8xf32> to vector<4x8x1xf32>
    %216 = vector.broadcast %215 : vector<4x8x1xf32> to vector<4x8x8xf32>
    %217 = arith.subf %213, %216 : vector<4x8x8xf32>
    %218 = math.exp %217 : vector<4x8x8xf32>
    %cst_53 = arith.constant dense<0.000000e+00> : vector<4x8xf32>
    %219 = vector.multi_reduction <add>, %218, %cst_53 [2] : vector<4x8x8xf32> to vector<4x8xf32>
    %220 = vector.shape_cast %219 : vector<4x8xf32> to vector<4x8x1xf32>
    %221 = vector.broadcast %220 : vector<4x8x1xf32> to vector<4x8x8xf32>
    %222 = arith.divf %218, %221 : vector<4x8x8xf32>
    %223 = arith.addf %205, %222 : vector<4x8x8xf32>
    %224 = vector.extract_strided_slice %170 {offsets = [0, 0, 64], sizes = [4, 8, 32], strides = [1, 1, 1]} : vector<4x8x128xf32> to vector<4x8x32xf32>
    "tpu.trace_start"() <{level = 10 : i32, message = "bqk,bkd->bqd"}> : () -> ()
    %cst_54 = arith.constant dense<0.000000e+00> : vector<4x8x32xf32>
    %225 = tpu.matmul %222, %224, %cst_54 {dimension_numbers = #tpu.dot_dimension_numbers<[2], [1], [1], [2], [0, 0, 0, 1, 1, 2], [0], [0]>, precision = #tpu.contract_precision<fp32>} : vector<4x8x8xf32>, vector<4x8x32xf32>, vector<4x8x32xf32> -> vector<4x8x32xf32>
    "tpu.trace_stop"() : () -> ()
    %226 = arith.addf %208, %225 : vector<4x8x32xf32>
    %227 = vector.extract_strided_slice %166 {offsets = [0, 0, 24], sizes = [4, 8, 8], strides = [1, 1, 1]} : vector<4x8x32xf32> to vector<4x8x8xf32>
    %228 = vector.extract_strided_slice %168 {offsets = [0, 0, 24], sizes = [4, 8, 8], strides = [1, 1, 1]} : vector<4x8x32xf32> to vector<4x8x8xf32>
    "tpu.trace_start"() <{level = 10 : i32, message = "bqd,bkd->bqk"}> : () -> ()
    %cst_55 = arith.constant dense<0.000000e+00> : vector<4x8x8xf32>
    %229 = tpu.matmul %227, %228, %cst_55 {dimension_numbers = #tpu.dot_dimension_numbers<[2], [2], [1], [1], [0, 0, 0, 1, 1, 1], [0], [0]>, precision = #tpu.contract_precision<fp32>} : vector<4x8x8xf32>, vector<4x8x8xf32>, vector<4x8x8xf32> -> vector<4x8x8xf32>
    "tpu.trace_stop"() : () -> ()
    %230 = vector.broadcast %2 : vector<4x1x8xf32> to vector<4x8x8xf32>
    %231 = arith.addf %229, %230 : vector<4x8x8xf32>
    %cst_56 = arith.constant dense<0xFF800000> : vector<4x8xf32>
    %232 = vector.multi_reduction <maximumf>, %231, %cst_56 [2] : vector<4x8x8xf32> to vector<4x8xf32>
    %233 = vector.shape_cast %232 : vector<4x8xf32> to vector<4x8x1xf32>
    %234 = vector.broadcast %233 : vector<4x8x1xf32> to vector<4x8x8xf32>
    %235 = arith.subf %231, %234 : vector<4x8x8xf32>
    %236 = math.exp %235 : vector<4x8x8xf32>
    %cst_57 = arith.constant dense<0.000000e+00> : vector<4x8xf32>
    %237 = vector.multi_reduction <add>, %236, %cst_57 [2] : vector<4x8x8xf32> to vector<4x8xf32>
    %238 = vector.shape_cast %237 : vector<4x8xf32> to vector<4x8x1xf32>
    %239 = vector.broadcast %238 : vector<4x8x1xf32> to vector<4x8x8xf32>
    %240 = arith.divf %236, %239 : vector<4x8x8xf32>
    %241 = arith.addf %223, %240 : vector<4x8x8xf32>
    %242 = vector.extract_strided_slice %170 {offsets = [0, 0, 96], sizes = [4, 8, 32], strides = [1, 1, 1]} : vector<4x8x128xf32> to vector<4x8x32xf32>
    "tpu.trace_start"() <{level = 10 : i32, message = "bqk,bkd->bqd"}> : () -> ()
    %cst_58 = arith.constant dense<0.000000e+00> : vector<4x8x32xf32>
    %243 = tpu.matmul %240, %242, %cst_58 {dimension_numbers = #tpu.dot_dimension_numbers<[2], [1], [1], [2], [0, 0, 0, 1, 1, 2], [0], [0]>, precision = #tpu.contract_precision<fp32>} : vector<4x8x8xf32>, vector<4x8x32xf32>, vector<4x8x32xf32> -> vector<4x8x32xf32>
    "tpu.trace_stop"() : () -> ()
    %244 = arith.addf %226, %243 : vector<4x8x32xf32>
    %cst_59 = arith.constant 2.500000e-01 : f32
    %245 = vector.broadcast %cst_59 : f32 to vector<4x8x8xf32>
    %246 = arith.mulf %241, %245 : vector<4x8x8xf32>
    %247 = arith.addf %127, %244 : vector<4x8x32xf32>
    %248 = vector.extract_strided_slice %6 {offsets = [7, 0], sizes = [1, 32], strides = [1, 1]} : vector<25x32xf32> to vector<1x32xf32>
    %249 = vector.shape_cast %248 : vector<1x32xf32> to vector<1x1x32xf32>
    %250 = vector.broadcast %249 : vector<1x1x32xf32> to vector<4x8x32xf32>
    %251 = arith.addf %247, %250 : vector<4x8x32xf32>
    %252 = vector.extract_strided_slice %6 {offsets = [4, 0], sizes = [1, 32], strides = [1, 1]} : vector<25x32xf32> to vector<1x32xf32>
    %253 = vector.extract_strided_slice %6 {offsets = [5, 0], sizes = [1, 32], strides = [1, 1]} : vector<25x32xf32> to vector<1x32xf32>
    %cst_60 = arith.constant dense<0.000000e+00> : vector<4x8xf32>
    %254 = vector.multi_reduction <add>, %251, %cst_60 [2] : vector<4x8x32xf32> to vector<4x8xf32>
    %255 = vector.shape_cast %254 : vector<4x8xf32> to vector<4x8x1xf32>
    %cst_61 = arith.constant 3.200000e+01 : f32
    %256 = vector.broadcast %cst_61 : f32 to vector<4x8x1xf32>
    %257 = arith.divf %255, %256 : vector<4x8x1xf32>
    %258 = vector.broadcast %257 : vector<4x8x1xf32> to vector<4x8x32xf32>
    %259 = arith.subf %251, %258 : vector<4x8x32xf32>
    %260 = arith.mulf %259, %259 : vector<4x8x32xf32>
    %cst_62 = arith.constant dense<0.000000e+00> : vector<4x8xf32>
    %261 = vector.multi_reduction <add>, %260, %cst_62 [2] : vector<4x8x32xf32> to vector<4x8xf32>
    %262 = vector.shape_cast %261 : vector<4x8xf32> to vector<4x8x1xf32>
    %cst_63 = arith.constant 3.200000e+01 : f32
    %263 = vector.broadcast %cst_63 : f32 to vector<4x8x1xf32>
    %264 = arith.divf %262, %263 : vector<4x8x1xf32>
    %265 = vector.broadcast %257 : vector<4x8x1xf32> to vector<4x8x32xf32>
    %266 = arith.subf %251, %265 : vector<4x8x32xf32>
    %cst_64 = arith.constant 9.99999974E-6 : f32
    %267 = vector.broadcast %cst_64 : f32 to vector<4x8x1xf32>
    %268 = arith.addf %264, %267 : vector<4x8x1xf32>
    %269 = math.rsqrt %268 : vector<4x8x1xf32>
    %270 = vector.broadcast %269 : vector<4x8x1xf32> to vector<4x8x32xf32>
    %271 = arith.mulf %266, %270 : vector<4x8x32xf32>
    %272 = vector.shape_cast %252 : vector<1x32xf32> to vector<1x1x32xf32>
    %273 = vector.broadcast %272 : vector<1x1x32xf32> to vector<4x8x32xf32>
    %274 = arith.mulf %271, %273 : vector<4x8x32xf32>
    %275 = vector.shape_cast %253 : vector<1x32xf32> to vector<1x1x32xf32>
    %276 = vector.broadcast %275 : vector<1x1x32xf32> to vector<4x8x32xf32>
    %277 = arith.addf %274, %276 : vector<4x8x32xf32>
    %278 = vector.shape_cast %277 : vector<4x8x32xf32> to vector<32x32xf32>
    %279 = vector.extract_strided_slice %4 {offsets = [0, 384], sizes = [32, 64], strides = [1, 1]} : vector<32x448xf32> to vector<32x64xf32>
    %cst_65 = arith.constant dense<0.000000e+00> : vector<32x64xf32>
    %280 = tpu.matmul %278, %279, %cst_65 {dimension_numbers = #tpu.dot_dimension_numbers<[1], [0], [0], [1], [0, 0, 1, 1], [], []>, precision = #tpu.contract_precision<fp32>} : vector<32x32xf32>, vector<32x64xf32>, vector<32x64xf32> -> vector<32x64xf32>
    %281 = vector.extract_strided_slice %5 {offsets = [0, 384], sizes = [1, 64], strides = [1, 1]} : vector<1x448xf32> to vector<1x64xf32>
    %282 = vector.broadcast %281 : vector<1x64xf32> to vector<32x64xf32>
    %283 = arith.addf %280, %282 : vector<32x64xf32>
    %cst_66 = arith.constant 0.000000e+00 : f32
    %284 = vector.broadcast %cst_66 : f32 to vector<32x64xf32>
    %285 = arith.maximumf %283, %284 : vector<32x64xf32>
    %c0_67 = arith.constant 0 : index
    %c0_68 = arith.constant 0 : index
    %286 = vector.load %arg5[%c0_67, %c0_68] : memref<64x32xf32, #tpu.memory_space<vmem>>, vector<64x32xf32>
    %cst_69 = arith.constant dense<0.000000e+00> : vector<32x32xf32>
    %287 = tpu.matmul %285, %286, %cst_69 {dimension_numbers = #tpu.dot_dimension_numbers<[1], [0], [0], [1], [0, 0, 1, 1], [], []>, precision = #tpu.contract_precision<fp32>} : vector<32x64xf32>, vector<64x32xf32>, vector<32x32xf32> -> vector<32x32xf32>
    %288 = vector.extract_strided_slice %6 {offsets = [8, 0], sizes = [1, 32], strides = [1, 1]} : vector<25x32xf32> to vector<1x32xf32>
    %289 = vector.broadcast %288 : vector<1x32xf32> to vector<32x32xf32>
    %290 = arith.addf %287, %289 : vector<32x32xf32>
    %291 = vector.shape_cast %290 : vector<32x32xf32> to vector<4x8x32xf32>
    %292 = arith.addf %251, %291 : vector<4x8x32xf32>
    %c0_70 = arith.constant 0 : index
    %c0_71 = arith.constant 0 : index
    %c0_72 = arith.constant 0 : index
    %293 = vector.load %arg7[%c0_70, %c0_71, %c0_72] : memref<4x8x32xf32, #tpu.memory_space<vmem>>, vector<4x8x32xf32>
    tpu.vector_store %arg7[%c0_70, %c0_71, %c0_72], %292 {strides = array<i32>} : memref<4x8x32xf32, #tpu.memory_space<vmem>>, vector<4x8x32xf32>,
    %c0_73 = arith.constant 0 : index
    %c0_74 = arith.constant 0 : index
    %c0_75 = arith.constant 0 : index
    %294 = vector.load %arg8[%c0_73, %c0_74, %c0_75] : memref<4x8x8xf32, #tpu.memory_space<vmem>>, vector<4x8x8xf32>
    tpu.vector_store %arg8[%c0_73, %c0_74, %c0_75], %246 {strides = array<i32>} : memref<4x8x8xf32, #tpu.memory_space<vmem>>, vector<4x8x8xf32>,
    return
  }
  func.func @transform_0(%arg0: i32) -> (i32, i32, i32) {
    %c0_i32 = arith.constant 0 : i32
    %c0_i32_0 = arith.constant 0 : i32
    %c0_i32_1 = arith.constant 0 : i32
    return %arg0, %c0_i32, %c0_i32_0 : i32, i32, i32
  }
  func.func @transform_1(%arg0: i32) -> (i32, i32, i32) {
    %c0_i32 = arith.constant 0 : i32
    %c0_i32_0 = arith.constant 0 : i32
    %c0_i32_1 = arith.constant 0 : i32
    return %arg0, %c0_i32, %c0_i32_0 : i32, i32, i32
  }
  func.func @transform_2(%arg0: i32) -> (i32, i32, i32) {
    %c0_i32 = arith.constant 0 : i32
    %c0_i32_0 = arith.constant 0 : i32
    %c0_i32_1 = arith.constant 0 : i32
    return %arg0, %c0_i32, %c0_i32_0 : i32, i32, i32
  }
  func.func @transform_3(%arg0: i32) -> (i32, i32) {
    %c0_i32 = arith.constant 0 : i32
    %c0_i32_0 = arith.constant 0 : i32
    %c0_i32_1 = arith.constant 0 : i32
    return %c0_i32, %c0_i32_0 : i32, i32
  }
  func.func @transform_4(%arg0: i32) -> (i32, i32) {
    %c0_i32 = arith.constant 0 : i32
    %c0_i32_0 = arith.constant 0 : i32
    %c0_i32_1 = arith.constant 0 : i32
    return %c0_i32, %c0_i32_0 : i32, i32
  }
  func.func @transform_5(%arg0: i32) -> (i32, i32) {
    %c0_i32 = arith.constant 0 : i32
    %c0_i32_0 = arith.constant 0 : i32
    %c0_i32_1 = arith.constant 0 : i32
    return %c0_i32, %c0_i32_0 : i32, i32
  }
  func.func @transform_6(%arg0: i32) -> (i32, i32, i32) {
    %c0_i32 = arith.constant 0 : i32
    %c0_i32_0 = arith.constant 0 : i32
    %c0_i32_1 = arith.constant 0 : i32
    return %arg0, %c0_i32, %c0_i32_0 : i32, i32, i32
  }
  func.func @transform_7(%arg0: i32) -> (i32, i32, i32) {
    %c0_i32 = arith.constant 0 : i32
    %c0_i32_0 = arith.constant 0 : i32
    %c0_i32_1 = arith.constant 0 : i32
    return %arg0, %c0_i32, %c0_i32_0 : i32, i32, i32
  }
}

</mosaic_0001>

<bundles_post_ra>
// kernel: tpu_custom_call.1
= control target key start
LH: loop header
LB: loop body
LE: loop exit
PB: predicated region body
PF: predicated region fallthrough
CT: control target
= control target key end

     0   :  { %13 = vsyncpa [#allocation3], 0  ;;  %s40903_s0 = inlined_call_operand.vmem [shape: f32[4,8,32], index: 0, kind: input, shape index: {}]   ;;  %s40904_s1 = inlined_call_operand.vmem [shape: f32[4,8,32], index: 1, kind: input, shape index: {}]   ;;  %s40905_s2 = inlined_call_operand.vmem [shape: f32[4,1,8], index: 2, kind: input, shape index: {}]   ;;  %s40906_s3 = inlined_call_operand.hbm [shape: f32[33,448], index: 3, kind: input, shape index: {}]   ;;  %s40907_s4 = inlined_call_operand.vmem [shape: f32[64,32], index: 4, kind: input, shape index: {}]   ;;  %s40908_s5 = inlined_call_operand.vmem [shape: f32[25,32], index: 5, kind: input, shape index: {}]   ;;  %s40909_s6 = inlined_call_operand.hbm [shape: f32[4,8,32], index: 6, kind: output, shape index: {0}]   ;;  %s40910_s7 = inlined_call_operand.hbm [shape: f32[4,8,8], index: 7, kind: output, shape index: {1}]  }
   0x1   :  { %14 = vsyncpa [#allocation4], 0 }
   0x2   :  { %15 = vsyncpa [#allocation7], 0  ;;  %s37400_s24 = smov [#allocation2]   ;;  %s37328_s28 = scalar_lea.hbm %s40906_s3, 2560 }
   0x3   :  { %s27_s25 = sshll.u32 %s37400_s24, 4  ;;  %p37329_p0 = scmp.ne.s32.totalorder %s40906_s3, %s37328_s28  ;;  %s28_s25 = int_to_ptr.vmem [resolvable:$true] %s27_s25 }
   0x4   :  { %p37332_p1 = scmp.lt.u32.totalorder %s37328_s28, %s40906_s3 }
   0x6   :  { %p37334_p2 = pnand %p37332_p1, %p37329_p0 }
   0x8   :  { %37337 = shalt.err (!%p37334_p2)
}
   0x9   :  { %s37338_s10 = scalar_lea.vmem %s28_s25, 2560  ;;  %p37343_p4 = scmp.lt.s32.totalorder %s28_s25, %s28_s25 }
   0xa   :  { %p37339_p3 = scmp.ne.s32.totalorder %s28_s25, %s37338_s10  ;;  %p37344_p5 = scmp.lt.s32.totalorder %s37338_s10, %s37338_s10 }
   0xc   :  { %p37345_p6 = por %p37344_p5, %p37343_p4 }
   0xe   :  { %p37346_p7 = pnand %p37345_p6, %p37339_p3 }
  0x10   :  { %37349 = shalt.err (!%p37346_p7)
}
  0x11   :  { %s37401_s11 = smov 512   ;;  %s37402_s12 = smov 32  }
  0x12   :  { %33 = dma.hbm_to_vmem [thread:$0]  %s40906_s3, 2560, %s28_s25, [#allocation3], %s37401_s11, %s37401_s11, %s37402_s12  }
  0x13   :  { %37394 = dma.done.wait [#allocation3], 2560  }
  0x14   :  { %37395 = vsyncadd [#allocation3], 4294964736  ;;  %vm77_vm0 = vcmask 261120   ;;  %v41_v0 = vld [vmem:[%s40903_s0] sm:$0xff]  ;;  %v43_v1 = vld [vmem:[%s40903_s0 + $0x10] sm:$0xff]  ;;  %vm149_vm1 = vcmask 1046528  }
  0x15   :  { %v42_v2 = vld [vmem:[%s40903_s0 + $0x8] sm:$0xff]  ;;  %v78_v3 = vsel %vm77_vm0, %v41_v0, 0.0  ;;  %v84_v4 = vsel %vm77_vm0, %v43_v1, 0.0  ;;  %v44_v5 = vld [vmem:[%s40903_s0 + $0x18] sm:$0xff]  ;;  %v53_v32 = vld [vmem:[#allocation2] sm:$0xff]  ;;  %vm37404_vm2 = vmmov 0  }
  0x16   :  { %79 = vadd.xlane.f32.xlu0 %v78_v3  ;;  %85 = vadd.xlane.f32.xlu1 %v84_v4  ;;  %v81_v6 = vsel %vm77_vm0, %v42_v2, 0.0  ;;  %v87_v7 = vsel %vm77_vm0, %v44_v5, 0.0  ;;  %v54_v28 = vld [vmem:[#allocation2 + $0x8] sm:$0xff]  ;;  %v57_v33 = vld [vmem:[#allocation2 + $0x20] sm:$0xff]  ;;  %v180_v34 = vand.u32 4294901760, %v53_v32  ;;  %s37405_s30 = smov 96  }
  0x17   :  { %v58_v29 = vld [vmem:[#allocation2 + $0x28] sm:$0xff]  ;;  %v178_v30 = vand.u32 4294901760, %v54_v28  ;;  %v184_v35 = vand.u32 4294901760, %v57_v33  ;;  %v61_v45 = vld [vmem:[#allocation2 + $0x40] sm:$0xff]  ;;  %s37406_s8 = smov 120   ;;  %s37407_s9 = smov 88  }
  0x18   :  { %v182_v31 = vand.u32 4294901760, %v58_v29  ;;  %v37510_v38 = vsub.f32 %v53_v32, %v180_v34  ;;  %v62_v40 = vld [vmem:[#allocation2 + $0x48] sm:$0xff]  ;;  %v65_v46 = vld [vmem:[#allocation2 + $0x60] sm:$0xff]  ;;  %v188_v50 = vand.u32 4294901760, %v61_v45  ;;  %vm875_vm3 = vcmask 64512   ;;  %s37408_s10 = smov 80  }
  0x19   :  { %v37506_v36 = vsub.f32 %v54_v28, %v178_v30  ;;  %v37512_v39 = vsub.f32 %v57_v33, %v184_v35  ;;  %v66_v41 = vld [vmem:[#allocation2 + $0x68] sm:$0xff]  ;;  %v186_v44 = vand.u32 4294901760, %v62_v40  ;;  %v192_v57 = vand.u32 4294901760, %v65_v46  ;;  %s37409_s11 = smov 64   ;;  %s37410_s13 = smov 112  }
  0x1a   :  { %82 = vadd.xlane.f32.xlu0 %v81_v6  ;;  %88 = vadd.xlane.f32.xlu1 %v87_v7  ;;  %v37508_v37 = vsub.f32 %v58_v29, %v182_v31  ;;  %v303_v47 = vand.u32 4294901760, %v37510_v38  ;;  %v190_v49 = vand.u32 4294901760, %v66_v41  ;;  %s37411_s14 = smov 104   ;;  %s37412_s15 = smov 72   ;;  %vm32443_vm4 = vcmask 523264  }
  0x1b   :  { %v297_v42 = vand.u32 4294901760, %v37506_v36  ;;  %v315_v48 = vand.u32 4294901760, %v37512_v39  ;;  %v37524_v53 = vsub.f32 %v62_v40, %v186_v44  ;;  %v37535_v3 = vsub.f32 %v65_v46, %v192_v57 }
  0x1c   :  { %v309_v43 = vand.u32 4294901760, %v37508_v37  ;;  %v304_v54 = vsub.f32 %v37510_v38, %v303_v47  ;;  %v37528_v56 = vsub.f32 %v66_v41, %v190_v49  ;;  %v36349_v28 = vpack.c.bf16 %v37512_v39, %v37510_v38 }
  0x1d   :  { %v298_v51 = vsub.f32 %v37506_v36, %v297_v42  ;;  %v316_v55 = vsub.f32 %v37512_v39, %v315_v48  ;;  %v321_v60 = vand.u32 4294901760, %v37524_v53  ;;  %v37568_v29 = vpack.c.bf16 %v190_v49, %v186_v44 }
  0x1e   :  { %v310_v52 = vsub.f32 %v37508_v37, %v309_v43  ;;  %v305_v61 = vand.u32 4294901760, %v304_v54  ;;  %v333_v63 = vand.u32 4294901760, %v37528_v56  ;;  %v37577_v32 = vpack.c.bf16 %v192_v57, %v188_v50  ;;  %v73_v54 = vld [vmem:[%s40908_s5] sm:$0xff] }
  0x1f   :  { %v299_v58 = vand.u32 4294901760, %v298_v51  ;;  %v317_v62 = vand.u32 4294901760, %v316_v55  ;;  %v131_v46 = vlaneseq }
  0x20   :  { %v311_v59 = vand.u32 4294901760, %v310_v52  ;;  %v37590_v40 = vpack.c.bf16 %v333_v63, %v321_v60 }
  0x21   :  { %v37537_v4 = vpack.c.bf16 %v317_v62, %v305_v61 }
  0xa3   :  { %v80_v8 = vpop.xlane.xlu0 %79  ;;  %v86_v9 = vpop.xlane.xlu1 %85 }
  0xa4   :  { %v91_v10 = vmul.f32 0.03125, %v80_v8  ;;  %v93_v11 = vmul.f32 0.03125, %v86_v9  ;;  %v339_v8 = vand.u32 4294901760, %v37535_v3 }
  0xa6   :  { %v37486_v12 = vsub.f32 %v41_v0, %v91_v10  ;;  %v37488_v13 = vsub.f32 %v43_v1, %v93_v11  ;;  %v37532_v0 = vsub.f32 %v61_v45, %v188_v50  ;;  %v36339_v1 = vpack.c.bf16 %v311_v59, %v299_v58 }
  0xa7   :  { %v83_v14 = vpop.xlane.xlu0 %82  ;;  %v89_v15 = vpop.xlane.xlu1 %88  ;;  %v340_v11 = vsub.f32 %v37535_v3, %v339_v8 }
  0xa8   :  { %v92_v16 = vmul.f32 0.03125, %v83_v14  ;;  %v94_v17 = vmul.f32 0.03125, %v89_v15  ;;  %v99_v18 = vmul.f32 %v37486_v12, %v37486_v12  ;;  %v101_v19 = vmul.f32 %v37488_v13, %v37488_v13  ;;  %36340 = vmatprep.subr.bf16.mxu0 %v36339_v1 }
  0xa9   :  { %v327_v6 = vand.u32 4294901760, %v37532_v0  ;;  %36342 = vmatpush1.bf16.msra.mxu0 %v37537_v4  ;;  %v36353_v33 = vpack.c.bf16 %v37535_v3, %v37532_v0 }
  0xaa   :  { %v37494_v20 = vsub.f32 %v42_v2, %v92_v16  ;;  %v37496_v21 = vsub.f32 %v44_v5, %v94_v17  ;;  %v103_v22 = vsel %vm77_vm0, %v99_v18, 0.0  ;;  %v109_v23 = vsel %vm77_vm0, %v101_v19, 0.0  ;;  %v75_v17 = vld [vmem:[%s40908_s5 + $0x10] sm:$0xff] }
  0xab   :  { %104 = vadd.xlane.f32.xlu0 %v103_v22  ;;  %v322_v2 = vsub.f32 %v37524_v53, %v321_v60  ;;  %v334_v5 = vsub.f32 %v37528_v56, %v333_v63  ;;  %v328_v10 = vsub.f32 %v37532_v0, %v327_v6  ;;  %v341_v16 = vand.u32 4294901760, %v340_v11  ;;  %v76_v22 = vld [vmem:[%s40908_s5 + $0x18] sm:$0x1] }
  0xac   :  { %v100_v24 = vmul.f32 %v37494_v20, %v37494_v20  ;;  %v102_v25 = vmul.f32 %v37496_v21, %v37496_v21  ;;  %v37553_v19 = vpack.c.bf16 %v182_v31, %v178_v30  ;;  %v36351_v31 = vpack.c.bf16 %v37528_v56, %v37524_v53  ;;  %v74_v56 = vld [vmem:[%s40908_s5 + $0x8] sm:$0xff] }
  0xad   :  { %v323_v7 = vand.u32 4294901760, %v322_v2  ;;  %v335_v9 = vand.u32 4294901760, %v334_v5  ;;  %v329_v15 = vand.u32 4294901760, %v328_v10  ;;  %v37592_v41 = vpack.c.bf16 %v339_v8, %v327_v6 }
  0xae   :  { %v106_v26 = vsel %vm77_vm0, %v100_v24, 0.0  ;;  %v112_v27 = vsel %vm77_vm0, %v102_v25, 0.0  ;;  %v37403_v24 = vmov 0.0   ;;  %v151_v25 = vrot.slane %v75_v17, 1  ;;  %36332 = vmatprep.subr.bf16.mxu1 %v37553_v19 }
  0xaf   :  { %110 = vadd.xlane.f32.xlu0 %v109_v23  ;;  %107 = vadd.xlane.f32.xlu1 %v106_v26  ;;  %v37545_v14 = vpack.c.bf16 %v335_v9, %v323_v7  ;;  %v37551_v18 = vpack.c.bf16 %v341_v16, %v329_v15  ;;  %v36347_v23 = vpack.c.bf16 %v37508_v37, %v37506_v36  ;;  %v872_v26 = vrot.slane %v76_v22, 1 }
  0xb0   :  { %399 = vmatprep.mubr.f32.mxu0 %v37403_v24  ;;  %250 = vmatprep.mubr.f32.mxu1 %v37403_v24  ;;  %v37594_v36 = vshrl.u32 %v131_v46, 7  ;;  %v150_v60 = vrot.slane %v74_v56, 1 }
  0xb1   :  { %36344 = vmatprep.subr.bf16.mxu0 %v37545_v14  ;;  %v37571_v30 = vsel %vm149_vm1, %v151_v25, %v872_v26 }
  0xb2   :  { %36346 = vmatpush1.bf16.msra.mxu0 %v37551_v18  ;;  %v141_v57 = vsub.s32 1, %v37594_v36  ;;  %v152_v2 = vsel %vm149_vm1, %v150_v60, %v151_v25 }
  0xb3   :  { %113 = vadd.xlane.f32.xlu1 %v112_v27  ;;  %v37561_v27 = vpack.c.bf16 %v184_v35, %v180_v34  ;;  %36348 = vmatprep.subr.bf16.mxu0 %v36347_v23  ;;  %v37586_v34 = vpack.c.bf16 %v309_v43, %v297_v42  ;;  %v37588_v35 = vpack.c.bf16 %v315_v48, %v303_v47  ;;  %v133_v48 = vsub.s32 0, %v37594_v36 }
  0xb4   :  { %v142_v62 = vrot.slane %v73_v54, %v141_v57 }
  0xb5   :  { %36334 = vmatpush1.bf16.msra.mxu1 %v37561_v27  ;;  %v134_v58 = vrot.slane %v73_v54, %v133_v48 }
  0xb6   :  { %36336 = vmatprep.subr.bf16.mxu1 %v37568_v29 }
  0xb9   :  { %36338 = vmatpush1.bf16.msra.mxu1 %v37577_v32 }
  0xba   :  { %36619 = vmatprep.subr.bf16.mxu1 %v36339_v1 }
 0x138   :  { %v105_v44 = vpop.xlane.xlu0 %104 }
 0x139   :  { %v115_v45 = vmul.f32 0.03125, %v105_v44 }
 0x13b   :  { %v119_v49 = vadd.f32 1e-05, %v115_v45 }
 0x13c   :  { %v108_v50 = vpop.xlane.xlu1 %107  ;;  %v111_v51 = vpop.xlane.xlu0 %110 }
 0x13d   :  { %37160 = vrsqrt.f32 %v119_v49  ;;  %v116_v52 = vmul.f32 0.03125, %v108_v50  ;;  %v117_v53 = vmul.f32 0.03125, %v111_v51 }
 0x13f   :  { %v120_v37 = vadd.f32 1e-05, %v116_v52  ;;  %v121_v42 = vadd.f32 1e-05, %v117_v53 }
 0x140   :  { %v114_v43 = vpop.xlane.xlu1 %113 }
 0x141   :  { %37162 = vrsqrt.f32 %v120_v37  ;;  %v118_v47 = vmul.f32 0.03125, %v114_v43 }
 0x142   :  { %37164 = vrsqrt.f32 %v121_v42 }
 0x143   :  { %v122_v55 = vadd.f32 1e-05, %v118_v47 }
 0x145   :  { %37166 = vrsqrt.f32 %v122_v55 }
 0x147   :  { %v37161_v59 = vpop.eup %37160 }
 0x148   :  { %v127_v61 = vmul.f32 %v37161_v59, %v37486_v12 }
 0x14a   :  { %v135_v63 = vmul.f32 %v134_v58, %v127_v61 }
 0x14b   :  { %v37163_v1 = vpop.eup %37162 }
 0x14c   :  { %v37165_v5 = vpop.eup %37164  ;;  %v128_v6 = vmul.f32 %v37163_v1, %v37494_v20  ;;  %v143_v7 = vadd.f32 %v142_v62, %v135_v63 }
 0x14d   :  { %v129_v8 = vmul.f32 %v37165_v5, %v37488_v13 }
 0x14e   :  { %v154_v9 = vadd.f32 %v152_v2, %v143_v7  ;;  %v136_v10 = vmul.f32 %v134_v58, %v128_v6 }
 0x14f   :  { %v37167_v11 = vpop.eup %37166  ;;  %v137_v15 = vmul.f32 %v134_v58, %v129_v8 }
 0x150   :  { %v130_v16 = vmul.f32 %v37167_v11, %v37496_v21  ;;  %v167_v17 = vsel %vm77_vm0, %v154_v9, 0  ;;  %v144_v12 = vadd.f32 %v142_v62, %v136_v10 }
 0x151   :  { %v37612_v22 = vand.u32 4294901760, %v167_v17  ;;  %v145_v23 = vadd.f32 %v142_v62, %v137_v15 }
 0x152   :  { %v138_v26 = vmul.f32 %v134_v58, %v130_v16  ;;  %v155_v25 = vadd.f32 %v152_v2, %v144_v12 }
 0x153   :  { %401 = vmatmul.mubr.f32.vlgmr.msra.gmra.mrb[0].mxu0 %v37612_v22  ;;  %v252_v20 = vsub.f32 %v167_v17, %v37612_v22  ;;  %v156_v44 = vadd.f32 %v152_v2, %v145_v23 }
 0x154   :  { %36350 = vmatpush1.bf16.msra.mxu0 %v36349_v28  ;;  %406 = vmatprep.mubr.f32.mxu0 %v37403_v24  ;;  %v170_v13 = vsel %vm77_vm0, %v155_v25, 0  ;;  %v146_v21 = vadd.f32 %v142_v62, %v138_v26 }
 0x155   :  { %v37621_v45 = vand.u32 4294901760, %v170_v13  ;;  %36352 = vmatprep.subr.bf16.mxu0 %v36351_v31  ;;  %v253_v46 = vand.u32 4294901760, %v252_v20  ;;  %v173_v49 = vsel %vm77_vm0, %v156_v44, 0 }
 0x156   :  { %v37624_v50 = vand.u32 4294901760, %v173_v49  ;;  %v157_v51 = vadd.f32 %v152_v2, %v146_v21 }
 0x157   :  { %408 = vmatmul.mubr.f32.gmra.mrb[2].mxu0 %v37621_v45  ;;  %v254_v52 = vsub.f32 %v252_v20, %v253_v46  ;;  %v263_v38 = vsub.f32 %v170_v13, %v37621_v45 }
 0x158   :  { %36354 = vmatpush1.bf16.msra.mxu0 %v36353_v33  ;;  %508 = vmatprep.mubr.f32.mxu0 %v37403_v24  ;;  %v274_v39 = vsub.f32 %v173_v49, %v37624_v50  ;;  %v176_v28 = vsel %vm77_vm0, %v157_v51, 0 }
 0x159   :  { %v255_v31 = vand.u32 4294901760, %v254_v52  ;;  %v264_v53 = vand.u32 4294901760, %v263_v38  ;;  %36356 = vmatprep.subr.bf16.mxu0 %v37553_v19  ;;  %v37635_v37 = vand.u32 4294901760, %v176_v28 }
 0x15a   :  { %v275_v42 = vand.u32 4294901760, %v274_v39 }
 0x15b   :  { %256 = vmatmul.mubr.f32.vlgmr.msra.gmra.mrb[0].mxu1 %v255_v31  ;;  %511 = vmatmul.mubr.f32.vlgmr.msra.gmra.mrb[0].mxu0 %v252_v20  ;;  %v265_v43 = vsub.f32 %v263_v38, %v264_v53  ;;  %v285_v47 = vsub.f32 %v176_v28, %v37635_v37 }
 0x15c   :  { %261 = vmatprep.mubr.f32.mxu1 %v37403_v24  ;;  %516 = vmatprep.mubr.f32.mxu0 %v37403_v24  ;;  %v276_v3 = vsub.f32 %v274_v39, %v275_v42 }
 0x15d   :  { %v266_v0 = vand.u32 4294901760, %v265_v43  ;;  %36358 = vmatpush1.bf16.msra.mxu0 %v37561_v27  ;;  %36621 = vmatpush1.bf16.msra.mxu1 %v37537_v4  ;;  %v286_v33 = vand.u32 4294901760, %v285_v47 }
 0x15e   :  { %36620 = vmatprep.subr.bf16.mxu1 %v37545_v14  ;;  %36360 = vmatprep.subr.bf16.mxu0 %v37568_v29  ;;  %v277_v54 = vand.u32 4294901760, %v276_v3 }
 0x15f   :  { %267 = vmatmul.mubr.f32.gmra.mrb[2].mxu1 %v266_v0  ;;  %519 = vmatmul.mubr.f32.gmra.mrb[2].mxu0 %v263_v38  ;;  %v287_v55 = vsub.f32 %v285_v47, %v286_v33 }
 0x160   :  { %272 = vmatprep.mubr.f32.mxu1 %v37403_v24  ;;  %524 = vmatprep.mubr.f32.mxu0 %v37403_v24 }
 0x161   :  { %36622 = vmatpush1.bf16.msra.mxu1 %v37551_v18  ;;  %36362 = vmatpush1.bf16.msra.mxu0 %v37577_v32  ;;  %v288_v4 = vand.u32 4294901760, %v287_v55 }
 0x162   :  { %36364 = vmatprep.subr.bf16.mxu0 %v37586_v34  ;;  %34111 = vmatprep.subr.mxu1 %v37403_v24 }
 0x163   :  { %278 = vmatmul.mubr.f32.gmra.mrb[4].mxu1 %v277_v54  ;;  %527 = vmatmul.mubr.f32.gmra.mrb[4].mxu0 %v274_v39 }
 0x164   :  { %283 = vmatprep.mubr.f32.mxu1 %v37403_v24  ;;  %532 = vmatprep.mubr.f32.mxu0 %v37403_v24 }
 0x167   :  { %289 = vmatmul.mubr.f32.gmra.mrb[6].mxu1 %v288_v4  ;;  %535 = vmatmul.mubr.f32.gmra.mrb[6].mxu0 %v285_v47 }
 0x168   :  { %413 = vmatprep.mubr.f32.mxu1 %v37403_v24  ;;  %613 = vmatprep.mubr.f32.mxu0 %v37403_v24 }
 0x16b   :  { %415 = vmatmul.mubr.f32.vlgmr.msra.gmra.mrb[4].mxu1 %v37624_v50  ;;  %617 = vmatmul.mubr.f32.vlgmr.msra.gmra.mrb[0].mxu0 %v253_v46 }
 0x16c   :  { %420 = vmatprep.mubr.f32.mxu1 %v37403_v24  ;;  %622 = vmatprep.mubr.f32.mxu0 %v37403_v24 }
 0x16d   :  { %36366 = vmatpush1.bf16.msra.mxu0 %v37588_v35 }
 0x16e   :  { %36368 = vmatprep.subr.bf16.mxu0 %v37590_v40  ;;  %v33167_v40 = vld [vmem:[#allocation2 + $0x80] ss:$0 sm:$0xff] }
 0x16f   :  { %422 = vmatmul.mubr.f32.gmra.mrb[6].mxu1 %v37635_v37  ;;  %626 = vmatmul.mubr.f32.gmra.mrb[2].mxu0 %v264_v53 }
 0x170   :  { %631 = vmatprep.mubr.f32.mxu0 %v37403_v24  ;;  %34113 = vmatprep.mubr.msk.f32.mxu1 %vm37404_vm2, %v37403_v24 }
 0x171   :  { %36370 = vmatpush1.bf16.msra.mxu0 %v37592_v41  ;;  %v33168_v41 = vld [vmem:[#allocation2 + $0x88] ss:$0 sm:$0xff] }
 0x172   :  { %36372 = vmatprep.subr.bf16.mxu0 %v37553_v19 }
 0x173   :  { %635 = vmatmul.mubr.f32.gmra.mrb[4].mxu0 %v275_v42 }
 0x174   :  { %640 = vmatprep.mubr.f32.mxu0 %v37403_v24 }
 0x177   :  { %644 = vmatmul.mubr.f32.gmra.mrb[6].mxu0 %v286_v33 }
 0x178   :  { %738 = vmatprep.mubr.f32.mxu0 %v37403_v24 }
 0x17b   :  { %740 = vmatmul.mubr.f32.vlgmr.msra.gmra.mrb[0].mxu0 %v37612_v22 }
 0x17c   :  { %745 = vmatprep.mubr.f32.mxu0 %v37403_v24  ;;  %36374 = vmatpush1.bf16.msra.mxu0 %v37561_v27 }
 0x17d   :  { %36376 = vmatprep.subr.bf16.mxu0 %v37568_v29 }
 0x17f   :  { %747 = vmatmul.mubr.f32.gmra.mrb[2].mxu0 %v37621_v45 }
 0x180   :  { %752 = vmatprep.mubr.f32.mxu0 %v37403_v24  ;;  %36378 = vmatpush1.bf16.msra.mxu0 %v37577_v32 }
 0x181   :  { %34261 = vmatprep.subr.mxu0 %v37403_v24 }
 0x183   :  { %754 = vmatmul.mubr.f32.gmra.mrb[4].mxu0 %v37624_v50 }
 0x184   :  { %759 = vmatprep.mubr.f32.mxu0 %v37403_v24 }
 0x187   :  { %761 = vmatmul.mubr.f32.gmra.mrb[6].mxu0 %v37635_v37 }
 0x188   :  { %839 = vmatprep.mubr.f32.mxu0 %v37403_v24 }
 0x18b   :  { %841 = vmatmul.mubr.f32.vlgmr.msra.gmra.mrb[0].mxu0 %v37612_v22 }
 0x18c   :  { %846 = vmatprep.mubr.f32.mxu0 %v37403_v24 }
 0x18f   :  { %848 = vmatmul.mubr.f32.gmra.mrb[2].mxu0 %v37621_v45 }
 0x190   :  { %853 = vmatprep.mubr.f32.mxu0 %v37403_v24 }
 0x193   :  { %855 = vmatmul.mubr.f32.gmra.mrb[4].mxu0 %v37624_v50 }
 0x194   :  { %860 = vmatprep.mubr.f32.mxu0 %v37403_v24 }
 0x197   :  { %862 = vmatmul.mubr.f32.gmra.mrb[6].mxu0 %v37635_v37 }
 0x198   :  { %34263 = vmatprep.mubr.msk.f32.mxu0 %vm37404_vm2, %v37403_v24 }
 0x22e   :  { %v257_v14 = vpop.f32.mrb[0].mxu1 }
 0x22f   :  { %v259_v18 = vpop.f32.mrb[1].mxu1  ;;  %v258_v56 = vadd.f32 %v33167_v40, %v257_v14 }
 0x230   :  { %v260_v57 = vadd.f32 %v33168_v41, %v259_v18 }
 0x232   :  { %v268_v19 = vpop.f32.mrb[2].mxu1 }
 0x233   :  { %v270_v27 = vpop.f32.mrb[3].mxu1  ;;  %v269_v62 = vadd.f32 %v33167_v40, %v268_v19 }
 0x234   :  { %v271_v63 = vadd.f32 %v33168_v41, %v270_v27 }
 0x23e   :  { %v416_v29 = vpop.f32.mrb[4].mxu1 }
 0x23f   :  { %v418_v32 = vpop.f32.mrb[5].mxu1  ;;  %v36631_v7 = vadd.f32 %v33167_v40, %v416_v29 }
 0x240   :  { %v36633_v8 = vadd.f32 %v33168_v41, %v418_v32 }
 0x242   :  { %v423_v34 = vpop.f32.mrb[6].mxu1 }
 0x243   :  { %v425_v35 = vpop.f32.mrb[7].mxu1  ;;  %v36635_v16 = vadd.f32 %v33167_v40, %v423_v34 }
 0x244   :  { %v36637_v17 = vadd.f32 %v33168_v41, %v425_v35 }
 0x25e   :  { %v842_v58 = vpop.f32.mrb[0].mxu0 }
 0x25f   :  { %v37688_v59 = vadd.f32 %v842_v58, %v258_v56  ;;  %v844_v60 = vpop.f32.mrb[1].mxu0 }
 0x260   :  { %v37690_v61 = vadd.f32 %v844_v60, %v260_v57 }
 0x261   :  { %869 = vrot.lane.b32.xlu0 %v37688_v59, %s37405_s30  ;;  %v876_v25 = vsel %vm875_vm3, %v37688_v59, 0 }
 0x262   :  { %v849_v1 = vpop.f32.mrb[2].mxu0  ;;  %v37726_v20 = vand.u32 4294901760, %v876_v25 }
 0x263   :  { %v37694_v2 = vadd.f32 %v849_v1, %v269_v62  ;;  %v851_v5 = vpop.f32.mrb[3].mxu0 }
 0x264   :  { %v37696_v6 = vadd.f32 %v851_v5, %v271_v63  ;;  %v947_v44 = vsub.f32 %v876_v25, %v37726_v20 }
 0x265   :  { %1327 = vrot.lane.b32.xlu1 %v37694_v2, %s37405_s30  ;;  %2729 = vrot.lane.b32.xlu0 %v37688_v59, %s37406_s8  ;;  %v1329_v34 = vsel %vm875_vm3, %v37694_v2, 0 }
 0x266   :  { %v856_v9 = vpop.f32.mrb[4].mxu0  ;;  %v948_v13 = vand.u32 4294901760, %v947_v44  ;;  %v37772_v40 = vand.u32 4294901760, %v1329_v34 }
 0x267   :  { %v37702_v10 = vadd.f32 %v36631_v7, %v856_v9  ;;  %v858_v11 = vpop.f32.mrb[5].mxu0 }
 0x268   :  { %v37704_v15 = vadd.f32 %v36633_v8, %v858_v11  ;;  %v949_v46 = vsub.f32 %v947_v44, %v948_v13  ;;  %v37781_v56 = vsub.f32 %v1329_v34, %v37772_v40 }
 0x269   :  { %3183 = vrot.lane.b32.xlu0 %v37694_v2, %s37406_s8  ;;  %1780 = vrot.lane.b32.xlu1 %v37702_v10, %s37405_s30 }
 0x26a   :  { %v863_v12 = vpop.f32.mrb[6].mxu0  ;;  %v950_v38 = vand.u32 4294901760, %v949_v46  ;;  %v1401_v62 = vand.u32 4294901760, %v37781_v56 }
 0x26b   :  { %v37710_v22 = vadd.f32 %v36635_v16, %v863_v12  ;;  %v865_v23 = vpop.f32.mrb[7].mxu0 }
 0x26c   :  { %v37712_v26 = vadd.f32 %v36637_v17, %v865_v23  ;;  %v1402_v1 = vsub.f32 %v37781_v56, %v1401_v62 }
 0x26d   :  { %3637 = vrot.lane.b32.xlu0 %v37702_v10, %s37406_s8  ;;  %2233 = vrot.lane.b32.xlu1 %v37710_v22, %s37405_s30 }
 0x26e   :  { %v1403_v11 = vand.u32 4294901760, %v1402_v1 }
 0x271   :  { %4091 = vrot.lane.b32.xlu0 %v37710_v22, %s37406_s8  ;;  %2731 = vrot.lane.b32.xlu1 %v37688_v59, %s37407_s9 }
 0x275   :  { %3185 = vrot.lane.b32.xlu1 %v37694_v2, %s37407_s9 }
 0x279   :  { %3639 = vrot.lane.b32.xlu1 %v37702_v10, %s37407_s9 }
 0x27d   :  { %4093 = vrot.lane.b32.xlu1 %v37710_v22, %s37407_s9 }
 0x2d3   :  { %v870_v21 = vpop.permute.xlu0 %869 }
 0x2d4   :  { %v878_v45 = vsel %vm875_vm3, %v870_v21, 0 }
 0x2d5   :  { %v881_v49 = vand.u32 4294901760, %v878_v45 }
 0x2d7   :  { %v958_v50 = vsub.f32 %v878_v45, %v881_v49  ;;  %v1328_v51 = vpop.permute.xlu1 %1327  ;;  %v37730_v52 = vpop.permute.xlu0 %2729  ;;  %34112 = vmatpush3.xpose.msra.mxu1 %v881_v49 }
 0x2d8   :  { %34116 = vmatprep.subr.mxu1 %v37403_v24  ;;  %v1331_v35 = vsel %vm875_vm3, %v1328_v51, 0 }
 0x2d9   :  { %v959_v39 = vand.u32 4294901760, %v958_v50  ;;  %v37774_v41 = vand.u32 4294901760, %v1331_v35 }
 0x2da   :  { %34114 = vmatmul.mubr.f32.vlgmr.msra.gmra.mrb[8].mxu1 %v950_v38 }
 0x2db   :  { %v960_v28 = vsub.f32 %v958_v50, %v959_v39  ;;  %v3184_v31 = vpop.permute.xlu0 %3183  ;;  %v37733_v53 = vpop.permute.xlu1 %1780  ;;  %34118 = vmatprep.mubr.msk.f32.mxu1 %vm37404_vm2, %v37403_v24  ;;  %v37784_v57 = vsub.f32 %v1331_v35, %v37774_v41 }
 0x2dc   :  { %v3187_v37 = vsel %vm875_vm3, %v3184_v31, 0  ;;  %v1784_v51 = vsel %vm875_vm3, %v37733_v53, 0 }
 0x2dd   :  { %v37738_v42 = vand.u32 4294901760, %v3187_v37  ;;  %v961_v43 = vand.u32 4294901760, %v960_v28  ;;  %v1412_v63 = vand.u32 4294901760, %v37784_v57 }
 0x2df   :  { %v37740_v47 = vpop.permute.xlu1 %2233  ;;  %v37743_v0 = vsub.f32 %v3187_v37, %v37738_v42  ;;  %34117 = vmatpush3.xpose.msra.mxu1 %v961_v43  ;;  %v37787_v58 = vpop.permute.xlu0 %3637  ;;  %v1413_v5 = vsub.f32 %v37784_v57, %v1412_v63 }
 0x2e0   :  { %34121 = vmatprep.subr.mxu1 %v37403_v24 }
 0x2e1   :  { %v3259_v33 = vand.u32 4294901760, %v37743_v0  ;;  %v1414_v17 = vand.u32 4294901760, %v1413_v5 }
 0x2e2   :  { %34119 = vmatmul.mubr.f32.vlgmr.msra.gmra.mrb[8].mxu1 %v37726_v20 }
 0x2e3   :  { %v37747_v3 = vpop.permute.xlu1 %2731  ;;  %34122 = vmatpush3.xpose.msra.mxu1 %v958_v50  ;;  %34123 = vmatprep.mubr.msk.f32.mxu1 %vm37404_vm2, %v37403_v24  ;;  %v3260_v55 = vsub.f32 %v37743_v0, %v3259_v33  ;;  %v4092_v7 = vpop.permute.xlu0 %4091  ;;  %v1782_v50 = vsel %vm875_vm3, %v37702_v10, 0 }
 0x2e4   :  { %34126 = vmatprep.subr.mxu1 %v37403_v24  ;;  %v4095_v9 = vsel %vm875_vm3, %v4092_v7, 0  ;;  %v37852_v38 = vand.u32 4294901760, %v1782_v50 }
 0x2e5   :  { %v3261_v19 = vand.u32 4294901760, %v3260_v55  ;;  %v37810_v12 = vand.u32 4294901760, %v4095_v9  ;;  %v2237_v55 = vsel %vm875_vm3, %v37740_v47, 0 }
 0x2e6   :  { %v1853_v28 = vsub.f32 %v1782_v50, %v37852_v38 }
 0x2e7   :  { %v3186_v54 = vpop.permute.xlu1 %3185  ;;  %v4166_v25 = vsub.f32 %v4095_v9, %v37810_v12  ;;  %v3641_v9 = vsel %vm875_vm3, %v37787_v58, 0 }
 0x2e8   :  { %v3189_v4 = vsel %vm875_vm3, %v3186_v54, 0  ;;  %v1854_v53 = vand.u32 4294901760, %v1853_v28  ;;  %v2235_v54 = vsel %vm875_vm3, %v37710_v22, 0 }
 0x2e9   :  { %v37755_v14 = vand.u32 4294901760, %v3189_v4 }
 0x2ea   :  { %34124 = vmatmul.mubr.f32.vlgmr.msra.gmra.mrb[8].mxu1 %v947_v44  ;;  %v4167_v44 = vand.u32 4294901760, %v4166_v25 }
 0x2eb   :  { %v3269_v18 = vsub.f32 %v3189_v4, %v37755_v14  ;;  %34262 = vmatpush3.xpose.msra.mxu0 %v37755_v14  ;;  %34127 = vmatpush3.xpose.msra.mxu1 %v881_v49  ;;  %v37791_v60 = vpop.permute.xlu1 %3639  ;;  %v2305_v4 = vand.u32 4294901760, %v2235_v54 }
 0x2ec   :  { %34128 = vmatprep.mubr.msk.f32.mxu1 %vm37404_vm2, %v37403_v24  ;;  %34131 = vmatprep.subr.mxu1 %v37403_v24  ;;  %v4168_v21 = vsub.f32 %v4166_v25, %v4167_v44 }
 0x2ed   :  { %v3270_v27 = vand.u32 4294901760, %v3269_v18  ;;  %34266 = vmatprep.subr.mxu0 %v37403_v24 }
 0x2ee   :  { %34264 = vmatmul.mubr.f32.vlgmr.msra.gmra.mrb[8].mxu0 %v3261_v19  ;;  %v4169_v46 = vand.u32 4294901760, %v4168_v21 }
 0x2ef   :  { %v3271_v29 = vsub.f32 %v3269_v18, %v3270_v27  ;;  %34268 = vmatprep.mubr.msk.f32.mxu0 %vm37404_vm2, %v37403_v24  ;;  %v4094_v8 = vpop.permute.xlu1 %4093 }
 0x2f0   :  { %v4097_v16 = vsel %vm875_vm3, %v4094_v8, 0 }
 0x2f1   :  { %v3272_v32 = vand.u32 4294901760, %v3271_v29  ;;  %v37814_v23 = vand.u32 4294901760, %v4097_v16 }
 0x2f2   :  { %34129 = vmatmul.mubr.f32.vlgmr.msra.gmra.mrb[8].mxu1 %v948_v13 }
 0x2f3   :  { %34267 = vmatpush3.xpose.msra.mxu0 %v3272_v32  ;;  %34132 = vmatpush3.xpose.msra.mxu1 %v959_v39  ;;  %v1787_v39 = vand.u32 4294901760, %v1784_v51 }
 0x2f4   :  { %34271 = vmatprep.subr.mxu0 %v37403_v24  ;;  %34133 = vmatprep.mubr.msk.f32.mxu1 %vm37404_vm2, %v37403_v24 }
 0x2f5   :  { %34136 = vmatprep.subr.mxu1 %v37403_v24  ;;  %v1864_v31 = vsub.f32 %v1784_v51, %v1787_v39 }
 0x2f6   :  { %34269 = vmatmul.mubr.f32.vlgmr.msra.gmra.mrb[8].mxu0 %v37738_v42 }
 0x2f7   :  { %34272 = vmatpush3.xpose.msra.mxu0 %v3269_v18  ;;  %34273 = vmatprep.mubr.msk.f32.mxu0 %vm37404_vm2, %v37403_v24  ;;  %v1865_v37 = vand.u32 4294901760, %v1864_v31  ;;  %v2306_v18 = vsub.f32 %v2235_v54, %v2305_v4 }
 0x2f8   :  { %34276 = vmatprep.subr.mxu0 %v37403_v24 }
 0x2f9   :  { %v1866_v43 = vsub.f32 %v1864_v31, %v1865_v37  ;;  %v2307_v47 = vand.u32 4294901760, %v2306_v18 }
 0x2fa   :  { %34134 = vmatmul.mubr.f32.vlgmr.msra.gmra.mrb[8].mxu1 %v37726_v20 }
 0x2fb   :  { %34137 = vmatpush3.xpose.msra.mxu1 %v881_v49  ;;  %34138 = vmatprep.mubr.msk.f32.mxu1 %vm37404_vm2, %v37403_v24  ;;  %v2308_v29 = vsub.f32 %v2306_v18, %v2307_v47 }
 0x2fc   :  { %34141 = vmatprep.subr.mxu1 %v37403_v24 }
 0x2fd   :  { %v2309_v34 = vand.u32 4294901760, %v2308_v29 }
 0x2fe   :  { %34274 = vmatmul.mubr.f32.vlgmr.msra.gmra.mrb[8].mxu0 %v37743_v0 }
 0x2ff   :  { %34277 = vmatpush3.xpose.msra.mxu0 %v37755_v14  ;;  %34278 = vmatprep.mubr.msk.f32.mxu0 %vm37404_vm2, %v37403_v24 }
 0x300   :  { %34281 = vmatprep.subr.mxu0 %v37403_v24 }
 0x302   :  { %34139 = vmatmul.mubr.f32.vlgmr.msra.gmra.mrb[8].mxu1 %v37726_v20  ;;  %v4177_v20 = vsub.f32 %v4097_v16, %v37814_v23  ;;  %v3711_v16 = vand.u32 4294901760, %v3641_v9 }
 0x303   :  { %34142 = vmatpush3.xpose.msra.mxu1 %v37774_v41  ;;  %34143 = vmatprep.mubr.msk.f32.mxu1 %vm37404_vm2, %v37403_v24 }
 0x304   :  { %34146 = vmatprep.subr.mxu1 %v37403_v24  ;;  %v4178_v13 = vand.u32 4294901760, %v4177_v20 }
 0x306   :  { %34279 = vmatmul.mubr.f32.vlgmr.msra.gmra.mrb[8].mxu0 %v3259_v33  ;;  %34144 = vmatmul.mubr.f32.vlgmr.msra.gmra.mrb[10].mxu1 %v1403_v11  ;;  %v4179_v45 = vsub.f32 %v4177_v20, %v4178_v13  ;;  %v1867_v33 = vand.u32 4294901760, %v1866_v43  ;;  %v3643_v11 = vsel %vm875_vm3, %v37791_v60, 0 }
 0x307   :  { %34282 = vmatpush3.xpose.msra.mxu0 %v3270_v27  ;;  %34147 = vmatpush3.xpose.msra.mxu1 %v1414_v17  ;;  %v3646_v17 = vand.u32 4294901760, %v3643_v11 }
 0x308   :  { %34148 = vmatprep.mubr.msk.f32.mxu1 %vm37404_vm2, %v37403_v24  ;;  %34151 = vmatprep.subr.mxu1 %v37403_v24  ;;  %v4180_v49 = vand.u32 4294901760, %v4179_v45 }
 0x309   :  { %34283 = vmatprep.mubr.msk.f32.mxu0 %vm37404_vm2, %v37403_v24  ;;  %34286 = vmatprep.subr.mxu0 %v37403_v24 }
 0x30e   :  { %34284 = vmatmul.mubr.f32.vlgmr.msra.gmra.mrb[8].mxu0 %v37738_v42  ;;  %34149 = vmatmul.mubr.f32.vlgmr.msra.gmra.mrb[10].mxu1 %v37772_v40 }
 0x30f   :  { %34287 = vmatpush3.xpose.msra.mxu0 %v37755_v14  ;;  %34152 = vmatpush3.xpose.msra.mxu1 %v37784_v57  ;;  %v2240_v14 = vand.u32 4294901760, %v2237_v55 }
 0x310   :  { %34153 = vmatprep.mubr.msk.f32.mxu1 %vm37404_vm2, %v37403_v24  ;;  %34156 = vmatprep.subr.mxu1 %v37403_v24 }
 0x311   :  { %34288 = vmatprep.mubr.msk.f32.mxu0 %vm37404_vm2, %v37403_v24  ;;  %34321 = vmatprep.subr.mxu0 %v37403_v24  ;;  %v2317_v19 = vsub.f32 %v2237_v55, %v2240_v14 }
 0x313   :  { %v2318_v27 = vand.u32 4294901760, %v2317_v19 }
 0x315   :  { %v2319_v32 = vsub.f32 %v2317_v19, %v2318_v27 }
 0x316   :  { %34289 = vmatmul.mubr.f32.vlgmr.msra.gmra.mrb[8].mxu0 %v37738_v42  ;;  %34154 = vmatmul.mubr.f32.vlgmr.msra.gmra.mrb[10].mxu1 %v37781_v56  ;;  %v1855_v42 = vsub.f32 %v1853_v28, %v1854_v53 }
 0x317   :  { %34322 = vmatpush3.xpose.msra.mxu0 %v37814_v23  ;;  %34157 = vmatpush3.xpose.msra.mxu1 %v37774_v41  ;;  %v2320_v35 = vand.u32 4294901760, %v2319_v32 }
 0x318   :  { %34323 = vmatprep.mubr.msk.f32.mxu0 %vm37404_vm2, %v37403_v24  ;;  %34326 = vmatprep.subr.mxu0 %v37403_v24  ;;  %v1856_v0 = vand.u32 4294901760, %v1855_v42 }
 0x319   :  { %34158 = vmatprep.mubr.msk.f32.mxu1 %vm37404_vm2, %v37403_v24  ;;  %34161 = vmatprep.subr.mxu1 %v37403_v24 }
 0x31a   :  { %34324 = vmatmul.mubr.f32.vlgmr.msra.gmra.mrb[10].mxu0 %v4169_v46 }
 0x31b   :  { %34327 = vmatpush3.xpose.msra.mxu0 %v4180_v49  ;;  %34328 = vmatprep.mubr.msk.f32.mxu0 %vm37404_vm2, %v37403_v24 }
 0x31c   :  { %34331 = vmatprep.subr.mxu0 %v37403_v24 }
 0x31e   :  { %34159 = vmatmul.mubr.f32.vlgmr.msra.gmra.mrb[10].mxu1 %v1401_v62 }
 0x31f   :  { %34162 = vmatpush3.xpose.msra.mxu1 %v1412_v63  ;;  %34163 = vmatprep.mubr.msk.f32.mxu1 %vm37404_vm2, %v37403_v24 }
 0x320   :  { %34166 = vmatprep.subr.mxu1 %v37403_v24 }
 0x322   :  { %34329 = vmatmul.mubr.f32.vlgmr.msra.gmra.mrb[10].mxu0 %v37810_v12 }
 0x323   :  { %34332 = vmatpush3.xpose.msra.mxu0 %v4177_v20  ;;  %34333 = vmatprep.mubr.msk.f32.mxu0 %vm37404_vm2, %v37403_v24 }
 0x324   :  { %34336 = vmatprep.subr.mxu0 %v37403_v24 }
 0x326   :  { %34164 = vmatmul.mubr.f32.vlgmr.msra.gmra.mrb[10].mxu1 %v37772_v40 }
 0x327   :  { %34167 = vmatpush3.xpose.msra.mxu1 %v37774_v41  ;;  %34168 = vmatprep.mubr.msk.f32.mxu1 %vm37404_vm2, %v37403_v24  ;;  %v2735_v41 = vsel %vm875_vm3, %v37747_v3, 0 }
 0x328   :  { %34171 = vmatprep.subr.mxu1 %v37403_v24  ;;  %v2738_v57 = vand.u32 4294901760, %v2735_v41 }
 0x32a   :  { %34334 = vmatmul.mubr.f32.vlgmr.msra.gmra.mrb[10].mxu0 %v4166_v25  ;;  %v2815_v63 = vsub.f32 %v2735_v41, %v2738_v57 }
 0x32b   :  { %34337 = vmatpush3.xpose.msra.mxu0 %v37814_v23  ;;  %34338 = vmatprep.mubr.msk.f32.mxu0 %vm37404_vm2, %v37403_v24 }
 0x32c   :  { %34341 = vmatprep.subr.mxu0 %v37403_v24  ;;  %v2816_v3 = vand.u32 4294901760, %v2815_v63 }
 0x32e   :  { %34169 = vmatmul.mubr.f32.vlgmr.msra.gmra.mrb[10].mxu1 %v37772_v40  ;;  %v2733_v40 = vsel %vm875_vm3, %v37730_v52, 0  ;;  %v2817_v5 = vsub.f32 %v2815_v63, %v2816_v3 }
 0x32f   :  { %34172 = vmatpush3.xpose.msra.mxu1 %v1787_v39  ;;  %34173 = vmatprep.mubr.msk.f32.mxu1 %vm37404_vm2, %v37403_v24  ;;  %v2803_v56 = vand.u32 4294901760, %v2733_v40 }
 0x330   :  { %34176 = vmatprep.subr.mxu1 %v37403_v24  ;;  %v2818_v8 = vand.u32 4294901760, %v2817_v5 }
 0x331   :  { %v2804_v62 = vsub.f32 %v2733_v40, %v2803_v56 }
 0x332   :  { %34339 = vmatmul.mubr.f32.vlgmr.msra.gmra.mrb[10].mxu0 %v4167_v44  ;;  %34174 = vmatmul.mubr.f32.vlgmr.msra.gmra.mrb[12].mxu1 %v1856_v0 }
 0x333   :  { %34342 = vmatpush3.xpose.msra.mxu0 %v4178_v13  ;;  %34177 = vmatpush3.xpose.msra.mxu1 %v1867_v33  ;;  %v2805_v52 = vand.u32 4294901760, %v2804_v62 }
 0x334   :  { %34178 = vmatprep.mubr.msk.f32.mxu1 %vm37404_vm2, %v37403_v24  ;;  %34181 = vmatprep.subr.mxu1 %v37403_v24 }
 0x335   :  { %34343 = vmatprep.mubr.msk.f32.mxu0 %vm37404_vm2, %v37403_v24  ;;  %34346 = vmatprep.subr.mxu0 %v37403_v24  ;;  %v2806_v1 = vsub.f32 %v2804_v62, %v2805_v52 }
 0x337   :  { %v2807_v7 = vand.u32 4294901760, %v2806_v1 }
 0x33a   :  { %34344 = vmatmul.mubr.f32.vlgmr.msra.gmra.mrb[10].mxu0 %v37810_v12  ;;  %34179 = vmatmul.mubr.f32.vlgmr.msra.gmra.mrb[12].mxu1 %v37852_v38 }
 0x33b   :  { %34347 = vmatpush3.xpose.msra.mxu0 %v37814_v23  ;;  %34182 = vmatpush3.xpose.msra.mxu1 %v1864_v31  ;;  %v3723_v23 = vsub.f32 %v3643_v11, %v3646_v17 }
 0x33c   :  { %34183 = vmatprep.mubr.msk.f32.mxu1 %vm37404_vm2, %v37403_v24  ;;  %34186 = vmatprep.subr.mxu1 %v37403_v24 }
 0x33d   :  { %34348 = vmatprep.mubr.msk.f32.mxu0 %vm37404_vm2, %v37403_v24  ;;  %34356 = vmatprep.subr.mxu0 %v37403_v24  ;;  %v3724_v60 = vand.u32 4294901760, %v3723_v23 }
 0x33f   :  { %v3725_v20 = vsub.f32 %v3723_v23, %v3724_v60 }
 0x341   :  { %v3726_v13 = vand.u32 4294901760, %v3725_v20 }
 0x342   :  { %34349 = vmatmul.mubr.f32.vlgmr.msra.gmra.mrb[10].mxu0 %v37810_v12  ;;  %34184 = vmatmul.mubr.f32.vlgmr.msra.gmra.mrb[12].mxu1 %v1853_v28  ;;  %v3712_v12 = vsub.f32 %v3641_v9, %v3711_v16 }
 0x343   :  { %34358 = vmatprep.mubr.msk.f32.mxu0 %vm37404_vm2, %v37403_v24  ;;  %34187 = vmatpush3.xpose.msra.mxu1 %v1787_v39 }
 0x344   :  { %34188 = vmatprep.mubr.msk.f32.mxu1 %vm37404_vm2, %v37403_v24  ;;  %34191 = vmatprep.subr.mxu1 %v37403_v24  ;;  %v3713_v58 = vand.u32 4294901760, %v3712_v12 }
 0x346   :  { %v3714_v25 = vsub.f32 %v3712_v12, %v3713_v58 }
 0x348   :  { %v3715_v44 = vand.u32 4294901760, %v3714_v25 }
 0x34a   :  { %34189 = vmatmul.mubr.f32.vlgmr.msra.gmra.mrb[12].mxu1 %v1854_v53 }
 0x34b   :  { %34192 = vmatpush3.xpose.msra.mxu1 %v1865_v37  ;;  %34193 = vmatprep.mubr.msk.f32.mxu1 %vm37404_vm2, %v37403_v24 }
 0x34c   :  { %34196 = vmatprep.subr.mxu1 %v37403_v24 }
 0x352   :  { %34194 = vmatmul.mubr.f32.vlgmr.msra.gmra.mrb[12].mxu1 %v37852_v38 }
 0x353   :  { %34197 = vmatpush3.xpose.msra.mxu1 %v1787_v39  ;;  %34198 = vmatprep.mubr.msk.f32.mxu1 %vm37404_vm2, %v37403_v24 }
 0x354   :  { %34201 = vmatprep.subr.mxu1 %v37403_v24 }
 0x35a   :  { %34199 = vmatmul.mubr.f32.vlgmr.msra.gmra.mrb[12].mxu1 %v37852_v38 }
 0x35b   :  { %34202 = vmatpush3.xpose.msra.mxu1 %v2240_v14  ;;  %34203 = vmatprep.mubr.msk.f32.mxu1 %vm37404_vm2, %v37403_v24 }
 0x35c   :  { %34206 = vmatprep.subr.mxu1 %v37403_v24 }
 0x35e   :  { %34204 = vmatmul.mubr.f32.vlgmr.msra.gmra.mrb[14].mxu1 %v2309_v34 }
 0x35f   :  { %34207 = vmatpush3.xpose.msra.mxu1 %v2320_v35  ;;  %34208 = vmatprep.mubr.msk.f32.mxu1 %vm37404_vm2, %v37403_v24 }
 0x360   :  { %34211 = vmatprep.subr.mxu1 %v37403_v24 }
 0x366   :  { %34209 = vmatmul.mubr.f32.vlgmr.msra.gmra.mrb[14].mxu1 %v2305_v4 }
 0x367   :  { %34212 = vmatpush3.xpose.msra.mxu1 %v2317_v19  ;;  %34213 = vmatprep.mubr.msk.f32.mxu1 %vm37404_vm2, %v37403_v24 }
 0x368   :  { %34216 = vmatprep.subr.mxu1 %v37403_v24 }
 0x36e   :  { %34214 = vmatmul.mubr.f32.vlgmr.msra.gmra.mrb[14].mxu1 %v2306_v18 }
 0x36f   :  { %34217 = vmatpush3.xpose.msra.mxu1 %v2240_v14  ;;  %34218 = vmatprep.mubr.msk.f32.mxu1 %vm37404_vm2, %v37403_v24 }
 0x370   :  { %34221 = vmatprep.subr.mxu1 %v37403_v24 }
 0x376   :  { %34219 = vmatmul.mubr.f32.vlgmr.msra.gmra.mrb[14].mxu1 %v2307_v47 }
 0x377   :  { %34222 = vmatpush3.xpose.msra.mxu1 %v2318_v27  ;;  %34223 = vmatprep.mubr.msk.f32.mxu1 %vm37404_vm2, %v37403_v24 }
 0x378   :  { %34226 = vmatprep.subr.mxu1 %v37403_v24 }
 0x37e   :  { %34224 = vmatmul.mubr.f32.vlgmr.msra.gmra.mrb[14].mxu1 %v2305_v4 }
 0x37f   :  { %34227 = vmatpush3.xpose.msra.mxu1 %v2240_v14  ;;  %34228 = vmatprep.mubr.msk.f32.mxu1 %vm37404_vm2, %v37403_v24 }
 0x380   :  { %34231 = vmatprep.subr.mxu1 %v37403_v24 }
 0x386   :  { %34229 = vmatmul.mubr.f32.vlgmr.msra.gmra.mrb[14].mxu1 %v2305_v4 }
 0x387   :  { %34232 = vmatpush3.xpose.msra.mxu1 %v2738_v57  ;;  %34233 = vmatprep.mubr.msk.f32.mxu1 %vm37404_vm2, %v37403_v24 }
 0x388   :  { %34236 = vmatprep.subr.mxu1 %v37403_v24 }
 0x38a   :  { %34234 = vmatmul.mubr.f32.vlgmr.msra.gmra.mrb[16].mxu1 %v2807_v7 }
 0x38b   :  { %34237 = vmatpush3.xpose.msra.mxu1 %v2818_v8  ;;  %34238 = vmatprep.mubr.msk.f32.mxu1 %vm37404_vm2, %v37403_v24 }
 0x38c   :  { %34241 = vmatprep.subr.mxu1 %v37403_v24 }
 0x392   :  { %34239 = vmatmul.mubr.f32.vlgmr.msra.gmra.mrb[16].mxu1 %v2803_v56 }
 0x393   :  { %34242 = vmatpush3.xpose.msra.mxu1 %v2815_v63  ;;  %34243 = vmatprep.mubr.msk.f32.mxu1 %vm37404_vm2, %v37403_v24 }
 0x394   :  { %34246 = vmatprep.subr.mxu1 %v37403_v24 }
 0x39a   :  { %34244 = vmatmul.mubr.f32.vlgmr.msra.gmra.mrb[16].mxu1 %v2804_v62 }
 0x39b   :  { %34247 = vmatpush3.xpose.msra.mxu1 %v2738_v57  ;;  %34248 = vmatprep.mubr.msk.f32.mxu1 %vm37404_vm2, %v37403_v24 }
 0x39c   :  { %34251 = vmatprep.subr.mxu1 %v37403_v24 }
 0x3a2   :  { %34249 = vmatmul.mubr.f32.vlgmr.msra.gmra.mrb[16].mxu1 %v2805_v52 }
 0x3a3   :  { %34252 = vmatpush3.xpose.msra.mxu1 %v2816_v3  ;;  %34253 = vmatprep.mubr.msk.f32.mxu1 %vm37404_vm2, %v37403_v24 }
 0x3a4   :  { %34256 = vmatprep.subr.mxu1 %v37403_v24 }
 0x3aa   :  { %34254 = vmatmul.mubr.f32.vlgmr.msra.gmra.mrb[16].mxu1 %v2803_v56 }
 0x3ab   :  { %34257 = vmatpush3.xpose.msra.mxu1 %v2738_v57  ;;  %34258 = vmatprep.mubr.msk.f32.mxu1 %vm37404_vm2, %v37403_v24 }
 0x3ac   :  { %34291 = vmatprep.subr.mxu1 %v37403_v24 }
 0x3b2   :  { %34259 = vmatmul.mubr.f32.vlgmr.msra.gmra.mrb[16].mxu1 %v2803_v56 }
 0x3b3   :  { %34292 = vmatpush3.xpose.msra.mxu1 %v3646_v17  ;;  %34293 = vmatprep.mubr.msk.f32.mxu1 %vm37404_vm2, %v37403_v24 }
 0x3b4   :  { %34296 = vmatprep.subr.mxu1 %v37403_v24 }
 0x3b6   :  { %34294 = vmatmul.mubr.f32.vlgmr.msra.gmra.mrb[18].mxu1 %v3715_v44 }
 0x3b7   :  { %34297 = vmatpush3.xpose.msra.mxu1 %v3726_v13  ;;  %34298 = vmatprep.mubr.msk.f32.mxu1 %vm37404_vm2, %v37403_v24 }
 0x3b8   :  { %34301 = vmatprep.subr.mxu1 %v37403_v24 }
 0x3be   :  { %34299 = vmatmul.mubr.f32.vlgmr.msra.gmra.mrb[18].mxu1 %v3711_v16 }
 0x3bf   :  { %34302 = vmatpush3.xpose.msra.mxu1 %v3723_v23  ;;  %34303 = vmatprep.mubr.msk.f32.mxu1 %vm37404_vm2, %v37403_v24 }
 0x3c0   :  { %34306 = vmatprep.subr.mxu1 %v37403_v24 }
 0x3c6   :  { %34304 = vmatmul.mubr.f32.vlgmr.msra.gmra.mrb[18].mxu1 %v3712_v12 }
 0x3c7   :  { %34307 = vmatpush3.xpose.msra.mxu1 %v3646_v17  ;;  %34308 = vmatprep.mubr.msk.f32.mxu1 %vm37404_vm2, %v37403_v24 }
 0x3c8   :  { %34311 = vmatprep.subr.mxu1 %v37403_v24 }
 0x3ce   :  { %34309 = vmatmul.mubr.f32.vlgmr.msra.gmra.mrb[18].mxu1 %v3713_v58 }
 0x3cf   :  { %34312 = vmatpush3.xpose.msra.mxu1 %v3724_v60  ;;  %34313 = vmatprep.mubr.msk.f32.mxu1 %vm37404_vm2, %v37403_v24 }
 0x3d0   :  { %34316 = vmatprep.subr.mxu1 %v37403_v24 }
 0x3d5   :  { %v1322_v21 = vpop.f32.mrb[8].mxu1 }
 0x3d6   :  { %v34140_v45 = vpop.f32.mrb[9].mxu1  ;;  %34314 = vmatmul.mubr.f32.vlgmr.msra.gmra.mrb[18].mxu1 %v3711_v16  ;;  %v36639_v40 = vadd.f32 %v1322_v21, %v37571_v30 }
 0x3d7   :  { %34317 = vmatpush3.xpose.msra.mxu1 %v3646_v17  ;;  %34318 = vmatprep.mubr.msk.f32.mxu1 %vm37404_vm2, %v37403_v24 }
 0x3d8   :  { %34351 = vmatprep.subr.mxu1 %v37403_v24  ;;  %v2685_v57 = vsel %vm875_vm3, %v36639_v40, -inf }
 0x3de   :  { %34319 = vmatmul.mubr.f32.vlgmr.msra.gmra.mrb[18].mxu1 %v3711_v16 }
 0x3df   :  { %34353 = vmatprep.mubr.msk.f32.mxu1 %vm37404_vm2, %v37403_v24 }
 0x3e9   :  { %v3633_v46 = vpop.f32.mrb[8].mxu0 }
 0x3ea   :  { %v36644_v49 = vadd.f32 %v3633_v46, %v37571_v30  ;;  %v34290_v50 = vpop.f32.mrb[9].mxu0 }
 0x3ec   :  { %v4548_v51 = vsel %vm875_vm3, %v36644_v49, -inf }
 0x3ed   :  { %4549 = vmax.xlane.f32.xlu1 %v4548_v51 }
 0x401   :  { %v1775_v38 = vpop.f32.mrb[10].mxu1 }
 0x402   :  { %v37972_v39 = vadd.f32 %v1775_v38, %v37571_v30  ;;  %v34170_v28 = vpop.f32.mrb[11].mxu1 }
 0x404   :  { %v2688_v31 = vsel %vm875_vm3, %v37972_v39, -inf }
 0x405   :  { %2689 = vmax.xlane.f32.xlu1 %v2688_v31 }
 0x415   :  { %v4541_v53 = vpop.f32.mrb[10].mxu0 }
 0x416   :  { %v34350_v37 = vpop.f32.mrb[11].mxu0  ;;  %v36646_v32 = vadd.f32 %v4541_v53, %v37571_v30 }
 0x418   :  { %v4554_v41 = vsel %vm875_vm3, %v36646_v32, -inf }
 0x42d   :  { %v2228_v42 = vpop.f32.mrb[12].mxu1 }
 0x42e   :  { %v34200_v43 = vpop.f32.mrb[13].mxu1  ;;  %v37991_v56 = vadd.f32 %v2228_v42, %v37571_v30 }
 0x430   :  { %v2691_v62 = vsel %vm875_vm3, %v37991_v56, -inf }
 0x459   :  { %v2681_v0 = vpop.f32.mrb[14].mxu1 }
 0x45a   :  { %v37977_v33 = vadd.f32 %v2681_v0, %v37571_v30  ;;  %v34230_v54 = vpop.f32.mrb[15].mxu1 }
 0x45c   :  { %v2694_v55 = vsel %vm875_vm3, %v37977_v33, -inf }
 0x45d   :  { %2695 = vmax.xlane.f32.xlu1 %v2694_v55 }
 0x47a   :  { %v4550_v4 = vpop.xlane.xlu1 %4549 }
 0x47b   :  { %v4558_v14 = vsub.f32 %v36644_v49, %v4550_v4 }
 0x47d   :  { %v4563_v18 = vmul.f32 1.442695, %v4558_v14 }
 0x47f   :  { %37168 = vpow2.f32 %v4563_v18 }
 0x485   :  { %v3179_v19 = vpop.f32.mrb[16].mxu1 }
 0x486   :  { %v36643_v47 = vadd.f32 %v3179_v19, %v37571_v30  ;;  %v34260_v27 = vpop.f32.mrb[17].mxu1 }
 0x488   :  { %v4545_v34 = vsel %vm875_vm3, %v36643_v47, -inf }
 0x489   :  { %v37982_v29 = vpop.eup %37168  ;;  %4546 = vmax.xlane.f32.xlu0 %v4545_v34 }
 0x48a   :  { %v4572_v35 = vsel %vm875_vm3, %v37982_v29, 0.0 }
 0x48b   :  { %4573 = vadd.xlane.f32.xlu1 %v4572_v35 }
 0x48d   :  { %4555 = vmax.xlane.f32.xlu0 %v4554_v41 }
 0x491   :  { %2686 = vmax.xlane.f32.xlu0 %v2685_v57 }
 0x492   :  { %v2690_v5 = vpop.xlane.xlu1 %2689 }
 0x493   :  { %v2698_v18 = vsub.f32 %v37972_v39, %v2690_v5 }
 0x495   :  { %2692 = vmax.xlane.f32.xlu0 %v2691_v62  ;;  %v2703_v19 = vmul.f32 1.442695, %v2698_v18 }
 0x49c   :  { %4589 = vrot.lane.b32.xlu1 %v37688_v59, %s37402_s12 }
 0x4b1   :  { %v4087_v63 = vpop.f32.mrb[18].mxu1 }
 0x4b2   :  { %v36645_v52 = vadd.f32 %v4087_v63, %v37571_v30  ;;  %v34320_v3 = vpop.f32.mrb[19].mxu1 }
 0x4b4   :  { %v4551_v1 = vsel %vm875_vm3, %v36645_v52, -inf }
 0x4b5   :  { %4552 = vmax.xlane.f32.xlu0 %v4551_v1 }
 0x4ea   :  { %v2696_v7 = vpop.xlane.xlu1 %2695 }
 0x4eb   :  { %v2700_v31 = vsub.f32 %v37977_v33, %v2696_v7 }
 0x4ed   :  { %v2707_v42 = vmul.f32 1.442695, %v2700_v31 }
 0x516   :  { %v4547_v8 = vpop.xlane.xlu0 %4546 }
 0x517   :  { %v4557_v38 = vsub.f32 %v36643_v47, %v4547_v8 }
 0x518   :  { %v38000_v9 = vpop.xlane.xlu1 %4573 }
 0x519   :  { %v4561_v53 = vmul.f32 1.442695, %v4557_v38 }
 0x51a   :  { %v4556_v11 = vpop.xlane.xlu0 %4555 }
 0x51b   :  { %v4560_v16 = vsub.f32 %v36646_v32, %v4556_v11 }
 0x51c   :  { %v4590_v17 = vpop.permute.xlu1 %4589 }
 0x51d   :  { %v38002_v12 = vand.u32 4294901760, %v4590_v17  ;;  %v4567_v23 = vmul.f32 1.442695, %v4560_v16 }
 0x51e   :  { %v2687_v60 = vpop.xlane.xlu0 %2686 }
 0x51f   :  { %v38005_v58 = vsub.f32 %v4590_v17, %v38002_v12  ;;  %34352 = vmatpush3.msra.mxu1 %v38002_v12  ;;  %37170 = vpow2.f32 %v4567_v23  ;;  %v2697_v25 = vsub.f32 %v36639_v40, %v2687_v60 }
 0x520   :  { %34361 = vmatprep.subr.mxu1 %v37403_v24 }
 0x521   :  { %v4674_v20 = vand.u32 4294901760, %v38005_v58  ;;  %v2701_v44 = vmul.f32 1.442695, %v2697_v25 }
 0x522   :  { %v2693_v51 = vpop.xlane.xlu0 %2692 }
 0x523   :  { %v4675_v13 = vsub.f32 %v38005_v58, %v4674_v20  ;;  %37172 = vpow2.f32 %v2701_v44  ;;  %v2699_v47 = vsub.f32 %v37991_v56, %v2693_v51 }
 0x524   :  { %37174 = vpow2.f32 %v4561_v53 }
 0x525   :  { %v4676_v21 = vand.u32 4294901760, %v4675_v13  ;;  %37176 = vpow2.f32 %v2707_v42  ;;  %v2705_v27 = vmul.f32 1.442695, %v2699_v47 }
 0x527   :  { %34357 = vmatpush3.msra.mxu0 %v4676_v21 }
 0x528   :  { %34366 = vmatprep.subr.mxu0 %v37403_v24 }
 0x529   :  { %v38014_v45 = vpop.eup %37170 }
 0x52a   :  { %v4578_v46 = vsel %vm875_vm3, %v38014_v45, 0.0 }
 0x52b   :  { %4579 = vadd.xlane.f32.xlu0 %v4578_v46 }
 0x52d   :  { %v38018_v49 = vpop.eup %37172 }
 0x52e   :  { %v2709_v50 = vsel %vm875_vm3, %v38018_v49, 0.0  ;;  %v37175_v0 = vpop.eup %37174 }
 0x52f   :  { %2710 = vadd.xlane.f32.xlu1 %v2709_v50  ;;  %v38027_v54 = vpop.eup %37176  ;;  %v4569_v55 = vsel %vm875_vm3, %v37175_v0, 0.0 }
 0x530   :  { %v2718_v14 = vsel %vm875_vm3, %v38027_v54, 0.0 }
 0x540   :  { %5945 = vrot.lane.b32.xlu1 %v37710_v22, %s37402_s12 }
 0x541   :  { %5041 = vrot.lane.b32.xlu0 %v37694_v2, %s37402_s12 }
 0x542   :  { %v4553_v28 = vpop.xlane.xlu0 %4552 }
 0x543   :  { %v4559_v37 = vsub.f32 %v36645_v52, %v4553_v28 }
 0x545   :  { %v4565_v43 = vmul.f32 1.442695, %v4559_v37 }
 0x547   :  { %37178 = vpow2.f32 %v4565_v43 }
 0x548   :  { %37180 = vpow2.f32 %v2703_v19 }
 0x549   :  { %37182 = vpow2.f32 %v2705_v27 }
 0x54a   :  { %37184 = vrcp.f32 %v38000_v9 }
 0x551   :  { %v38030_v4 = vpop.eup %37178 }
 0x552   :  { %v4575_v33 = vsel %vm875_vm3, %v38030_v4, 0.0  ;;  %v38042_v32 = vpop.eup %37180 }
 0x553   :  { %v2712_v34 = vsel %vm875_vm3, %v38042_v32, 0.0  ;;  %v38046_v35 = vpop.eup %37182 }
 0x554   :  { %v2715_v40 = vsel %vm875_vm3, %v38046_v35, 0.0  ;;  %v37185_v63 = vpop.eup %37184 }
 0x555   :  { %v4584_v5 = vmul.f32 %v37185_v63, %v37982_v29 }
 0x557   :  { %v5045_v16 = vsel %vm875_vm3, %v4584_v5, 0 }
 0x558   :  { %v38079_v60 = vand.u32 4294901760, %v5045_v16 }
 0x55a   :  { %v5114_v50 = vsub.f32 %v5045_v16, %v38079_v60 }
 0x560   :  { %4570 = vadd.xlane.f32.xlu0 %v4569_v55 }
 0x564   :  { %2719 = vadd.xlane.f32.xlu1 %v2718_v14  ;;  %4576 = vadd.xlane.f32.xlu0 %v4575_v33 }
 0x575   :  { %8207 = vrot.lane.b32.xlu1 %v37688_v59, %s37408_s10 }
 0x579   :  { %9569 = vrot.lane.b32.xlu1 %v37710_v22, %s37408_s10 }
 0x57a   :  { %5493 = vrot.lane.b32.xlu0 %v37702_v10, %s37402_s12 }
 0x599   :  { %2713 = vadd.xlane.f32.xlu0 %v2712_v34 }
 0x59d   :  { %2716 = vadd.xlane.f32.xlu0 %v2715_v40 }
 0x5b3   :  { %6397 = vrot.lane.b32.xlu0 %v37688_v59, %s37409_s11 }
 0x5b7   :  { %6849 = vrot.lane.b32.xlu0 %v37694_v2, %s37409_s11 }
 0x5b8   :  { %v4580_v39 = vpop.xlane.xlu0 %4579 }
 0x5bb   :  { %7301 = vrot.lane.b32.xlu0 %v37702_v10, %s37409_s11 }
 0x5bc   :  { %v5042_v41 = vpop.permute.xlu0 %5041  ;;  %v2711_v21 = vpop.xlane.xlu1 %2710 }
 0x5bd   :  { %v5048_v57 = vand.u32 4294901760, %v5042_v41 }
 0x5bf   :  { %7753 = vrot.lane.b32.xlu0 %v37710_v22, %s37409_s11  ;;  %v38069_v3 = vsub.f32 %v5042_v41, %v5048_v57 }
 0x5c0   :  { %v5946_v37 = vpop.permute.xlu1 %5945 }
 0x5c1   :  { %v5126_v11 = vand.u32 4294901760, %v38069_v3 }
 0x5c3   :  { %8205 = vrot.lane.b32.xlu0 %v37688_v59, %s37410_s13  ;;  %v5127_v25 = vsub.f32 %v38069_v3, %v5126_v11 }
 0x5c5   :  { %v5128_v38 = vand.u32 4294901760, %v5127_v25 }
 0x5c7   :  { %8659 = vrot.lane.b32.xlu0 %v37694_v2, %s37410_s13 }
 0x5cb   :  { %8661 = vrot.lane.b32.xlu0 %v37694_v2, %s37408_s10 }
 0x5cf   :  { %9113 = vrot.lane.b32.xlu0 %v37702_v10, %s37410_s13 }
 0x5d3   :  { %9115 = vrot.lane.b32.xlu0 %v37702_v10, %s37408_s10 }
 0x5d7   :  { %9567 = vrot.lane.b32.xlu0 %v37710_v22, %s37410_s13 }
 0x5ed   :  { %v4571_v56 = vpop.xlane.xlu0 %4570 }
 0x5ee   :  { %37186 = vrcp.f32 %v4571_v56 }
 0x5f1   :  { %v4577_v62 = vpop.xlane.xlu0 %4576 }
 0x5f2   :  { %37188 = vrcp.f32 %v4577_v62 }
 0x5f3   :  { %37190 = vrcp.f32 %v4580_v39 }
 0x5f4   :  { %37192 = vrcp.f32 %v2711_v21 }
 0x5f5   :  { %v5494_v9 = vpop.permute.xlu0 %5493 }
 0x5f6   :  { %v38081_v29 = vand.u32 4294901760, %v5494_v9 }
 0x5f8   :  { %v37187_v52 = vpop.eup %37186  ;;  %v38092_v51 = vsub.f32 %v5494_v9, %v38081_v29 }
 0x5f9   :  { %v4582_v1 = vmul.f32 %v37187_v52, %v37175_v0  ;;  %v38112_v0 = vand.u32 4294901760, %v5946_v37 }
 0x5fa   :  { %v5578_v31 = vand.u32 4294901760, %v38092_v51 }
 0x5fb   :  { %v4593_v7 = vsel %vm875_vm3, %v4582_v1, 0  ;;  %v38125_v14 = vsub.f32 %v5946_v37, %v38112_v0 }
 0x5fc   :  { %v4661_v8 = vand.u32 4294901760, %v4593_v7  ;;  %v37189_v44 = vpop.eup %37188 }
 0x5fd   :  { %v4586_v28 = vmul.f32 %v37189_v44, %v38030_v4  ;;  %v6030_v47 = vand.u32 4294901760, %v38125_v14 }
 0x5fe   :  { %v4662_v17 = vsub.f32 %v4593_v7, %v4661_v8  ;;  %34359 = vmatmul.mubr.f32.vlgmr.msra.gmra.mrb[12].mxu0 %v4661_v8 }
 0x5ff   :  { %34367 = vmatpush3.msra.mxu0 %v38002_v12  ;;  %34368 = vmatprep.mubr.msk.f32.mxu0 %vm37404_vm2, %v37403_v24  ;;  %v5497_v53 = vsel %vm875_vm3, %v4586_v28, 0  ;;  %v6031_v40 = vsub.f32 %v38125_v14, %v6030_v47 }
 0x600   :  { %34376 = vmatprep.subr.mxu0 %v37403_v24  ;;  %v4663_v23 = vand.u32 4294901760, %v4662_v17  ;;  %v38110_v43 = vand.u32 4294901760, %v5497_v53 }
 0x601   :  { %v6032_v62 = vand.u32 4294901760, %v6031_v40 }
 0x602   :  { %34369 = vmatmul.mubr.f32.vlgmr.msra.gmra.mrb[14].mxu0 %v4663_v23  ;;  %v4664_v13 = vsub.f32 %v4662_v17, %v4663_v23  ;;  %v5566_v4 = vsub.f32 %v5497_v53, %v38110_v43 }
 0x603   :  { %34377 = vmatpush3.msra.mxu0 %v38002_v12  ;;  %34378 = vmatprep.mubr.msk.f32.mxu0 %vm37404_vm2, %v37403_v24  ;;  %v5115_v12 = vand.u32 4294901760, %v5114_v50 }
 0x604   :  { %34386 = vmatprep.subr.mxu0 %v37403_v24  ;;  %v4665_v46 = vand.u32 4294901760, %v4664_v13  ;;  %v5567_v19 = vand.u32 4294901760, %v5566_v4 }
 0x605   :  { %v5116_v42 = vsub.f32 %v5114_v50, %v5115_v12 }
 0x606   :  { %34354 = vmatmul.mubr.f32.vlgmr.msra.gmra.mrb[20].mxu1 %v4665_v46  ;;  %34379 = vmatmul.mubr.f32.vlgmr.msra.gmra.mrb[16].mxu0 %v4661_v8  ;;  %v5568_v27 = vsub.f32 %v5566_v4, %v5567_v19 }
 0x607   :  { %34362 = vmatpush3.msra.mxu1 %v38005_v58  ;;  %34387 = vmatpush3.msra.mxu0 %v5128_v38  ;;  %v5579_v58 = vsub.f32 %v38092_v51, %v5578_v31  ;;  %v5117_v55 = vand.u32 4294901760, %v5116_v42 }
 0x608   :  { %34363 = vmatprep.mubr.msk.f32.mxu1 %vm37404_vm2, %v37403_v24  ;;  %34371 = vmatprep.subr.mxu1 %v37403_v24  ;;  %v5569_v41 = vand.u32 4294901760, %v5568_v27 }
 0x609   :  { %34388 = vmatprep.mubr.msk.f32.mxu0 %vm37404_vm2, %v37403_v24  ;;  %34396 = vmatprep.subr.mxu0 %v37403_v24  ;;  %v5580_v33 = vand.u32 4294901760, %v5579_v58 }
 0x60a   :  { %34364 = vmatmul.mubr.f32.vlgmr.msra.gmra.mrb[22].mxu1 %v4662_v17  ;;  %34389 = vmatmul.mubr.f32.vlgmr.msra.gmra.mrb[18].mxu0 %v38079_v60 }
 0x60b   :  { %34372 = vmatpush3.msra.mxu1 %v4674_v20  ;;  %34397 = vmatpush3.msra.mxu0 %v5048_v57  ;;  %v37191_v20 = vpop.eup %37190 }
 0x60c   :  { %34373 = vmatprep.mubr.msk.f32.mxu1 %vm37404_vm2, %v37403_v24  ;;  %34381 = vmatprep.subr.mxu1 %v37403_v24  ;;  %v4588_v18 = vmul.f32 %v37191_v20, %v38014_v45  ;;  %v37193_v39 = vpop.eup %37192 }
 0x60d   :  { %34398 = vmatprep.mubr.msk.f32.mxu0 %vm37404_vm2, %v37403_v24  ;;  %34406 = vmatprep.subr.mxu0 %v37403_v24 }
 0x60e   :  { %34374 = vmatmul.mubr.f32.vlgmr.msra.gmra.mrb[24].mxu1 %v4661_v8  ;;  %34399 = vmatmul.mubr.f32.vlgmr.msra.gmra.mrb[20].mxu0 %v5115_v12  ;;  %v5949_v45 = vsel %vm875_vm3, %v4588_v18, 0 }
 0x60f   :  { %34382 = vmatpush3.msra.mxu1 %v5048_v57  ;;  %34407 = vmatpush3.msra.mxu0 %v5048_v57  ;;  %v38148_v34 = vand.u32 4294901760, %v5949_v45  ;;  %v2722_v57 = vmul.f32 %v37193_v39, %v38018_v49 }
 0x610   :  { %34383 = vmatprep.mubr.msk.f32.mxu1 %vm37404_vm2, %v37403_v24  ;;  %34391 = vmatprep.subr.mxu1 %v37403_v24 }
 0x611   :  { %34408 = vmatprep.mubr.msk.f32.mxu0 %vm37404_vm2, %v37403_v24  ;;  %34416 = vmatprep.subr.mxu0 %v37403_v24  ;;  %v6018_v56 = vsub.f32 %v5949_v45, %v38148_v34  ;;  %v6401_v49 = vsel %vm875_vm3, %v2722_v57, 0 }
 0x612   :  { %34384 = vmatmul.mubr.f32.vlgmr.msra.gmra.mrb[26].mxu1 %v5117_v55  ;;  %34409 = vmatmul.mubr.f32.vlgmr.msra.gmra.mrb[22].mxu0 %v38079_v60 }
 0x613   :  { %34392 = vmatpush3.msra.mxu1 %v38069_v3  ;;  %34417 = vmatpush3.msra.mxu0 %v5580_v33  ;;  %v6019_v63 = vand.u32 4294901760, %v6018_v56  ;;  %v38183_v3 = vand.u32 4294901760, %v6401_v49 }
 0x614   :  { %34393 = vmatprep.mubr.msk.f32.mxu1 %vm37404_vm2, %v37403_v24  ;;  %34401 = vmatprep.subr.mxu1 %v37403_v24 }
 0x615   :  { %34418 = vmatprep.mubr.msk.f32.mxu0 %vm37404_vm2, %v37403_v24  ;;  %34426 = vmatprep.subr.mxu0 %v37403_v24  ;;  %v6020_v52 = vsub.f32 %v6018_v56, %v6019_v63  ;;  %v6470_v7 = vsub.f32 %v6401_v49, %v38183_v3 }
 0x616   :  { %34394 = vmatmul.mubr.f32.vlgmr.msra.gmra.mrb[28].mxu1 %v5114_v50  ;;  %34419 = vmatmul.mubr.f32.vlgmr.msra.gmra.mrb[24].mxu0 %v38110_v43 }
 0x617   :  { %34402 = vmatpush3.msra.mxu1 %v5126_v11  ;;  %34427 = vmatpush3.msra.mxu0 %v38081_v29  ;;  %v6021_v5 = vand.u32 4294901760, %v6020_v52  ;;  %v6471_v11 = vand.u32 4294901760, %v6470_v7 }
 0x618   :  { %34403 = vmatprep.mubr.msk.f32.mxu1 %vm37404_vm2, %v37403_v24  ;;  %34411 = vmatprep.subr.mxu1 %v37403_v24 }
 0x619   :  { %34428 = vmatprep.mubr.msk.f32.mxu0 %vm37404_vm2, %v37403_v24  ;;  %34436 = vmatprep.subr.mxu0 %v37403_v24  ;;  %v6472_v17 = vsub.f32 %v6470_v7, %v6471_v11 }
 0x61a   :  { %34404 = vmatmul.mubr.f32.vlgmr.msra.gmra.mrb[30].mxu1 %v38079_v60  ;;  %34429 = vmatmul.mubr.f32.vlgmr.msra.gmra.mrb[26].mxu0 %v5567_v19 }
 0x61b   :  { %34412 = vmatpush3.msra.mxu1 %v38081_v29  ;;  %34437 = vmatpush3.msra.mxu0 %v38081_v29  ;;  %v2720_v29 = vpop.xlane.xlu1 %2719  ;;  %v6473_v46 = vand.u32 4294901760, %v6472_v17 }
 0x61c   :  { %34413 = vmatprep.mubr.msk.f32.mxu1 %vm37404_vm2, %v37403_v24  ;;  %34421 = vmatprep.subr.mxu1 %v37403_v24 }
 0x61d   :  { %34438 = vmatprep.mubr.msk.f32.mxu0 %vm37404_vm2, %v37403_v24  ;;  %34446 = vmatprep.subr.mxu0 %v37403_v24 }
 0x61e   :  { %34414 = vmatmul.mubr.f32.vlgmr.msra.gmra.mrb[32].mxu1 %v5569_v41  ;;  %34439 = vmatmul.mubr.f32.vlgmr.msra.gmra.mrb[28].mxu0 %v38110_v43 }
 0x61f   :  { %34422 = vmatpush3.msra.mxu1 %v38092_v51  ;;  %34447 = vmatpush3.msra.mxu0 %v6032_v62 }
 0x620   :  { %34423 = vmatprep.mubr.msk.f32.mxu1 %vm37404_vm2, %v37403_v24  ;;  %34431 = vmatprep.subr.mxu1 %v37403_v24 }
 0x621   :  { %34448 = vmatprep.mubr.msk.f32.mxu0 %vm37404_vm2, %v37403_v24  ;;  %34456 = vmatprep.subr.mxu0 %v37403_v24 }
 0x622   :  { %34424 = vmatmul.mubr.f32.vlgmr.msra.gmra.mrb[34].mxu1 %v5566_v4  ;;  %34449 = vmatmul.mubr.f32.vlgmr.msra.gmra.mrb[30].mxu0 %v38148_v34 }
 0x623   :  { %34432 = vmatpush3.msra.mxu1 %v5578_v31  ;;  %34457 = vmatpush3.msra.mxu0 %v38112_v0 }
 0x624   :  { %34433 = vmatprep.mubr.msk.f32.mxu1 %vm37404_vm2, %v37403_v24  ;;  %34441 = vmatprep.subr.mxu1 %v37403_v24 }
 0x625   :  { %34458 = vmatprep.mubr.msk.f32.mxu0 %vm37404_vm2, %v37403_v24  ;;  %34466 = vmatprep.subr.mxu0 %v37403_v24 }
 0x626   :  { %34434 = vmatmul.mubr.f32.vlgmr.msra.gmra.mrb[36].mxu1 %v38110_v43  ;;  %34459 = vmatmul.mubr.f32.vlgmr.msra.gmra.mrb[32].mxu0 %v6019_v63  ;;  %v2714_v1 = vpop.xlane.xlu0 %2713 }
 0x627   :  { %34442 = vmatpush3.msra.mxu1 %v38112_v0  ;;  %34467 = vmatpush3.msra.mxu0 %v38112_v0  ;;  %37194 = vrcp.f32 %v2714_v1 }
 0x628   :  { %34443 = vmatprep.mubr.msk.f32.mxu1 %vm37404_vm2, %v37403_v24  ;;  %34451 = vmatprep.subr.mxu1 %v37403_v24 }
 0x629   :  { %34468 = vmatprep.mubr.msk.f32.mxu0 %vm37404_vm2, %v37403_v24  ;;  %34476 = vmatprep.subr.mxu0 %v37403_v24 }
 0x62a   :  { %34444 = vmatmul.mubr.f32.vlgmr.msra.gmra.mrb[38].mxu1 %v6021_v5  ;;  %34469 = vmatmul.mubr.f32.vlgmr.msra.gmra.mrb[34].mxu0 %v38148_v34  ;;  %v2717_v8 = vpop.xlane.xlu0 %2716 }
 0x62b   :  { %34452 = vmatpush3.msra.mxu1 %v38125_v14  ;;  %37196 = vrcp.f32 %v2717_v8  ;;  %34453 = vmatprep.mubr.msk.f32.mxu1 %vm37404_vm2, %v37403_v24 }
 0x62c   :  { %34461 = vmatprep.subr.mxu1 %v37403_v24  ;;  %34478 = vmatprep.mubr.msk.f32.mxu0 %vm37404_vm2, %v37403_v24  ;;  %37198 = vrcp.f32 %v2720_v29 }
 0x62e   :  { %34454 = vmatmul.mubr.f32.vlgmr.msra.gmra.mrb[40].mxu1 %v6018_v56  ;;  %v6398_v16 = vpop.permute.xlu0 %6397 }
 0x62f   :  { %34462 = vmatpush3.msra.mxu1 %v6030_v47  ;;  %v6404_v9 = vand.u32 4294901760, %v6398_v16  ;;  %34463 = vmatprep.mubr.msk.f32.mxu1 %vm37404_vm2, %v37403_v24 }
 0x630   :  { %34471 = vmatprep.subr.mxu1 %v37403_v24 }
 0x631   :  { %v37195_v23 = vpop.eup %37194  ;;  %v6481_v60 = vsub.f32 %v6398_v16, %v6404_v9 }
 0x632   :  { %v2724_v25 = vmul.f32 %v37195_v23, %v38042_v32  ;;  %34464 = vmatmul.mubr.f32.vlgmr.msra.gmra.mrb[42].mxu1 %v38148_v34  ;;  %v6850_v44 = vpop.permute.xlu0 %6849 }
 0x633   :  { %v6482_v13 = vand.u32 4294901760, %v6481_v60  ;;  %34472 = vmatpush3.msra.mxu1 %v6404_v9  ;;  %v38212_v21 = vand.u32 4294901760, %v6850_v44  ;;  %34473 = vmatprep.mubr.msk.f32.mxu1 %vm37404_vm2, %v37403_v24 }
 0x634   :  { %34481 = vmatprep.subr.mxu1 %v37403_v24  ;;  %v6853_v50 = vsel %vm875_vm3, %v2724_v25, 0 }
 0x635   :  { %v37197_v51 = vpop.eup %37196  ;;  %v6933_v38 = vsub.f32 %v6850_v44, %v38212_v21  ;;  %v6483_v32 = vsub.f32 %v6481_v60, %v6482_v13  ;;  %v38219_v28 = vand.u32 4294901760, %v6853_v50 }
 0x636   :  { %v2726_v12 = vmul.f32 %v37197_v51, %v38046_v35  ;;  %34474 = vmatmul.mubr.f32.vlgmr.msra.gmra.mrb[44].mxu1 %v6473_v46  ;;  %v7302_v43 = vpop.permute.xlu0 %7301  ;;  %v37199_v4 = vpop.eup %37198 }
 0x637   :  { %34482 = vmatpush3.msra.mxu1 %v6481_v60  ;;  %v6484_v31 = vand.u32 4294901760, %v6483_v32  ;;  %34483 = vmatprep.mubr.msk.f32.mxu1 %vm37404_vm2, %v37403_v24  ;;  %v6922_v53 = vsub.f32 %v6853_v50, %v38219_v28  ;;  %v6934_v37 = vand.u32 4294901760, %v6933_v38  ;;  %v38231_v35 = vand.u32 4294901760, %v7302_v43 }
 0x638   :  { %34491 = vmatprep.subr.mxu1 %v37403_v24  ;;  %v7305_v0 = vsel %vm875_vm3, %v2726_v12, 0  ;;  %v2728_v47 = vmul.f32 %v37199_v4, %v38027_v54 }
 0x639   :  { %34477 = vmatpush3.msra.mxu0 %v6484_v31  ;;  %v6923_v42 = vand.u32 4294901760, %v6922_v53  ;;  %v6935_v20 = vsub.f32 %v6933_v38, %v6934_v37  ;;  %v38236_v55 = vand.u32 4294901760, %v7305_v0  ;;  %v7385_v14 = vsub.f32 %v7302_v43, %v38231_v35 }
 0x63a   :  { %34479 = vmatmul.mubr.f32.vlgmr.msra.gmra.mrb[36].mxu0 %v38183_v3  ;;  %34484 = vmatmul.mubr.f32.vlgmr.msra.gmra.mrb[46].mxu1 %v6470_v7  ;;  %v7754_v45 = vpop.permute.xlu0 %7753  ;;  %v7757_v54 = vsel %vm875_vm3, %v2728_v47, 0  ;;  %v8208_v7 = vpop.permute.xlu1 %8207 }
 0x63b   :  { %34486 = vmatprep.subr.mxu0 %v37403_v24  ;;  %34492 = vmatpush3.msra.mxu1 %v6482_v13  ;;  %v6924_v58 = vsub.f32 %v6922_v53, %v6923_v42  ;;  %v6936_v18 = vand.u32 4294901760, %v6935_v20  ;;  %v38248_v19 = vsub.f32 %v7305_v0, %v38236_v55  ;;  %v7386_v27 = vand.u32 4294901760, %v7385_v14 }
 0x63c   :  { %34487 = vmatpush3.msra.mxu0 %v6404_v9  ;;  %34488 = vmatprep.mubr.msk.f32.mxu0 %vm37404_vm2, %v37403_v24  ;;  %v38265_v40 = vand.u32 4294901760, %v7754_v45  ;;  %v38271_v56 = vand.u32 4294901760, %v7757_v54 }
 0x63d   :  { %34493 = vmatprep.mubr.msk.f32.mxu1 %vm37404_vm2, %v37403_v24  ;;  %34496 = vmatprep.subr.mxu0 %v37403_v24  ;;  %v6925_v33 = vand.u32 4294901760, %v6924_v58  ;;  %v7375_v34 = vand.u32 4294901760, %v38248_v19  ;;  %v7387_v41 = vsub.f32 %v7385_v14, %v7386_v27 }
 0x63e   :  { %34501 = vmatprep.subr.mxu1 %v37403_v24  ;;  %34489 = vmatmul.mubr.f32.vlgmr.msra.gmra.mrb[38].mxu0 %v6471_v11  ;;  %v8206_v57 = vpop.permute.xlu0 %8205  ;;  %v38280_v62 = vsub.f32 %v7754_v45, %v38265_v40  ;;  %v38286_v52 = vsub.f32 %v7757_v54, %v38271_v56 }
 0x63f   :  { %34494 = vmatmul.mubr.f32.vlgmr.msra.gmra.mrb[48].mxu1 %v38183_v3  ;;  %34497 = vmatpush3.msra.mxu0 %v6404_v9  ;;  %v7376_v39 = vsub.f32 %v38248_v19, %v7375_v34  ;;  %v7388_v49 = vand.u32 4294901760, %v7387_v41  ;;  %v8209_v8 = vsel %vm875_vm3, %v8206_v57, 0  ;;  %v8211_v9 = vsel %vm875_vm3, %v8208_v7, 0 }
 0x640   :  { %34502 = vmatpush3.msra.mxu1 %v38212_v21  ;;  %34498 = vmatprep.mubr.msk.f32.mxu0 %vm37404_vm2, %v37403_v24  ;;  %v7838_v1 = vand.u32 4294901760, %v38280_v62  ;;  %v7827_v5 = vand.u32 4294901760, %v38286_v52  ;;  %v38313_v23 = vand.u32 4294901760, %v8209_v8  ;;  %v38319_v29 = vand.u32 4294901760, %v8211_v9 }
 0x641   :  { %34503 = vmatprep.mubr.msk.f32.mxu1 %vm37404_vm2, %v37403_v24  ;;  %34506 = vmatprep.subr.mxu0 %v37403_v24  ;;  %v7377_v63 = vand.u32 4294901760, %v7376_v39 }
 0x642   :  { %34511 = vmatprep.subr.mxu1 %v37403_v24  ;;  %34499 = vmatmul.mubr.f32.vlgmr.msra.gmra.mrb[40].mxu0 %v38183_v3  ;;  %v8660_v3 = vpop.permute.xlu0 %8659  ;;  %v7828_v11 = vsub.f32 %v38286_v52, %v7827_v5  ;;  %v7839_v16 = vsub.f32 %v38280_v62, %v7838_v1  ;;  %v38330_v46 = vsub.f32 %v8209_v8, %v38313_v23 }
 0x643   :  { %34504 = vmatmul.mubr.f32.vlgmr.msra.gmra.mrb[50].mxu1 %v6925_v33  ;;  %34507 = vmatpush3.msra.mxu0 %v6936_v18  ;;  %v8663_v60 = vsel %vm875_vm3, %v8660_v3, 0  ;;  %v38338_v51 = vsub.f32 %v8211_v9, %v38319_v29 }
 0x644   :  { %34512 = vmatpush3.msra.mxu1 %v6933_v38  ;;  %34508 = vmatprep.mubr.msk.f32.mxu0 %vm37404_vm2, %v37403_v24  ;;  %v7829_v44 = vand.u32 4294901760, %v7828_v11  ;;  %v7840_v13 = vand.u32 4294901760, %v7839_v16  ;;  %v8281_v32 = vand.u32 4294901760, %v38330_v46 }
 0x645   :  { %34513 = vmatprep.mubr.msk.f32.mxu1 %vm37404_vm2, %v37403_v24  ;;  %34516 = vmatprep.subr.mxu0 %v37403_v24  ;;  %v8292_v12 = vand.u32 4294901760, %v38338_v51 }
 0x646   :  { %34521 = vmatprep.subr.mxu1 %v37403_v24  ;;  %34509 = vmatmul.mubr.f32.vlgmr.msra.gmra.mrb[42].mxu0 %v38219_v28  ;;  %v8662_v17 = vpop.permute.xlu0 %8661 }
 0x647   :  { %34514 = vmatmul.mubr.f32.vlgmr.msra.gmra.mrb[52].mxu1 %v6922_v53  ;;  %34517 = vmatpush3.msra.mxu0 %v38212_v21  ;;  %v8665_v25 = vsel %vm875_vm3, %v8662_v17, 0  ;;  %v8282_v53 = vsub.f32 %v38330_v46, %v8281_v32 }
 0x648   :  { %34522 = vmatpush3.msra.mxu1 %v6934_v37  ;;  %34518 = vmatprep.mubr.msk.f32.mxu0 %vm37404_vm2, %v37403_v24  ;;  %v38332_v50 = vand.u32 4294901760, %v8665_v25 }
 0x649   :  { %34523 = vmatprep.mubr.msk.f32.mxu1 %vm37404_vm2, %v37403_v24  ;;  %34526 = vmatprep.subr.mxu0 %v37403_v24 }
 0x64a   :  { %34531 = vmatprep.subr.mxu1 %v37403_v24  ;;  %34519 = vmatmul.mubr.f32.vlgmr.msra.gmra.mrb[44].mxu0 %v6923_v42  ;;  %v8293_v42 = vsub.f32 %v38338_v51, %v8292_v12  ;;  %v9114_v4 = vpop.permute.xlu0 %9113 }
 0x64b   :  { %34524 = vmatmul.mubr.f32.vlgmr.msra.gmra.mrb[54].mxu1 %v38219_v28  ;;  %34527 = vmatpush3.msra.mxu0 %v38212_v21  ;;  %v38327_v21 = vand.u32 4294901760, %v8663_v60  ;;  %v9117_v33 = vsel %vm875_vm3, %v9114_v4, 0 }
 0x64c   :  { %34532 = vmatpush3.msra.mxu1 %v38231_v35  ;;  %34528 = vmatprep.mubr.msk.f32.mxu0 %vm37404_vm2, %v37403_v24  ;;  %v8294_v58 = vand.u32 4294901760, %v8293_v42  ;;  %v38411_v45 = vand.u32 4294901760, %v9117_v33 }
 0x64d   :  { %34533 = vmatprep.mubr.msk.f32.mxu1 %vm37404_vm2, %v37403_v24  ;;  %34536 = vmatprep.subr.mxu0 %v37403_v24  ;;  %v38346_v38 = vsub.f32 %v8663_v60, %v38327_v21 }
 0x64e   :  { %34541 = vmatprep.subr.mxu1 %v37403_v24  ;;  %34529 = vmatmul.mubr.f32.vlgmr.msra.gmra.mrb[46].mxu0 %v38219_v28  ;;  %v38352_v28 = vsub.f32 %v8665_v25, %v38332_v50  ;;  %v9188_v41 = vsub.f32 %v9117_v33, %v38411_v45 }
 0x64f   :  { %34534 = vmatmul.mubr.f32.vlgmr.msra.gmra.mrb[56].mxu1 %v7377_v63  ;;  %34537 = vmatpush3.msra.mxu0 %v7388_v49  ;;  %v8735_v31 = vand.u32 4294901760, %v38346_v38 }
 0x650   :  { %34542 = vmatpush3.msra.mxu1 %v7385_v14  ;;  %34538 = vmatprep.mubr.msk.f32.mxu0 %vm37404_vm2, %v37403_v24  ;;  %v8746_v37 = vand.u32 4294901760, %v38352_v28  ;;  %v9116_v14 = vpop.permute.xlu0 %9115  ;;  %v9189_v63 = vand.u32 4294901760, %v9188_v41 }
 0x651   :  { %34543 = vmatprep.mubr.msk.f32.mxu1 %vm37404_vm2, %v37403_v24  ;;  %34546 = vmatprep.subr.mxu0 %v37403_v24  ;;  %v8736_v43 = vsub.f32 %v38346_v38, %v8735_v31  ;;  %v9119_v47 = vsel %vm875_vm3, %v9116_v14, 0 }
 0x652   :  { %34551 = vmatprep.subr.mxu1 %v37403_v24  ;;  %34539 = vmatmul.mubr.f32.vlgmr.msra.gmra.mrb[48].mxu0 %v38236_v55  ;;  %v8747_v0 = vsub.f32 %v38352_v28, %v8746_v37  ;;  %v38416_v54 = vand.u32 4294901760, %v9119_v47 }
 0x653   :  { %34544 = vmatmul.mubr.f32.vlgmr.msra.gmra.mrb[58].mxu1 %v38248_v19  ;;  %34547 = vmatpush3.msra.mxu0 %v38231_v35  ;;  %v8737_v20 = vand.u32 4294901760, %v8736_v43  ;;  %v9570_v19 = vpop.permute.xlu1 %9569 }
 0x654   :  { %34552 = vmatpush3.msra.mxu1 %v7386_v27  ;;  %34548 = vmatprep.mubr.msk.f32.mxu0 %vm37404_vm2, %v37403_v24  ;;  %v9568_v18 = vpop.permute.xlu0 %9567 }
 0x655   :  { %34553 = vmatprep.mubr.msk.f32.mxu1 %vm37404_vm2, %v37403_v24  ;;  %34556 = vmatprep.subr.mxu0 %v37403_v24  ;;  %v9571_v27 = vsel %vm875_vm3, %v9568_v18, 0 }
 0x656   :  { %34561 = vmatprep.subr.mxu1 %v37403_v24  ;;  %34549 = vmatmul.mubr.f32.vlgmr.msra.gmra.mrb[50].mxu0 %v7375_v34  ;;  %v9573_v34 = vsel %vm875_vm3, %v9570_v19, 0 }
 0x657   :  { %34554 = vmatmul.mubr.f32.vlgmr.msra.gmra.mrb[60].mxu1 %v38236_v55  ;;  %34557 = vmatpush3.msra.mxu0 %v38231_v35  ;;  %v8283_v35 = vand.u32 4294901760, %v8282_v53  ;;  %v38423_v39 = vand.u32 4294901760, %v9573_v34 }
 0x658   :  { %34562 = vmatpush3.msra.mxu1 %v38265_v40  ;;  %34558 = vmatprep.mubr.msk.f32.mxu0 %vm37404_vm2, %v37403_v24 }
 0x659   :  { %34563 = vmatprep.mubr.msk.f32.mxu1 %vm37404_vm2, %v37403_v24  ;;  %34566 = vmatprep.subr.mxu0 %v37403_v24 }
 0x65a   :  { %34571 = vmatprep.subr.mxu1 %v37403_v24  ;;  %34559 = vmatmul.mubr.f32.vlgmr.msra.gmra.mrb[52].mxu0 %v38236_v55  ;;  %v8748_v55 = vand.u32 4294901760, %v8747_v0 }
 0x65b   :  { %34564 = vmatmul.mubr.f32.vlgmr.msra.gmra.mrb[62].mxu1 %v7829_v44  ;;  %34567 = vmatpush3.msra.mxu0 %v7840_v13 }
 0x65c   :  { %34572 = vmatpush3.msra.mxu1 %v38280_v62  ;;  %34568 = vmatprep.mubr.msk.f32.mxu0 %vm37404_vm2, %v37403_v24  ;;  %v9653_v62 = vsub.f32 %v9573_v34, %v38423_v39 }
 0x65d   :  { %34573 = vmatprep.mubr.msk.f32.mxu1 %vm37404_vm2, %v37403_v24  ;;  %34576 = vmatprep.subr.mxu0 %v37403_v24 }
 0x65e   :  { %34581 = vmatprep.subr.mxu1 %v37403_v24  ;;  %34569 = vmatmul.mubr.f32.vlgmr.msra.gmra.mrb[54].mxu0 %v38271_v56  ;;  %v9654_v3 = vand.u32 4294901760, %v9653_v62 }
 0x65f   :  { %34574 = vmatmul.mubr.f32.vlgmr.msra.gmra.mrb[64].mxu1 %v38286_v52  ;;  %34577 = vmatpush3.msra.mxu0 %v38265_v40 }
 0x660   :  { %34582 = vmatpush3.msra.mxu1 %v7838_v1  ;;  %34578 = vmatprep.mubr.msk.f32.mxu0 %vm37404_vm2, %v37403_v24  ;;  %v9190_v1 = vsub.f32 %v9188_v41, %v9189_v63  ;;  %v9655_v8 = vsub.f32 %v9653_v62, %v9654_v3 }
 0x661   :  { %34583 = vmatprep.mubr.msk.f32.mxu1 %vm37404_vm2, %v37403_v24  ;;  %34586 = vmatprep.subr.mxu0 %v37403_v24 }
 0x662   :  { %34579 = vmatmul.mubr.f32.vlgmr.msra.gmra.mrb[56].mxu0 %v7827_v5  ;;  %34591 = vmatprep.subr.mxu1 %v37403_v24  ;;  %v9191_v11 = vand.u32 4294901760, %v9190_v1  ;;  %v9656_v17 = vand.u32 4294901760, %v9655_v8 }
 0x663   :  { %34584 = vmatmul.mubr.f32.vlgmr.msra.gmra.mrb[66].mxu1 %v38271_v56  ;;  %34587 = vmatpush3.msra.mxu0 %v38265_v40  ;;  %v38420_v40 = vand.u32 4294901760, %v9571_v27 }
 0x664   :  { %34588 = vmatprep.mubr.msk.f32.mxu0 %vm37404_vm2, %v37403_v24  ;;  %34593 = vmatprep.mubr.msk.f32.mxu1 %vm37404_vm2, %v37403_v24 }
 0x665   :  { %34621 = vmatprep.subr.mxu0 %v37403_v24  ;;  %v9642_v57 = vsub.f32 %v9571_v27, %v38420_v40 }
 0x666   :  { %34589 = vmatmul.mubr.f32.vlgmr.msra.gmra.mrb[58].mxu0 %v38271_v56  ;;  %v9199_v56 = vsub.f32 %v9119_v47, %v38416_v54 }
 0x667   :  { %34592 = vmatpush3.xpose.msra.mxu1 %v38319_v29  ;;  %34623 = vmatprep.mubr.msk.f32.mxu0 %vm37404_vm2, %v37403_v24  ;;  %v9643_v52 = vand.u32 4294901760, %v9642_v57 }
 0x668   :  { %34596 = vmatprep.subr.mxu1 %v37403_v24  ;;  %v9200_v49 = vand.u32 4294901760, %v9199_v56 }
 0x669   :  { %v9644_v7 = vsub.f32 %v9642_v57, %v9643_v52 }
 0x66a   :  { %34594 = vmatmul.mubr.f32.vlgmr.msra.gmra.mrb[68].mxu1 %v8283_v35  ;;  %34622 = vmatpush3.xpose.msra.mxu0 %v38332_v50  ;;  %v9201_v5 = vsub.f32 %v9199_v56, %v9200_v49 }
 0x66b   :  { %34597 = vmatpush3.xpose.msra.mxu1 %v8294_v58  ;;  %34626 = vmatprep.subr.mxu0 %v37403_v24  ;;  %v9645_v9 = vand.u32 4294901760, %v9644_v7 }
 0x66c   :  { %34598 = vmatprep.mubr.msk.f32.mxu1 %vm37404_vm2, %v37403_v24  ;;  %34601 = vmatprep.subr.mxu1 %v37403_v24  ;;  %v9202_v16 = vand.u32 4294901760, %v9201_v5 }
 0x66d   :  { %34624 = vmatmul.mubr.f32.vlgmr.msra.gmra.mrb[60].mxu0 %v8737_v20 }
 0x66e   :  { %34627 = vmatpush3.xpose.msra.mxu0 %v8748_v55  ;;  %34628 = vmatprep.mubr.msk.f32.mxu0 %vm37404_vm2, %v37403_v24 }
 0x66f   :  { %34631 = vmatprep.subr.mxu0 %v37403_v24 }
 0x672   :  { %34599 = vmatmul.mubr.f32.vlgmr.msra.gmra.mrb[68].mxu1 %v38313_v23 }
 0x673   :  { %34602 = vmatpush3.xpose.msra.mxu1 %v38338_v51  ;;  %34603 = vmatprep.mubr.msk.f32.mxu1 %vm37404_vm2, %v37403_v24 }
 0x674   :  { %34606 = vmatprep.subr.mxu1 %v37403_v24 }
 0x675   :  { %34629 = vmatmul.mubr.f32.vlgmr.msra.gmra.mrb[60].mxu0 %v38327_v21 }
 0x676   :  { %34632 = vmatpush3.xpose.msra.mxu0 %v38352_v28  ;;  %34633 = vmatprep.mubr.msk.f32.mxu0 %vm37404_vm2, %v37403_v24 }
 0x677   :  { %34636 = vmatprep.subr.mxu0 %v37403_v24 }
 0x67a   :  { %34604 = vmatmul.mubr.f32.vlgmr.msra.gmra.mrb[68].mxu1 %v38330_v46 }
 0x67b   :  { %34607 = vmatpush3.xpose.msra.mxu1 %v38319_v29  ;;  %34608 = vmatprep.mubr.msk.f32.mxu1 %vm37404_vm2, %v37403_v24 }
 0x67c   :  { %34611 = vmatprep.subr.mxu1 %v37403_v24 }
 0x67d   :  { %34634 = vmatmul.mubr.f32.vlgmr.msra.gmra.mrb[60].mxu0 %v38346_v38 }
 0x67e   :  { %34637 = vmatpush3.xpose.msra.mxu0 %v38332_v50  ;;  %34638 = vmatprep.mubr.msk.f32.mxu0 %vm37404_vm2, %v37403_v24 }
 0x67f   :  { %34641 = vmatprep.subr.mxu0 %v37403_v24 }
 0x682   :  { %34609 = vmatmul.mubr.f32.vlgmr.msra.gmra.mrb[68].mxu1 %v8281_v32 }
 0x683   :  { %34612 = vmatpush3.xpose.msra.mxu1 %v8292_v12  ;;  %34613 = vmatprep.mubr.msk.f32.mxu1 %vm37404_vm2, %v37403_v24 }
 0x684   :  { %34616 = vmatprep.subr.mxu1 %v37403_v24 }
 0x685   :  { %34639 = vmatmul.mubr.f32.vlgmr.msra.gmra.mrb[60].mxu0 %v8735_v31 }
 0x686   :  { %34642 = vmatpush3.xpose.msra.mxu0 %v8746_v37  ;;  %34643 = vmatprep.mubr.msk.f32.mxu0 %vm37404_vm2, %v37403_v24 }
 0x687   :  { %34646 = vmatprep.subr.mxu0 %v37403_v24 }
 0x68a   :  { %34614 = vmatmul.mubr.f32.vlgmr.msra.gmra.mrb[68].mxu1 %v38313_v23 }
 0x68b   :  { %34617 = vmatpush3.xpose.msra.mxu1 %v38319_v29  ;;  %34618 = vmatprep.mubr.msk.f32.mxu1 %vm37404_vm2, %v37403_v24 }
 0x68c   :  { %34651 = vmatprep.subr.mxu1 %v37403_v24 }
 0x68d   :  { %34644 = vmatmul.mubr.f32.vlgmr.msra.gmra.mrb[60].mxu0 %v38327_v21 }
 0x68e   :  { %34647 = vmatpush3.xpose.msra.mxu0 %v38332_v50  ;;  %34648 = vmatprep.mubr.msk.f32.mxu0 %vm37404_vm2, %v37403_v24 }
 0x68f   :  { %34681 = vmatprep.subr.mxu0 %v37403_v24 }
 0x692   :  { %34619 = vmatmul.mubr.f32.vlgmr.msra.gmra.mrb[68].mxu1 %v38313_v23  ;;  %v38474_v23 = vand.u32 4294901760, %v37690_v61 }
 0x693   :  { %34652 = vmatpush3.xpose.msra.mxu1 %v38416_v54  ;;  %34653 = vmatprep.mubr.msk.f32.mxu1 %vm37404_vm2, %v37403_v24 }
 0x694   :  { %34656 = vmatprep.subr.mxu1 %v37403_v24  ;;  %v38482_v60 = vsub.f32 %v37690_v61, %v38474_v23 }
 0x695   :  { %34649 = vmatmul.mubr.f32.vlgmr.msra.gmra.mrb[60].mxu0 %v38327_v21 }
 0x696   :  { %34654 = vmatmul.mubr.f32.vlgmr.msra.gmra.mrb[70].mxu1 %v9191_v11  ;;  %34682 = vmatpush3.xpose.msra.mxu0 %v38423_v39  ;;  %v10147_v29 = vand.u32 4294901760, %v38482_v60 }
 0x697   :  { %34657 = vmatpush3.xpose.msra.mxu1 %v9202_v16  ;;  %34683 = vmatprep.mubr.msk.f32.mxu0 %vm37404_vm2, %v37403_v24 }
 0x698   :  { %34686 = vmatprep.subr.mxu0 %v37403_v24  ;;  %34658 = vmatprep.mubr.msk.f32.mxu1 %vm37404_vm2, %v37403_v24  ;;  %v10148_v25 = vsub.f32 %v38482_v60, %v10147_v29 }
 0x699   :  { %34684 = vmatmul.mubr.f32.vlgmr.msra.gmra.mrb[62].mxu0 %v9645_v9  ;;  %34661 = vmatprep.subr.mxu1 %v37403_v24 }
 0x69a   :  { %34687 = vmatpush3.xpose.msra.mxu0 %v9656_v17  ;;  %34688 = vmatprep.mubr.msk.f32.mxu0 %vm37404_vm2, %v37403_v24  ;;  %v10149_v44 = vand.u32 4294901760, %v10148_v25 }
 0x69b   :  { %34691 = vmatprep.subr.mxu0 %v37403_v24 }
 0x69e   :  { %34659 = vmatmul.mubr.f32.vlgmr.msra.gmra.mrb[70].mxu1 %v38411_v45 }
 0x69f   :  { %34662 = vmatpush3.xpose.msra.mxu1 %v9199_v56  ;;  %34663 = vmatprep.mubr.msk.f32.mxu1 %vm37404_vm2, %v37403_v24 }
 0x6a0   :  { %34666 = vmatprep.subr.mxu1 %v37403_v24 }
 0x6a1   :  { %34689 = vmatmul.mubr.f32.vlgmr.msra.gmra.mrb[62].mxu0 %v38420_v40 }
 0x6a2   :  { %34692 = vmatpush3.xpose.msra.mxu0 %v9653_v62  ;;  %34693 = vmatprep.mubr.msk.f32.mxu0 %vm37404_vm2, %v37403_v24 }
 0x6a3   :  { %34696 = vmatprep.subr.mxu0 %v37403_v24 }
 0x6a6   :  { %34664 = vmatmul.mubr.f32.vlgmr.msra.gmra.mrb[70].mxu1 %v9188_v41 }
 0x6a7   :  { %34667 = vmatpush3.xpose.msra.mxu1 %v38416_v54  ;;  %34668 = vmatprep.mubr.msk.f32.mxu1 %vm37404_vm2, %v37403_v24 }
 0x6a8   :  { %34671 = vmatprep.subr.mxu1 %v37403_v24 }
 0x6a9   :  { %34694 = vmatmul.mubr.f32.vlgmr.msra.gmra.mrb[62].mxu0 %v9642_v57 }
 0x6aa   :  { %34697 = vmatpush3.xpose.msra.mxu0 %v38423_v39  ;;  %34698 = vmatprep.mubr.msk.f32.mxu0 %vm37404_vm2, %v37403_v24 }
 0x6ab   :  { %34701 = vmatprep.subr.mxu0 %v37403_v24 }
 0x6ae   :  { %34669 = vmatmul.mubr.f32.vlgmr.msra.gmra.mrb[70].mxu1 %v9189_v63 }
 0x6af   :  { %34672 = vmatpush3.xpose.msra.mxu1 %v9200_v49  ;;  %34673 = vmatprep.mubr.msk.f32.mxu1 %vm37404_vm2, %v37403_v24 }
 0x6b0   :  { %34676 = vmatprep.subr.mxu1 %v37403_v24 }
 0x6b1   :  { %34699 = vmatmul.mubr.f32.vlgmr.msra.gmra.mrb[62].mxu0 %v9643_v52 }
 0x6b2   :  { %34702 = vmatpush3.xpose.msra.mxu0 %v9654_v3  ;;  %34703 = vmatprep.mubr.msk.f32.mxu0 %vm37404_vm2, %v37403_v24 }
 0x6b3   :  { %34706 = vmatprep.subr.mxu0 %v37403_v24 }
 0x6b6   :  { %34674 = vmatmul.mubr.f32.vlgmr.msra.gmra.mrb[70].mxu1 %v38411_v45 }
 0x6b7   :  { %34677 = vmatpush3.xpose.msra.mxu1 %v38416_v54  ;;  %34678 = vmatprep.mubr.msk.f32.mxu1 %vm37404_vm2, %v37403_v24 }
 0x6b8   :  { %34711 = vmatprep.subr.mxu1 %v37403_v24 }
 0x6b9   :  { %34704 = vmatmul.mubr.f32.vlgmr.msra.gmra.mrb[62].mxu0 %v38420_v40 }
 0x6ba   :  { %34707 = vmatpush3.xpose.msra.mxu0 %v38423_v39  ;;  %34708 = vmatprep.mubr.msk.f32.mxu0 %vm37404_vm2, %v37403_v24 }
 0x6bb   :  { %34716 = vmatprep.subr.mxu0 %v37403_v24 }
 0x6be   :  { %34679 = vmatmul.mubr.f32.vlgmr.msra.gmra.mrb[70].mxu1 %v38411_v45 }
 0x6bf   :  { %34712 = vmatpush3.msra.mxu1 %v38474_v23  ;;  %34713 = vmatprep.mubr.msk.f32.mxu1 %vm37404_vm2, %v37403_v24 }
 0x6c0   :  { %34721 = vmatprep.subr.mxu1 %v37403_v24 }
 0x6c1   :  { %34709 = vmatmul.mubr.f32.vlgmr.msra.gmra.mrb[62].mxu0 %v38420_v40 }
 0x6c2   :  { %34717 = vmatpush3.msra.mxu0 %v10149_v44  ;;  %34718 = vmatprep.mubr.msk.f32.mxu0 %vm37404_vm2, %v37403_v24 }
 0x6c3   :  { %34726 = vmatprep.subr.mxu0 %v37403_v24 }
 0x6d1   :  { %v4743_v13 = vpop.f32.mrb[12].mxu0 }
 0x6d2   :  { %v34360_v21 = vpop.f32.mrb[13].mxu0 }
 0x6d5   :  { %v4891_v46 = vpop.f32.mrb[14].mxu0 }
 0x6d6   :  { %v34370_v50 = vpop.f32.mrb[15].mxu0 }
 0x6d9   :  { %v4667_v51 = vpop.f32.mrb[20].mxu1  ;;  %v5037_v38 = vpop.f32.mrb[16].mxu0 }
 0x6da   :  { %v4744_v32 = vadd.f32 %v4743_v13, %v4667_v51  ;;  %v34355_v28 = vpop.f32.mrb[21].mxu1  ;;  %v34380_v12 = vpop.f32.mrb[17].mxu0 }
 0x6dd   :  { %v4817_v31 = vpop.f32.mrb[22].mxu1  ;;  %v5195_v53 = vpop.f32.mrb[18].mxu0 }
 0x6de   :  { %v4818_v37 = vadd.f32 %v4817_v31, %v4744_v32  ;;  %v34365_v42 = vpop.f32.mrb[23].mxu1  ;;  %v34390_v43 = vpop.f32.mrb[19].mxu0 }
 0x6e0   :  { %v4892_v0 = vadd.f32 %v4891_v46, %v4818_v37 }
 0x6e1   :  { %v4965_v35 = vpop.f32.mrb[24].mxu1  ;;  %v5343_v58 = vpop.f32.mrb[20].mxu0 }
 0x6e2   :  { %v4966_v20 = vadd.f32 %v4965_v35, %v4892_v0  ;;  %v34375_v55 = vpop.f32.mrb[25].mxu1  ;;  %v34400_v4 = vpop.f32.mrb[21].mxu0 }
 0x6e4   :  { %v5038_v14 = vadd.f32 %v5037_v38, %v4966_v20 }
 0x6e5   :  { %v5119_v33 = vpop.f32.mrb[26].mxu1  ;;  %v5489_v18 = vpop.f32.mrb[22].mxu0 }
 0x6e6   :  { %v5196_v19 = vadd.f32 %v5195_v53, %v5119_v33  ;;  %v34385_v47 = vpop.f32.mrb[27].mxu1  ;;  %v34410_v45 = vpop.f32.mrb[23].mxu0 }
 0x6e9   :  { %v5269_v27 = vpop.f32.mrb[28].mxu1  ;;  %v5647_v34 = vpop.f32.mrb[24].mxu0 }
 0x6ea   :  { %v5270_v54 = vadd.f32 %v5269_v27, %v5196_v19  ;;  %v34395_v40 = vpop.f32.mrb[29].mxu1  ;;  %v34420_v39 = vpop.f32.mrb[25].mxu0 }
 0x6ec   :  { %v5344_v41 = vadd.f32 %v5343_v58, %v5270_v54 }
 0x6ed   :  { %v5417_v56 = vpop.f32.mrb[30].mxu1  ;;  %v5795_v57 = vpop.f32.mrb[26].mxu0 }
 0x6ee   :  { %v5418_v62 = vadd.f32 %v5417_v56, %v5344_v41  ;;  %v34405_v63 = vpop.f32.mrb[31].mxu1  ;;  %v34430_v49 = vpop.f32.mrb[27].mxu0 }
 0x6f0   :  { %v5490_v52 = vadd.f32 %v5489_v18, %v5418_v62 }
 0x6f1   :  { %v5571_v3 = vpop.f32.mrb[32].mxu1  ;;  %v5941_v1 = vpop.f32.mrb[28].mxu0 }
 0x6f2   :  { %v5648_v5 = vadd.f32 %v5647_v34, %v5571_v3  ;;  %v34415_v7 = vpop.f32.mrb[33].mxu1  ;;  %v34440_v8 = vpop.f32.mrb[29].mxu0 }
 0x6f5   :  { %v5721_v11 = vpop.f32.mrb[34].mxu1  ;;  %v6099_v16 = vpop.f32.mrb[30].mxu0 }
 0x6f6   :  { %v5722_v9 = vadd.f32 %v5721_v11, %v5648_v5  ;;  %v34425_v17 = vpop.f32.mrb[35].mxu1  ;;  %v34450_v25 = vpop.f32.mrb[31].mxu0 }
 0x6f8   :  { %v5796_v44 = vadd.f32 %v5795_v57, %v5722_v9 }
 0x6f9   :  { %v5869_v13 = vpop.f32.mrb[36].mxu1  ;;  %v6247_v21 = vpop.f32.mrb[32].mxu0 }
 0x6fa   :  { %v5870_v46 = vadd.f32 %v5869_v13, %v5796_v44  ;;  %v34435_v50 = vpop.f32.mrb[37].mxu1  ;;  %v34460_v51 = vpop.f32.mrb[33].mxu0 }
 0x6fc   :  { %v5942_v38 = vadd.f32 %v5941_v1, %v5870_v46 }
 0x6fd   :  { %v6023_v32 = vpop.f32.mrb[38].mxu1  ;;  %v6393_v28 = vpop.f32.mrb[34].mxu0 }
 0x6fe   :  { %v6100_v12 = vadd.f32 %v6099_v16, %v6023_v32  ;;  %v34445_v31 = vpop.f32.mrb[39].mxu1  ;;  %v34470_v53 = vpop.f32.mrb[35].mxu0 }
 0x701   :  { %v6173_v37 = vpop.f32.mrb[40].mxu1 }
 0x702   :  { %v6174_v42 = vadd.f32 %v6173_v37, %v6100_v12  ;;  %v34455_v43 = vpop.f32.mrb[41].mxu1 }
 0x704   :  { %v6248_v0 = vadd.f32 %v6247_v21, %v6174_v42 }
 0x705   :  { %v6321_v35 = vpop.f32.mrb[42].mxu1 }
 0x706   :  { %v6322_v58 = vadd.f32 %v6321_v35, %v6248_v0  ;;  %v34465_v20 = vpop.f32.mrb[43].mxu1 }
 0x708   :  { %v6394_v55 = vadd.f32 %v6393_v28, %v6322_v58 }
 0x709   :  { %v6475_v4 = vpop.f32.mrb[44].mxu1 }
 0x70a   :  { %v6476_v33 = vadd.f32 %v6475_v4, %v5038_v14  ;;  %v34475_v18 = vpop.f32.mrb[45].mxu1 }
 0x70d   :  { %v6551_v19 = vpop.f32.mrb[36].mxu0  ;;  %v6625_v47 = vpop.f32.mrb[46].mxu1 }
 0x70e   :  { %v6552_v45 = vadd.f32 %v6551_v19, %v6476_v33  ;;  %v34480_v27 = vpop.f32.mrb[37].mxu0  ;;  %v34485_v34 = vpop.f32.mrb[47].mxu1 }
 0x710   :  { %v6626_v54 = vadd.f32 %v6625_v47, %v6552_v45 }
 0x711   :  { %v6699_v40 = vpop.f32.mrb[38].mxu0 }
 0x712   :  { %v6700_v39 = vadd.f32 %v6699_v40, %v6626_v54  ;;  %v6773_v41 = vpop.f32.mrb[48].mxu1  ;;  %v34490_v56 = vpop.f32.mrb[39].mxu0 }
 0x713   :  { %v34495_v57 = vpop.f32.mrb[49].mxu1 }
 0x714   :  { %v6774_v62 = vadd.f32 %v6773_v41, %v6700_v39 }
 0x715   :  { %v6845_v63 = vpop.f32.mrb[40].mxu0 }
 0x716   :  { %v38507_v49 = vadd.f32 %v6845_v63, %v6774_v62  ;;  %v6927_v3 = vpop.f32.mrb[50].mxu1  ;;  %v34500_v1 = vpop.f32.mrb[41].mxu0 }
 0x717   :  { %v6928_v5 = vadd.f32 %v6927_v3, %v5490_v52  ;;  %v34505_v14 = vpop.f32.mrb[51].mxu1 }
 0x719   :  { %v7003_v7 = vpop.f32.mrb[42].mxu0 }
 0x71a   :  { %v7004_v8 = vadd.f32 %v7003_v7, %v6928_v5  ;;  %v7077_v11 = vpop.f32.mrb[52].mxu1  ;;  %v34510_v16 = vpop.f32.mrb[43].mxu0 }
 0x71b   :  { %v34515_v9 = vpop.f32.mrb[53].mxu1 }
 0x71c   :  { %v7078_v17 = vadd.f32 %v7077_v11, %v7004_v8 }
 0x71d   :  { %v7151_v25 = vpop.f32.mrb[44].mxu0 }
 0x71e   :  { %v7152_v44 = vadd.f32 %v7151_v25, %v7078_v17  ;;  %v7225_v13 = vpop.f32.mrb[54].mxu1  ;;  %v34520_v21 = vpop.f32.mrb[45].mxu0 }
 0x71f   :  { %v34525_v46 = vpop.f32.mrb[55].mxu1 }
 0x720   :  { %v7226_v50 = vadd.f32 %v7225_v13, %v7152_v44 }
 0x721   :  { %v7297_v51 = vpop.f32.mrb[46].mxu0 }
 0x722   :  { %v38509_v32 = vadd.f32 %v7297_v51, %v7226_v50  ;;  %v7379_v28 = vpop.f32.mrb[56].mxu1  ;;  %v34530_v12 = vpop.f32.mrb[47].mxu0 }
 0x723   :  { %v7380_v31 = vadd.f32 %v7379_v28, %v5942_v38  ;;  %v34535_v52 = vpop.f32.mrb[57].mxu1 }
 0x725   :  { %v7455_v53 = vpop.f32.mrb[48].mxu0 }
 0x726   :  { %v7456_v37 = vadd.f32 %v7455_v53, %v7380_v31  ;;  %v7529_v42 = vpop.f32.mrb[58].mxu1  ;;  %v34540_v43 = vpop.f32.mrb[49].mxu0 }
 0x727   :  { %v34545_v0 = vpop.f32.mrb[59].mxu1 }
 0x728   :  { %v7530_v35 = vadd.f32 %v7529_v42, %v7456_v37 }
 0x729   :  { %v7603_v58 = vpop.f32.mrb[50].mxu0 }
 0x72a   :  { %v7604_v20 = vadd.f32 %v7603_v58, %v7530_v35  ;;  %v7677_v4 = vpop.f32.mrb[60].mxu1  ;;  %v34550_v33 = vpop.f32.mrb[51].mxu0 }
 0x72b   :  { %v34555_v18 = vpop.f32.mrb[61].mxu1 }
 0x72c   :  { %v7678_v19 = vadd.f32 %v7677_v4, %v7604_v20 }
 0x72d   :  { %v7749_v47 = vpop.f32.mrb[52].mxu0 }
 0x72e   :  { %v38511_v45 = vadd.f32 %v7749_v47, %v7678_v19  ;;  %v7831_v27 = vpop.f32.mrb[62].mxu1  ;;  %v34560_v34 = vpop.f32.mrb[53].mxu0 }
 0x72f   :  { %v7832_v54 = vadd.f32 %v7831_v27, %v6394_v55  ;;  %v34565_v38 = vpop.f32.mrb[63].mxu1 }
 0x731   :  { %v7907_v40 = vpop.f32.mrb[54].mxu0 }
 0x732   :  { %v7908_v39 = vadd.f32 %v7907_v40, %v7832_v54  ;;  %v7981_v41 = vpop.f32.mrb[64].mxu1  ;;  %v34570_v56 = vpop.f32.mrb[55].mxu0 }
 0x733   :  { %v34575_v57 = vpop.f32.mrb[65].mxu1 }
 0x734   :  { %v7982_v62 = vadd.f32 %v7981_v41, %v7908_v39 }
 0x735   :  { %v8055_v63 = vpop.f32.mrb[56].mxu0 }
 0x736   :  { %v8056_v3 = vadd.f32 %v8055_v63, %v7982_v62  ;;  %v8129_v1 = vpop.f32.mrb[66].mxu1  ;;  %v34580_v5 = vpop.f32.mrb[57].mxu0 }
 0x737   :  { %v34585_v14 = vpop.f32.mrb[67].mxu1 }
 0x738   :  { %v8130_v7 = vadd.f32 %v8129_v1, %v8056_v3  ;;  %v10518_v3 = vand.u32 4294901760, %v37696_v6 }
 0x739   :  { %v8201_v8 = vpop.f32.mrb[58].mxu0 }
 0x73a   :  { %v38513_v11 = vadd.f32 %v8201_v8, %v8130_v7  ;;  %v34590_v16 = vpop.f32.mrb[59].mxu0 }
 0x765   :  { %v8655_v9 = vpop.f32.mrb[68].mxu1 }
 0x766   :  { %v36647_v55 = vadd.f32 %v8655_v9, %v37571_v30  ;;  %v34620_v17 = vpop.f32.mrb[69].mxu1 }
 0x767   :  { %v38557_v17 = vand.u32 4294901760, %v37704_v15 }
 0x768   :  { %v9109_v25 = vpop.f32.mrb[60].mxu0  ;;  %v10021_v44 = vsel %vm875_vm3, %v36647_v55, -inf }
 0x769   :  { %v36648_v13 = vadd.f32 %v9109_v25, %v37571_v30  ;;  %10022 = vmax.xlane.f32.xlu0 %v10021_v44  ;;  %v34650_v21 = vpop.f32.mrb[61].mxu0 }
 0x76b   :  { %v10024_v46 = vsel %vm875_vm3, %v36648_v13, -inf }
 0x76c   :  { %10025 = vmax.xlane.f32.xlu1 %v10024_v46  ;;  %v38566_v46 = vsub.f32 %v37704_v15, %v38557_v17 }
 0x791   :  { %v9563_v50 = vpop.f32.mrb[70].mxu1 }
 0x792   :  { %v36649_v51 = vadd.f32 %v9563_v50, %v37571_v30  ;;  %v34680_v28 = vpop.f32.mrb[71].mxu1 }
 0x794   :  { %v10017_v12 = vpop.f32.mrb[62].mxu0  ;;  %v10027_v31 = vsel %vm875_vm3, %v36649_v51, -inf }
 0x795   :  { %v36650_v52 = vadd.f32 %v10017_v12, %v37571_v30  ;;  %10028 = vmax.xlane.f32.xlu0 %v10027_v31  ;;  %v34710_v53 = vpop.f32.mrb[63].mxu0 }
 0x796   :  { %v11416_v53 = vand.u32 4294901760, %v37712_v26 }
 0x797   :  { %v10030_v37 = vsel %vm875_vm3, %v36650_v52, -inf }
 0x799   :  { %10031 = vmax.xlane.f32.xlu0 %v10030_v37 }
 0x7f6   :  { %v10023_v42 = vpop.xlane.xlu0 %10022 }
 0x7f7   :  { %v10033_v43 = vsub.f32 %v36647_v55, %v10023_v42 }
 0x7f9   :  { %v10037_v0 = vmul.f32 1.442695, %v10033_v43  ;;  %v10026_v35 = vpop.xlane.xlu1 %10025 }
 0x7fa   :  { %v10034_v58 = vsub.f32 %v36648_v13, %v10026_v35 }
 0x7fb   :  { %37200 = vpow2.f32 %v10037_v0  ;;  %v38610_v0 = vsub.f32 %v37712_v26, %v11416_v53 }
 0x7fc   :  { %v10039_v20 = vmul.f32 1.442695, %v10034_v58 }
 0x7fe   :  { %37202 = vpow2.f32 %v10039_v20 }
 0x805   :  { %v37201_v4 = vpop.eup %37200 }
 0x806   :  { %v10045_v33 = vsel %vm875_vm3, %v37201_v4, 0.0 }
 0x807   :  { %10046 = vadd.xlane.f32.xlu1 %v10045_v33 }
 0x808   :  { %v37203_v18 = vpop.eup %37202 }
 0x809   :  { %v10048_v19 = vsel %vm875_vm3, %v37203_v18, 0.0 }
 0x80a   :  { %10049 = vadd.xlane.f32.xlu0 %v10048_v19 }
 0x822   :  { %v10029_v47 = vpop.xlane.xlu0 %10028 }
 0x823   :  { %v10035_v27 = vsub.f32 %v36649_v51, %v10029_v47  ;;  %v11045_v51 = vand.u32 4294901760, %v38566_v46 }
 0x825   :  { %v10041_v34 = vmul.f32 1.442695, %v10035_v27  ;;  %v11046_v12 = vsub.f32 %v38566_v46, %v11045_v51 }
 0x826   :  { %v10032_v54 = vpop.xlane.xlu0 %10031 }
 0x827   :  { %37204 = vpow2.f32 %v10041_v34  ;;  %v10036_v38 = vsub.f32 %v36650_v52, %v10032_v54 }
 0x829   :  { %v10043_v40 = vmul.f32 1.442695, %v10036_v38 }
 0x82b   :  { %37206 = vpow2.f32 %v10043_v40 }
 0x831   :  { %v38525_v39 = vpop.eup %37204 }
 0x832   :  { %v10051_v41 = vsel %vm875_vm3, %v38525_v39, 0.0 }
 0x833   :  { %10052 = vadd.xlane.f32.xlu1 %v10051_v41 }
 0x835   :  { %v38529_v56 = vpop.eup %37206 }
 0x836   :  { %v10054_v57 = vsel %vm875_vm3, %v38529_v56, 0.0 }
 0x837   :  { %10055 = vadd.xlane.f32.xlu0 %v10054_v57 }
 0x844   :  { %11865 = vrot.lane.b32.xlu1 %v37688_v59, %s37411_s14 }
 0x848   :  { %12319 = vrot.lane.b32.xlu1 %v37694_v2, %s37411_s14 }
 0x84c   :  { %12321 = vrot.lane.b32.xlu1 %v37694_v2, %s37412_s15  ;;  %v38547_v2 = vsub.f32 %v37696_v6, %v10518_v3 }
 0x84d   :  { %11867 = vrot.lane.b32.xlu0 %v37688_v59, %s37412_s15 }
 0x84e   :  { %v10596_v8 = vand.u32 4294901760, %v38547_v2 }
 0x850   :  { %12775 = vrot.lane.b32.xlu1 %v37702_v10, %s37412_s15  ;;  %v10597_v25 = vsub.f32 %v38547_v2, %v10596_v8 }
 0x851   :  { %12773 = vrot.lane.b32.xlu0 %v37702_v10, %s37411_s14 }
 0x852   :  { %v10598_v50 = vand.u32 4294901760, %v10597_v25 }
 0x854   :  { %13229 = vrot.lane.b32.xlu1 %v37710_v22, %s37412_s15 }
 0x855   :  { %13227 = vrot.lane.b32.xlu0 %v37710_v22, %s37411_s14 }
 0x894   :  { %v10047_v62 = vpop.xlane.xlu1 %10046 }
 0x895   :  { %37208 = vrcp.f32 %v10047_v62 }
 0x897   :  { %v10050_v63 = vpop.xlane.xlu0 %10049 }
 0x898   :  { %37210 = vrcp.f32 %v10050_v63 }
 0x89f   :  { %v37209_v1 = vpop.eup %37208 }
 0x8a0   :  { %v10058_v59 = vmul.f32 %v37209_v1, %v37201_v4 }
 0x8a2   :  { %v37211_v5 = vpop.eup %37210  ;;  %v10066_v14 = vsel %vm875_vm3, %v10058_v59, 0 }
 0x8a3   :  { %v10134_v10 = vand.u32 4294901760, %v10066_v14  ;;  %v10060_v7 = vmul.f32 %v37211_v5, %v37203_v18  ;;  %v11494_v18 = vand.u32 4294901760, %v38610_v0 }
 0x8a5   :  { %v10135_v16 = vsub.f32 %v10066_v14, %v10134_v10  ;;  %34719 = vmatmul.mubr.f32.vlgmr.msra.gmra.mrb[64].mxu0 %v10134_v10  ;;  %v10515_v22 = vsel %vm875_vm3, %v10060_v7, 0  ;;  %v11495_v54 = vsub.f32 %v38610_v0, %v11494_v18 }
 0x8a6   :  { %34727 = vmatpush3.msra.mxu0 %v38474_v23  ;;  %34728 = vmatprep.mubr.msk.f32.mxu0 %vm37404_vm2, %v37403_v24  ;;  %v10583_v55 = vand.u32 4294901760, %v10515_v22 }
 0x8a7   :  { %34736 = vmatprep.subr.mxu0 %v37403_v24  ;;  %v10136_v9 = vand.u32 4294901760, %v10135_v16  ;;  %v11496_v62 = vand.u32 4294901760, %v11495_v54 }
 0x8a8   :  { %v10584_v21 = vsub.f32 %v10515_v22, %v10583_v55 }
 0x8a9   :  { %34729 = vmatmul.mubr.f32.vlgmr.msra.gmra.mrb[66].mxu0 %v10136_v9  ;;  %v10137_v44 = vsub.f32 %v10135_v16, %v10136_v9 }
 0x8aa   :  { %34737 = vmatpush3.msra.mxu0 %v38474_v23  ;;  %34738 = vmatprep.mubr.msk.f32.mxu0 %vm37404_vm2, %v37403_v24  ;;  %v10585_v23 = vand.u32 4294901760, %v10584_v21 }
 0x8ab   :  { %34746 = vmatprep.subr.mxu0 %v37403_v24  ;;  %v10138_v13 = vand.u32 4294901760, %v10137_v44 }
 0x8ac   :  { %v10586_v28 = vsub.f32 %v10584_v21, %v10585_v23 }
 0x8ad   :  { %34714 = vmatmul.mubr.f32.vlgmr.msra.gmra.mrb[72].mxu1 %v10138_v13  ;;  %34739 = vmatmul.mubr.f32.vlgmr.msra.gmra.mrb[68].mxu0 %v10134_v10 }
 0x8ae   :  { %34722 = vmatpush3.msra.mxu1 %v38482_v60  ;;  %34747 = vmatpush3.msra.mxu0 %v10598_v50  ;;  %v10587_v60 = vand.u32 4294901760, %v10586_v28 }
 0x8af   :  { %34723 = vmatprep.mubr.msk.f32.mxu1 %vm37404_vm2, %v37403_v24  ;;  %34731 = vmatprep.subr.mxu1 %v37403_v24 }
 0x8b0   :  { %34748 = vmatprep.mubr.msk.f32.mxu0 %vm37404_vm2, %v37403_v24  ;;  %34756 = vmatprep.subr.mxu0 %v37403_v24 }
 0x8b1   :  { %34724 = vmatmul.mubr.f32.vlgmr.msra.gmra.mrb[74].mxu1 %v10135_v16  ;;  %34749 = vmatmul.mubr.f32.vlgmr.msra.gmra.mrb[70].mxu0 %v10583_v55 }
 0x8b2   :  { %34732 = vmatpush3.msra.mxu1 %v10147_v29  ;;  %34757 = vmatpush3.msra.mxu0 %v10518_v3  ;;  %v11047_v29 = vand.u32 4294901760, %v11046_v12 }
 0x8b3   :  { %34733 = vmatprep.mubr.msk.f32.mxu1 %vm37404_vm2, %v37403_v24  ;;  %34741 = vmatprep.subr.mxu1 %v37403_v24 }
 0x8b4   :  { %34758 = vmatprep.mubr.msk.f32.mxu0 %vm37404_vm2, %v37403_v24  ;;  %34766 = vmatprep.subr.mxu0 %v37403_v24 }
 0x8b5   :  { %34734 = vmatmul.mubr.f32.vlgmr.msra.gmra.mrb[76].mxu1 %v10134_v10  ;;  %34759 = vmatmul.mubr.f32.vlgmr.msra.gmra.mrb[72].mxu0 %v10585_v23 }
 0x8b6   :  { %34742 = vmatpush3.msra.mxu1 %v10518_v3  ;;  %34767 = vmatpush3.msra.mxu0 %v10518_v3 }
 0x8b7   :  { %34743 = vmatprep.mubr.msk.f32.mxu1 %vm37404_vm2, %v37403_v24  ;;  %34751 = vmatprep.subr.mxu1 %v37403_v24 }
 0x8b8   :  { %34768 = vmatprep.mubr.msk.f32.mxu0 %vm37404_vm2, %v37403_v24  ;;  %34776 = vmatprep.subr.mxu0 %v37403_v24 }
 0x8b9   :  { %34744 = vmatmul.mubr.f32.vlgmr.msra.gmra.mrb[78].mxu1 %v10587_v60  ;;  %34769 = vmatmul.mubr.f32.vlgmr.msra.gmra.mrb[74].mxu0 %v10583_v55 }
 0x8ba   :  { %34752 = vmatpush3.msra.mxu1 %v38547_v2  ;;  %34777 = vmatpush3.msra.mxu0 %v11047_v29 }
 0x8bb   :  { %34753 = vmatprep.mubr.msk.f32.mxu1 %vm37404_vm2, %v37403_v24  ;;  %34761 = vmatprep.subr.mxu1 %v37403_v24 }
 0x8bc   :  { %34778 = vmatprep.mubr.msk.f32.mxu0 %vm37404_vm2, %v37403_v24  ;;  %34786 = vmatprep.subr.mxu0 %v37403_v24 }
 0x8bd   :  { %34754 = vmatmul.mubr.f32.vlgmr.msra.gmra.mrb[80].mxu1 %v10584_v21 }
 0x8be   :  { %34762 = vmatpush3.msra.mxu1 %v10596_v8  ;;  %34763 = vmatprep.mubr.msk.f32.mxu1 %vm37404_vm2, %v37403_v24 }
 0x8bf   :  { %34771 = vmatprep.subr.mxu1 %v37403_v24 }
 0x8c0   :  { %v10053_v31 = vpop.xlane.xlu1 %10052 }
 0x8c1   :  { %37212 = vrcp.f32 %v10053_v31  ;;  %34764 = vmatmul.mubr.f32.vlgmr.msra.gmra.mrb[82].mxu1 %v10583_v55 }
 0x8c2   :  { %34772 = vmatpush3.msra.mxu1 %v38557_v17  ;;  %34773 = vmatprep.mubr.msk.f32.mxu1 %vm37404_vm2, %v37403_v24 }
 0x8c3   :  { %34781 = vmatprep.subr.mxu1 %v37403_v24 }
 0x8c4   :  { %v10056_v52 = vpop.xlane.xlu0 %10055  ;;  %v11866_v42 = vpop.permute.xlu1 %11865 }
 0x8c5   :  { %37214 = vrcp.f32 %v10056_v52  ;;  %v11869_v5 = vsel %vm875_vm3, %v11866_v42, 0 }
 0x8c6   :  { %v38660_v8 = vand.u32 4294901760, %v11869_v5 }
 0x8c8   :  { %v12320_v20 = vpop.permute.xlu1 %12319  ;;  %v11868_v2 = vpop.permute.xlu0 %11867 }
 0x8c9   :  { %v11871_v7 = vsel %vm875_vm3, %v11868_v2, 0 }
 0x8ca   :  { %v38663_v22 = vand.u32 4294901760, %v11871_v7 }
 0x8cb   :  { %v37213_v37 = vpop.eup %37212 }
 0x8cc   :  { %v10062_v43 = vmul.f32 %v37213_v37, %v38525_v39  ;;  %v12322_v38 = vpop.permute.xlu1 %12321  ;;  %v12323_v39 = vsel %vm875_vm3, %v12320_v20, 0  ;;  %v38683_v44 = vsub.f32 %v11871_v7, %v38663_v22  ;;  %v12774_v29 = vpop.permute.xlu0 %12773 }
 0x8cd   :  { %v12325_v57 = vsel %vm875_vm3, %v12322_v38, 0  ;;  %v38632_v63 = vand.u32 4294901760, %v12323_v39 }
 0x8ce   :  { %v10964_v58 = vsel %vm875_vm3, %v10062_v43, 0  ;;  %v38635_v3 = vand.u32 4294901760, %v12325_v57  ;;  %v11952_v50 = vand.u32 4294901760, %v38683_v44 }
 0x8cf   :  { %v37215_v35 = vpop.eup %37214  ;;  %v11032_v4 = vand.u32 4294901760, %v10964_v58  ;;  %v38645_v59 = vsub.f32 %v12323_v39, %v38632_v63 }
 0x8d0   :  { %v10064_v33 = vmul.f32 %v37215_v35, %v38529_v56  ;;  %v38651_v14 = vsub.f32 %v12325_v57, %v38635_v3  ;;  %v11953_v28 = vsub.f32 %v38683_v44, %v11952_v50  ;;  %v12776_v31 = vpop.permute.xlu1 %12775  ;;  %v13228_v52 = vpop.permute.xlu0 %13227 }
 0x8d1   :  { %v11033_v19 = vsub.f32 %v10964_v58, %v11032_v4  ;;  %34779 = vmatmul.mubr.f32.vlgmr.msra.gmra.mrb[76].mxu0 %v11032_v4  ;;  %v12395_v16 = vand.u32 4294901760, %v38645_v59  ;;  %v13231_v37 = vsel %vm875_vm3, %v13228_v52, 0  ;;  %v12777_v58 = vsel %vm875_vm3, %v12774_v29, 0 }
 0x8d2   :  { %v11413_v47 = vsel %vm875_vm3, %v10064_v33, 0  ;;  %34787 = vmatpush3.msra.mxu0 %v38557_v17  ;;  %34788 = vmatprep.mubr.msk.f32.mxu0 %vm37404_vm2, %v37403_v24  ;;  %v12406_v9 = vand.u32 4294901760, %v38651_v14  ;;  %v11954_v60 = vand.u32 4294901760, %v11953_v28  ;;  %v38732_v43 = vand.u32 4294901760, %v13231_v37 }
 0x8d3   :  { %34796 = vmatprep.subr.mxu0 %v37403_v24  ;;  %v11034_v27 = vand.u32 4294901760, %v11033_v19  ;;  %v38620_v34 = vand.u32 4294901760, %v11413_v47  ;;  %v12396_v25 = vsub.f32 %v38645_v59, %v12395_v16  ;;  %v38748_v33 = vand.u32 4294901760, %v12777_v58 }
 0x8d4   :  { %v12407_v13 = vsub.f32 %v38651_v14, %v12406_v9  ;;  %v13302_v35 = vsub.f32 %v13231_v37, %v38732_v43 }
 0x8d5   :  { %34789 = vmatmul.mubr.f32.vlgmr.msra.gmra.mrb[78].mxu0 %v11034_v27  ;;  %v11035_v40 = vsub.f32 %v11033_v19, %v11034_v27  ;;  %v11482_v56 = vsub.f32 %v11413_v47, %v38620_v34  ;;  %v12848_v27 = vsub.f32 %v12777_v58, %v38748_v33 }
 0x8d6   :  { %34797 = vmatpush3.msra.mxu0 %v38557_v17  ;;  %34798 = vmatprep.mubr.msk.f32.mxu0 %vm37404_vm2, %v37403_v24  ;;  %v38674_v17 = vsub.f32 %v11869_v5, %v38660_v8  ;;  %v12408_v23 = vand.u32 4294901760, %v12407_v13 }
 0x8d7   :  { %34806 = vmatprep.subr.mxu0 %v37403_v24  ;;  %v11036_v41 = vand.u32 4294901760, %v11035_v40  ;;  %v11483_v1 = vand.u32 4294901760, %v11482_v56  ;;  %v12849_v40 = vand.u32 4294901760, %v12848_v27 }
 0x8d8   :  { %v11941_v21 = vand.u32 4294901760, %v38674_v17 }
 0x8d9   :  { %34774 = vmatmul.mubr.f32.vlgmr.msra.gmra.mrb[84].mxu1 %v11036_v41  ;;  %34799 = vmatmul.mubr.f32.vlgmr.msra.gmra.mrb[80].mxu0 %v11032_v4  ;;  %v11484_v10 = vsub.f32 %v11482_v56, %v11483_v1  ;;  %v12850_v57 = vsub.f32 %v12848_v27, %v12849_v40 }
 0x8da   :  { %34782 = vmatpush3.msra.mxu1 %v38566_v46  ;;  %34807 = vmatpush3.msra.mxu0 %v11496_v62  ;;  %v12397_v46 = vand.u32 4294901760, %v12396_v25 }
 0x8db   :  { %34783 = vmatprep.mubr.msk.f32.mxu1 %vm37404_vm2, %v37403_v24  ;;  %34791 = vmatprep.subr.mxu1 %v37403_v24  ;;  %v11485_v55 = vand.u32 4294901760, %v11484_v10 }
 0x8dc   :  { %34808 = vmatprep.mubr.msk.f32.mxu0 %vm37404_vm2, %v37403_v24  ;;  %34816 = vmatprep.subr.mxu0 %v37403_v24 }
 0x8dd   :  { %34784 = vmatmul.mubr.f32.vlgmr.msra.gmra.mrb[86].mxu1 %v11033_v19  ;;  %34809 = vmatmul.mubr.f32.vlgmr.msra.gmra.mrb[82].mxu0 %v38620_v34 }
 0x8de   :  { %34792 = vmatpush3.msra.mxu1 %v11045_v51  ;;  %34817 = vmatpush3.msra.mxu0 %v11416_v53  ;;  %v11942_v51 = vsub.f32 %v38674_v17, %v11941_v21 }
 0x8df   :  { %34793 = vmatprep.mubr.msk.f32.mxu1 %vm37404_vm2, %v37403_v24  ;;  %34801 = vmatprep.subr.mxu1 %v37403_v24 }
 0x8e0   :  { %34818 = vmatprep.mubr.msk.f32.mxu0 %vm37404_vm2, %v37403_v24  ;;  %34826 = vmatprep.subr.mxu0 %v37403_v24  ;;  %v11943_v12 = vand.u32 4294901760, %v11942_v51 }
 0x8e1   :  { %34794 = vmatmul.mubr.f32.vlgmr.msra.gmra.mrb[88].mxu1 %v11032_v4  ;;  %34819 = vmatmul.mubr.f32.vlgmr.msra.gmra.mrb[84].mxu0 %v11483_v1  ;;  %v12779_v4 = vsel %vm875_vm3, %v12776_v31, 0 }
 0x8e2   :  { %34802 = vmatpush3.msra.mxu1 %v11416_v53  ;;  %34827 = vmatpush3.msra.mxu0 %v11416_v53  ;;  %v13230_v53 = vpop.permute.xlu1 %13229  ;;  %v38753_v19 = vand.u32 4294901760, %v12779_v4 }
 0x8e3   :  { %34803 = vmatprep.mubr.msk.f32.mxu1 %vm37404_vm2, %v37403_v24  ;;  %34811 = vmatprep.subr.mxu1 %v37403_v24  ;;  %v13233_v42 = vsel %vm875_vm3, %v13230_v53, 0 }
 0x8e4   :  { %34828 = vmatprep.mubr.msk.f32.mxu0 %vm37404_vm2, %v37403_v24  ;;  %34861 = vmatprep.subr.mxu0 %v37403_v24  ;;  %v12859_v54 = vsub.f32 %v12779_v4, %v38753_v19 }
 0x8e5   :  { %34804 = vmatmul.mubr.f32.vlgmr.msra.gmra.mrb[90].mxu1 %v11485_v55  ;;  %34829 = vmatmul.mubr.f32.vlgmr.msra.gmra.mrb[86].mxu0 %v38620_v34 }
 0x8e6   :  { %34812 = vmatpush3.msra.mxu1 %v38610_v0  ;;  %34813 = vmatprep.mubr.msk.f32.mxu1 %vm37404_vm2, %v37403_v24  ;;  %v38737_v0 = vand.u32 4294901760, %v13233_v42  ;;  %v12860_v41 = vand.u32 4294901760, %v12859_v54 }
 0x8e7   :  { %34821 = vmatprep.subr.mxu1 %v37403_v24  ;;  %34863 = vmatprep.mubr.msk.f32.mxu0 %vm37404_vm2, %v37403_v24 }
 0x8e8   :  { %v13313_v20 = vsub.f32 %v13233_v42, %v38737_v0  ;;  %v12861_v62 = vsub.f32 %v12859_v54, %v12860_v41 }
 0x8e9   :  { %34862 = vmatpush3.xpose.msra.mxu0 %v38635_v3  ;;  %34814 = vmatmul.mubr.f32.vlgmr.msra.gmra.mrb[92].mxu1 %v11482_v56 }
 0x8ea   :  { %34822 = vmatpush3.msra.mxu1 %v11494_v18  ;;  %34866 = vmatprep.subr.mxu0 %v37403_v24  ;;  %v13303_v18 = vand.u32 4294901760, %v13302_v35  ;;  %v13314_v47 = vand.u32 4294901760, %v13313_v20 }
 0x8eb   :  { %34823 = vmatprep.mubr.msk.f32.mxu1 %vm37404_vm2, %v37403_v24  ;;  %34831 = vmatprep.subr.mxu1 %v37403_v24 }
 0x8ec   :  { %34864 = vmatmul.mubr.f32.vlgmr.msra.gmra.mrb[88].mxu0 %v12397_v46  ;;  %v13315_v38 = vsub.f32 %v13313_v20, %v13314_v47 }
 0x8ed   :  { %34867 = vmatpush3.xpose.msra.mxu0 %v12408_v23  ;;  %34824 = vmatmul.mubr.f32.vlgmr.msra.gmra.mrb[94].mxu1 %v38620_v34  ;;  %v13304_v34 = vsub.f32 %v13302_v35, %v13303_v18 }
 0x8ee   :  { %34833 = vmatprep.mubr.msk.f32.mxu1 %vm37404_vm2, %v37403_v24  ;;  %34868 = vmatprep.mubr.msk.f32.mxu0 %vm37404_vm2, %v37403_v24  ;;  %v13316_v56 = vand.u32 4294901760, %v13315_v38 }
 0x8ef   :  { %34871 = vmatprep.subr.mxu0 %v37403_v24  ;;  %v13305_v39 = vand.u32 4294901760, %v13304_v34 }
 0x8f1   :  { %34832 = vmatpush3.xpose.msra.mxu1 %v38663_v22 }
 0x8f2   :  { %34836 = vmatprep.subr.mxu1 %v37403_v24 }
 0x8f4   :  { %34834 = vmatmul.mubr.f32.vlgmr.msra.gmra.mrb[96].mxu1 %v11943_v12  ;;  %34869 = vmatmul.mubr.f32.vlgmr.msra.gmra.mrb[88].mxu0 %v38632_v63 }
 0x8f5   :  { %34872 = vmatpush3.xpose.msra.mxu0 %v38651_v14  ;;  %34837 = vmatpush3.xpose.msra.mxu1 %v11954_v60 }
 0x8f6   :  { %34838 = vmatprep.mubr.msk.f32.mxu1 %vm37404_vm2, %v37403_v24  ;;  %34841 = vmatprep.subr.mxu1 %v37403_v24 }
 0x8f7   :  { %34873 = vmatprep.mubr.msk.f32.mxu0 %vm37404_vm2, %v37403_v24  ;;  %34876 = vmatprep.subr.mxu0 %v37403_v24 }
 0x8fc   :  { %34839 = vmatmul.mubr.f32.vlgmr.msra.gmra.mrb[96].mxu1 %v38660_v8  ;;  %34874 = vmatmul.mubr.f32.vlgmr.msra.gmra.mrb[88].mxu0 %v38645_v59 }
 0x8fd   :  { %34842 = vmatpush3.xpose.msra.mxu1 %v38683_v44  ;;  %34877 = vmatpush3.xpose.msra.mxu0 %v38635_v3 }
 0x8fe   :  { %34843 = vmatprep.mubr.msk.f32.mxu1 %vm37404_vm2, %v37403_v24  ;;  %34846 = vmatprep.subr.mxu1 %v37403_v24 }
 0x8ff   :  { %34878 = vmatprep.mubr.msk.f32.mxu0 %vm37404_vm2, %v37403_v24  ;;  %34881 = vmatprep.subr.mxu0 %v37403_v24 }
 0x904   :  { %34844 = vmatmul.mubr.f32.vlgmr.msra.gmra.mrb[96].mxu1 %v38674_v17  ;;  %34879 = vmatmul.mubr.f32.vlgmr.msra.gmra.mrb[88].mxu0 %v12395_v16 }
 0x905   :  { %34847 = vmatpush3.xpose.msra.mxu1 %v38663_v22  ;;  %34882 = vmatpush3.xpose.msra.mxu0 %v12406_v9 }
 0x906   :  { %34848 = vmatprep.mubr.msk.f32.mxu1 %vm37404_vm2, %v37403_v24  ;;  %34851 = vmatprep.subr.mxu1 %v37403_v24 }
 0x907   :  { %34883 = vmatprep.mubr.msk.f32.mxu0 %vm37404_vm2, %v37403_v24  ;;  %34886 = vmatprep.subr.mxu0 %v37403_v24 }
 0x90c   :  { %34849 = vmatmul.mubr.f32.vlgmr.msra.gmra.mrb[96].mxu1 %v11941_v21  ;;  %34884 = vmatmul.mubr.f32.vlgmr.msra.gmra.mrb[88].mxu0 %v38632_v63 }
 0x90d   :  { %34852 = vmatpush3.xpose.msra.mxu1 %v11952_v50  ;;  %34887 = vmatpush3.xpose.msra.mxu0 %v38635_v3  ;;  %v12862_v3 = vand.u32 4294901760, %v12861_v62 }
 0x90e   :  { %34853 = vmatprep.mubr.msk.f32.mxu1 %vm37404_vm2, %v37403_v24  ;;  %34856 = vmatprep.subr.mxu1 %v37403_v24 }
 0x90f   :  { %34888 = vmatprep.mubr.msk.f32.mxu0 %vm37404_vm2, %v37403_v24  ;;  %34921 = vmatprep.subr.mxu0 %v37403_v24 }
 0x914   :  { %34854 = vmatmul.mubr.f32.vlgmr.msra.gmra.mrb[96].mxu1 %v38660_v8  ;;  %34889 = vmatmul.mubr.f32.vlgmr.msra.gmra.mrb[88].mxu0 %v38632_v63  ;;  %v12851_v63 = vand.u32 4294901760, %v12850_v57 }
 0x915   :  { %34857 = vmatpush3.xpose.msra.mxu1 %v38663_v22  ;;  %34922 = vmatpush3.xpose.msra.mxu0 %v38737_v0 }
 0x916   :  { %34923 = vmatprep.mubr.msk.f32.mxu0 %vm37404_vm2, %v37403_v24  ;;  %34926 = vmatprep.subr.mxu0 %v37403_v24 }
 0x917   :  { %34858 = vmatprep.mubr.msk.f32.mxu1 %vm37404_vm2, %v37403_v24  ;;  %34891 = vmatprep.subr.mxu1 %v37403_v24 }
 0x918   :  { %34924 = vmatmul.mubr.f32.vlgmr.msra.gmra.mrb[90].mxu0 %v13305_v39 }
 0x919   :  { %34927 = vmatpush3.xpose.msra.mxu0 %v13316_v56  ;;  %34928 = vmatprep.mubr.msk.f32.mxu0 %vm37404_vm2, %v37403_v24 }
 0x91a   :  { %34931 = vmatprep.subr.mxu0 %v37403_v24 }
 0x91c   :  { %34859 = vmatmul.mubr.f32.vlgmr.msra.gmra.mrb[96].mxu1 %v38660_v8 }
 0x91d   :  { %34892 = vmatpush3.xpose.msra.mxu1 %v38753_v19  ;;  %34893 = vmatprep.mubr.msk.f32.mxu1 %vm37404_vm2, %v37403_v24 }
 0x91e   :  { %34896 = vmatprep.subr.mxu1 %v37403_v24 }
 0x920   :  { %34894 = vmatmul.mubr.f32.vlgmr.msra.gmra.mrb[98].mxu1 %v12851_v63  ;;  %34929 = vmatmul.mubr.f32.vlgmr.msra.gmra.mrb[90].mxu0 %v38732_v43 }
 0x921   :  { %34897 = vmatpush3.xpose.msra.mxu1 %v12862_v3  ;;  %34932 = vmatpush3.xpose.msra.mxu0 %v13313_v20 }
 0x922   :  { %34898 = vmatprep.mubr.msk.f32.mxu1 %vm37404_vm2, %v37403_v24  ;;  %34901 = vmatprep.subr.mxu1 %v37403_v24 }
 0x923   :  { %34933 = vmatprep.mubr.msk.f32.mxu0 %vm37404_vm2, %v37403_v24  ;;  %34936 = vmatprep.subr.mxu0 %v37403_v24 }
 0x928   :  { %34899 = vmatmul.mubr.f32.vlgmr.msra.gmra.mrb[98].mxu1 %v38748_v33  ;;  %34934 = vmatmul.mubr.f32.vlgmr.msra.gmra.mrb[90].mxu0 %v13302_v35 }
 0x929   :  { %34902 = vmatpush3.xpose.msra.mxu1 %v12859_v54  ;;  %34937 = vmatpush3.xpose.msra.mxu0 %v38737_v0 }
 0x92a   :  { %34903 = vmatprep.mubr.msk.f32.mxu1 %vm37404_vm2, %v37403_v24  ;;  %34906 = vmatprep.subr.mxu1 %v37403_v24 }
 0x92b   :  { %34938 = vmatprep.mubr.msk.f32.mxu0 %vm37404_vm2, %v37403_v24  ;;  %34941 = vmatprep.subr.mxu0 %v37403_v24 }
 0x930   :  { %34904 = vmatmul.mubr.f32.vlgmr.msra.gmra.mrb[98].mxu1 %v12848_v27  ;;  %34939 = vmatmul.mubr.f32.vlgmr.msra.gmra.mrb[90].mxu0 %v13303_v18 }
 0x931   :  { %34907 = vmatpush3.xpose.msra.mxu1 %v38753_v19  ;;  %34942 = vmatpush3.xpose.msra.mxu0 %v13314_v47 }
 0x932   :  { %34908 = vmatprep.mubr.msk.f32.mxu1 %vm37404_vm2, %v37403_v24  ;;  %34911 = vmatprep.subr.mxu1 %v37403_v24 }
 0x933   :  { %34943 = vmatprep.mubr.msk.f32.mxu0 %vm37404_vm2, %v37403_v24  ;;  %34946 = vmatprep.subr.mxu0 %v37403_v24 }
 0x938   :  { %34909 = vmatmul.mubr.f32.vlgmr.msra.gmra.mrb[98].mxu1 %v12849_v40  ;;  %34944 = vmatmul.mubr.f32.vlgmr.msra.gmra.mrb[90].mxu0 %v38732_v43 }
 0x939   :  { %34912 = vmatpush3.xpose.msra.mxu1 %v12860_v41  ;;  %34947 = vmatpush3.xpose.msra.mxu0 %v38737_v0 }
 0x93a   :  { %34913 = vmatprep.mubr.msk.f32.mxu1 %vm37404_vm2, %v37403_v24  ;;  %34916 = vmatprep.subr.mxu1 %v37403_v24 }
 0x93b   :  { %34948 = vmatprep.mubr.msk.f32.mxu0 %vm37404_vm2, %v37403_v24  ;;  %34956 = vmatprep.subr.mxu0 %v37403_v24 }
 0x940   :  { %34914 = vmatmul.mubr.f32.vlgmr.msra.gmra.mrb[98].mxu1 %v38748_v33  ;;  %34949 = vmatmul.mubr.f32.vlgmr.msra.gmra.mrb[90].mxu0 %v38732_v43 }
 0x941   :  { %34917 = vmatpush3.xpose.msra.mxu1 %v38753_v19  ;;  %34918 = vmatprep.mubr.msk.f32.mxu1 %vm37404_vm2, %v37403_v24 }
 0x942   :  { %34951 = vmatprep.subr.mxu1 %v37403_v24  ;;  %34958 = vmatprep.mubr.msk.f32.mxu0 %vm37404_vm2, %v37403_v24 }
 0x948   :  { %34919 = vmatmul.mubr.f32.vlgmr.msra.gmra.mrb[98].mxu1 %v38748_v33 }
 0x949   :  { %34953 = vmatprep.mubr.msk.f32.mxu1 %vm37404_vm2, %v37403_v24 }
 0x978   :  { %v10216_v1 = vpop.f32.mrb[64].mxu0 }
 0x979   :  { %v34720_v2 = vpop.f32.mrb[65].mxu0 }
 0x97c   :  { %v10364_v59 = vpop.f32.mrb[66].mxu0 }
 0x97d   :  { %v34730_v5 = vpop.f32.mrb[67].mxu0 }
 0x980   :  { %v10140_v14 = vpop.f32.mrb[72].mxu1  ;;  %v10510_v10 = vpop.f32.mrb[68].mxu0 }
 0x981   :  { %v10217_v7 = vadd.f32 %v10216_v1, %v10140_v14  ;;  %v34715_v8 = vpop.f32.mrb[73].mxu1  ;;  %v34740_v16 = vpop.f32.mrb[69].mxu0 }
 0x984   :  { %v10290_v22 = vpop.f32.mrb[74].mxu1  ;;  %v10665_v9 = vpop.f32.mrb[70].mxu0 }
 0x985   :  { %v10291_v55 = vadd.f32 %v10290_v22, %v10217_v7  ;;  %v34725_v17 = vpop.f32.mrb[75].mxu1  ;;  %v34750_v25 = vpop.f32.mrb[71].mxu0 }
 0x987   :  { %v10365_v44 = vadd.f32 %v10364_v59, %v10291_v55 }
 0x988   :  { %v10438_v13 = vpop.f32.mrb[76].mxu1  ;;  %v10813_v21 = vpop.f32.mrb[72].mxu0 }
 0x989   :  { %v10439_v46 = vadd.f32 %v10438_v13, %v10365_v44  ;;  %v34735_v50 = vpop.f32.mrb[77].mxu1  ;;  %v34760_v23 = vpop.f32.mrb[73].mxu0 }
 0x98b   :  { %v10511_v51 = vadd.f32 %v10510_v10, %v10439_v46 }
 0x98c   :  { %v10589_v28 = vpop.f32.mrb[78].mxu1  ;;  %v10959_v12 = vpop.f32.mrb[74].mxu0 }
 0x98d   :  { %v38820_v60 = vadd.f32 %v10511_v51, %v38507_v49  ;;  %v10666_v29 = vadd.f32 %v10665_v9, %v10589_v28  ;;  %v34745_v31 = vpop.f32.mrb[79].mxu1  ;;  %v34770_v52 = vpop.f32.mrb[75].mxu0 }
 0x990   :  { %v10739_v53 = vpop.f32.mrb[80].mxu1 }
 0x991   :  { %v10740_v37 = vadd.f32 %v10739_v53, %v10666_v29  ;;  %v34755_v42 = vpop.f32.mrb[81].mxu1 }
 0x993   :  { %v10814_v43 = vadd.f32 %v10813_v21, %v10740_v37 }
 0x994   :  { %v10887_v0 = vpop.f32.mrb[82].mxu1 }
 0x995   :  { %v10888_v35 = vadd.f32 %v10887_v0, %v10814_v43  ;;  %v34765_v58 = vpop.f32.mrb[83].mxu1 }
 0x997   :  { %v10960_v20 = vadd.f32 %v10959_v12, %v10888_v35 }
 0x999   :  { %v38823_v4 = vadd.f32 %v10960_v20, %v38509_v32 }
 0x9a4   :  { %v11114_v33 = vpop.f32.mrb[76].mxu0 }
 0x9a5   :  { %v34780_v18 = vpop.f32.mrb[77].mxu0 }
 0x9a8   :  { %v11262_v19 = vpop.f32.mrb[78].mxu0 }
 0x9a9   :  { %v34790_v47 = vpop.f32.mrb[79].mxu0 }
 0x9ac   :  { %v11038_v49 = vpop.f32.mrb[84].mxu1  ;;  %v11408_v27 = vpop.f32.mrb[80].mxu0 }
 0x9ad   :  { %v11115_v34 = vadd.f32 %v11114_v33, %v11038_v49  ;;  %v34775_v54 = vpop.f32.mrb[85].mxu1  ;;  %v34800_v38 = vpop.f32.mrb[81].mxu0 }
 0x9b0   :  { %v11188_v40 = vpop.f32.mrb[86].mxu1  ;;  %v11563_v39 = vpop.f32.mrb[82].mxu0 }
 0x9b1   :  { %v11189_v41 = vadd.f32 %v11188_v40, %v11115_v34  ;;  %v34785_v56 = vpop.f32.mrb[87].mxu1  ;;  %v34810_v57 = vpop.f32.mrb[83].mxu0 }
 0x9b3   :  { %v11263_v62 = vadd.f32 %v11262_v19, %v11189_v41 }
 0x9b4   :  { %v11336_v63 = vpop.f32.mrb[88].mxu1  ;;  %v11711_v3 = vpop.f32.mrb[84].mxu0 }
 0x9b5   :  { %v11337_v1 = vadd.f32 %v11336_v63, %v11263_v62  ;;  %v34795_v32 = vpop.f32.mrb[89].mxu1  ;;  %v34820_v2 = vpop.f32.mrb[85].mxu0 }
 0x9b7   :  { %v11409_v59 = vadd.f32 %v11408_v27, %v11337_v1 }
 0x9b8   :  { %v11487_v5 = vpop.f32.mrb[90].mxu1  ;;  %v11857_v14 = vpop.f32.mrb[86].mxu0 }
 0x9b9   :  { %v11564_v10 = vadd.f32 %v11563_v39, %v11487_v5  ;;  %v34805_v7 = vpop.f32.mrb[91].mxu1  ;;  %v34830_v8 = vpop.f32.mrb[87].mxu0  ;;  %v38826_v16 = vadd.f32 %v11409_v59, %v38511_v45 }
 0x9bc   :  { %v11637_v22 = vpop.f32.mrb[92].mxu1 }
 0x9bd   :  { %v11638_v9 = vadd.f32 %v11637_v22, %v11564_v10  ;;  %v34815_v55 = vpop.f32.mrb[93].mxu1 }
 0x9bf   :  { %v11712_v17 = vadd.f32 %v11711_v3, %v11638_v9 }
 0x9c0   :  { %v11785_v25 = vpop.f32.mrb[94].mxu1 }
 0x9c1   :  { %v11786_v44 = vadd.f32 %v11785_v25, %v11712_v17  ;;  %v34825_v13 = vpop.f32.mrb[95].mxu1 }
 0x9c3   :  { %v11858_v21 = vadd.f32 %v11857_v14, %v11786_v44 }
 0x9c5   :  { %v38829_v46 = vadd.f32 %v11858_v21, %v38513_v11 }
 0x9e7   :  { %v12769_v50 = vpop.f32.mrb[88].mxu0 }
 0x9e8   :  { %v36652_v23 = vadd.f32 %v12769_v50, %v37571_v30  ;;  %v34890_v51 = vpop.f32.mrb[89].mxu0 }
 0x9ea   :  { %v13684_v28 = vsel %vm875_vm3, %v36652_v23, -inf }
 0x9eb   :  { %13685 = vmax.xlane.f32.xlu1 %v13684_v28 }
 0x9ef   :  { %v12315_v45 = vpop.f32.mrb[96].mxu1 }
 0x9f0   :  { %v36651_v12 = vadd.f32 %v12315_v45, %v37571_v30  ;;  %v34860_v29 = vpop.f32.mrb[97].mxu1 }
 0x9f2   :  { %v13681_v31 = vsel %vm875_vm3, %v36651_v12, -inf }
 0x9f3   :  { %13682 = vmax.xlane.f32.xlu0 %v13681_v31 }
 0xa13   :  { %v13677_v52 = vpop.f32.mrb[90].mxu0 }
 0xa14   :  { %v34950_v53 = vpop.f32.mrb[91].mxu0  ;;  %v36654_v43 = vadd.f32 %v13677_v52, %v37571_v30 }
 0xa16   :  { %v13690_v35 = vsel %vm875_vm3, %v36654_v43, -inf }
 0xa1b   :  { %v13223_v37 = vpop.f32.mrb[98].mxu1 }
 0xa1c   :  { %v36653_v11 = vadd.f32 %v13223_v37, %v37571_v30  ;;  %v34920_v42 = vpop.f32.mrb[99].mxu1 }
 0xa1e   :  { %v13687_v0 = vsel %vm875_vm3, %v36653_v11, -inf }
 0xa1f   :  { %13688 = vmax.xlane.f32.xlu0 %v13687_v0 }
 0xa23   :  { %13691 = vmax.xlane.f32.xlu0 %v13690_v35 }
 0xa78   :  { %v13686_v58 = vpop.xlane.xlu1 %13685 }
 0xa79   :  { %v13694_v20 = vsub.f32 %v36652_v23, %v13686_v58 }
 0xa7b   :  { %v13699_v33 = vmul.f32 1.442695, %v13694_v20 }
 0xa7d   :  { %37216 = vpow2.f32 %v13699_v33 }
 0xa80   :  { %v13683_v18 = vpop.xlane.xlu0 %13682 }
 0xa81   :  { %v13693_v19 = vsub.f32 %v36651_v12, %v13683_v18 }
 0xa83   :  { %v13697_v47 = vmul.f32 1.442695, %v13693_v19 }
 0xa85   :  { %37218 = vpow2.f32 %v13697_v47 }
 0xa87   :  { %v38839_v49 = vpop.eup %37216 }
 0xa88   :  { %v13708_v27 = vsel %vm875_vm3, %v38839_v49, 0.0 }
 0xa89   :  { %13709 = vadd.xlane.f32.xlu0 %v13708_v27 }
 0xa8f   :  { %v37219_v30 = vpop.eup %37218 }
 0xa90   :  { %v13705_v34 = vsel %vm875_vm3, %v37219_v30, 0.0 }
 0xa91   :  { %13706 = vadd.xlane.f32.xlu1 %v13705_v34 }
 0xa9f   :  { %13726 = vrot.lane.b32.xlu0 %v37690_v61, %s37405_s30 }
 0xaa3   :  { %14632 = vrot.lane.b32.xlu0 %v37704_v15, %s37405_s30 }
 0xaac   :  { %v13689_v54 = vpop.xlane.xlu0 %13688 }
 0xaad   :  { %v13695_v38 = vsub.f32 %v36653_v11, %v13689_v54 }
 0xaaf   :  { %v13701_v41 = vmul.f32 1.442695, %v13695_v38 }
 0xab0   :  { %v13692_v40 = vpop.xlane.xlu0 %13691 }
 0xab1   :  { %v13696_v39 = vsub.f32 %v36654_v43, %v13692_v40 }
 0xab3   :  { %v13703_v56 = vmul.f32 1.442695, %v13696_v39 }
 0xab5   :  { %37220 = vpow2.f32 %v13703_v56 }
 0xab6   :  { %37222 = vpow2.f32 %v13701_v41 }
 0xabf   :  { %v38848_v57 = vpop.eup %37220 }
 0xac0   :  { %v13714_v62 = vsel %vm875_vm3, %v38848_v57, 0.0  ;;  %v38852_v63 = vpop.eup %37222 }
 0xac1   :  { %13715 = vadd.xlane.f32.xlu1 %v13714_v62  ;;  %v13711_v61 = vsel %vm875_vm3, %v38852_v63, 0.0 }
 0xac5   :  { %13712 = vadd.xlane.f32.xlu1 %v13711_v61 }
 0xad6   :  { %14179 = vrot.lane.b32.xlu1 %v37696_v6, %s37405_s30 }
 0xada   :  { %15085 = vrot.lane.b32.xlu1 %v37712_v26, %s37405_s30 }
 0xb16   :  { %v13710_v15 = vpop.xlane.xlu0 %13709 }
 0xb1a   :  { %v13727_v3 = vpop.permute.xlu0 %13726 }
 0xb1b   :  { %v13733_v1 = vand.u32 4294901760, %v13727_v3 }
 0xb1d   :  { %v13810_v32 = vsub.f32 %v13727_v3, %v13733_v1  ;;  %34952 = vmatpush3.msra.mxu1 %v13733_v1 }
 0xb1e   :  { %v13707_v2 = vpop.xlane.xlu1 %13706  ;;  %34961 = vmatprep.subr.mxu1 %v37403_v24  ;;  %v14633_v45 = vpop.permute.xlu0 %14632 }
 0xb1f   :  { %v13811_v59 = vand.u32 4294901760, %v13810_v32  ;;  %37224 = vrcp.f32 %v13707_v2  ;;  %v38881_v52 = vand.u32 4294901760, %v14633_v45 }
 0xb20   :  { %37226 = vrcp.f32 %v13710_v15 }
 0xb21   :  { %v13812_v5 = vsub.f32 %v13810_v32, %v13811_v59  ;;  %v14716_v43 = vsub.f32 %v14633_v45, %v38881_v52 }
 0xb23   :  { %v13813_v14 = vand.u32 4294901760, %v13812_v5  ;;  %v14717_v18 = vand.u32 4294901760, %v14716_v43 }
 0xb25   :  { %34957 = vmatpush3.msra.mxu0 %v13813_v14  ;;  %v14718_v34 = vsub.f32 %v14716_v43, %v14717_v18 }
 0xb26   :  { %34966 = vmatprep.subr.mxu0 %v37403_v24 }
 0xb27   :  { %v14719_v41 = vand.u32 4294901760, %v14718_v34 }
 0xb29   :  { %v37225_v10 = vpop.eup %37224 }
 0xb2a   :  { %v13718_v6 = vmul.f32 %v37225_v10, %v37219_v30  ;;  %v37227_v17 = vpop.eup %37226 }
 0xb2b   :  { %v13720_v25 = vmul.f32 %v37227_v17, %v38839_v49 }
 0xb2c   :  { %v13730_v7 = vsel %vm875_vm3, %v13718_v6, 0 }
 0xb2d   :  { %v13798_v26 = vand.u32 4294901760, %v13730_v7  ;;  %v14183_v44 = vsel %vm875_vm3, %v13720_v25, 0 }
 0xb2e   :  { %v14251_v13 = vand.u32 4294901760, %v14183_v44 }
 0xb2f   :  { %v13799_v8 = vsub.f32 %v13730_v7, %v13798_v26  ;;  %34959 = vmatmul.mubr.f32.vlgmr.msra.gmra.mrb[92].mxu0 %v13798_v26 }
 0xb30   :  { %34967 = vmatpush3.msra.mxu0 %v13733_v1  ;;  %34968 = vmatprep.mubr.msk.f32.mxu0 %vm37404_vm2, %v37403_v24  ;;  %v14252_v21 = vsub.f32 %v14183_v44, %v14251_v13 }
 0xb31   :  { %34976 = vmatprep.subr.mxu0 %v37403_v24  ;;  %v13800_v22 = vand.u32 4294901760, %v13799_v8 }
 0xb32   :  { %v14253_v23 = vand.u32 4294901760, %v14252_v21 }
 0xb33   :  { %34969 = vmatmul.mubr.f32.vlgmr.msra.gmra.mrb[94].mxu0 %v13800_v22  ;;  %v13801_v9 = vsub.f32 %v13799_v8, %v13800_v22 }
 0xb34   :  { %34977 = vmatpush3.msra.mxu0 %v13733_v1  ;;  %34978 = vmatprep.mubr.msk.f32.mxu0 %vm37404_vm2, %v37403_v24  ;;  %v14254_v28 = vsub.f32 %v14252_v21, %v14253_v23 }
 0xb35   :  { %v13802_v55 = vand.u32 4294901760, %v13801_v9  ;;  %34986 = vmatprep.subr.mxu0 %v37403_v24 }
 0xb36   :  { %v14255_v31 = vand.u32 4294901760, %v14254_v28  ;;  %v37313_v28 = vld [vmem:[%s40903_s0] sm:$0xff] }
 0xb37   :  { %34954 = vmatmul.mubr.f32.vlgmr.msra.gmra.mrb[100].mxu1 %v13802_v55  ;;  %34979 = vmatmul.mubr.f32.vlgmr.msra.gmra.mrb[96].mxu0 %v13798_v26 }
 0xb38   :  { %34962 = vmatpush3.msra.mxu1 %v13810_v32  ;;  %34963 = vmatprep.mubr.msk.f32.mxu1 %vm37404_vm2, %v37403_v24 }
 0xb39   :  { %34971 = vmatprep.subr.mxu1 %v37403_v24  ;;  %34988 = vmatprep.mubr.msk.f32.mxu0 %vm37404_vm2, %v37403_v24 }
 0xb3b   :  { %34964 = vmatmul.mubr.f32.vlgmr.msra.gmra.mrb[102].mxu1 %v13799_v8 }
 0xb3c   :  { %34972 = vmatpush3.msra.mxu1 %v13811_v59  ;;  %34973 = vmatprep.mubr.msk.f32.mxu1 %vm37404_vm2, %v37403_v24 }
 0xb3d   :  { %34981 = vmatprep.subr.mxu1 %v37403_v24 }
 0xb3f   :  { %34974 = vmatmul.mubr.f32.vlgmr.msra.gmra.mrb[104].mxu1 %v13798_v26 }
 0xb40   :  { %34983 = vmatprep.mubr.msk.f32.mxu1 %vm37404_vm2, %v37403_v24 }
 0xb4e   :  { %v13716_v50 = vpop.xlane.xlu1 %13715 }
 0xb4f   :  { %37228 = vrcp.f32 %v13716_v50 }
 0xb52   :  { %v13713_v51 = vpop.xlane.xlu1 %13712 }
 0xb53   :  { %37230 = vrcp.f32 %v13713_v51 }
 0xb56   :  { %v14180_v12 = vpop.permute.xlu1 %14179 }
 0xb57   :  { %v14186_v29 = vand.u32 4294901760, %v14180_v12 }
 0xb59   :  { %v14263_v53 = vsub.f32 %v14180_v12, %v14186_v29  ;;  %34982 = vmatpush3.msra.mxu1 %v14186_v29  ;;  %v37229_v37 = vpop.eup %37228 }
 0xb5a   :  { %34984 = vmatmul.mubr.f32.vlgmr.msra.gmra.mrb[106].mxu1 %v14255_v31  ;;  %34991 = vmatprep.subr.mxu1 %v37403_v24  ;;  %v13724_v35 = vmul.f32 %v37229_v37, %v38848_v57  ;;  %v15086_v47 = vpop.permute.xlu1 %15085 }
 0xb5b   :  { %v14264_v11 = vand.u32 4294901760, %v14263_v53  ;;  %34992 = vmatpush3.msra.mxu1 %v14263_v53  ;;  %34993 = vmatprep.mubr.msk.f32.mxu1 %vm37404_vm2, %v37403_v24  ;;  %v15092_v30 = vand.u32 4294901760, %v15086_v47 }
 0xb5c   :  { %35001 = vmatprep.subr.mxu1 %v37403_v24  ;;  %v15089_v49 = vsel %vm875_vm3, %v13724_v35, 0 }
 0xb5d   :  { %v37231_v42 = vpop.eup %37230  ;;  %v14265_v0 = vsub.f32 %v14263_v53, %v14264_v11  ;;  %v15157_v38 = vand.u32 4294901760, %v15089_v49  ;;  %v15169_v39 = vsub.f32 %v15086_v47, %v15092_v30 }
 0xb5e   :  { %v13722_v58 = vmul.f32 %v37231_v42, %v38852_v63  ;;  %34994 = vmatmul.mubr.f32.vlgmr.msra.gmra.mrb[108].mxu1 %v14252_v21 }
 0xb5f   :  { %v14266_v20 = vand.u32 4294901760, %v14265_v0  ;;  %35002 = vmatpush3.msra.mxu1 %v14264_v11  ;;  %35003 = vmatprep.mubr.msk.f32.mxu1 %vm37404_vm2, %v37403_v24  ;;  %v15158_v57 = vsub.f32 %v15089_v49, %v15157_v38  ;;  %v15170_v62 = vand.u32 4294901760, %v15169_v39 }
 0xb60   :  { %35011 = vmatprep.subr.mxu1 %v37403_v24  ;;  %v14636_v33 = vsel %vm875_vm3, %v13722_v58, 0 }
 0xb61   :  { %34987 = vmatpush3.msra.mxu0 %v14266_v20  ;;  %v14704_v19 = vand.u32 4294901760, %v14636_v33  ;;  %v15159_v63 = vand.u32 4294901760, %v15158_v57  ;;  %v15171_v61 = vsub.f32 %v15169_v39, %v15170_v62 }
 0xb62   :  { %34989 = vmatmul.mubr.f32.vlgmr.msra.gmra.mrb[98].mxu0 %v14251_v13  ;;  %34996 = vmatprep.subr.mxu0 %v37403_v24 }
 0xb63   :  { %35004 = vmatmul.mubr.f32.vlgmr.msra.gmra.mrb[110].mxu1 %v14251_v13  ;;  %34997 = vmatpush3.msra.mxu0 %v14186_v29  ;;  %v14705_v27 = vsub.f32 %v14636_v33, %v14704_v19  ;;  %v15160_v15 = vsub.f32 %v15158_v57, %v15159_v63  ;;  %v15172_v3 = vand.u32 4294901760, %v15171_v61 }
 0xb64   :  { %35012 = vmatpush3.msra.mxu1 %v38881_v52  ;;  %34998 = vmatprep.mubr.msk.f32.mxu0 %vm37404_vm2, %v37403_v24 }
 0xb65   :  { %35006 = vmatprep.subr.mxu0 %v37403_v24  ;;  %35013 = vmatprep.mubr.msk.f32.mxu1 %vm37404_vm2, %v37403_v24  ;;  %v14706_v54 = vand.u32 4294901760, %v14705_v27  ;;  %v15161_v1 = vand.u32 4294901760, %v15160_v15 }
 0xb66   :  { %34999 = vmatmul.mubr.f32.vlgmr.msra.gmra.mrb[100].mxu0 %v14253_v23  ;;  %35021 = vmatprep.subr.mxu1 %v37403_v24  ;;  %v38945_v23 = vld [vmem:[%s40908_s5] sm:$0xff] }
 0xb67   :  { %35007 = vmatpush3.msra.mxu0 %v14186_v29  ;;  %35008 = vmatprep.mubr.msk.f32.mxu0 %vm37404_vm2, %v37403_v24  ;;  %v14707_v40 = vsub.f32 %v14705_v27, %v14706_v54 }
 0xb68   :  { %35016 = vmatprep.subr.mxu0 %v37403_v24 }
 0xb69   :  { %v14708_v56 = vand.u32 4294901760, %v14707_v40 }
 0xb6a   :  { %35009 = vmatmul.mubr.f32.vlgmr.msra.gmra.mrb[102].mxu0 %v14251_v13  ;;  %v15547_v13 = vsub.s32 6, %v37594_v36 }
 0xb6b   :  { %35017 = vmatpush3.msra.mxu0 %v14719_v41  ;;  %35014 = vmatmul.mubr.f32.vlgmr.msra.gmra.mrb[112].mxu1 %v14708_v56 }
 0xb6c   :  { %35022 = vmatpush3.msra.mxu1 %v14716_v43  ;;  %35018 = vmatprep.mubr.msk.f32.mxu0 %vm37404_vm2, %v37403_v24  ;;  %v38948_v51 = vrot.slane %v38945_v23, %v15547_v13 }
 0xb6d   :  { %35026 = vmatprep.subr.mxu0 %v37403_v24  ;;  %35023 = vmatprep.mubr.msk.f32.mxu1 %vm37404_vm2, %v37403_v24 }
 0xb6e   :  { %35019 = vmatmul.mubr.f32.vlgmr.msra.gmra.mrb[104].mxu0 %v14704_v19  ;;  %35031 = vmatprep.subr.mxu1 %v37403_v24 }
 0xb6f   :  { %35027 = vmatpush3.msra.mxu0 %v38881_v52  ;;  %35024 = vmatmul.mubr.f32.vlgmr.msra.gmra.mrb[114].mxu1 %v14705_v27 }
 0xb70   :  { %35032 = vmatpush3.msra.mxu1 %v14717_v18  ;;  %35028 = vmatprep.mubr.msk.f32.mxu0 %vm37404_vm2, %v37403_v24 }
 0xb71   :  { %35036 = vmatprep.subr.mxu0 %v37403_v24  ;;  %35033 = vmatprep.mubr.msk.f32.mxu1 %vm37404_vm2, %v37403_v24 }
 0xb72   :  { %35029 = vmatmul.mubr.f32.vlgmr.msra.gmra.mrb[106].mxu0 %v14706_v54  ;;  %35041 = vmatprep.subr.mxu1 %v37403_v24 }
 0xb73   :  { %35037 = vmatpush3.msra.mxu0 %v38881_v52  ;;  %35034 = vmatmul.mubr.f32.vlgmr.msra.gmra.mrb[116].mxu1 %v14704_v19 }
 0xb74   :  { %35042 = vmatpush3.msra.mxu1 %v15092_v30  ;;  %35038 = vmatprep.mubr.msk.f32.mxu0 %vm37404_vm2, %v37403_v24 }
 0xb75   :  { %35046 = vmatprep.subr.mxu0 %v37403_v24  ;;  %35043 = vmatprep.mubr.msk.f32.mxu1 %vm37404_vm2, %v37403_v24 }
 0xb76   :  { %35039 = vmatmul.mubr.f32.vlgmr.msra.gmra.mrb[108].mxu0 %v14704_v19  ;;  %35051 = vmatprep.subr.mxu1 %v37403_v24 }
 0xb77   :  { %35047 = vmatpush3.msra.mxu0 %v15172_v3  ;;  %35044 = vmatmul.mubr.f32.vlgmr.msra.gmra.mrb[118].mxu1 %v15161_v1 }
 0xb78   :  { %35052 = vmatpush3.msra.mxu1 %v15169_v39  ;;  %35048 = vmatprep.mubr.msk.f32.mxu0 %vm37404_vm2, %v37403_v24 }
 0xb79   :  { %35056 = vmatprep.subr.mxu0 %v37403_v24  ;;  %35053 = vmatprep.mubr.msk.f32.mxu1 %vm37404_vm2, %v37403_v24 }
 0xb7a   :  { %35049 = vmatmul.mubr.f32.vlgmr.msra.gmra.mrb[110].mxu0 %v15157_v38  ;;  %35061 = vmatprep.subr.mxu1 %v37403_v24 }
 0xb7b   :  { %35057 = vmatpush3.msra.mxu0 %v15092_v30  ;;  %35054 = vmatmul.mubr.f32.vlgmr.msra.gmra.mrb[120].mxu1 %v15158_v57 }
 0xb7c   :  { %35062 = vmatpush3.msra.mxu1 %v15170_v62  ;;  %35058 = vmatprep.mubr.msk.f32.mxu0 %vm37404_vm2, %v37403_v24 }
 0xb7d   :  { %35066 = vmatprep.subr.mxu0 %v37403_v24  ;;  %35063 = vmatprep.mubr.msk.f32.mxu1 %vm37404_vm2, %v37403_v24 }
 0xb7e   :  { %35059 = vmatmul.mubr.f32.vlgmr.msra.gmra.mrb[112].mxu0 %v15159_v63 }
 0xb7f   :  { %35067 = vmatpush3.msra.mxu0 %v15092_v30  ;;  %35064 = vmatmul.mubr.f32.vlgmr.msra.gmra.mrb[122].mxu1 %v15157_v38 }
 0xb80   :  { %35068 = vmatprep.mubr.msk.f32.mxu0 %vm37404_vm2, %v37403_v24 }
 0xb82   :  { %35069 = vmatmul.mubr.f32.vlgmr.msra.gmra.mrb[114].mxu0 %v15157_v38  ;;  %v37314_v38 = vld [vmem:[%s40903_s0 + $0x8] sm:$0xff] }
 0xb83   :  { %16395 = vmatprep.mubr.f32.mxu0 %v37403_v24 }
 0xc02   :  { %v13880_v32 = vpop.f32.mrb[92].mxu0 }
 0xc03   :  { %v34960_v2 = vpop.f32.mrb[93].mxu0 }
 0xc06   :  { %v14028_v59 = vpop.f32.mrb[94].mxu0 }
 0xc07   :  { %v34970_v5 = vpop.f32.mrb[95].mxu0 }
 0xc0a   :  { %v13804_v14 = vpop.f32.mrb[100].mxu1  ;;  %v14174_v10 = vpop.f32.mrb[96].mxu0 }
 0xc0b   :  { %v13881_v6 = vadd.f32 %v13880_v32, %v13804_v14  ;;  %v34955_v7 = vpop.f32.mrb[101].mxu1  ;;  %v34980_v26 = vpop.f32.mrb[97].mxu0 }
 0xc0e   :  { %v13954_v8 = vpop.f32.mrb[102].mxu1 }
 0xc0f   :  { %v13955_v22 = vadd.f32 %v13954_v8, %v13881_v6  ;;  %v34965_v9 = vpop.f32.mrb[103].mxu1  ;;  %v37315_v8 = vld [vmem:[%s40903_s0 + $0x10] sm:$0xff] }
 0xc11   :  { %v14029_v55 = vadd.f32 %v14028_v59, %v13955_v22 }
 0xc12   :  { %v14102_v17 = vpop.f32.mrb[104].mxu1 }
 0xc13   :  { %v14103_v25 = vadd.f32 %v14102_v17, %v14029_v55  ;;  %v34975_v44 = vpop.f32.mrb[105].mxu1 }
 0xc15   :  { %v14175_v21 = vadd.f32 %v14174_v10, %v14103_v25 }
 0xc17   :  { %v15537_v50 = vadd.f32 %v14175_v21, %v38820_v60 }
 0xc19   :  { %v15541_v45 = vadd.f32 %v37313_v28, %v15537_v50 }
 0xc1b   :  { %v38954_v12 = vadd.f32 %v38948_v51, %v15541_v45 }
 0xc1d   :  { %v15553_v29 = vsel %vm77_vm0, %v38954_v12, 0.0 }
 0xc1e   :  { %15554 = vadd.xlane.f32.xlu0 %v15553_v29 }
 0xc2d   :  { %v14257_v60 = vpop.f32.mrb[106].mxu1 }
 0xc2e   :  { %v34985_v31 = vpop.f32.mrb[107].mxu1 }
 0xc31   :  { %v14407_v52 = vpop.f32.mrb[108].mxu1 }
 0xc32   :  { %v34995_v53 = vpop.f32.mrb[109].mxu1 }
 0xc35   :  { %v14333_v37 = vpop.f32.mrb[98].mxu0 }
 0xc36   :  { %v14334_v11 = vadd.f32 %v14333_v37, %v14257_v60  ;;  %v14555_v42 = vpop.f32.mrb[110].mxu1  ;;  %v34990_v43 = vpop.f32.mrb[99].mxu0 }
 0xc37   :  { %v35005_v0 = vpop.f32.mrb[111].mxu1 }
 0xc38   :  { %v14408_v35 = vadd.f32 %v14407_v52, %v14334_v11  ;;  %v38977_v11 = vld [vmem:[#allocation2 + $0x8] sm:$0xff] }
 0xc39   :  { %v14481_v58 = vpop.f32.mrb[100].mxu0 }
 0xc3a   :  { %v14482_v20 = vadd.f32 %v14481_v58, %v14408_v35  ;;  %v35000_v33 = vpop.f32.mrb[101].mxu0  ;;  %v37318_v35 = vld [vmem:[#allocation2 + $0x28] sm:$0xff]  ;;  %v59_v58 = vld [vmem:[#allocation2 + $0x30] sm:$0xff] }
 0xc3b   :  { %v67_v33 = vld [vmem:[#allocation2 + $0x70] sm:$0xff] }
 0xc3c   :  { %v14556_v18 = vadd.f32 %v14555_v42, %v14482_v20  ;;  %v37317_v42 = vld [vmem:[%s40903_s0 + $0x18] sm:$0xff]  ;;  %v63_v20 = vld [vmem:[#allocation2 + $0x50] sm:$0xff] }
 0xc3d   :  { %v14627_v19 = vpop.f32.mrb[102].mxu0 }
 0xc3e   :  { %v14628_v47 = vadd.f32 %v14627_v19, %v14556_v18  ;;  %v35010_v49 = vpop.f32.mrb[103].mxu0  ;;  %v14710_v27 = vpop.f32.mrb[112].mxu1  ;;  %v55_v18 = vld [vmem:[#allocation2 + $0x10] sm:$0xff]  ;;  %v38998_v19 = vld [vmem:[#allocation2 + $0x68] sm:$0xff] }
 0xc3f   :  { %v35015_v30 = vpop.f32.mrb[113].mxu1 }
 0xc40   :  { %v15538_v34 = vadd.f32 %v14628_v47, %v38823_v4 }
 0xc41   :  { %v14786_v54 = vpop.f32.mrb[104].mxu0 }
 0xc42   :  { %v15542_v40 = vadd.f32 %v37314_v38, %v15538_v34  ;;  %v14787_v39 = vadd.f32 %v14786_v54, %v14710_v27  ;;  %v35020_v41 = vpop.f32.mrb[105].mxu0  ;;  %v14860_v56 = vpop.f32.mrb[114].mxu1 }
 0xc43   :  { %v35025_v57 = vpop.f32.mrb[115].mxu1 }
 0xc44   :  { %v14861_v62 = vadd.f32 %v14860_v56, %v14787_v39  ;;  %v38963_v63 = vadd.f32 %v38948_v51, %v15542_v40 }
 0xc45   :  { %v14934_v61 = vpop.f32.mrb[106].mxu0 }
 0xc46   :  { %v14935_v15 = vadd.f32 %v14934_v61, %v14861_v62  ;;  %v35030_v3 = vpop.f32.mrb[107].mxu0  ;;  %v15008_v1 = vpop.f32.mrb[116].mxu1  ;;  %v15556_v4 = vsel %vm77_vm0, %v38963_v63, 0.0 }
 0xc47   :  { %15557 = vadd.xlane.f32.xlu1 %v15556_v4  ;;  %v35035_v32 = vpop.f32.mrb[117].mxu1 }
 0xc48   :  { %v15009_v2 = vadd.f32 %v15008_v1, %v14935_v15  ;;  %v45_v32 = vld [vmem:[%s40904_s1] sm:$0xff] }
 0xc49   :  { %v15080_v59 = vpop.f32.mrb[108].mxu0 }
 0xc4a   :  { %v15081_v5 = vadd.f32 %v15080_v59, %v15009_v2  ;;  %v35040_v14 = vpop.f32.mrb[109].mxu0  ;;  %v15163_v10 = vpop.f32.mrb[118].mxu1 }
 0xc4b   :  { %v35045_v6 = vpop.f32.mrb[119].mxu1  ;;  %v16312_v14 = vsel %vm77_vm0, %v45_v32, 0 }
 0xc4c   :  { %v15539_v7 = vadd.f32 %v15081_v5, %v38826_v16 }
 0xc4d   :  { %v15239_v26 = vpop.f32.mrb[110].mxu0 }
 0xc4e   :  { %v15543_v22 = vadd.f32 %v37315_v8, %v15539_v7  ;;  %v15240_v9 = vadd.f32 %v15239_v26, %v15163_v10  ;;  %v35050_v55 = vpop.f32.mrb[111].mxu0  ;;  %v15313_v17 = vpop.f32.mrb[120].mxu1  ;;  %v46_v7 = vld [vmem:[%s40904_s1 + $0x8] sm:$0xff] }
 0xc4f   :  { %v35055_v25 = vpop.f32.mrb[121].mxu1 }
 0xc50   :  { %v15314_v44 = vadd.f32 %v15313_v17, %v15240_v9  ;;  %v38972_v13 = vadd.f32 %v38948_v51, %v15543_v22  ;;  %v39031_v9 = vand.u32 4294901760, %v16312_v14 }
 0xc51   :  { %v15387_v21 = vpop.f32.mrb[112].mxu0 }
 0xc52   :  { %v15388_v50 = vadd.f32 %v15387_v21, %v15314_v44  ;;  %v35060_v28 = vpop.f32.mrb[113].mxu0  ;;  %v15461_v45 = vpop.f32.mrb[122].mxu1  ;;  %v15559_v16 = vsel %vm77_vm0, %v38972_v13, 0.0  ;;  %v16315_v44 = vsel %vm77_vm0, %v46_v7, 0  ;;  %v47_v21 = vld [vmem:[%s40904_s1 + $0x10] sm:$0xff] }
 0xc53   :  { %15560 = vadd.xlane.f32.xlu0 %v15559_v16  ;;  %v35065_v29 = vpop.f32.mrb[123].mxu1 }
 0xc54   :  { %v15462_v60 = vadd.f32 %v15461_v45, %v15388_v50 }
 0xc55   :  { %v15533_v31 = vpop.f32.mrb[114].mxu0 }
 0xc56   :  { %v15534_v52 = vadd.f32 %v15533_v31, %v15462_v60  ;;  %v35070_v53 = vpop.f32.mrb[115].mxu0  ;;  %v39048_v60 = vsub.f32 %v16312_v14, %v39031_v9  ;;  %v39050_v31 = vand.u32 4294901760, %v16315_v44 }
 0xc58   :  { %v15540_v37 = vadd.f32 %v15534_v52, %v38829_v46  ;;  %16275 = vrot.lane.b32.xlu1 %v38977_v11, %s37402_s12  ;;  %v16318_v52 = vsel %vm77_vm0, %v47_v21, 0 }
 0xc5a   :  { %v15544_v43 = vadd.f32 %v37317_v42, %v15540_v37 }
 0xc5c   :  { %v38985_v0 = vadd.f32 %v38948_v51, %v15544_v43  ;;  %16279 = vrot.lane.b32.xlu1 %v37318_v35, %s37402_s12  ;;  %v38994_v51 = vld [vmem:[#allocation2 + $0x48] sm:$0xff] }
 0xc5e   :  { %v15562_v46 = vsel %vm77_vm0, %v38985_v0, 0.0 }
 0xc5f   :  { %15563 = vadd.xlane.f32.xlu0 %v15562_v46 }
 0xc60   :  { %16281 = vrot.lane.b32.xlu1 %v59_v58, %s37402_s12 }
 0xc64   :  { %16285 = vrot.lane.b32.xlu1 %v63_v20, %s37402_s12 }
 0xc68   :  { %16289 = vrot.lane.b32.xlu1 %v67_v33, %s37402_s12 }
 0xc75   :  { %16277 = vrot.lane.b32.xlu0 %v55_v18, %s37402_s12 }
 0xc79   :  { %16283 = vrot.lane.b32.xlu0 %v38994_v51, %s37402_s12 }
 0xc7d   :  { %16287 = vrot.lane.b32.xlu0 %v38998_v19, %s37402_s12 }
 0xcab   :  { %v15555_v47 = vpop.xlane.xlu0 %15554 }
 0xcac   :  { %v15565_v49 = vmul.f32 0.03125, %v15555_v47 }
 0xcae   :  { %v39003_v27 = vsub.f32 %v38954_v12, %v15565_v49 }
 0xcb0   :  { %v15573_v30 = vmul.f32 %v39003_v27, %v39003_v27 }
 0xcb2   :  { %v15577_v34 = vsel %vm77_vm0, %v15573_v30, 0.0  ;;  %v48_v30 = vld [vmem:[%s40904_s1 + $0x18] sm:$0xff] }
 0xcb3   :  { %15578 = vadd.xlane.f32.xlu1 %v15577_v34  ;;  %v16321_v32 = vsel %vm77_vm0, %v48_v30, 0 }
 0xcb4   :  { %v39114_v21 = vand.u32 4294901760, %v16321_v32 }
 0xcc4   :  { %15627 = vrot.lane.b32.xlu1 %v37318_v35, %s37409_s11 }
 0xcd4   :  { %v15558_v54 = vpop.xlane.xlu1 %15557 }
 0xcd5   :  { %v15566_v38 = vmul.f32 0.03125, %v15558_v54 }
 0xcd7   :  { %v39010_v40 = vsub.f32 %v38963_v63, %v15566_v38 }
 0xcd8   :  { %v16276_v39 = vpop.permute.xlu1 %16275 }
 0xcd9   :  { %v15574_v41 = vmul.f32 %v39010_v40, %v39010_v40 }
 0xcdb   :  { %v15580_v56 = vsel %vm77_vm0, %v15574_v41, 0.0  ;;  %v39078_v41 = vsub.f32 %v16315_v44, %v39050_v31 }
 0xcdc   :  { %15581 = vadd.xlane.f32.xlu0 %v15580_v56  ;;  %v16280_v57 = vpop.permute.xlu1 %16279 }
 0xce0   :  { %v15561_v62 = vpop.xlane.xlu0 %15560  ;;  %v16282_v61 = vpop.permute.xlu1 %16281 }
 0xce1   :  { %v15567_v15 = vmul.f32 0.03125, %v15561_v62  ;;  %v16292_v59 = vsel %vm77_vm0, %v16280_v57, %v16282_v61  ;;  %v16327_v5 = vand.u32 4294901760, %v16282_v61  ;;  %v39083_v62 = vand.u32 4294901760, %v16318_v52 }
 0xce2   :  { %v16329_v26 = vand.u32 4294901760, %v16292_v59 }
 0xce3   :  { %v39016_v3 = vsub.f32 %v38972_v13, %v15567_v15  ;;  %v39026_v10 = vsub.f32 %v16282_v61, %v16327_v5  ;;  %v39112_v44 = vsub.f32 %v16318_v52, %v39083_v62 }
 0xce4   :  { %v16286_v1 = vpop.permute.xlu1 %16285  ;;  %v39033_v17 = vsub.f32 %v16292_v59, %v16329_v26 }
 0xce5   :  { %v15575_v4 = vmul.f32 %v39016_v3, %v39016_v3  ;;  %v16331_v22 = vand.u32 4294901760, %v16286_v1  ;;  %v16454_v50 = vand.u32 4294901760, %v39026_v10 }
 0xce6   :  { %v16460_v53 = vand.u32 4294901760, %v39033_v17 }
 0xce7   :  { %v15583_v2 = vsel %vm77_vm0, %v15575_v4, 0.0  ;;  %v39040_v28 = vsub.f32 %v16286_v1, %v16331_v22  ;;  %v16455_v20 = vsub.f32 %v39026_v10, %v16454_v50 }
 0xce8   :  { %15584 = vadd.xlane.f32.xlu0 %v15583_v2  ;;  %v16290_v6 = vpop.permute.xlu1 %16289  ;;  %v16461_v61 = vsub.f32 %v39033_v17, %v16460_v53 }
 0xce9   :  { %v16335_v25 = vand.u32 4294901760, %v16290_v6  ;;  %v16466_v58 = vand.u32 4294901760, %v39040_v28  ;;  %v16456_v2 = vand.u32 4294901760, %v16455_v20 }
 0xceb   :  { %v39045_v16 = vsub.f32 %v16290_v6, %v16335_v25  ;;  %v39058_v46 = vpack.c.bf16 %v16335_v25, %v16331_v22  ;;  %v16467_v59 = vsub.f32 %v39040_v28, %v16466_v58 }
 0xcec   :  { %v15564_v8 = vpop.xlane.xlu0 %15563 }
 0xced   :  { %v15568_v55 = vmul.f32 0.03125, %v15564_v8  ;;  %v16478_v47 = vand.u32 4294901760, %v39045_v16  ;;  %v16409_v8 = vand.u32 4294901760, %v39078_v41  ;;  %v16468_v20 = vand.u32 4294901760, %v16467_v59 }
 0xcef   :  { %v39043_v45 = vsub.f32 %v38985_v0, %v15568_v55 }
 0xcf0   :  { %v16278_v29 = vpop.permute.xlu0 %16277 }
 0xcf1   :  { %v16291_v37 = vsel %vm77_vm0, %v16276_v39, %v16278_v29  ;;  %v16323_v42 = vand.u32 4294901760, %v16278_v29  ;;  %v15576_v43 = vmul.f32 %v39043_v45, %v39043_v45  ;;  %v16398_v39 = vand.u32 4294901760, %v39048_v60 }
 0xcf2   :  { %v16325_v35 = vand.u32 4294901760, %v16291_v37 }
 0xcf3   :  { %v39063_v33 = vsub.f32 %v16278_v29, %v16323_v42  ;;  %v15586_v18 = vsel %vm77_vm0, %v15576_v43, 0.0  ;;  %v39067_v49 = vpack.c.bf16 %v16327_v5, %v16323_v42  ;;  %v16479_v5 = vsub.f32 %v39045_v16, %v16478_v47 }
 0xcf4   :  { %v39072_v34 = vsub.f32 %v16291_v37, %v16325_v35  ;;  %15587 = vadd.xlane.f32.xlu1 %v15586_v18  ;;  %v16284_v54 = vpop.permute.xlu0 %16283  ;;  %v39074_v38 = vpack.c.bf16 %v16329_v26, %v16325_v35  ;;  %v16399_v26 = vsub.f32 %v39048_v60, %v16398_v39  ;;  %v16462_v43 = vand.u32 4294901760, %v16461_v61 }
 0xcf5   :  { %v16293_v56 = vsel %vm77_vm0, %v16284_v54, %v16286_v1  ;;  %36428 = vmatprep.subr.bf16.mxu0 %v39067_v49  ;;  %v16442_v57 = vand.u32 4294901760, %v39063_v33  ;;  %v16480_v18 = vand.u32 4294901760, %v16479_v5  ;;  %v39129_v61 = vsub.f32 %v16321_v32, %v39114_v21 }
 0xcf6   :  { %v16448_v15 = vand.u32 4294901760, %v39072_v34  ;;  %v16333_v4 = vand.u32 4294901760, %v16293_v56  ;;  %36430 = vmatpush1.bf16.msra.mxu0 %v39074_v38  ;;  %v16400_v52 = vand.u32 4294901760, %v16399_v26 }
 0xcf7   :  { %36432 = vmatprep.subr.bf16.mxu0 %v39058_v46  ;;  %v16443_v1 = vsub.f32 %v39063_v33, %v16442_v57  ;;  %v36439_v59 = vpack.c.bf16 %v16480_v18, %v16468_v20  ;;  %v36459_v18 = vpack.c.bf16 %v16454_v50, %v16442_v57 }
 0xcf8   :  { %v39101_v14 = vsub.f32 %v16293_v56, %v16333_v4  ;;  %v16288_v7 = vpop.permute.xlu0 %16287  ;;  %v16449_v22 = vsub.f32 %v39072_v34, %v16448_v15  ;;  %v16410_v56 = vsub.f32 %v39078_v41, %v16409_v8 }
 0xcf9   :  { %v16294_v55 = vsel %vm77_vm0, %v16288_v7, %v16290_v6  ;;  %v16444_v25 = vand.u32 4294901760, %v16443_v1  ;;  %v16420_v1 = vand.u32 4294901760, %v39112_v44 }
 0xcfa   :  { %v16472_v29 = vand.u32 4294901760, %v39101_v14  ;;  %v16337_v37 = vand.u32 4294901760, %v16294_v55  ;;  %v16450_v42 = vand.u32 4294901760, %v16449_v22  ;;  %v16411_v26 = vand.u32 4294901760, %v16410_v56 }
 0xcfb   :  { %v36435_v35 = vpack.c.bf16 %v16456_v2, %v16444_v25  ;;  %v16421_v32 = vsub.f32 %v39112_v44, %v16420_v1  ;;  %v16431_v22 = vand.u32 4294901760, %v39129_v61 }
 0xcfc   :  { %v16473_v30 = vsub.f32 %v39101_v14, %v16472_v29  ;;  %v39120_v54 = vpack.c.bf16 %v16337_v37, %v16333_v4  ;;  %v39122_v6 = vsub.f32 %v16294_v55, %v16337_v37  ;;  %v36437_v4 = vpack.c.bf16 %v16462_v43, %v16450_v42  ;;  %v37321_v43 = vld [vmem:[#allocation2 + $0x88] ss:$0 sm:$0xff] }
 0xcfd   :  { %v16422_v37 = vand.u32 4294901760, %v16421_v32  ;;  %v16432_v42 = vsub.f32 %v39129_v61, %v16431_v22 }
 0xcfe   :  { %v16484_v2 = vand.u32 4294901760, %v39122_v6  ;;  %36434 = vmatpush1.bf16.msra.mxu0 %v39120_v54  ;;  %15625 = vrot.lane.b32.xlu0 %v38977_v11, %s37409_s11  ;;  %v16474_v5 = vand.u32 4294901760, %v16473_v30  ;;  %v36443_v11 = vpack.c.bf16 %v39026_v10, %v39063_v33  ;;  %v36449_v20 = vpack.c.bf16 %v39122_v6, %v39101_v14 }
 0xcff   :  { %36436 = vmatprep.subr.bf16.mxu0 %v36435_v35  ;;  %v16433_v35 = vand.u32 4294901760, %v16432_v42  ;;  %v36461_v33 = vpack.c.bf16 %v16460_v53, %v16448_v15  ;;  %v36463_v10 = vpack.c.bf16 %v16478_v47, %v16466_v58  ;;  %v33169_v53 = vld [vmem:[#allocation2 + $0x90] ss:$0 sm:$0xff]  ;;  %v15615_v58 = vsub.s32 3, %v37594_v36 }
 0xd00   :  { %v16485_v7 = vsub.f32 %v39122_v6, %v16484_v2  ;;  %v36465_v50 = vpack.c.bf16 %v16484_v2, %v16472_v29 }
 0xd01   :  { %16401 = vmatmul.mubr.f32.vlgmr.msra.gmra.mrb[116].mxu0 %v16400_v52 }
 0xd02   :  { %v16486_v55 = vand.u32 4294901760, %v16485_v7  ;;  %16406 = vmatprep.mubr.f32.mxu0 %v37403_v24  ;;  %36438 = vmatpush1.bf16.msra.mxu0 %v36437_v4 }
 0xd03   :  { %36440 = vmatprep.subr.bf16.mxu0 %v36439_v59  ;;  %15629 = vrot.lane.b32.xlu0 %v38994_v51, %s37409_s11  ;;  %v36445_v51 = vpack.c.bf16 %v39033_v17, %v39072_v34  ;;  %v39232_v34 = vrot.slane %v38945_v23, %v15615_v58 }
 0xd04   :  { %v36441_v25 = vpack.c.bf16 %v16486_v55, %v16474_v5 }
 0xd05   :  { %16412 = vmatmul.mubr.f32.gmra.mrb[118].mxu0 %v16411_v26  ;;  %15631 = vrot.lane.b32.xlu1 %v38998_v19, %s37409_s11  ;;  %v36447_v19 = vpack.c.bf16 %v39045_v16, %v39040_v28 }
 0xd06   :  { %16417 = vmatprep.mubr.f32.mxu0 %v37403_v24  ;;  %36442 = vmatpush1.bf16.msra.mxu0 %v36441_v25 }
 0xd07   :  { %36444 = vmatprep.subr.bf16.mxu0 %v36443_v11  ;;  %15638 = vrot.lane.b32.xlu0 %v37321_v43, %s37409_s11 }
 0xd09   :  { %16423 = vmatmul.mubr.f32.gmra.mrb[120].mxu0 %v16422_v37  ;;  %16304 = vrot.lane.b32.xlu1 %v37321_v43, %s37402_s12 }
 0xd0a   :  { %16428 = vmatprep.mubr.f32.mxu0 %v37403_v24 }
 0xd0b   :  { %16306 = vrot.lane.b32.xlu0 %v33169_v53, %s37402_s12 }
 0xd0d   :  { %16434 = vmatmul.mubr.f32.gmra.mrb[122].mxu0 %v16433_v35 }
 0xd0e   :  { %16544 = vmatprep.mubr.f32.mxu0 %v37403_v24 }
 0xd11   :  { %16546 = vmatmul.mubr.f32.vlgmr.msra.gmra.mrb[116].mxu0 %v39031_v9 }
 0xd12   :  { %36446 = vmatpush1.bf16.msra.mxu0 %v36445_v51  ;;  %16551 = vmatprep.mubr.f32.mxu0 %v37403_v24 }
 0xd13   :  { %36448 = vmatprep.subr.bf16.mxu0 %v36447_v19 }
 0xd15   :  { %16553 = vmatmul.mubr.f32.gmra.mrb[118].mxu0 %v39050_v31 }
 0xd16   :  { %36450 = vmatpush1.bf16.msra.mxu0 %v36449_v20  ;;  %16558 = vmatprep.mubr.f32.mxu0 %v37403_v24 }
 0xd17   :  { %36452 = vmatprep.subr.bf16.mxu0 %v39067_v49 }
 0xd19   :  { %16560 = vmatmul.mubr.f32.gmra.mrb[120].mxu0 %v39083_v62 }
 0xd1a   :  { %16565 = vmatprep.mubr.f32.mxu0 %v37403_v24 }
 0xd1d   :  { %16567 = vmatmul.mubr.f32.gmra.mrb[122].mxu0 %v39114_v21 }
 0xd1e   :  { %16653 = vmatprep.mubr.f32.mxu0 %v37403_v24 }
 0xd21   :  { %16656 = vmatmul.mubr.f32.vlgmr.msra.gmra.mrb[116].mxu0 %v39048_v60  ;;  %v15607_v60 = vsub.s32 2, %v37594_v36 }
 0xd22   :  { %36454 = vmatpush1.bf16.msra.mxu0 %v39074_v38  ;;  %16661 = vmatprep.mubr.f32.mxu0 %v37403_v24 }
 0xd23   :  { %36456 = vmatprep.subr.bf16.mxu0 %v39058_v46 }
 0xd25   :  { %16664 = vmatmul.mubr.f32.gmra.mrb[118].mxu0 %v39078_v41 }
 0xd26   :  { %36458 = vmatpush1.bf16.msra.mxu0 %v39120_v54  ;;  %16669 = vmatprep.mubr.f32.mxu0 %v37403_v24 }
 0xd27   :  { %36460 = vmatprep.subr.bf16.mxu0 %v36459_v18 }
 0xd29   :  { %16672 = vmatmul.mubr.f32.gmra.mrb[120].mxu0 %v39112_v44 }
 0xd2a   :  { %16677 = vmatprep.mubr.f32.mxu0 %v37403_v24 }
 0xd2d   :  { %16680 = vmatmul.mubr.f32.gmra.mrb[122].mxu0 %v39129_v61 }
 0xd2e   :  { %16758 = vmatprep.mubr.f32.mxu0 %v37403_v24 }
 0xd31   :  { %16762 = vmatmul.mubr.f32.vlgmr.msra.gmra.mrb[116].mxu0 %v16398_v39 }
 0xd32   :  { %36462 = vmatpush1.bf16.msra.mxu0 %v36461_v33  ;;  %16767 = vmatprep.mubr.f32.mxu0 %v37403_v24 }
 0xd33   :  { %36464 = vmatprep.subr.bf16.mxu0 %v36463_v10 }
 0xd35   :  { %16771 = vmatmul.mubr.f32.gmra.mrb[118].mxu0 %v16409_v8 }
 0xd36   :  { %36466 = vmatpush1.bf16.msra.mxu0 %v36465_v50  ;;  %16776 = vmatprep.mubr.f32.mxu0 %v37403_v24 }
 0xd37   :  { %36468 = vmatprep.subr.bf16.mxu0 %v39067_v49 }
 0xd39   :  { %16780 = vmatmul.mubr.f32.gmra.mrb[120].mxu0 %v16420_v1 }
 0xd3a   :  { %16785 = vmatprep.mubr.f32.mxu0 %v37403_v24 }
 0xd3d   :  { %16789 = vmatmul.mubr.f32.gmra.mrb[122].mxu0 %v16431_v22 }
 0xd3e   :  { %16883 = vmatprep.mubr.f32.mxu0 %v37403_v24 }
 0xd40   :  { %v15579_v17 = vpop.xlane.xlu1 %15578 }
 0xd41   :  { %v15589_v28 = vmul.f32 0.03125, %v15579_v17  ;;  %16885 = vmatmul.mubr.f32.vlgmr.msra.gmra.mrb[116].mxu0 %v39031_v9 }
 0xd42   :  { %36470 = vmatpush1.bf16.msra.mxu0 %v39074_v38  ;;  %16890 = vmatprep.mubr.f32.mxu0 %v37403_v24 }
 0xd43   :  { %v15593_v16 = vadd.f32 1e-05, %v15589_v28  ;;  %36472 = vmatprep.subr.bf16.mxu0 %v39058_v46  ;;  %v39227_v46 = vrot.slane %v38945_v23, %v15607_v60 }
 0xd45   :  { %37232 = vrsqrt.f32 %v15593_v16  ;;  %16892 = vmatmul.mubr.f32.gmra.mrb[118].mxu0 %v39050_v31 }
 0xd46   :  { %36474 = vmatpush1.bf16.msra.mxu0 %v39120_v54  ;;  %16897 = vmatprep.mubr.f32.mxu0 %v37403_v24 }
 0xd47   :  { %35245 = vmatprep.subr.mxu0 %v37403_v24 }
 0xd49   :  { %16899 = vmatmul.mubr.f32.gmra.mrb[120].mxu0 %v39083_v62 }
 0xd4a   :  { %16904 = vmatprep.mubr.f32.mxu0 %v37403_v24 }
 0xd4d   :  { %16906 = vmatmul.mubr.f32.gmra.mrb[122].mxu0 %v39114_v21 }
 0xd4e   :  { %16984 = vmatprep.mubr.f32.mxu0 %v37403_v24 }
 0xd4f   :  { %v37233_v47 = vpop.eup %37232 }
 0xd50   :  { %v15601_v49 = vmul.f32 %v37233_v47, %v39003_v27 }
 0xd51   :  { %16986 = vmatmul.mubr.f32.vlgmr.msra.gmra.mrb[116].mxu0 %v39031_v9 }
 0xd52   :  { %v15609_v38 = vmul.f32 %v39227_v46, %v15601_v49  ;;  %16991 = vmatprep.mubr.f32.mxu0 %v37403_v24 }
 0xd54   :  { %v15617_v39 = vadd.f32 %v39232_v34, %v15609_v38 }
 0xd55   :  { %16993 = vmatmul.mubr.f32.gmra.mrb[118].mxu0 %v39050_v31 }
 0xd56   :  { %v15642_v41 = vsel %vm77_vm0, %v15617_v39, 0  ;;  %16998 = vmatprep.mubr.f32.mxu0 %v37403_v24 }
 0xd57   :  { %v39241_v57 = vand.u32 4294901760, %v15642_v41 }
 0xd59   :  { %v39244_v27 = vsub.f32 %v15642_v41, %v39241_v57  ;;  %17000 = vmatmul.mubr.f32.gmra.mrb[120].mxu0 %v39083_v62  ;;  %v15628_v62 = vpop.permute.xlu1 %15627 }
 0xd5a   :  { %17005 = vmatprep.mubr.f32.mxu0 %v37403_v24  ;;  %v15657_v30 = vand.u32 4294901760, %v15628_v62 }
 0xd5b   :  { %v15724_v23 = vand.u32 4294901760, %v39244_v27 }
 0xd5c   :  { %v39256_v1 = vsub.f32 %v15628_v62, %v15657_v30 }
 0xd5d   :  { %v15725_v9 = vsub.f32 %v39244_v27, %v15724_v23  ;;  %17007 = vmatmul.mubr.f32.gmra.mrb[122].mxu0 %v39114_v21 }
 0xd5e   :  { %35247 = vmatprep.mubr.msk.f32.mxu0 %vm37404_vm2, %v37403_v24 }
 0xd5f   :  { %v15726_v31 = vand.u32 4294901760, %v15725_v9 }
 0xd61   :  { %35079 = vmatprep.mubr.f32.mxu1 %v15726_v31 }
 0xd69   :  { %v15582_v15 = vpop.xlane.xlu0 %15581 }
 0xd6a   :  { %v15590_v14 = vmul.f32 0.03125, %v15582_v15 }
 0xd6c   :  { %v15594_v8 = vadd.f32 1e-05, %v15590_v14 }
 0xd6e   :  { %37234 = vrsqrt.f32 %v15594_v8 }
 0xd75   :  { %v15585_v44 = vpop.xlane.xlu0 %15584 }
 0xd76   :  { %v15591_v29 = vmul.f32 0.03125, %v15585_v44 }
 0xd78   :  { %v37235_v54 = vpop.eup %37234  ;;  %v15595_v6 = vadd.f32 1e-05, %v15591_v29 }
 0xd79   :  { %v15602_v52 = vmul.f32 %v37235_v54, %v39010_v40  ;;  %v15626_v56 = vpop.permute.xlu0 %15625  ;;  %v15772_v40 = vand.u32 4294901760, %v39256_v1 }
 0xd7a   :  { %37236 = vrsqrt.f32 %v15595_v6  ;;  %v15654_v21 = vand.u32 4294901760, %v15626_v56 }
 0xd7b   :  { %v15610_v61 = vmul.f32 %v39227_v46, %v15602_v52  ;;  %v15773_v43 = vsub.f32 %v39256_v1, %v15772_v40 }
 0xd7c   :  { %v39259_v2 = vpack.c.bf16 %v15657_v30, %v15654_v21  ;;  %v39261_v4 = vsub.f32 %v15626_v56, %v15654_v21 }
 0xd7d   :  { %v15630_v59 = vpop.permute.xlu0 %15629  ;;  %v15618_v5 = vadd.f32 %v39232_v34, %v15610_v61  ;;  %v15774_v17 = vand.u32 4294901760, %v15773_v43 }
 0xd7e   :  { %v15765_v7 = vand.u32 4294901760, %v39261_v4  ;;  %36380 = vmatprep.subr.bf16.mxu1 %v39259_v2  ;;  %v15660_v26 = vand.u32 4294901760, %v15630_v59  ;;  %v36395_v30 = vpack.c.bf16 %v39256_v1, %v39261_v4 }
 0xd7f   :  { %36382 = vmatpush3.bf16.msra.mxu1 %v39259_v2  ;;  %v15645_v32 = vsel %vm77_vm0, %v15618_v5, 0 }
 0xd80   :  { %v39269_v22 = vsub.f32 %v15630_v59, %v15660_v26  ;;  %v39271_v55 = vand.u32 4294901760, %v15645_v32  ;;  %v15766_v25 = vsub.f32 %v39261_v4, %v15765_v7 }
 0xd81   :  { %v15588_v11 = vpop.xlane.xlu1 %15587 }
 0xd82   :  { %v15592_v37 = vmul.f32 0.03125, %v15588_v11  ;;  %v39277_v42 = vsub.f32 %v15645_v32, %v39271_v55  ;;  %v15779_v19 = vand.u32 4294901760, %v39269_v22  ;;  %v15767_v50 = vand.u32 4294901760, %v15766_v25 }
 0xd84   :  { %v37237_v35 = vpop.eup %37236  ;;  %v15596_v51 = vadd.f32 1e-05, %v15592_v37  ;;  %v15734_v20 = vand.u32 4294901760, %v39277_v42  ;;  %v15780_v53 = vsub.f32 %v39269_v22, %v15779_v19  ;;  %v36387_v49 = vpack.c.bf16 %v15774_v17, %v15767_v50 }
 0xd85   :  { %v15603_v18 = vmul.f32 %v37237_v35, %v39016_v3  ;;  %v15632_v33 = vpop.permute.xlu1 %15631 }
 0xd86   :  { %37238 = vrsqrt.f32 %v15596_v51  ;;  %v15663_v10 = vand.u32 4294901760, %v15632_v33  ;;  %v15735_v58 = vsub.f32 %v39277_v42, %v15734_v20  ;;  %v15781_v9 = vand.u32 4294901760, %v15780_v53 }
 0xd87   :  { %v15611_v28 = vmul.f32 %v39227_v46, %v15603_v18 }
 0xd88   :  { %v15785_v16 = vsub.f32 %v15632_v33, %v15663_v10  ;;  %v39286_v60 = vpack.c.bf16 %v15663_v10, %v15660_v26  ;;  %v15736_v41 = vand.u32 4294901760, %v15735_v58 }
 0xd89   :  { %v15619_v3 = vadd.f32 %v39232_v34, %v15611_v28 }
 0xd8a   :  { %v15786_v47 = vand.u32 4294901760, %v15785_v16  ;;  %36384 = vmatprep.subr.bf16.mxu1 %v39286_v60  ;;  %v36399_v32 = vpack.c.bf16 %v15785_v16, %v39269_v22 }
 0xd8b   :  { %36386 = vmatpush3.bf16.msra.mxu1 %v39286_v60  ;;  %v15648_v38 = vsel %vm77_vm0, %v15619_v3, 0 }
 0xd8c   :  { %v15787_v39 = vsub.f32 %v15785_v16, %v15786_v47  ;;  %36388 = vmatprep.subr.bf16.mxu1 %v36387_v49  ;;  %v15742_v31 = vand.u32 4294901760, %v15648_v38 }
 0xd8e   :  { %35080 = vmatmul.mubr.f32.vlgmr.msra.gmra.mrb[124].mxu1 %v15736_v41  ;;  %v15788_v15 = vand.u32 4294901760, %v15787_v39  ;;  %v15743_v14 = vsub.f32 %v15648_v38, %v15742_v31 }
 0xd8f   :  { %36390 = vmatpush3.bf16.msra.mxu1 %v36387_v49 }
 0xd90   :  { %v37239_v8 = vpop.eup %37238  ;;  %v36391_v62 = vpack.c.bf16 %v15788_v15, %v15781_v9  ;;  %v15744_v44 = vand.u32 4294901760, %v15743_v14 }
 0xd91   :  { %v15604_v29 = vmul.f32 %v37239_v8, %v39043_v45 }
 0xd92   :  { %36392 = vmatprep.subr.bf16.mxu1 %v36391_v62  ;;  %v15745_v54 = vsub.f32 %v15743_v14, %v15744_v44 }
 0xd93   :  { %36394 = vmatpush3.bf16.msra.mxu1 %v36391_v62  ;;  %v15612_v6 = vmul.f32 %v39227_v46, %v15604_v29  ;;  %v36411_v46 = vpack.c.bf16 %v15772_v40, %v15765_v7 }
 0xd94   :  { %36396 = vmatprep.subr.bf16.mxu1 %v36395_v30  ;;  %v15746_v52 = vand.u32 4294901760, %v15745_v54 }
 0xd95   :  { %v15620_v56 = vadd.f32 %v39232_v34, %v15612_v6  ;;  %v36415_v34 = vpack.c.bf16 %v15786_v47, %v15779_v19 }
 0xd96   :  { %35082 = vmatprep.mubr.f32.mxu1 %v15746_v52 }
 0xd97   :  { %v15651_v21 = vsel %vm77_vm0, %v15620_v56, 0 }
 0xd98   :  { %v15752_v61 = vand.u32 4294901760, %v15651_v21 }
 0xd9a   :  { %v15753_v59 = vsub.f32 %v15651_v21, %v15752_v61 }
 0xd9c   :  { %v15754_v5 = vand.u32 4294901760, %v15753_v59 }
 0xd9e   :  { %v15755_v26 = vsub.f32 %v15753_v59, %v15754_v5 }
 0xda0   :  { %v15756_v45 = vand.u32 4294901760, %v15755_v26 }
 0xda2   :  { %35083 = vmatmul.mubr.f32.gmra.mrb[126].mxu1 %v15756_v45 }
 0xda3   :  { %35093 = vmatprep.mubr.f32.mxu1 %v39241_v57 }
 0xda6   :  { %35094 = vmatmul.mubr.f32.vlgmr.msra.gmra.mrb[124].mxu1 %v39271_v55 }
 0xda7   :  { %36398 = vmatpush3.bf16.msra.mxu1 %v36395_v30  ;;  %35096 = vmatprep.mubr.f32.mxu1 %v15742_v31 }
 0xda8   :  { %36400 = vmatprep.subr.bf16.mxu1 %v36399_v32 }
 0xdaa   :  { %35097 = vmatmul.mubr.f32.gmra.mrb[126].mxu1 %v15752_v61 }
 0xdab   :  { %36402 = vmatpush3.bf16.msra.mxu1 %v36399_v32  ;;  %35107 = vmatprep.mubr.f32.mxu1 %v39244_v27  ;;  %v15639_v27 = vpop.permute.xlu0 %15638 }
 0xdac   :  { %36404 = vmatprep.subr.bf16.mxu1 %v39259_v2 }
 0xdae   :  { %35108 = vmatmul.mubr.f32.vlgmr.msra.gmra.mrb[124].mxu1 %v39277_v42 }
 0xdaf   :  { %36406 = vmatpush3.bf16.msra.mxu1 %v39259_v2  ;;  %35110 = vmatprep.mubr.f32.mxu1 %v15743_v14  ;;  %v39334_v1 = vpop.permute.xlu0 %16306 }
 0xdb0   :  { %36408 = vmatprep.subr.bf16.mxu1 %v39286_v60 }
 0xdb2   :  { %35111 = vmatmul.mubr.f32.gmra.mrb[126].mxu1 %v15753_v59 }
 0xdb3   :  { %36410 = vmatpush3.bf16.msra.mxu1 %v39286_v60  ;;  %35121 = vmatprep.mubr.f32.mxu1 %v15724_v23  ;;  %v16305_v23 = vpop.permute.xlu1 %16304 }
 0xdb4   :  { %36412 = vmatprep.subr.bf16.mxu1 %v36411_v46 }
 0xdb6   :  { %35122 = vmatmul.mubr.f32.vlgmr.msra.gmra.mrb[124].mxu1 %v15734_v20 }
 0xdb7   :  { %36414 = vmatpush3.bf16.msra.mxu1 %v36411_v46  ;;  %35124 = vmatprep.mubr.f32.mxu1 %v15744_v44 }
 0xdb8   :  { %36416 = vmatprep.subr.bf16.mxu1 %v36415_v34 }
 0xdba   :  { %35125 = vmatmul.mubr.f32.gmra.mrb[126].mxu1 %v15754_v5 }
 0xdbb   :  { %36418 = vmatpush3.bf16.msra.mxu1 %v36415_v34  ;;  %35135 = vmatprep.mubr.f32.mxu1 %v39241_v57 }
 0xdbc   :  { %36420 = vmatprep.subr.bf16.mxu1 %v39259_v2 }
 0xdbe   :  { %35136 = vmatmul.mubr.f32.vlgmr.msra.gmra.mrb[124].mxu1 %v39271_v55 }
 0xdbf   :  { %36422 = vmatpush3.bf16.msra.mxu1 %v39259_v2  ;;  %35138 = vmatprep.mubr.f32.mxu1 %v15742_v31  ;;  %v16308_v2 = vsel %vm77_vm0, %v16305_v23, %v39334_v1 }
 0xdc0   :  { %36424 = vmatprep.subr.bf16.mxu1 %v39286_v60 }
 0xdc2   :  { %35139 = vmatmul.mubr.f32.gmra.mrb[126].mxu1 %v15752_v61 }
 0xdc3   :  { %36426 = vmatpush3.bf16.msra.mxu1 %v39286_v60  ;;  %35149 = vmatprep.mubr.f32.mxu1 %v39241_v57 }
 0xdc4   :  { %35155 = vmatprep.subr.mxu1 %v37403_v24 }
 0xdc6   :  { %35150 = vmatmul.mubr.f32.vlgmr.msra.gmra.mrb[124].mxu1 %v39271_v55 }
 0xdc7   :  { %35152 = vmatprep.mubr.f32.mxu1 %v15742_v31 }
 0xdca   :  { %35153 = vmatmul.mubr.f32.gmra.mrb[126].mxu1 %v15752_v61 }
 0xdcb   :  { %35157 = vmatprep.mubr.msk.f32.mxu1 %vm37404_vm2, %v37403_v24 }
 0xe24   :  { %v16987_v4 = vpop.f32.mrb[116].mxu0 }
 0xe25   :  { %v39338_v7 = vpop.f32.mrb[117].mxu0  ;;  %v39340_v57 = vadd.f32 %v16987_v4, %v16308_v2 }
 0xe27   :  { %18895 = vrot.lane.b32.xlu0 %v39340_v57, %s37406_s8  ;;  %v17041_v40 = vsel %vm875_vm3, %v39340_v57, 0 }
 0xe28   :  { %v16994_v22 = vpop.f32.mrb[118].mxu0  ;;  %v39346_v55 = vand.u32 4294901760, %v17041_v40 }
 0xe29   :  { %v39348_v11 = vadd.f32 %v16994_v22, %v16308_v2  ;;  %v39350_v25 = vpop.f32.mrb[119].mxu0 }
 0xe2a   :  { %35156 = vmatpush3.xpose.msra.mxu1 %v39346_v55  ;;  %v17121_v50 = vsub.f32 %v17041_v40, %v39346_v55 }
 0xe2b   :  { %19349 = vrot.lane.b32.xlu0 %v39348_v11, %s37406_s8  ;;  %35160 = vmatprep.subr.mxu1 %v37403_v24  ;;  %v17493_v61 = vsel %vm875_vm3, %v39348_v11, 0 }
 0xe2c   :  { %v17001_v37 = vpop.f32.mrb[120].mxu0  ;;  %v17122_v49 = vand.u32 4294901760, %v17121_v50  ;;  %v17496_v5 = vand.u32 4294901760, %v17493_v61 }
 0xe2d   :  { %v39356_v42 = vadd.f32 %v17001_v37, %v16308_v2  ;;  %v39358_v43 = vpop.f32.mrb[121].mxu0 }
 0xe2e   :  { %v17123_v8 = vsub.f32 %v17121_v50, %v17122_v49  ;;  %v17573_v32 = vsub.f32 %v17493_v61, %v17496_v5 }
 0xe2f   :  { %19803 = vrot.lane.b32.xlu0 %v39356_v42, %s37406_s8 }
 0xe30   :  { %v17008_v35 = vpop.f32.mrb[122].mxu0  ;;  %v17124_v54 = vand.u32 4294901760, %v17123_v8  ;;  %v17574_v34 = vand.u32 4294901760, %v17573_v32 }
 0xe31   :  { %v39362_v51 = vadd.f32 %v17008_v35, %v16308_v2  ;;  %v39364_v19 = vpop.f32.mrb[123].mxu0  ;;  %v17945_v35 = vsel %vm875_vm3, %v39356_v42, 0 }
 0xe32   :  { %v17575_v4 = vsub.f32 %v17573_v32, %v17574_v34 }
 0xe33   :  { %20257 = vrot.lane.b32.xlu0 %v39362_v51, %s37406_s8  ;;  %v18397_v20 = vsel %vm875_vm3, %v39362_v51, 0 }
 0xe34   :  { %v39370_v18 = vand.u32 4294901760, %v18397_v20 }
 0xe36   :  { %35246 = vmatpush3.xpose.msra.mxu0 %v39370_v18  ;;  %v18477_v60 = vsub.f32 %v18397_v20, %v39370_v18 }
 0xe37   :  { %35250 = vmatprep.subr.mxu0 %v37403_v24 }
 0xe38   :  { %v18478_v31 = vand.u32 4294901760, %v18477_v60 }
 0xe3a   :  { %v18479_v30 = vsub.f32 %v18477_v60, %v18478_v31 }
 0xe3c   :  { %v18480_v56 = vand.u32 4294901760, %v18479_v30 }
 0xe99   :  { %v35151_v33 = vpop.f32.mrb[124].mxu1  ;;  %v39437_v45 = vpop.permute.xlu0 %18895 }
 0xe9a   :  { %v16245_v10 = vpop.f32.mrb[125].mxu1  ;;  %v39386_v47 = vadd.f32 %v35151_v33, %v15639_v27 }
 0xe9b   :  { %v39375_v17 = vadd.f32 %v16245_v10, %v15639_v27 }
 0xe9c   :  { %v17490_v21 = vsel %vm875_vm3, %v39386_v47, 0 }
 0xe9d   :  { %v17038_v28 = vsel %vm875_vm3, %v39375_v17, 0  ;;  %v35154_v16 = vpop.f32.mrb[126].mxu1  ;;  %18893 = vrot.lane.b32.xlu1 %v39375_v17, %s37406_s8  ;;  %v39430_v59 = vand.u32 4294901760, %v17490_v21 }
 0xe9e   :  { %v39382_v53 = vand.u32 4294901760, %v17038_v28  ;;  %v39384_v58 = vadd.f32 %v35154_v16, %v15639_v27  ;;  %v16257_v3 = vpop.f32.mrb[127].mxu1 }
 0xe9f   :  { %v39396_v14 = vadd.f32 %v16257_v3, %v15639_v27  ;;  %v17562_v26 = vsub.f32 %v17490_v21, %v39430_v59  ;;  %v19350_v27 = vpop.permute.xlu0 %19349 }
 0xea0   :  { %v17110_v38 = vsub.f32 %v17038_v28, %v39382_v53  ;;  %v18394_v39 = vsel %vm875_vm3, %v39384_v58, 0  ;;  %v19353_v2 = vsel %vm875_vm3, %v19350_v27, 0 }
 0xea1   :  { %v39391_v41 = vand.u32 4294901760, %v18394_v39  ;;  %19347 = vrot.lane.b32.xlu1 %v39386_v47, %s37406_s8  ;;  %v17563_v46 = vand.u32 4294901760, %v17562_v26  ;;  %v39453_v40 = vand.u32 4294901760, %v19353_v2  ;;  %v17942_v37 = vsel %vm875_vm3, %v39396_v14, 0 }
 0xea2   :  { %v17111_v9 = vand.u32 4294901760, %v17110_v38  ;;  %v39477_v20 = vand.u32 4294901760, %v17942_v37 }
 0xea3   :  { %v18466_v15 = vsub.f32 %v18394_v39, %v39391_v41  ;;  %v17564_v23 = vsub.f32 %v17562_v26, %v17563_v46  ;;  %v19804_v27 = vpop.permute.xlu0 %19803 }
 0xea4   :  { %v17112_v62 = vsub.f32 %v17110_v38, %v17111_v9  ;;  %v18014_v33 = vsub.f32 %v17942_v37, %v39477_v20 }
 0xea5   :  { %v18467_v44 = vand.u32 4294901760, %v18466_v15  ;;  %19801 = vrot.lane.b32.xlu1 %v39396_v14, %s37406_s8  ;;  %v17565_v22 = vand.u32 4294901760, %v17564_v23 }
 0xea6   :  { %v17113_v29 = vand.u32 4294901760, %v17112_v62  ;;  %v18899_v62 = vsel %vm875_vm3, %v39437_v45, 0 }
 0xea7   :  { %v18468_v6 = vsub.f32 %v18466_v15, %v18467_v44 }
 0xea8   :  { %35158 = vmatmul.mubr.f32.vlgmr.msra.gmra.mrb[128].mxu1 %v17113_v29 }
 0xea9   :  { %35161 = vmatpush3.xpose.msra.mxu1 %v17124_v54  ;;  %20255 = vrot.lane.b32.xlu1 %v39384_v58, %s37406_s8  ;;  %v18469_v52 = vand.u32 4294901760, %v18468_v6  ;;  %v39516_v54 = vand.u32 4294901760, %v18899_v62 }
 0xeaa   :  { %35162 = vmatprep.mubr.msk.f32.mxu1 %vm37404_vm2, %v37403_v24  ;;  %35165 = vmatprep.subr.mxu1 %v37403_v24 }
 0xeab   :  { %35248 = vmatmul.mubr.f32.vlgmr.msra.gmra.mrb[124].mxu0 %v18469_v52  ;;  %v39520_v61 = vsub.f32 %v18899_v62, %v39516_v54 }
 0xeac   :  { %35251 = vmatpush3.xpose.msra.mxu0 %v18480_v56  ;;  %35252 = vmatprep.mubr.msk.f32.mxu0 %vm37404_vm2, %v37403_v24 }
 0xead   :  { %35255 = vmatprep.subr.mxu0 %v37403_v24 }
 0xeb0   :  { %35163 = vmatmul.mubr.f32.vlgmr.msra.gmra.mrb[128].mxu1 %v39382_v53 }
 0xeb1   :  { %35166 = vmatpush3.xpose.msra.mxu1 %v17121_v50  ;;  %35167 = vmatprep.mubr.msk.f32.mxu1 %vm37404_vm2, %v37403_v24  ;;  %v18015_v50 = vand.u32 4294901760, %v18014_v33 }
 0xeb2   :  { %35170 = vmatprep.subr.mxu1 %v37403_v24 }
 0xeb3   :  { %35253 = vmatmul.mubr.f32.vlgmr.msra.gmra.mrb[124].mxu0 %v39391_v41  ;;  %v18016_v16 = vsub.f32 %v18014_v33, %v18015_v50 }
 0xeb4   :  { %35256 = vmatpush3.xpose.msra.mxu0 %v18477_v60  ;;  %35257 = vmatprep.mubr.msk.f32.mxu0 %vm37404_vm2, %v37403_v24 }
 0xeb5   :  { %35260 = vmatprep.subr.mxu0 %v37403_v24 }
 0xeb8   :  { %35168 = vmatmul.mubr.f32.vlgmr.msra.gmra.mrb[128].mxu1 %v17110_v38  ;;  %v39499_v38 = vsub.f32 %v19353_v2, %v39453_v40  ;;  %v20258_v2 = vpop.permute.xlu0 %20257 }
 0xeb9   :  { %35171 = vmatpush3.xpose.msra.mxu1 %v39346_v55  ;;  %35172 = vmatprep.mubr.msk.f32.mxu1 %vm37404_vm2, %v37403_v24 }
 0xeba   :  { %35175 = vmatprep.subr.mxu1 %v37403_v24 }
 0xebb   :  { %35258 = vmatmul.mubr.f32.vlgmr.msra.gmra.mrb[124].mxu0 %v18466_v15 }
 0xebc   :  { %35261 = vmatpush3.xpose.msra.mxu0 %v39370_v18  ;;  %35262 = vmatprep.mubr.msk.f32.mxu0 %vm37404_vm2, %v37403_v24 }
 0xebd   :  { %35265 = vmatprep.subr.mxu0 %v37403_v24 }
 0xec0   :  { %35173 = vmatmul.mubr.f32.vlgmr.msra.gmra.mrb[128].mxu1 %v17111_v9 }
 0xec1   :  { %35176 = vmatpush3.xpose.msra.mxu1 %v17122_v49  ;;  %35177 = vmatprep.mubr.msk.f32.mxu1 %vm37404_vm2, %v37403_v24 }
 0xec2   :  { %35180 = vmatprep.subr.mxu1 %v37403_v24 }
 0xec3   :  { %35263 = vmatmul.mubr.f32.vlgmr.msra.gmra.mrb[124].mxu0 %v18467_v44 }
 0xec4   :  { %35266 = vmatpush3.xpose.msra.mxu0 %v18478_v31  ;;  %35267 = vmatprep.mubr.msk.f32.mxu0 %vm37404_vm2, %v37403_v24  ;;  %v19434_v31 = vand.u32 4294901760, %v39499_v38 }
 0xec5   :  { %35270 = vmatprep.subr.mxu0 %v37403_v24 }
 0xec6   :  { %v19435_v29 = vsub.f32 %v39499_v38, %v19434_v31 }
 0xec8   :  { %35178 = vmatmul.mubr.f32.vlgmr.msra.gmra.mrb[128].mxu1 %v39382_v53  ;;  %v19436_v56 = vand.u32 4294901760, %v19435_v29 }
 0xec9   :  { %35181 = vmatpush3.xpose.msra.mxu1 %v39346_v55  ;;  %35182 = vmatprep.mubr.msk.f32.mxu1 %vm37404_vm2, %v37403_v24  ;;  %v17576_v55 = vand.u32 4294901760, %v17575_v4 }
 0xeca   :  { %35185 = vmatprep.subr.mxu1 %v37403_v24 }
 0xecb   :  { %35268 = vmatmul.mubr.f32.vlgmr.msra.gmra.mrb[124].mxu0 %v39391_v41 }
 0xecc   :  { %35271 = vmatpush3.xpose.msra.mxu0 %v39370_v18  ;;  %35272 = vmatprep.mubr.msk.f32.mxu0 %vm37404_vm2, %v37403_v24  ;;  %v17948_v18 = vand.u32 4294901760, %v17945_v35 }
 0xecd   :  { %35305 = vmatprep.subr.mxu0 %v37403_v24 }
 0xece   :  { %v18025_v10 = vsub.f32 %v17945_v35, %v17948_v18 }
 0xed0   :  { %35183 = vmatmul.mubr.f32.vlgmr.msra.gmra.mrb[128].mxu1 %v39382_v53  ;;  %v18026_v28 = vand.u32 4294901760, %v18025_v10  ;;  %v18017_v53 = vand.u32 4294901760, %v18016_v16 }
 0xed1   :  { %35186 = vmatpush3.xpose.msra.mxu1 %v17496_v5  ;;  %35187 = vmatprep.mubr.msk.f32.mxu1 %vm37404_vm2, %v37403_v24 }
 0xed2   :  { %35190 = vmatprep.subr.mxu1 %v37403_v24  ;;  %v18027_v60 = vsub.f32 %v18025_v10, %v18026_v28 }
 0xed3   :  { %35273 = vmatmul.mubr.f32.vlgmr.msra.gmra.mrb[124].mxu0 %v39391_v41 }
 0xed4   :  { %35306 = vmatpush3.xpose.msra.mxu0 %v39453_v40  ;;  %35188 = vmatmul.mubr.f32.vlgmr.msra.gmra.mrb[130].mxu1 %v17565_v22  ;;  %v18028_v3 = vand.u32 4294901760, %v18027_v60  ;;  %v20261_v22 = vsel %vm875_vm3, %v20258_v2, 0 }
 0xed5   :  { %35191 = vmatpush3.xpose.msra.mxu1 %v17576_v55  ;;  %35192 = vmatprep.mubr.msk.f32.mxu1 %vm37404_vm2, %v37403_v24  ;;  %v39560_v37 = vand.u32 4294901760, %v20261_v22 }
 0xed6   :  { %35195 = vmatprep.subr.mxu1 %v37403_v24  ;;  %35307 = vmatprep.mubr.msk.f32.mxu0 %vm37404_vm2, %v37403_v24 }
 0xed7   :  { %35310 = vmatprep.subr.mxu0 %v37403_v24 }
 0xedc   :  { %35193 = vmatmul.mubr.f32.vlgmr.msra.gmra.mrb[130].mxu1 %v39430_v59 }
 0xedd   :  { %35196 = vmatpush3.xpose.msra.mxu1 %v17573_v32  ;;  %35197 = vmatprep.mubr.msk.f32.mxu1 %vm37404_vm2, %v37403_v24 }
 0xede   :  { %35200 = vmatprep.subr.mxu1 %v37403_v24 }
 0xee4   :  { %35198 = vmatmul.mubr.f32.vlgmr.msra.gmra.mrb[130].mxu1 %v17562_v26 }
 0xee5   :  { %35201 = vmatpush3.xpose.msra.mxu1 %v17496_v5  ;;  %35202 = vmatprep.mubr.msk.f32.mxu1 %vm37404_vm2, %v37403_v24 }
 0xee6   :  { %35205 = vmatprep.subr.mxu1 %v37403_v24 }
 0xeec   :  { %35203 = vmatmul.mubr.f32.vlgmr.msra.gmra.mrb[130].mxu1 %v17563_v46 }
 0xeed   :  { %35206 = vmatpush3.xpose.msra.mxu1 %v17574_v34  ;;  %35207 = vmatprep.mubr.msk.f32.mxu1 %vm37404_vm2, %v37403_v24 }
 0xeee   :  { %35210 = vmatprep.subr.mxu1 %v37403_v24 }
 0xef4   :  { %35208 = vmatmul.mubr.f32.vlgmr.msra.gmra.mrb[130].mxu1 %v39430_v59 }
 0xef5   :  { %35211 = vmatpush3.xpose.msra.mxu1 %v17496_v5  ;;  %35212 = vmatprep.mubr.msk.f32.mxu1 %vm37404_vm2, %v37403_v24  ;;  %v18980_v5 = vand.u32 4294901760, %v39520_v61 }
 0xef6   :  { %35215 = vmatprep.subr.mxu1 %v37403_v24 }
 0xef7   :  { %v18981_v45 = vsub.f32 %v39520_v61, %v18980_v5 }
 0xef9   :  { %v18982_v46 = vand.u32 4294901760, %v18981_v45 }
 0xefc   :  { %35213 = vmatmul.mubr.f32.vlgmr.msra.gmra.mrb[130].mxu1 %v39430_v59 }
 0xefd   :  { %35216 = vmatpush3.xpose.msra.mxu1 %v17948_v18  ;;  %35217 = vmatprep.mubr.msk.f32.mxu1 %vm37404_vm2, %v37403_v24 }
 0xefe   :  { %35220 = vmatprep.subr.mxu1 %v37403_v24 }
 0xf00   :  { %35218 = vmatmul.mubr.f32.vlgmr.msra.gmra.mrb[132].mxu1 %v18017_v53 }
 0xf01   :  { %35221 = vmatpush3.xpose.msra.mxu1 %v18028_v3  ;;  %35222 = vmatprep.mubr.msk.f32.mxu1 %vm37404_vm2, %v37403_v24 }
 0xf02   :  { %35225 = vmatprep.subr.mxu1 %v37403_v24 }
 0xf08   :  { %35223 = vmatmul.mubr.f32.vlgmr.msra.gmra.mrb[132].mxu1 %v39477_v20 }
 0xf09   :  { %35226 = vmatpush3.xpose.msra.mxu1 %v18025_v10  ;;  %35227 = vmatprep.mubr.msk.f32.mxu1 %vm37404_vm2, %v37403_v24 }
 0xf0a   :  { %35230 = vmatprep.subr.mxu1 %v37403_v24 }
 0xf0f   :  { %v18894_v49 = vpop.permute.xlu1 %18893 }
 0xf10   :  { %35228 = vmatmul.mubr.f32.vlgmr.msra.gmra.mrb[132].mxu1 %v18014_v33  ;;  %v18897_v15 = vsel %vm875_vm3, %v18894_v49, 0 }
 0xf11   :  { %35231 = vmatpush3.xpose.msra.mxu1 %v17948_v18  ;;  %35232 = vmatprep.mubr.msk.f32.mxu1 %vm37404_vm2, %v37403_v24  ;;  %v39513_v30 = vand.u32 4294901760, %v18897_v15 }
 0xf12   :  { %35235 = vmatprep.subr.mxu1 %v37403_v24 }
 0xf13   :  { %v19348_v39 = vpop.permute.xlu1 %19347  ;;  %v18968_v21 = vsub.f32 %v18897_v15, %v39513_v30 }
 0xf14   :  { %v19351_v41 = vsel %vm875_vm3, %v19348_v39, 0 }
 0xf15   :  { %v39503_v9 = vand.u32 4294901760, %v19351_v41  ;;  %v18969_v59 = vand.u32 4294901760, %v18968_v21 }
 0xf17   :  { %v19422_v8 = vsub.f32 %v19351_v41, %v39503_v9  ;;  %v18970_v26 = vsub.f32 %v18968_v21, %v18969_v59  ;;  %v19802_v34 = vpop.permute.xlu1 %19801 }
 0xf18   :  { %35233 = vmatmul.mubr.f32.vlgmr.msra.gmra.mrb[132].mxu1 %v18015_v50  ;;  %v19805_v10 = vsel %vm875_vm3, %v19802_v34, 0  ;;  %v19807_v50 = vsel %vm875_vm3, %v19804_v27, 0 }
 0xf19   :  { %v19423_v44 = vand.u32 4294901760, %v19422_v8  ;;  %35236 = vmatpush3.xpose.msra.mxu1 %v18026_v28  ;;  %35237 = vmatprep.mubr.msk.f32.mxu1 %vm37404_vm2, %v37403_v24  ;;  %v18971_v32 = vand.u32 4294901760, %v18970_v26  ;;  %v39581_v16 = vand.u32 4294901760, %v19805_v10  ;;  %v19810_v60 = vand.u32 4294901760, %v19807_v50 }
 0xf1a   :  { %35240 = vmatprep.subr.mxu1 %v37403_v24 }
 0xf1b   :  { %v19424_v6 = vsub.f32 %v19422_v8, %v19423_v44  ;;  %v20256_v23 = vpop.permute.xlu1 %20255  ;;  %v19876_v49 = vsub.f32 %v19805_v10, %v39581_v16 }
 0xf1c   :  { %v20259_v4 = vsel %vm875_vm3, %v20256_v23, 0 }
 0xf1d   :  { %v19425_v52 = vand.u32 4294901760, %v19424_v6  ;;  %v39557_v55 = vand.u32 4294901760, %v20259_v4  ;;  %v19877_v39 = vand.u32 4294901760, %v19876_v49 }
 0xf1f   :  { %35308 = vmatmul.mubr.f32.vlgmr.msra.gmra.mrb[126].mxu0 %v19425_v52  ;;  %v39563_v35 = vsub.f32 %v20259_v4, %v39557_v55 }
 0xf20   :  { %35311 = vmatpush3.xpose.msra.mxu0 %v19436_v56  ;;  %35238 = vmatmul.mubr.f32.vlgmr.msra.gmra.mrb[132].mxu1 %v39477_v20 }
 0xf21   :  { %35241 = vmatpush3.xpose.msra.mxu1 %v17948_v18  ;;  %35312 = vmatprep.mubr.msk.f32.mxu0 %vm37404_vm2, %v37403_v24  ;;  %v20331_v18 = vand.u32 4294901760, %v39563_v35 }
 0xf22   :  { %35315 = vmatprep.subr.mxu0 %v37403_v24  ;;  %35242 = vmatprep.mubr.msk.f32.mxu1 %vm37404_vm2, %v37403_v24 }
 0xf23   :  { %35275 = vmatprep.subr.mxu1 %v37403_v24  ;;  %v20332_v28 = vsub.f32 %v39563_v35, %v20331_v18 }
 0xf25   :  { %v20333_v53 = vand.u32 4294901760, %v20332_v28 }
 0xf27   :  { %35313 = vmatmul.mubr.f32.vlgmr.msra.gmra.mrb[126].mxu0 %v39503_v9 }
 0xf28   :  { %35316 = vmatpush3.xpose.msra.mxu0 %v39499_v38  ;;  %35243 = vmatmul.mubr.f32.vlgmr.msra.gmra.mrb[132].mxu1 %v39477_v20  ;;  %v20341_v20 = vsub.f32 %v20261_v22, %v39560_v37  ;;  %v19887_v38 = vsub.f32 %v19807_v50, %v19810_v60 }
 0xf29   :  { %35276 = vmatpush3.xpose.msra.mxu1 %v39516_v54  ;;  %35277 = vmatprep.mubr.msk.f32.mxu1 %vm37404_vm2, %v37403_v24 }
 0xf2a   :  { %35280 = vmatprep.subr.mxu1 %v37403_v24  ;;  %35317 = vmatprep.mubr.msk.f32.mxu0 %vm37404_vm2, %v37403_v24  ;;  %v20342_v33 = vand.u32 4294901760, %v20341_v20  ;;  %v19888_v41 = vand.u32 4294901760, %v19887_v38 }
 0xf2b   :  { %35320 = vmatprep.subr.mxu0 %v37403_v24 }
 0xf2c   :  { %35278 = vmatmul.mubr.f32.vlgmr.msra.gmra.mrb[134].mxu1 %v18971_v32 }
 0xf2d   :  { %35281 = vmatpush3.xpose.msra.mxu1 %v18982_v46  ;;  %35282 = vmatprep.mubr.msk.f32.mxu1 %vm37404_vm2, %v37403_v24  ;;  %v33172_v46 = vld [vmem:[%s40905_s2 + $0x2] ss:$0 sm:$0xff] }
 0xf2e   :  { %35285 = vmatprep.subr.mxu1 %v37403_v24 }
 0xf2f   :  { %35318 = vmatmul.mubr.f32.vlgmr.msra.gmra.mrb[126].mxu0 %v19422_v8 }
 0xf30   :  { %35321 = vmatpush3.xpose.msra.mxu0 %v39453_v40  ;;  %35322 = vmatprep.mubr.msk.f32.mxu0 %vm37404_vm2, %v37403_v24 }
 0xf31   :  { %35325 = vmatprep.subr.mxu0 %v37403_v24 }
 0xf34   :  { %35283 = vmatmul.mubr.f32.vlgmr.msra.gmra.mrb[134].mxu1 %v39513_v30 }
 0xf35   :  { %35286 = vmatpush3.xpose.msra.mxu1 %v39520_v61  ;;  %35287 = vmatprep.mubr.msk.f32.mxu1 %vm37404_vm2, %v37403_v24  ;;  %v33171_v61 = vld [vmem:[%s40905_s2 + $0x1] ss:$0 sm:$0xff] }
 0xf36   :  { %35290 = vmatprep.subr.mxu1 %v37403_v24 }
 0xf37   :  { %35323 = vmatmul.mubr.f32.vlgmr.msra.gmra.mrb[126].mxu0 %v19423_v44 }
 0xf38   :  { %35326 = vmatpush3.xpose.msra.mxu0 %v19434_v31  ;;  %35327 = vmatprep.mubr.msk.f32.mxu0 %vm37404_vm2, %v37403_v24  ;;  %v19889_v31 = vsub.f32 %v19887_v38, %v19888_v41 }
 0xf39   :  { %35330 = vmatprep.subr.mxu0 %v37403_v24 }
 0xf3a   :  { %v19890_v8 = vand.u32 4294901760, %v19889_v31 }
 0xf3c   :  { %35288 = vmatmul.mubr.f32.vlgmr.msra.gmra.mrb[134].mxu1 %v18968_v21  ;;  %v33170_v21 = vld [vmem:[%s40905_s2] ss:$0 sm:$0xff] }
 0xf3d   :  { %35291 = vmatpush3.xpose.msra.mxu1 %v39516_v54  ;;  %35292 = vmatprep.mubr.msk.f32.mxu1 %vm37404_vm2, %v37403_v24 }
 0xf3e   :  { %35295 = vmatprep.subr.mxu1 %v37403_v24 }
 0xf3f   :  { %35328 = vmatmul.mubr.f32.vlgmr.msra.gmra.mrb[126].mxu0 %v39503_v9 }
 0xf40   :  { %35331 = vmatpush3.xpose.msra.mxu0 %v39453_v40  ;;  %35332 = vmatprep.mubr.msk.f32.mxu0 %vm37404_vm2, %v37403_v24  ;;  %v20343_v40 = vsub.f32 %v20341_v20, %v20342_v33 }
 0xf41   :  { %35365 = vmatprep.subr.mxu0 %v37403_v24 }
 0xf42   :  { %v20344_v3 = vand.u32 4294901760, %v20343_v40 }
 0xf44   :  { %35293 = vmatmul.mubr.f32.vlgmr.msra.gmra.mrb[134].mxu1 %v18969_v59 }
 0xf45   :  { %35296 = vmatpush3.xpose.msra.mxu1 %v18980_v5  ;;  %35297 = vmatprep.mubr.msk.f32.mxu1 %vm37404_vm2, %v37403_v24 }
 0xf46   :  { %35300 = vmatprep.subr.mxu1 %v37403_v24 }
 0xf47   :  { %35333 = vmatmul.mubr.f32.vlgmr.msra.gmra.mrb[126].mxu0 %v39503_v9  ;;  %v19878_v9 = vsub.f32 %v19876_v49, %v19877_v39 }
 0xf48   :  { %35366 = vmatpush3.xpose.msra.mxu0 %v39560_v37  ;;  %35367 = vmatprep.mubr.msk.f32.mxu0 %vm37404_vm2, %v37403_v24 }
 0xf49   :  { %35370 = vmatprep.subr.mxu0 %v37403_v24  ;;  %v19879_v15 = vand.u32 4294901760, %v19878_v9 }
 0xf4b   :  { %35368 = vmatmul.mubr.f32.vlgmr.msra.gmra.mrb[128].mxu0 %v20333_v53 }
 0xf4c   :  { %35371 = vmatpush3.xpose.msra.mxu0 %v20344_v3  ;;  %35298 = vmatmul.mubr.f32.vlgmr.msra.gmra.mrb[134].mxu1 %v39513_v30 }
 0xf4d   :  { %35301 = vmatpush3.xpose.msra.mxu1 %v39516_v54  ;;  %35372 = vmatprep.mubr.msk.f32.mxu0 %vm37404_vm2, %v37403_v24 }
 0xf4e   :  { %35375 = vmatprep.subr.mxu0 %v37403_v24  ;;  %35302 = vmatprep.mubr.msk.f32.mxu1 %vm37404_vm2, %v37403_v24 }
 0xf4f   :  { %35335 = vmatprep.subr.mxu1 %v37403_v24 }
 0xf53   :  { %35373 = vmatmul.mubr.f32.vlgmr.msra.gmra.mrb[128].mxu0 %v39557_v55 }
 0xf54   :  { %35376 = vmatpush3.xpose.msra.mxu0 %v20341_v20  ;;  %35303 = vmatmul.mubr.f32.vlgmr.msra.gmra.mrb[134].mxu1 %v39513_v30 }
 0xf55   :  { %35336 = vmatpush3.xpose.msra.mxu1 %v19810_v60  ;;  %35337 = vmatprep.mubr.msk.f32.mxu1 %vm37404_vm2, %v37403_v24 }
 0xf56   :  { %35340 = vmatprep.subr.mxu1 %v37403_v24  ;;  %35377 = vmatprep.mubr.msk.f32.mxu0 %vm37404_vm2, %v37403_v24 }
 0xf57   :  { %35380 = vmatprep.subr.mxu0 %v37403_v24 }
 0xf58   :  { %35338 = vmatmul.mubr.f32.vlgmr.msra.gmra.mrb[136].mxu1 %v19879_v15 }
 0xf59   :  { %35341 = vmatpush3.xpose.msra.mxu1 %v19890_v8  ;;  %35342 = vmatprep.mubr.msk.f32.mxu1 %vm37404_vm2, %v37403_v24 }
 0xf5a   :  { %35345 = vmatprep.subr.mxu1 %v37403_v24 }
 0xf5b   :  { %35378 = vmatmul.mubr.f32.vlgmr.msra.gmra.mrb[128].mxu0 %v39563_v35 }
 0xf5c   :  { %35381 = vmatpush3.xpose.msra.mxu0 %v39560_v37  ;;  %35382 = vmatprep.mubr.msk.f32.mxu0 %vm37404_vm2, %v37403_v24 }
 0xf5d   :  { %35385 = vmatprep.subr.mxu0 %v37403_v24 }
 0xf60   :  { %35343 = vmatmul.mubr.f32.vlgmr.msra.gmra.mrb[136].mxu1 %v39581_v16 }
 0xf61   :  { %35346 = vmatpush3.xpose.msra.mxu1 %v19887_v38  ;;  %35347 = vmatprep.mubr.msk.f32.mxu1 %vm37404_vm2, %v37403_v24 }
 0xf62   :  { %35350 = vmatprep.subr.mxu1 %v37403_v24 }
 0xf63   :  { %35383 = vmatmul.mubr.f32.vlgmr.msra.gmra.mrb[128].mxu0 %v20331_v18 }
 0xf64   :  { %35386 = vmatpush3.xpose.msra.mxu0 %v20342_v33  ;;  %35387 = vmatprep.mubr.msk.f32.mxu0 %vm37404_vm2, %v37403_v24 }
 0xf65   :  { %35390 = vmatprep.subr.mxu0 %v37403_v24 }
 0xf68   :  { %35348 = vmatmul.mubr.f32.vlgmr.msra.gmra.mrb[136].mxu1 %v19876_v49 }
 0xf69   :  { %35351 = vmatpush3.xpose.msra.mxu1 %v19810_v60  ;;  %35352 = vmatprep.mubr.msk.f32.mxu1 %vm37404_vm2, %v37403_v24 }
 0xf6a   :  { %35355 = vmatprep.subr.mxu1 %v37403_v24 }
 0xf6b   :  { %35388 = vmatmul.mubr.f32.vlgmr.msra.gmra.mrb[128].mxu0 %v39557_v55 }
 0xf6c   :  { %35391 = vmatpush3.xpose.msra.mxu0 %v39560_v37  ;;  %35392 = vmatprep.mubr.msk.f32.mxu0 %vm37404_vm2, %v37403_v24  ;;  %v33173_v37 = vld [vmem:[%s40905_s2 + $0x3] ss:$0 sm:$0xff] }
 0xf6d   :  { %35400 = vmatprep.subr.mxu0 %v37403_v24 }
 0xf70   :  { %35353 = vmatmul.mubr.f32.vlgmr.msra.gmra.mrb[136].mxu1 %v19877_v39 }
 0xf71   :  { %35356 = vmatpush3.xpose.msra.mxu1 %v19888_v41  ;;  %35357 = vmatprep.mubr.msk.f32.mxu1 %vm37404_vm2, %v37403_v24 }
 0xf72   :  { %35360 = vmatprep.subr.mxu1 %v37403_v24 }
 0xf73   :  { %35393 = vmatmul.mubr.f32.vlgmr.msra.gmra.mrb[128].mxu0 %v39557_v55 }
 0xf74   :  { %35402 = vmatprep.mubr.msk.f32.mxu0 %vm37404_vm2, %v37403_v24 }
 0xf78   :  { %35358 = vmatmul.mubr.f32.vlgmr.msra.gmra.mrb[136].mxu1 %v39581_v16 }
 0xf79   :  { %35361 = vmatpush3.xpose.msra.mxu1 %v19810_v60  ;;  %35362 = vmatprep.mubr.msk.f32.mxu1 %vm37404_vm2, %v37403_v24 }
 0xf7a   :  { %35395 = vmatprep.subr.mxu1 %v37403_v24 }
 0xf80   :  { %35363 = vmatmul.mubr.f32.vlgmr.msra.gmra.mrb[136].mxu1 %v39581_v16 }
 0xf81   :  { %35397 = vmatprep.mubr.msk.f32.mxu1 %vm37404_vm2, %v37403_v24 }
 0xfa3   :  { %v17485_v62 = vpop.f32.mrb[128].mxu1 }
 0xfa4   :  { %v35184_v44 = vpop.f32.mrb[129].mxu1  ;;  %v36667_v45 = vadd.f32 %v33170_v21, %v17485_v62 }
 0xfa6   :  { %v18841_v29 = vpop.f32.mrb[124].mxu0  ;;  %v18845_v27 = vsel %vm875_vm3, %v36667_v45, -inf }
 0xfa7   :  { %v35274_v30 = vpop.f32.mrb[125].mxu0  ;;  %v36670_v50 = vadd.f32 %v33173_v37, %v18841_v29 }
 0xfa9   :  { %v18854_v40 = vsel %vm875_vm3, %v36670_v50, -inf }
 0xfcf   :  { %v17937_v54 = vpop.f32.mrb[130].mxu1 }
 0xfd0   :  { %v35214_v6 = vpop.f32.mrb[131].mxu1  ;;  %v36668_v33 = vadd.f32 %v33171_v61, %v17937_v54 }
 0xfd2   :  { %v18848_v28 = vsel %vm875_vm3, %v36668_v33, -inf }
 0xffb   :  { %v18389_v52 = vpop.f32.mrb[132].mxu1 }
 0xffc   :  { %v35244_v56 = vpop.f32.mrb[133].mxu1  ;;  %v39652_v34 = vadd.f32 %v33172_v46, %v18389_v52 }
 0xffe   :  { %v18851_v23 = vsel %vm875_vm3, %v39652_v34, -inf }
0x101a   :  { %v19797_v59 = vpop.f32.mrb[126].mxu0 }
0x101b   :  { %v36672_v5 = vadd.f32 %v33171_v61, %v19797_v59  ;;  %v35334_v26 = vpop.f32.mrb[127].mxu0 }
0x101d   :  { %v20712_v32 = vsel %vm875_vm3, %v36672_v5, -inf }
0x101e   :  { %20713 = vmax.xlane.f32.xlu0 %v20712_v32 }
0x1022   :  { %18846 = vmax.xlane.f32.xlu0 %v18845_v27 }
0x1026   :  { %18852 = vmax.xlane.f32.xlu0 %v18851_v23 }
0x1027   :  { %v19343_v2 = vpop.f32.mrb[134].mxu1 }
0x1028   :  { %v36671_v4 = vadd.f32 %v33170_v21, %v19343_v2  ;;  %v35304_v22 = vpop.f32.mrb[135].mxu1 }
0x102a   :  { %v20709_v55 = vsel %vm875_vm3, %v36671_v4, -inf }
0x102b   :  { %20710 = vmax.xlane.f32.xlu1 %v20709_v55 }
0x1046   :  { %v20705_v35 = vpop.f32.mrb[128].mxu0 }
0x1047   :  { %v36674_v20 = vadd.f32 %v33173_v37, %v20705_v35  ;;  %v35394_v18 = vpop.f32.mrb[129].mxu0 }
0x1049   :  { %v20718_v10 = vsel %vm875_vm3, %v36674_v20, -inf }
0x104a   :  { %20719 = vmax.xlane.f32.xlu1 %v20718_v10 }
0x104e   :  { %18849 = vmax.xlane.f32.xlu1 %v18848_v28 }
0x1052   :  { %18855 = vmax.xlane.f32.xlu1 %v18854_v40 }
0x1053   :  { %v20251_v16 = vpop.f32.mrb[136].mxu1 }
0x1054   :  { %v36673_v60 = vadd.f32 %v33172_v46, %v20251_v16  ;;  %v35364_v53 = vpop.f32.mrb[137].mxu1 }
0x1056   :  { %v20715_v3 = vsel %vm875_vm3, %v36673_v60, -inf }
0x1057   :  { %20716 = vmax.xlane.f32.xlu0 %v20715_v3 }
0x106d   :  { %21209 = vrot.lane.b32.xlu0 %v39348_v11, %s37409_s11 }
0x10ab   :  { %v20714_v49 = vpop.xlane.xlu0 %20713 }
0x10ac   :  { %v20722_v38 = vsub.f32 %v36672_v5, %v20714_v49 }
0x10ae   :  { %v20727_v39 = vmul.f32 1.442695, %v20722_v38 }
0x10af   :  { %v18847_v30 = vpop.xlane.xlu0 %18846 }
0x10b0   :  { %37240 = vpow2.f32 %v20727_v39  ;;  %v18857_v52 = vsub.f32 %v36667_v45, %v18847_v30 }
0x10b2   :  { %v18861_v56 = vmul.f32 1.442695, %v18857_v52 }
0x10b3   :  { %v18853_v21 = vpop.xlane.xlu0 %18852 }
0x10b4   :  { %v18859_v35 = vsub.f32 %v39652_v34, %v18853_v21 }
0x10b6   :  { %v18865_v18 = vmul.f32 1.442695, %v18859_v35 }
0x10b8   :  { %v20711_v41 = vpop.xlane.xlu1 %20710 }
0x10b9   :  { %v20721_v9 = vsub.f32 %v36671_v4, %v20711_v41 }
0x10ba   :  { %v39667_v31 = vpop.eup %37240 }
0x10bb   :  { %v20725_v15 = vmul.f32 1.442695, %v20721_v9  ;;  %v20736_v8 = vsel %vm875_vm3, %v39667_v31, 0.0 }
0x10bc   :  { %20737 = vadd.xlane.f32.xlu1 %v20736_v8 }
0x10bd   :  { %37242 = vpow2.f32 %v20725_v15 }
0x10c7   :  { %v39671_v62 = vpop.eup %37242 }
0x10c8   :  { %v20733_v44 = vsel %vm875_vm3, %v39671_v62, 0.0 }
0x10c9   :  { %20734 = vadd.xlane.f32.xlu0 %v20733_v44 }
0x10cd   :  { %20757 = vrot.lane.b32.xlu1 %v39340_v57, %s37409_s11 }
0x10d7   :  { %v20720_v29 = vpop.xlane.xlu1 %20719 }
0x10d8   :  { %v20724_v54 = vsub.f32 %v36674_v20, %v20720_v29 }
0x10da   :  { %v20731_v6 = vmul.f32 1.442695, %v20724_v54 }
0x10db   :  { %v18850_v2 = vpop.xlane.xlu1 %18849 }
0x10dc   :  { %37244 = vpow2.f32 %v20731_v6  ;;  %v18858_v55 = vsub.f32 %v36668_v33, %v18850_v2 }
0x10dd   :  { %37246 = vpow2.f32 %v18861_v56 }
0x10de   :  { %v18863_v20 = vmul.f32 1.442695, %v18858_v55 }
0x10df   :  { %v18856_v4 = vpop.xlane.xlu1 %18855 }
0x10e0   :  { %v18860_v22 = vsub.f32 %v36670_v50, %v18856_v4 }
0x10e2   :  { %v18867_v37 = vmul.f32 1.442695, %v18860_v22 }
0x10e4   :  { %v20717_v61 = vpop.xlane.xlu0 %20716 }
0x10e5   :  { %v20723_v59 = vsub.f32 %v36673_v60, %v20717_v61 }
0x10e6   :  { %v39677_v5 = vpop.eup %37244 }
0x10e7   :  { %v20729_v26 = vmul.f32 1.442695, %v20723_v59  ;;  %v20742_v32 = vsel %vm875_vm3, %v39677_v5, 0.0  ;;  %v39681_v46 = vpop.eup %37246 }
0x10e8   :  { %20743 = vadd.xlane.f32.xlu0 %v20742_v32  ;;  %v18869_v27 = vsel %vm875_vm3, %v39681_v46, 0.0  ;;  %v21210_v49 = vpop.permute.xlu0 %21209 }
0x10e9   :  { %37248 = vpow2.f32 %v20729_v26  ;;  %v21216_v15 = vand.u32 4294901760, %v21210_v49 }
0x10ea   :  { %37250 = vpow2.f32 %v18867_v37 }
0x10eb   :  { %37252 = vpow2.f32 %v18863_v20  ;;  %v21293_v29 = vsub.f32 %v21210_v49, %v21216_v15 }
0x10ec   :  { %37254 = vpow2.f32 %v18865_v18 }
0x10ed   :  { %v21294_v56 = vand.u32 4294901760, %v21293_v29 }
0x10ef   :  { %v21295_v59 = vsub.f32 %v21293_v29, %v21294_v56 }
0x10f1   :  { %18870 = vadd.xlane.f32.xlu1 %v18869_v27 }
0x10f3   :  { %v39685_v45 = vpop.eup %37248 }
0x10f4   :  { %v20739_v23 = vsel %vm875_vm3, %v39685_v45, 0.0  ;;  %v39694_v10 = vpop.eup %37250 }
0x10f5   :  { %20740 = vadd.xlane.f32.xlu0 %v20739_v23  ;;  %v18878_v28 = vsel %vm875_vm3, %v39694_v10, 0.0  ;;  %v39698_v40 = vpop.eup %37252  ;;  %v21296_v23 = vand.u32 4294901760, %v21295_v59 }
0x10f6   :  { %v18872_v50 = vsel %vm875_vm3, %v39698_v40, 0.0  ;;  %v39702_v33 = vpop.eup %37254 }
0x10f7   :  { %v18875_v34 = vsel %vm875_vm3, %v39702_v33, 0.0 }
0x1102   :  { %22113 = vrot.lane.b32.xlu1 %v39362_v51, %s37409_s11 }
0x110b   :  { %21661 = vrot.lane.b32.xlu0 %v39356_v42, %s37409_s11 }
0x1126   :  { %18879 = vadd.xlane.f32.xlu1 %v18878_v28 }
0x112a   :  { %18873 = vadd.xlane.f32.xlu0 %v18872_v50 }
0x112e   :  { %18876 = vadd.xlane.f32.xlu0 %v18875_v34 }
0x1137   :  { %24827 = vrot.lane.b32.xlu1 %v39386_v47, %s37410_s13 }
0x113b   :  { %25737 = vrot.lane.b32.xlu1 %v39362_v51, %s37410_s13 }
0x1144   :  { %22565 = vrot.lane.b32.xlu0 %v39340_v57, %s37405_s30 }
0x1148   :  { %23017 = vrot.lane.b32.xlu0 %v39348_v11, %s37405_s30 }
0x1149   :  { %v20738_v16 = vpop.xlane.xlu1 %20737 }
0x114a   :  { %37256 = vrcp.f32 %v20738_v16 }
0x114c   :  { %23469 = vrot.lane.b32.xlu0 %v39356_v42, %s37405_s30 }
0x114d   :  { %v20758_v60 = vpop.permute.xlu1 %20757 }
0x114e   :  { %v20764_v53 = vand.u32 4294901760, %v20758_v60 }
0x1150   :  { %v20841_v3 = vsub.f32 %v20758_v60, %v20764_v53  ;;  %35396 = vmatpush3.msra.mxu1 %v20764_v53  ;;  %23921 = vrot.lane.b32.xlu0 %v39362_v51, %s37405_s30 }
0x1151   :  { %35405 = vmatprep.subr.mxu1 %v37403_v24 }
0x1152   :  { %v20842_v38 = vand.u32 4294901760, %v20841_v3 }
0x1154   :  { %v20843_v39 = vsub.f32 %v20841_v3, %v20842_v38  ;;  %24373 = vrot.lane.b32.xlu0 %v39375_v17, %s37410_s13  ;;  %v37257_v8 = vpop.eup %37256 }
0x1155   :  { %v39732_v54 = vmul.f32 %v37257_v8, %v39667_v31 }
0x1156   :  { %v20844_v41 = vand.u32 4294901760, %v20843_v39  ;;  %v20735_v9 = vpop.xlane.xlu0 %20734 }
0x1157   :  { %37258 = vrcp.f32 %v20735_v9  ;;  %v21213_v21 = vsel %vm875_vm3, %v39732_v54, 0 }
0x1158   :  { %35401 = vmatpush3.msra.mxu0 %v20844_v41  ;;  %24375 = vrot.lane.b32.xlu0 %v39340_v57, %s37410_s13 }
0x1159   :  { %35410 = vmatprep.subr.mxu0 %v37403_v24 }
0x115c   :  { %24829 = vrot.lane.b32.xlu0 %v39348_v11, %s37410_s13 }
0x1160   :  { %25281 = vrot.lane.b32.xlu0 %v39396_v14, %s37410_s13 }
0x1161   :  { %v37259_v44 = vpop.eup %37258 }
0x1162   :  { %v39729_v30 = vmul.f32 %v37259_v44, %v39671_v62  ;;  %v21281_v62 = vand.u32 4294901760, %v21213_v21 }
0x1164   :  { %25283 = vrot.lane.b32.xlu0 %v39356_v42, %s37410_s13  ;;  %v20761_v6 = vsel %vm875_vm3, %v39729_v30, 0  ;;  %v21282_v27 = vsub.f32 %v21213_v21, %v21281_v62 }
0x1165   :  { %v20829_v52 = vand.u32 4294901760, %v20761_v6 }
0x1166   :  { %v21283_v2 = vand.u32 4294901760, %v21282_v27 }
0x1167   :  { %v20830_v61 = vsub.f32 %v20761_v6, %v20829_v52  ;;  %35403 = vmatmul.mubr.f32.vlgmr.msra.gmra.mrb[130].mxu0 %v20829_v52 }
0x1168   :  { %35411 = vmatpush3.msra.mxu0 %v20764_v53  ;;  %25735 = vrot.lane.b32.xlu0 %v39384_v58, %s37410_s13  ;;  %v21284_v4 = vsub.f32 %v21282_v27, %v21283_v2 }
0x1169   :  { %35412 = vmatprep.mubr.msk.f32.mxu0 %vm37404_vm2, %v37403_v24  ;;  %35420 = vmatprep.subr.mxu0 %v37403_v24  ;;  %v20831_v31 = vand.u32 4294901760, %v20830_v61 }
0x116a   :  { %v21285_v22 = vand.u32 4294901760, %v21284_v4 }
0x116b   :  { %35413 = vmatmul.mubr.f32.vlgmr.msra.gmra.mrb[132].mxu0 %v20831_v31  ;;  %v20832_v26 = vsub.f32 %v20830_v61, %v20831_v31 }
0x116c   :  { %35421 = vmatpush3.msra.mxu0 %v20764_v53  ;;  %35422 = vmatprep.mubr.msk.f32.mxu0 %vm37404_vm2, %v37403_v24 }
0x116d   :  { %35430 = vmatprep.subr.mxu0 %v37403_v24  ;;  %v20833_v32 = vand.u32 4294901760, %v20832_v26 }
0x116f   :  { %35398 = vmatmul.mubr.f32.vlgmr.msra.gmra.mrb[138].mxu1 %v20833_v32  ;;  %35423 = vmatmul.mubr.f32.vlgmr.msra.gmra.mrb[134].mxu0 %v20829_v52 }
0x1170   :  { %35406 = vmatpush3.msra.mxu1 %v20841_v3  ;;  %35431 = vmatpush3.msra.mxu0 %v21296_v23 }
0x1171   :  { %35407 = vmatprep.mubr.msk.f32.mxu1 %vm37404_vm2, %v37403_v24  ;;  %35415 = vmatprep.subr.mxu1 %v37403_v24 }
0x1172   :  { %35432 = vmatprep.mubr.msk.f32.mxu0 %vm37404_vm2, %v37403_v24  ;;  %35440 = vmatprep.subr.mxu0 %v37403_v24 }
0x1173   :  { %35408 = vmatmul.mubr.f32.vlgmr.msra.gmra.mrb[140].mxu1 %v20830_v61  ;;  %35433 = vmatmul.mubr.f32.vlgmr.msra.gmra.mrb[136].mxu0 %v21281_v62 }
0x1174   :  { %35416 = vmatpush3.msra.mxu1 %v20842_v38  ;;  %35441 = vmatpush3.msra.mxu0 %v21216_v15 }
0x1175   :  { %35417 = vmatprep.mubr.msk.f32.mxu1 %vm37404_vm2, %v37403_v24  ;;  %35425 = vmatprep.subr.mxu1 %v37403_v24  ;;  %v20744_v55 = vpop.xlane.xlu0 %20743 }
0x1176   :  { %35442 = vmatprep.mubr.msk.f32.mxu0 %vm37404_vm2, %v37403_v24  ;;  %35450 = vmatprep.subr.mxu0 %v37403_v24 }
0x1177   :  { %35418 = vmatmul.mubr.f32.vlgmr.msra.gmra.mrb[142].mxu1 %v20829_v52  ;;  %35443 = vmatmul.mubr.f32.vlgmr.msra.gmra.mrb[138].mxu0 %v21283_v2 }
0x1178   :  { %35426 = vmatpush3.msra.mxu1 %v21216_v15  ;;  %35451 = vmatpush3.msra.mxu0 %v21216_v15 }
0x1179   :  { %35427 = vmatprep.mubr.msk.f32.mxu1 %vm37404_vm2, %v37403_v24  ;;  %35435 = vmatprep.subr.mxu1 %v37403_v24 }
0x117a   :  { %35452 = vmatprep.mubr.msk.f32.mxu0 %vm37404_vm2, %v37403_v24  ;;  %35460 = vmatprep.subr.mxu0 %v37403_v24 }
0x117b   :  { %35428 = vmatmul.mubr.f32.vlgmr.msra.gmra.mrb[144].mxu1 %v21285_v22  ;;  %35453 = vmatmul.mubr.f32.vlgmr.msra.gmra.mrb[140].mxu0 %v21281_v62 }
0x117c   :  { %35436 = vmatpush3.msra.mxu1 %v21293_v29  ;;  %35437 = vmatprep.mubr.msk.f32.mxu1 %vm37404_vm2, %v37403_v24 }
0x117d   :  { %35445 = vmatprep.subr.mxu1 %v37403_v24  ;;  %35462 = vmatprep.mubr.msk.f32.mxu0 %vm37404_vm2, %v37403_v24 }
0x117e   :  { %v18871_v37 = vpop.xlane.xlu1 %18870 }
0x117f   :  { %37260 = vrcp.f32 %v18871_v37  ;;  %35438 = vmatmul.mubr.f32.vlgmr.msra.gmra.mrb[146].mxu1 %v21282_v27 }
0x1180   :  { %35446 = vmatpush3.msra.mxu1 %v21294_v56  ;;  %35447 = vmatprep.mubr.msk.f32.mxu1 %vm37404_vm2, %v37403_v24  ;;  %37262 = vrcp.f32 %v20744_v55 }
0x1181   :  { %35455 = vmatprep.subr.mxu1 %v37403_v24 }
0x1182   :  { %v20741_v35 = vpop.xlane.xlu0 %20740  ;;  %v22114_v18 = vpop.permute.xlu1 %22113 }
0x1183   :  { %37264 = vrcp.f32 %v20741_v35  ;;  %35448 = vmatmul.mubr.f32.vlgmr.msra.gmra.mrb[148].mxu1 %v21281_v62  ;;  %v22120_v60 = vand.u32 4294901760, %v22114_v18 }
0x1184   :  { %35457 = vmatprep.mubr.msk.f32.mxu1 %vm37404_vm2, %v37403_v24 }
0x1185   :  { %v22197_v41 = vsub.f32 %v22114_v18, %v22120_v60 }
0x1186   :  { %v21662_v20 = vpop.permute.xlu0 %21661 }
0x1187   :  { %v21668_v28 = vand.u32 4294901760, %v21662_v20  ;;  %v22198_v29 = vand.u32 4294901760, %v22197_v41 }
0x1189   :  { %v37261_v50 = vpop.eup %37260  ;;  %v21745_v34 = vsub.f32 %v21662_v20, %v21668_v28  ;;  %35456 = vmatpush3.msra.mxu1 %v21668_v28  ;;  %v22199_v52 = vsub.f32 %v22197_v41, %v22198_v29 }
0x118a   :  { %v39777_v16 = vmul.f32 %v37261_v50, %v39681_v46  ;;  %35465 = vmatprep.subr.mxu1 %v37403_v24  ;;  %v37263_v53 = vpop.eup %37262 }
0x118b   :  { %v21746_v3 = vand.u32 4294901760, %v21745_v34  ;;  %v39788_v15 = vmul.f32 %v37263_v53, %v39677_v5  ;;  %v22200_v31 = vand.u32 4294901760, %v22199_v52 }
0x118c   :  { %v39782_v49 = vadd.f32 %v39729_v30, %v39777_v16  ;;  %v22569_v32 = vsel %vm875_vm3, %v39777_v16, 0 }
0x118d   :  { %v37265_v38 = vpop.eup %37264  ;;  %v21747_v39 = vsub.f32 %v21745_v34, %v21746_v3  ;;  %v22117_v30 = vsel %vm875_vm3, %v39788_v15, 0  ;;  %v39831_v27 = vand.u32 4294901760, %v22569_v32 }
0x118e   :  { %v39785_v9 = vmul.f32 %v37265_v38, %v39685_v45  ;;  %v22185_v45 = vand.u32 4294901760, %v22117_v30 }
0x118f   :  { %v21748_v46 = vand.u32 4294901760, %v21747_v39  ;;  %v22638_v2 = vsub.f32 %v22569_v32, %v39831_v27 }
0x1190   :  { %v21665_v8 = vsel %vm875_vm3, %v39785_v9, 0  ;;  %v22186_v61 = vsub.f32 %v22117_v30, %v22185_v45 }
0x1191   :  { %35461 = vmatpush3.msra.mxu0 %v21748_v46  ;;  %v21733_v44 = vand.u32 4294901760, %v21665_v8  ;;  %v22639_v22 = vand.u32 4294901760, %v22638_v2 }
0x1192   :  { %35470 = vmatprep.subr.mxu0 %v37403_v24  ;;  %v22187_v62 = vand.u32 4294901760, %v22186_v61 }
0x1193   :  { %v21734_v6 = vsub.f32 %v21665_v8, %v21733_v44  ;;  %35463 = vmatmul.mubr.f32.vlgmr.msra.gmra.mrb[142].mxu0 %v21733_v44  ;;  %v22640_v37 = vsub.f32 %v22638_v2, %v22639_v22 }
0x1194   :  { %35471 = vmatpush3.msra.mxu0 %v21668_v28  ;;  %35472 = vmatprep.mubr.msk.f32.mxu0 %vm37404_vm2, %v37403_v24  ;;  %v22188_v59 = vsub.f32 %v22186_v61, %v22187_v62 }
0x1195   :  { %35480 = vmatprep.subr.mxu0 %v37403_v24  ;;  %v21735_v5 = vand.u32 4294901760, %v21734_v6 }
0x1196   :  { %v22189_v26 = vand.u32 4294901760, %v22188_v59 }
0x1197   :  { %35473 = vmatmul.mubr.f32.vlgmr.msra.gmra.mrb[144].mxu0 %v21735_v5  ;;  %v21736_v56 = vsub.f32 %v21734_v6, %v21735_v5 }
0x1198   :  { %35481 = vmatpush3.msra.mxu0 %v21668_v28  ;;  %35482 = vmatprep.mubr.msk.f32.mxu0 %vm37404_vm2, %v37403_v24 }
0x1199   :  { %35490 = vmatprep.subr.mxu0 %v37403_v24  ;;  %v21737_v21 = vand.u32 4294901760, %v21736_v56 }
0x119b   :  { %35458 = vmatmul.mubr.f32.vlgmr.msra.gmra.mrb[150].mxu1 %v21737_v21  ;;  %35483 = vmatmul.mubr.f32.vlgmr.msra.gmra.mrb[146].mxu0 %v21733_v44 }
0x119c   :  { %35466 = vmatpush3.msra.mxu1 %v21745_v34  ;;  %35491 = vmatpush3.msra.mxu0 %v22200_v31  ;;  %v22641_v34 = vand.u32 4294901760, %v22640_v37 }
0x119d   :  { %35467 = vmatprep.mubr.msk.f32.mxu1 %vm37404_vm2, %v37403_v24  ;;  %35475 = vmatprep.subr.mxu1 %v37403_v24 }
0x119e   :  { %35492 = vmatprep.mubr.msk.f32.mxu0 %vm37404_vm2, %v37403_v24  ;;  %35500 = vmatprep.subr.mxu0 %v37403_v24 }
0x119f   :  { %35468 = vmatmul.mubr.f32.vlgmr.msra.gmra.mrb[152].mxu1 %v21734_v6  ;;  %35493 = vmatmul.mubr.f32.vlgmr.msra.gmra.mrb[148].mxu0 %v22185_v45 }
0x11a0   :  { %35476 = vmatpush3.msra.mxu1 %v21746_v3  ;;  %35501 = vmatpush3.msra.mxu0 %v22120_v60 }
0x11a1   :  { %35477 = vmatprep.mubr.msk.f32.mxu1 %vm37404_vm2, %v37403_v24  ;;  %35485 = vmatprep.subr.mxu1 %v37403_v24 }
0x11a2   :  { %35502 = vmatprep.mubr.msk.f32.mxu0 %vm37404_vm2, %v37403_v24  ;;  %35510 = vmatprep.subr.mxu0 %v37403_v24 }
0x11a3   :  { %35478 = vmatmul.mubr.f32.vlgmr.msra.gmra.mrb[154].mxu1 %v21733_v44  ;;  %35503 = vmatmul.mubr.f32.vlgmr.msra.gmra.mrb[150].mxu0 %v22187_v62 }
0x11a4   :  { %35486 = vmatpush3.msra.mxu1 %v22120_v60  ;;  %35511 = vmatpush3.msra.mxu0 %v22120_v60 }
0x11a5   :  { %35487 = vmatprep.mubr.msk.f32.mxu1 %vm37404_vm2, %v37403_v24  ;;  %35495 = vmatprep.subr.mxu1 %v37403_v24 }
0x11a6   :  { %35512 = vmatprep.mubr.msk.f32.mxu0 %vm37404_vm2, %v37403_v24  ;;  %35520 = vmatprep.subr.mxu0 %v37403_v24 }
0x11a7   :  { %35488 = vmatmul.mubr.f32.vlgmr.msra.gmra.mrb[156].mxu1 %v22189_v26  ;;  %35513 = vmatmul.mubr.f32.vlgmr.msra.gmra.mrb[152].mxu0 %v22185_v45 }
0x11a8   :  { %35496 = vmatpush3.msra.mxu1 %v22197_v41  ;;  %35497 = vmatprep.mubr.msk.f32.mxu1 %vm37404_vm2, %v37403_v24 }
0x11a9   :  { %35505 = vmatprep.subr.mxu1 %v37403_v24  ;;  %35522 = vmatprep.mubr.msk.f32.mxu0 %vm37404_vm2, %v37403_v24 }
0x11ab   :  { %35498 = vmatmul.mubr.f32.vlgmr.msra.gmra.mrb[158].mxu1 %v22186_v61 }
0x11ac   :  { %35506 = vmatpush3.msra.mxu1 %v22198_v29  ;;  %35507 = vmatprep.mubr.msk.f32.mxu1 %vm37404_vm2, %v37403_v24 }
0x11ad   :  { %35515 = vmatprep.subr.mxu1 %v37403_v24 }
0x11af   :  { %35508 = vmatmul.mubr.f32.vlgmr.msra.gmra.mrb[160].mxu1 %v22185_v45 }
0x11b0   :  { %35517 = vmatprep.mubr.msk.f32.mxu1 %vm37404_vm2, %v37403_v24 }
0x11b3   :  { %v18880_v23 = vpop.xlane.xlu1 %18879 }
0x11b4   :  { %37266 = vrcp.f32 %v18880_v23 }
0x11b7   :  { %v18874_v4 = vpop.xlane.xlu0 %18873 }
0x11b8   :  { %37268 = vrcp.f32 %v18874_v4 }
0x11bb   :  { %v18877_v55 = vpop.xlane.xlu0 %18876 }
0x11bc   :  { %37270 = vrcp.f32 %v18877_v55 }
0x11be   :  { %v37267_v35 = vpop.eup %37266 }
0x11bf   :  { %v18888_v20 = vmul.f32 %v37267_v35, %v39694_v10  ;;  %v22566_v18 = vpop.permute.xlu0 %22565 }
0x11c0   :  { %v22572_v28 = vand.u32 4294901760, %v22566_v18 }
0x11c1   :  { %v39836_v50 = vadd.f32 %v39788_v15, %v18888_v20  ;;  %v23925_v32 = vsel %vm875_vm3, %v18888_v20, 0 }
0x11c2   :  { %v37269_v16 = vpop.eup %37268  ;;  %v22649_v60 = vsub.f32 %v22566_v18, %v22572_v28  ;;  %35516 = vmatpush3.msra.mxu1 %v22572_v28  ;;  %v39896_v4 = vand.u32 4294901760, %v23925_v32 }
0x11c3   :  { %v39839_v53 = vmul.f32 %v37269_v16, %v39698_v40  ;;  %35518 = vmatmul.mubr.f32.vlgmr.msra.gmra.mrb[162].mxu1 %v22641_v34  ;;  %35525 = vmatprep.subr.mxu1 %v37403_v24  ;;  %v23018_v3 = vpop.permute.xlu0 %23017 }
0x11c4   :  { %v22650_v38 = vand.u32 4294901760, %v22649_v60  ;;  %v39842_v39 = vand.u32 4294901760, %v23018_v3  ;;  %35526 = vmatpush3.msra.mxu1 %v22649_v60  ;;  %35527 = vmatprep.mubr.msk.f32.mxu1 %vm37404_vm2, %v37403_v24  ;;  %v39911_v20 = vsub.f32 %v23925_v32, %v39896_v4 }
0x11c5   :  { %35535 = vmatprep.subr.mxu1 %v37403_v24  ;;  %v23021_v10 = vsel %vm875_vm3, %v39839_v53, 0 }
0x11c6   :  { %v37271_v41 = vpop.eup %37270  ;;  %v22651_v15 = vsub.f32 %v22649_v60, %v22650_v38  ;;  %v23101_v40 = vsub.f32 %v23018_v3, %v39842_v39  ;;  %v39850_v46 = vand.u32 4294901760, %v23021_v10  ;;  %v23995_v34 = vand.u32 4294901760, %v39911_v20 }
0x11c7   :  { %v18886_v8 = vmul.f32 %v37271_v41, %v39702_v33  ;;  %35528 = vmatmul.mubr.f32.vlgmr.msra.gmra.mrb[164].mxu1 %v22638_v2  ;;  %v23470_v33 = vpop.permute.xlu0 %23469  ;;  %v24828_v41 = vpop.permute.xlu1 %24827 }
0x11c8   :  { %v22652_v44 = vand.u32 4294901760, %v22651_v15  ;;  %35536 = vmatpush3.msra.mxu1 %v22650_v38  ;;  %35537 = vmatprep.mubr.msk.f32.mxu1 %vm37404_vm2, %v37403_v24  ;;  %v23090_v29 = vsub.f32 %v23021_v10, %v39850_v46  ;;  %v23102_v5 = vand.u32 4294901760, %v23101_v40  ;;  %v39869_v21 = vand.u32 4294901760, %v23470_v33 }
0x11c9   :  { %v39857_v30 = vadd.f32 %v39785_v9, %v18886_v8  ;;  %35545 = vmatprep.subr.mxu1 %v37403_v24  ;;  %v23473_v6 = vsel %vm875_vm3, %v18886_v8, 0  ;;  %v23996_v38 = vsub.f32 %v39911_v20, %v23995_v34 }
0x11ca   :  { %35521 = vmatpush3.msra.mxu0 %v22652_v44  ;;  %v23091_v45 = vand.u32 4294901760, %v23090_v29  ;;  %v39861_v52 = vand.u32 4294901760, %v23473_v6  ;;  %v23103_v9 = vsub.f32 %v23101_v40, %v23102_v5  ;;  %v23553_v59 = vsub.f32 %v23470_v33, %v39869_v21 }
0x11cb   :  { %35523 = vmatmul.mubr.f32.vlgmr.msra.gmra.mrb[154].mxu0 %v39831_v27  ;;  %35530 = vmatprep.subr.mxu0 %v37403_v24  ;;  %v23922_v23 = vpop.permute.xlu0 %23921  ;;  %v24831_v44 = vsel %vm875_vm3, %v24828_v41, 0 }
0x11cc   :  { %35538 = vmatmul.mubr.f32.vlgmr.msra.gmra.mrb[166].mxu1 %v39831_v27  ;;  %35531 = vmatpush3.msra.mxu0 %v22572_v28  ;;  %v23092_v56 = vsub.f32 %v23090_v29, %v23091_v45  ;;  %v39875_v31 = vsub.f32 %v23473_v6, %v39861_v52  ;;  %v23104_v62 = vand.u32 4294901760, %v23103_v9  ;;  %v23554_v2 = vand.u32 4294901760, %v23553_v59 }
0x11cd   :  { %35546 = vmatpush3.msra.mxu1 %v39842_v39  ;;  %35532 = vmatprep.mubr.msk.f32.mxu0 %vm37404_vm2, %v37403_v24  ;;  %v39905_v55 = vand.u32 4294901760, %v23922_v23  ;;  %v39968_v33 = vand.u32 4294901760, %v24831_v44 }
0x11ce   :  { %35540 = vmatprep.subr.mxu0 %v37403_v24  ;;  %35547 = vmatprep.mubr.msk.f32.mxu1 %vm37404_vm2, %v37403_v24  ;;  %v23093_v61 = vand.u32 4294901760, %v23092_v56  ;;  %v23543_v26 = vand.u32 4294901760, %v39875_v31 }
0x11cf   :  { %35533 = vmatmul.mubr.f32.vlgmr.msra.gmra.mrb[156].mxu0 %v22639_v22  ;;  %35555 = vmatprep.subr.mxu1 %v37403_v24  ;;  %v23555_v22 = vsub.f32 %v23553_v59, %v23554_v2  ;;  %v24374_v37 = vpop.permute.xlu0 %24373 }
0x11d0   :  { %35541 = vmatpush3.msra.mxu0 %v22572_v28  ;;  %35548 = vmatmul.mubr.f32.vlgmr.msra.gmra.mrb[168].mxu1 %v23093_v61  ;;  %v24005_v28 = vsub.f32 %v23922_v23, %v39905_v55  ;;  %v24377_v3 = vsel %vm875_vm3, %v24374_v37, 0 }
0x11d1   :  { %35556 = vmatpush3.msra.mxu1 %v23101_v40  ;;  %35542 = vmatprep.mubr.msk.f32.mxu0 %vm37404_vm2, %v37403_v24  ;;  %v23556_v18 = vand.u32 4294901760, %v23555_v22  ;;  %v39939_v10 = vand.u32 4294901760, %v24377_v3 }
0x11d2   :  { %35550 = vmatprep.subr.mxu0 %v37403_v24  ;;  %35557 = vmatprep.mubr.msk.f32.mxu1 %vm37404_vm2, %v37403_v24  ;;  %v24006_v60 = vand.u32 4294901760, %v24005_v28 }
0x11d3   :  { %35543 = vmatmul.mubr.f32.vlgmr.msra.gmra.mrb[158].mxu0 %v39831_v27  ;;  %35565 = vmatprep.subr.mxu1 %v37403_v24  ;;  %v23544_v27 = vsub.f32 %v39875_v31, %v23543_v26  ;;  %v24376_v16 = vpop.permute.xlu0 %24375 }
0x11d4   :  { %35551 = vmatpush3.msra.mxu0 %v23104_v62  ;;  %35558 = vmatmul.mubr.f32.vlgmr.msra.gmra.mrb[170].mxu1 %v23090_v29  ;;  %v24007_v15 = vsub.f32 %v24005_v28, %v24006_v60  ;;  %v39955_v29 = vsub.f32 %v24377_v3, %v39939_v10 }
0x11d5   :  { %35566 = vmatpush3.msra.mxu1 %v23102_v5  ;;  %35552 = vmatprep.mubr.msk.f32.mxu0 %vm37404_vm2, %v37403_v24  ;;  %v23545_v35 = vand.u32 4294901760, %v23544_v27 }
0x11d6   :  { %35560 = vmatprep.subr.mxu0 %v37403_v24  ;;  %35567 = vmatprep.mubr.msk.f32.mxu1 %vm37404_vm2, %v37403_v24  ;;  %v24008_v6 = vand.u32 4294901760, %v24007_v15  ;;  %v24449_v56 = vand.u32 4294901760, %v39955_v29 }
0x11d7   :  { %35553 = vmatmul.mubr.f32.vlgmr.msra.gmra.mrb[160].mxu0 %v39850_v46  ;;  %35575 = vmatprep.subr.mxu1 %v37403_v24  ;;  %v24830_v8 = vpop.permute.xlu0 %24829 }
0x11d8   :  { %35561 = vmatpush3.msra.mxu0 %v39842_v39  ;;  %35568 = vmatmul.mubr.f32.vlgmr.msra.gmra.mrb[172].mxu1 %v39850_v46  ;;  %v24450_v61 = vsub.f32 %v39955_v29, %v24449_v56 }
0x11d9   :  { %35576 = vmatpush3.msra.mxu1 %v39869_v21  ;;  %35562 = vmatprep.mubr.msk.f32.mxu0 %vm37404_vm2, %v37403_v24 }
0x11da   :  { %35570 = vmatprep.subr.mxu0 %v37403_v24  ;;  %35577 = vmatprep.mubr.msk.f32.mxu1 %vm37404_vm2, %v37403_v24 }
0x11db   :  { %35563 = vmatmul.mubr.f32.vlgmr.msra.gmra.mrb[162].mxu0 %v23091_v45  ;;  %35585 = vmatprep.subr.mxu1 %v37403_v24  ;;  %v24833_v45 = vsel %vm875_vm3, %v24830_v8, 0 }
0x11dc   :  { %35571 = vmatpush3.msra.mxu0 %v39842_v39  ;;  %35578 = vmatmul.mubr.f32.vlgmr.msra.gmra.mrb[174].mxu1 %v23545_v35  ;;  %v24379_v39 = vsel %vm875_vm3, %v24376_v16, 0  ;;  %v39972_v9 = vand.u32 4294901760, %v24833_v45  ;;  %v25738_v16 = vpop.permute.xlu1 %25737 }
0x11dd   :  { %35586 = vmatpush3.msra.mxu1 %v23553_v59  ;;  %35572 = vmatprep.mubr.msk.f32.mxu0 %vm37404_vm2, %v37403_v24  ;;  %v39944_v40 = vand.u32 4294901760, %v24379_v39 }
0x11de   :  { %35580 = vmatprep.subr.mxu0 %v37403_v24  ;;  %35587 = vmatprep.mubr.msk.f32.mxu1 %vm37404_vm2, %v37403_v24 }
0x11df   :  { %35573 = vmatmul.mubr.f32.vlgmr.msra.gmra.mrb[164].mxu0 %v39850_v46  ;;  %35595 = vmatprep.subr.mxu1 %v37403_v24  ;;  %v23997_v46 = vand.u32 4294901760, %v23996_v38  ;;  %v39960_v5 = vsub.f32 %v24379_v39, %v39944_v40  ;;  %v25741_v38 = vsel %vm875_vm3, %v25738_v16, 0 }
0x11e0   :  { %35581 = vmatpush3.msra.mxu0 %v23556_v18  ;;  %35588 = vmatmul.mubr.f32.vlgmr.msra.gmra.mrb[176].mxu1 %v39875_v31  ;;  %v39989_v31 = vsub.f32 %v24833_v45, %v39972_v9  ;;  %v40061_v15 = vand.u32 4294901760, %v25741_v38 }
0x11e1   :  { %35596 = vmatpush3.msra.mxu1 %v23554_v2  ;;  %35582 = vmatprep.mubr.msk.f32.mxu0 %vm37404_vm2, %v37403_v24 }
0x11e2   :  { %35590 = vmatprep.subr.mxu0 %v37403_v24  ;;  %35597 = vmatprep.mubr.msk.f32.mxu1 %vm37404_vm2, %v37403_v24  ;;  %v24914_v32 = vand.u32 4294901760, %v39989_v31 }
0x11e3   :  { %35583 = vmatmul.mubr.f32.vlgmr.msra.gmra.mrb[166].mxu0 %v39861_v52  ;;  %35605 = vmatprep.subr.mxu1 %v37403_v24 }
0x11e4   :  { %35591 = vmatpush3.msra.mxu0 %v39869_v21  ;;  %35598 = vmatmul.mubr.f32.vlgmr.msra.gmra.mrb[178].mxu1 %v39861_v52  ;;  %v24915_v27 = vsub.f32 %v39989_v31, %v24914_v32 }
0x11e5   :  { %35606 = vmatpush3.msra.mxu1 %v39905_v55  ;;  %35592 = vmatprep.mubr.msk.f32.mxu0 %vm37404_vm2, %v37403_v24 }
0x11e6   :  { %35600 = vmatprep.subr.mxu0 %v37403_v24  ;;  %35607 = vmatprep.mubr.msk.f32.mxu1 %vm37404_vm2, %v37403_v24 }
0x11e7   :  { %35593 = vmatmul.mubr.f32.vlgmr.msra.gmra.mrb[168].mxu0 %v23543_v26  ;;  %35615 = vmatprep.subr.mxu1 %v37403_v24  ;;  %v24451_v26 = vand.u32 4294901760, %v24450_v61 }
0x11e8   :  { %35601 = vmatpush3.msra.mxu0 %v39869_v21  ;;  %35608 = vmatmul.mubr.f32.vlgmr.msra.gmra.mrb[180].mxu1 %v23997_v46  ;;  %v24460_v21 = vand.u32 4294901760, %v39960_v5 }
0x11e9   :  { %35616 = vmatpush3.msra.mxu1 %v24005_v28  ;;  %35602 = vmatprep.mubr.msk.f32.mxu0 %vm37404_vm2, %v37403_v24 }
0x11ea   :  { %35610 = vmatprep.subr.mxu0 %v37403_v24  ;;  %35617 = vmatprep.mubr.msk.f32.mxu1 %vm37404_vm2, %v37403_v24  ;;  %v24461_v62 = vsub.f32 %v39960_v5, %v24460_v21 }
0x11eb   :  { %35603 = vmatmul.mubr.f32.vlgmr.msra.gmra.mrb[170].mxu0 %v39861_v52  ;;  %35625 = vmatprep.subr.mxu1 %v37403_v24  ;;  %v39983_v52 = vsub.f32 %v24831_v44, %v39968_v33 }
0x11ec   :  { %35611 = vmatpush3.msra.mxu0 %v24008_v6  ;;  %35618 = vmatmul.mubr.f32.vlgmr.msra.gmra.mrb[182].mxu1 %v39911_v20  ;;  %v24462_v23 = vand.u32 4294901760, %v24461_v62 }
0x11ed   :  { %35626 = vmatpush3.msra.mxu1 %v24006_v60  ;;  %35612 = vmatprep.mubr.msk.f32.mxu0 %vm37404_vm2, %v37403_v24  ;;  %v24903_v59 = vand.u32 4294901760, %v39983_v52 }
0x11ee   :  { %35620 = vmatprep.subr.mxu0 %v37403_v24  ;;  %35627 = vmatprep.mubr.msk.f32.mxu1 %vm37404_vm2, %v37403_v24 }
0x11ef   :  { %35613 = vmatmul.mubr.f32.vlgmr.msra.gmra.mrb[172].mxu0 %v39896_v4  ;;  %35635 = vmatprep.subr.mxu1 %v37403_v24  ;;  %v24904_v2 = vsub.f32 %v39983_v52, %v24903_v59 }
0x11f0   :  { %35621 = vmatpush3.msra.mxu0 %v39905_v55  ;;  %35628 = vmatmul.mubr.f32.vlgmr.msra.gmra.mrb[184].mxu1 %v39896_v4 }
0x11f1   :  { %35622 = vmatprep.mubr.msk.f32.mxu0 %vm37404_vm2, %v37403_v24  ;;  %35630 = vmatprep.subr.mxu0 %v37403_v24  ;;  %v24905_v22 = vand.u32 4294901760, %v24904_v2 }
0x11f2   :  { %35637 = vmatprep.mubr.msk.f32.mxu1 %vm37404_vm2, %v37403_v24 }
0x11f3   :  { %35623 = vmatmul.mubr.f32.vlgmr.msra.gmra.mrb[174].mxu0 %v23995_v34 }
0x11f4   :  { %35631 = vmatpush3.msra.mxu0 %v39905_v55  ;;  %35636 = vmatpush3.xpose.msra.mxu1 %v39944_v40  ;;  %v24916_v55 = vand.u32 4294901760, %v24915_v27 }
0x11f5   :  { %35632 = vmatprep.mubr.msk.f32.mxu0 %vm37404_vm2, %v37403_v24  ;;  %35640 = vmatprep.subr.mxu1 %v37403_v24 }
0x11f6   :  { %35665 = vmatprep.subr.mxu0 %v37403_v24 }
0x11f7   :  { %35638 = vmatmul.mubr.f32.vlgmr.msra.gmra.mrb[186].mxu1 %v24451_v26  ;;  %35633 = vmatmul.mubr.f32.vlgmr.msra.gmra.mrb[176].mxu0 %v39896_v4  ;;  %v25282_v4 = vpop.permute.xlu0 %25281 }
0x11f8   :  { %35641 = vmatpush3.xpose.msra.mxu1 %v24462_v23  ;;  %35667 = vmatprep.mubr.msk.f32.mxu0 %vm37404_vm2, %v37403_v24  ;;  %v25285_v35 = vsel %vm875_vm3, %v25282_v4, 0 }
0x11f9   :  { %35642 = vmatprep.mubr.msk.f32.mxu1 %vm37404_vm2, %v37403_v24  ;;  %35645 = vmatprep.subr.mxu1 %v37403_v24  ;;  %v40041_v18 = vand.u32 4294901760, %v25285_v35 }
0x11fb   :  { %35666 = vmatpush3.xpose.msra.mxu0 %v39972_v9  ;;  %v25284_v37 = vpop.permute.xlu0 %25283  ;;  %v40050_v60 = vsub.f32 %v25285_v35, %v40041_v18 }
0x11fc   :  { %35670 = vmatprep.subr.mxu0 %v37403_v24  ;;  %v25287_v20 = vsel %vm875_vm3, %v25284_v37, 0 }
0x11fd   :  { %v40046_v28 = vand.u32 4294901760, %v25287_v20  ;;  %v25357_v46 = vand.u32 4294901760, %v40050_v60 }
0x11fe   :  { %35668 = vmatmul.mubr.f32.vlgmr.msra.gmra.mrb[178].mxu0 %v24905_v22 }
0x11ff   :  { %35643 = vmatmul.mubr.f32.vlgmr.msra.gmra.mrb[186].mxu1 %v39939_v10  ;;  %35671 = vmatpush3.xpose.msra.mxu0 %v24916_v55  ;;  %v25736_v34 = vpop.permute.xlu0 %25735  ;;  %v25367_v39 = vsub.f32 %v25287_v20, %v40046_v28 }
0x1200   :  { %35646 = vmatpush3.xpose.msra.mxu1 %v39960_v5  ;;  %35672 = vmatprep.mubr.msk.f32.mxu0 %vm37404_vm2, %v37403_v24  ;;  %v25739_v3 = vsel %vm875_vm3, %v25736_v34, 0 }
0x1201   :  { %35675 = vmatprep.subr.mxu0 %v37403_v24  ;;  %35647 = vmatprep.mubr.msk.f32.mxu1 %vm37404_vm2, %v37403_v24  ;;  %v40056_v41 = vand.u32 4294901760, %v25739_v3  ;;  %v25368_v8 = vand.u32 4294901760, %v25367_v39 }
0x1202   :  { %35650 = vmatprep.subr.mxu1 %v37403_v24 }
0x1203   :  { %v25810_v44 = vsub.f32 %v25739_v3, %v40056_v41  ;;  %v25369_v6 = vsub.f32 %v25367_v39, %v25368_v8 }
0x1205   :  { %v25811_v5 = vand.u32 4294901760, %v25810_v44 }
0x1206   :  { %35673 = vmatmul.mubr.f32.vlgmr.msra.gmra.mrb[178].mxu0 %v39968_v33 }
0x1207   :  { %35676 = vmatpush3.xpose.msra.mxu0 %v39989_v31  ;;  %35648 = vmatmul.mubr.f32.vlgmr.msra.gmra.mrb[186].mxu1 %v39955_v29  ;;  %v25821_v29 = vsub.f32 %v25741_v38, %v40061_v15 }
0x1208   :  { %35651 = vmatpush3.xpose.msra.mxu1 %v39944_v40  ;;  %35677 = vmatprep.mubr.msk.f32.mxu0 %vm37404_vm2, %v37403_v24 }
0x1209   :  { %35680 = vmatprep.subr.mxu0 %v37403_v24  ;;  %35652 = vmatprep.mubr.msk.f32.mxu1 %vm37404_vm2, %v37403_v24  ;;  %v25822_v45 = vand.u32 4294901760, %v25821_v29 }
0x120a   :  { %35655 = vmatprep.subr.mxu1 %v37403_v24 }
0x120e   :  { %35678 = vmatmul.mubr.f32.vlgmr.msra.gmra.mrb[178].mxu0 %v39983_v52 }
0x120f   :  { %35681 = vmatpush3.xpose.msra.mxu0 %v39972_v9  ;;  %35653 = vmatmul.mubr.f32.vlgmr.msra.gmra.mrb[186].mxu1 %v24449_v56 }
0x1210   :  { %35656 = vmatpush3.xpose.msra.mxu1 %v24460_v21  ;;  %35682 = vmatprep.mubr.msk.f32.mxu0 %vm37404_vm2, %v37403_v24  ;;  %v25370_v21 = vand.u32 4294901760, %v25369_v6 }
0x1211   :  { %35685 = vmatprep.subr.mxu0 %v37403_v24  ;;  %35657 = vmatprep.mubr.msk.f32.mxu1 %vm37404_vm2, %v37403_v24 }
0x1212   :  { %35660 = vmatprep.subr.mxu1 %v37403_v24 }
0x1216   :  { %35683 = vmatmul.mubr.f32.vlgmr.msra.gmra.mrb[178].mxu0 %v24903_v59 }
0x1217   :  { %35686 = vmatpush3.xpose.msra.mxu0 %v24914_v32  ;;  %35658 = vmatmul.mubr.f32.vlgmr.msra.gmra.mrb[186].mxu1 %v39939_v10 }
0x1218   :  { %35661 = vmatpush3.xpose.msra.mxu1 %v39944_v40  ;;  %35687 = vmatprep.mubr.msk.f32.mxu0 %vm37404_vm2, %v37403_v24  ;;  %v25358_v40 = vsub.f32 %v40050_v60, %v25357_v46 }
0x1219   :  { %35690 = vmatprep.subr.mxu0 %v37403_v24  ;;  %35662 = vmatprep.mubr.msk.f32.mxu1 %vm37404_vm2, %v37403_v24 }
0x121a   :  { %35695 = vmatprep.subr.mxu1 %v37403_v24  ;;  %v25359_v56 = vand.u32 4294901760, %v25358_v40 }
0x121e   :  { %35688 = vmatmul.mubr.f32.vlgmr.msra.gmra.mrb[178].mxu0 %v39968_v33 }
0x121f   :  { %35691 = vmatpush3.xpose.msra.mxu0 %v39972_v9  ;;  %35663 = vmatmul.mubr.f32.vlgmr.msra.gmra.mrb[186].mxu1 %v39939_v10  ;;  %v25812_v9 = vsub.f32 %v25810_v44, %v25811_v5  ;;  %v25823_v10 = vsub.f32 %v25821_v29, %v25822_v45 }
0x1220   :  { %35696 = vmatpush3.xpose.msra.mxu1 %v40046_v28  ;;  %35697 = vmatprep.mubr.msk.f32.mxu1 %vm37404_vm2, %v37403_v24 }
0x1221   :  { %35700 = vmatprep.subr.mxu1 %v37403_v24  ;;  %35692 = vmatprep.mubr.msk.f32.mxu0 %vm37404_vm2, %v37403_v24  ;;  %v25813_v52 = vand.u32 4294901760, %v25812_v9  ;;  %v25824_v61 = vand.u32 4294901760, %v25823_v10 }
0x1222   :  { %35725 = vmatprep.subr.mxu0 %v37403_v24 }
0x1223   :  { %35698 = vmatmul.mubr.f32.vlgmr.msra.gmra.mrb[188].mxu1 %v25359_v56 }
0x1224   :  { %35701 = vmatpush3.xpose.msra.mxu1 %v25370_v21  ;;  %35702 = vmatprep.mubr.msk.f32.mxu1 %vm37404_vm2, %v37403_v24 }
0x1225   :  { %35705 = vmatprep.subr.mxu1 %v37403_v24 }
0x1226   :  { %35693 = vmatmul.mubr.f32.vlgmr.msra.gmra.mrb[178].mxu0 %v39968_v33 }
0x1227   :  { %35726 = vmatpush3.xpose.msra.mxu0 %v40061_v15  ;;  %35727 = vmatprep.mubr.msk.f32.mxu0 %vm37404_vm2, %v37403_v24 }
0x1228   :  { %35730 = vmatprep.subr.mxu0 %v37403_v24 }
0x122a   :  { %35728 = vmatmul.mubr.f32.vlgmr.msra.gmra.mrb[180].mxu0 %v25813_v52 }
0x122b   :  { %35731 = vmatpush3.xpose.msra.mxu0 %v25824_v61  ;;  %35703 = vmatmul.mubr.f32.vlgmr.msra.gmra.mrb[188].mxu1 %v40041_v18 }
0x122c   :  { %35706 = vmatpush3.xpose.msra.mxu1 %v25367_v39  ;;  %35732 = vmatprep.mubr.msk.f32.mxu0 %vm37404_vm2, %v37403_v24 }
0x122d   :  { %35735 = vmatprep.subr.mxu0 %v37403_v24  ;;  %35707 = vmatprep.mubr.msk.f32.mxu1 %vm37404_vm2, %v37403_v24 }
0x122e   :  { %35710 = vmatprep.subr.mxu1 %v37403_v24 }
0x1232   :  { %35733 = vmatmul.mubr.f32.vlgmr.msra.gmra.mrb[180].mxu0 %v40056_v41 }
0x1233   :  { %35736 = vmatpush3.xpose.msra.mxu0 %v25821_v29  ;;  %35708 = vmatmul.mubr.f32.vlgmr.msra.gmra.mrb[188].mxu1 %v40050_v60 }
0x1234   :  { %35711 = vmatpush3.xpose.msra.mxu1 %v40046_v28  ;;  %35737 = vmatprep.mubr.msk.f32.mxu0 %vm37404_vm2, %v37403_v24 }
0x1235   :  { %35740 = vmatprep.subr.mxu0 %v37403_v24  ;;  %35712 = vmatprep.mubr.msk.f32.mxu1 %vm37404_vm2, %v37403_v24 }
0x1236   :  { %35715 = vmatprep.subr.mxu1 %v37403_v24 }
0x123a   :  { %35738 = vmatmul.mubr.f32.vlgmr.msra.gmra.mrb[180].mxu0 %v25810_v44  ;;  %v20911_v33 = vpop.f32.mrb[130].mxu0 }
0x123b   :  { %35741 = vmatpush3.xpose.msra.mxu0 %v40061_v15  ;;  %35713 = vmatmul.mubr.f32.vlgmr.msra.gmra.mrb[188].mxu1 %v25357_v46  ;;  %v35404_v31 = vpop.f32.mrb[131].mxu0 }
0x123c   :  { %35716 = vmatpush3.xpose.msra.mxu1 %v25368_v8  ;;  %35742 = vmatprep.mubr.msk.f32.mxu0 %vm37404_vm2, %v37403_v24 }
0x123d   :  { %35745 = vmatprep.subr.mxu0 %v37403_v24  ;;  %35717 = vmatprep.mubr.msk.f32.mxu1 %vm37404_vm2, %v37403_v24 }
0x123e   :  { %v21059_v62 = vpop.f32.mrb[132].mxu0  ;;  %35720 = vmatprep.subr.mxu1 %v37403_v24 }
0x123f   :  { %v35414_v59 = vpop.f32.mrb[133].mxu0 }
0x1242   :  { %35743 = vmatmul.mubr.f32.vlgmr.msra.gmra.mrb[180].mxu0 %v25811_v5  ;;  %v20835_v26 = vpop.f32.mrb[138].mxu1  ;;  %v21205_v32 = vpop.f32.mrb[134].mxu0 }
0x1243   :  { %35746 = vmatpush3.xpose.msra.mxu0 %v25822_v45  ;;  %v20912_v23 = vadd.f32 %v20911_v33, %v20835_v26  ;;  %35718 = vmatmul.mubr.f32.vlgmr.msra.gmra.mrb[188].mxu1 %v40041_v18  ;;  %v35399_v2 = vpop.f32.mrb[139].mxu1  ;;  %v35424_v27 = vpop.f32.mrb[135].mxu0 }
0x1244   :  { %35721 = vmatpush3.xpose.msra.mxu1 %v40046_v28  ;;  %35747 = vmatprep.mubr.msk.f32.mxu0 %vm37404_vm2, %v37403_v24 }
0x1245   :  { %35750 = vmatprep.subr.mxu0 %v37403_v24  ;;  %35722 = vmatprep.mubr.msk.f32.mxu1 %vm37404_vm2, %v37403_v24 }
0x1246   :  { %v20985_v22 = vpop.f32.mrb[140].mxu1  ;;  %v21363_v55 = vpop.f32.mrb[136].mxu0  ;;  %35755 = vmatprep.subr.mxu1 %v37403_v24 }
0x1247   :  { %v20986_v4 = vadd.f32 %v20985_v22, %v20912_v23  ;;  %v35409_v37 = vpop.f32.mrb[141].mxu1  ;;  %v35434_v35 = vpop.f32.mrb[137].mxu0 }
0x1249   :  { %v21060_v20 = vadd.f32 %v21059_v62, %v20986_v4 }
0x124a   :  { %35748 = vmatmul.mubr.f32.vlgmr.msra.gmra.mrb[180].mxu0 %v40056_v41  ;;  %v21133_v34 = vpop.f32.mrb[142].mxu1  ;;  %v21511_v28 = vpop.f32.mrb[138].mxu0 }
0x124b   :  { %35751 = vmatpush3.xpose.msra.mxu0 %v40061_v15  ;;  %v21134_v16 = vadd.f32 %v21133_v34, %v21060_v20  ;;  %35723 = vmatmul.mubr.f32.vlgmr.msra.gmra.mrb[188].mxu1 %v40041_v18  ;;  %v35419_v60 = vpop.f32.mrb[143].mxu1  ;;  %v35444_v3 = vpop.f32.mrb[139].mxu0 }
0x124c   :  { %35752 = vmatprep.mubr.msk.f32.mxu0 %vm37404_vm2, %v37403_v24  ;;  %35760 = vmatprep.subr.mxu0 %v37403_v24 }
0x124d   :  { %v21206_v38 = vadd.f32 %v21205_v32, %v21134_v16  ;;  %35757 = vmatprep.mubr.msk.f32.mxu1 %vm37404_vm2, %v37403_v24 }
0x124e   :  { %v21287_v39 = vpop.f32.mrb[144].mxu1  ;;  %v21657_v46 = vpop.f32.mrb[140].mxu0 }
0x124f   :  { %v21364_v8 = vadd.f32 %v21363_v55, %v21287_v39  ;;  %v35429_v44 = vpop.f32.mrb[145].mxu1  ;;  %v35454_v29 = vpop.f32.mrb[141].mxu0 }
0x1252   :  { %35753 = vmatmul.mubr.f32.vlgmr.msra.gmra.mrb[180].mxu0 %v40056_v41  ;;  %v21437_v15 = vpop.f32.mrb[146].mxu1 }
0x1253   :  { %v21438_v18 = vadd.f32 %v21437_v15, %v21364_v8  ;;  %v35439_v40 = vpop.f32.mrb[147].mxu1  ;;  %35762 = vmatprep.mubr.msk.f32.mxu0 %vm37404_vm2, %v37403_v24 }
0x1255   :  { %v21512_v6 = vadd.f32 %v21511_v28, %v21438_v18 }
0x1256   :  { %v21585_v5 = vpop.f32.mrb[148].mxu1 }
0x1257   :  { %v21586_v45 = vadd.f32 %v21585_v5, %v21512_v6  ;;  %v35449_v56 = vpop.f32.mrb[149].mxu1 }
0x1259   :  { %v21658_v21 = vadd.f32 %v21657_v46, %v21586_v45 }
0x1266   :  { %v21815_v9 = vpop.f32.mrb[142].mxu0 }
0x1267   :  { %v35464_v10 = vpop.f32.mrb[143].mxu0 }
0x126a   :  { %v21963_v52 = vpop.f32.mrb[144].mxu0 }
0x126b   :  { %v35474_v61 = vpop.f32.mrb[145].mxu0 }
0x126e   :  { %v21739_v33 = vpop.f32.mrb[150].mxu1  ;;  %v22109_v31 = vpop.f32.mrb[146].mxu0 }
0x126f   :  { %v21816_v62 = vadd.f32 %v21815_v9, %v21739_v33  ;;  %v35459_v59 = vpop.f32.mrb[151].mxu1  ;;  %v35484_v41 = vpop.f32.mrb[147].mxu0 }
0x1272   :  { %v21889_v26 = vpop.f32.mrb[152].mxu1  ;;  %v22267_v32 = vpop.f32.mrb[148].mxu0 }
0x1273   :  { %v21890_v23 = vadd.f32 %v21889_v26, %v21816_v62  ;;  %v35469_v2 = vpop.f32.mrb[153].mxu1  ;;  %v35494_v27 = vpop.f32.mrb[149].mxu0 }
0x1275   :  { %v21964_v22 = vadd.f32 %v21963_v52, %v21890_v23 }
0x1276   :  { %v22037_v55 = vpop.f32.mrb[154].mxu1  ;;  %v22415_v4 = vpop.f32.mrb[150].mxu0 }
0x1277   :  { %v22038_v37 = vadd.f32 %v22037_v55, %v21964_v22  ;;  %v35479_v35 = vpop.f32.mrb[155].mxu1  ;;  %v35504_v20 = vpop.f32.mrb[151].mxu0 }
0x1279   :  { %v22110_v34 = vadd.f32 %v22109_v31, %v22038_v37 }
0x127a   :  { %v22191_v28 = vpop.f32.mrb[156].mxu1  ;;  %v22561_v16 = vpop.f32.mrb[152].mxu0 }
0x127b   :  { %v22268_v60 = vadd.f32 %v22267_v32, %v22191_v28  ;;  %v35489_v3 = vpop.f32.mrb[157].mxu1  ;;  %v35514_v39 = vpop.f32.mrb[153].mxu0 }
0x127e   :  { %v22341_v46 = vpop.f32.mrb[158].mxu1 }
0x127f   :  { %v22342_v8 = vadd.f32 %v22341_v46, %v22268_v60  ;;  %v35499_v44 = vpop.f32.mrb[159].mxu1 }
0x1281   :  { %v22416_v29 = vadd.f32 %v22415_v4, %v22342_v8 }
0x1282   :  { %v22489_v15 = vpop.f32.mrb[160].mxu1 }
0x1283   :  { %v22490_v18 = vadd.f32 %v22489_v15, %v22416_v29  ;;  %v35509_v40 = vpop.f32.mrb[161].mxu1 }
0x1285   :  { %v22562_v6 = vadd.f32 %v22561_v16, %v22490_v18 }
0x1296   :  { %v22643_v5 = vpop.f32.mrb[162].mxu1 }
0x1297   :  { %v22644_v45 = vadd.f32 %v22643_v5, %v21206_v38  ;;  %v35519_v56 = vpop.f32.mrb[163].mxu1 }
0x129a   :  { %v22793_v9 = vpop.f32.mrb[164].mxu1 }
0x129b   :  { %v35529_v10 = vpop.f32.mrb[165].mxu1 }
0x129e   :  { %v22719_v52 = vpop.f32.mrb[154].mxu0 }
0x129f   :  { %v22720_v61 = vadd.f32 %v22719_v52, %v22644_v45  ;;  %v22941_v33 = vpop.f32.mrb[166].mxu1  ;;  %v35524_v31 = vpop.f32.mrb[155].mxu0 }
0x12a0   :  { %v35539_v62 = vpop.f32.mrb[167].mxu1 }
0x12a1   :  { %v22794_v59 = vadd.f32 %v22793_v9, %v22720_v61 }
0x12a2   :  { %v22867_v41 = vpop.f32.mrb[156].mxu0 }
0x12a3   :  { %v22868_v26 = vadd.f32 %v22867_v41, %v22794_v59  ;;  %v35534_v32 = vpop.f32.mrb[157].mxu0  ;;  %v23095_v23 = vpop.f32.mrb[168].mxu1 }
0x12a4   :  { %v23096_v2 = vadd.f32 %v23095_v23, %v21658_v21  ;;  %v35549_v27 = vpop.f32.mrb[169].mxu1 }
0x12a5   :  { %v22942_v22 = vadd.f32 %v22941_v33, %v22868_v26 }
0x12a6   :  { %v23013_v55 = vpop.f32.mrb[158].mxu0 }
0x12a7   :  { %v40131_v4 = vadd.f32 %v23013_v55, %v22942_v22  ;;  %v35544_v38 = vpop.f32.mrb[159].mxu0  ;;  %v23245_v37 = vpop.f32.mrb[170].mxu1 }
0x12a8   :  { %v35559_v35 = vpop.f32.mrb[171].mxu1 }
0x12aa   :  { %v23171_v20 = vpop.f32.mrb[160].mxu0 }
0x12ab   :  { %v23172_v28 = vadd.f32 %v23171_v20, %v23096_v2  ;;  %v35554_v16 = vpop.f32.mrb[161].mxu0  ;;  %v23393_v60 = vpop.f32.mrb[172].mxu1 }
0x12ac   :  { %v35569_v3 = vpop.f32.mrb[173].mxu1 }
0x12ad   :  { %v23246_v39 = vadd.f32 %v23245_v37, %v23172_v28 }
0x12ae   :  { %v23319_v46 = vpop.f32.mrb[162].mxu0 }
0x12af   :  { %v23320_v8 = vadd.f32 %v23319_v46, %v23246_v39  ;;  %v35564_v44 = vpop.f32.mrb[163].mxu0  ;;  %v23547_v29 = vpop.f32.mrb[174].mxu1 }
0x12b0   :  { %v23548_v15 = vadd.f32 %v23547_v29, %v22110_v34  ;;  %v35579_v21 = vpop.f32.mrb[175].mxu1 }
0x12b1   :  { %v23394_v18 = vadd.f32 %v23393_v60, %v23320_v8 }
0x12b2   :  { %v23465_v40 = vpop.f32.mrb[164].mxu0 }
0x12b3   :  { %v40133_v5 = vadd.f32 %v23465_v40, %v23394_v18  ;;  %v35574_v45 = vpop.f32.mrb[165].mxu0  ;;  %v23697_v56 = vpop.f32.mrb[176].mxu1  ;;  %v40142_v18 = vld [vmem:[%s40905_s2] ss:$0 sm:$0xff] }
0x12b4   :  { %v35589_v9 = vpop.f32.mrb[177].mxu1 }
0x12b6   :  { %v23623_v10 = vpop.f32.mrb[166].mxu0 }
0x12b7   :  { %v23624_v52 = vadd.f32 %v23623_v10, %v23548_v15  ;;  %v35584_v61 = vpop.f32.mrb[167].mxu0  ;;  %v23845_v33 = vpop.f32.mrb[178].mxu1  ;;  %v40149_v10 = vld [vmem:[%s40905_s2 + $0x1] ss:$0 sm:$0xff] }
0x12b8   :  { %v35599_v31 = vpop.f32.mrb[179].mxu1 }
0x12b9   :  { %v23698_v62 = vadd.f32 %v23697_v56, %v23624_v52 }
0x12ba   :  { %v23771_v59 = vpop.f32.mrb[168].mxu0 }
0x12bb   :  { %v23772_v41 = vadd.f32 %v23771_v59, %v23698_v62  ;;  %v35594_v26 = vpop.f32.mrb[169].mxu0  ;;  %v23999_v32 = vpop.f32.mrb[180].mxu1  ;;  %v40156_v62 = vld [vmem:[%s40905_s2 + $0x2] ss:$0 sm:$0xff] }
0x12bc   :  { %v24000_v23 = vadd.f32 %v23999_v32, %v22562_v6  ;;  %v35609_v34 = vpop.f32.mrb[181].mxu1 }
0x12bd   :  { %v23846_v2 = vadd.f32 %v23845_v33, %v23772_v41 }
0x12be   :  { %v23917_v27 = vpop.f32.mrb[170].mxu0 }
0x12bf   :  { %v40135_v22 = vadd.f32 %v23917_v27, %v23846_v2  ;;  %v35604_v55 = vpop.f32.mrb[171].mxu0  ;;  %v24149_v38 = vpop.f32.mrb[182].mxu1 }
0x12c0   :  { %v35619_v37 = vpop.f32.mrb[183].mxu1 }
0x12c2   :  { %v24075_v35 = vpop.f32.mrb[172].mxu0 }
0x12c3   :  { %v24076_v20 = vadd.f32 %v24075_v35, %v24000_v23  ;;  %v35614_v28 = vpop.f32.mrb[173].mxu0  ;;  %v24297_v16 = vpop.f32.mrb[184].mxu1  ;;  %v40163_v23 = vld [vmem:[%s40905_s2 + $0x3] ss:$0 sm:$0xff] }
0x12c4   :  { %v35629_v60 = vpop.f32.mrb[185].mxu1 }
0x12c5   :  { %v24150_v3 = vadd.f32 %v24149_v38, %v24076_v20 }
0x12c6   :  { %v24223_v39 = vpop.f32.mrb[174].mxu0 }
0x12c7   :  { %v24224_v46 = vadd.f32 %v24223_v39, %v24150_v3  ;;  %v35624_v8 = vpop.f32.mrb[175].mxu0 }
0x12c9   :  { %v24298_v44 = vadd.f32 %v24297_v16, %v24224_v46 }
0x12ca   :  { %v24369_v29 = vpop.f32.mrb[176].mxu0 }
0x12cb   :  { %v40137_v6 = vadd.f32 %v24369_v29, %v24298_v44  ;;  %v35634_v15 = vpop.f32.mrb[177].mxu0 }
0x12f2   :  { %v24823_v21 = vpop.f32.mrb[186].mxu1 }
0x12f3   :  { %v36675_v40 = vadd.f32 %v40142_v18, %v24823_v21  ;;  %v35664_v45 = vpop.f32.mrb[187].mxu1 }
0x12f5   :  { %v26189_v56 = vsel %vm875_vm3, %v36675_v40, -inf }
0x12f6   :  { %26190 = vmax.xlane.f32.xlu0 %v26189_v56 }
0x12f9   :  { %v25277_v9 = vpop.f32.mrb[178].mxu0 }
0x12fa   :  { %v36676_v52 = vadd.f32 %v40149_v10, %v25277_v9  ;;  %v35694_v61 = vpop.f32.mrb[179].mxu0 }
0x12fc   :  { %v26192_v33 = vsel %vm875_vm3, %v36676_v52, -inf }
0x12fd   :  { %26193 = vmax.xlane.f32.xlu1 %v26192_v33 }
0x131e   :  { %v25731_v31 = vpop.f32.mrb[188].mxu1 }
0x131f   :  { %v36677_v59 = vadd.f32 %v40156_v62, %v25731_v31  ;;  %v35724_v41 = vpop.f32.mrb[189].mxu1 }
0x1321   :  { %v26195_v26 = vsel %vm875_vm3, %v36677_v59, -inf }
0x1322   :  { %26196 = vmax.xlane.f32.xlu0 %v26195_v26  ;;  %v20754_v26 = vadd.f32 %v39732_v54, %v39839_v53 }
0x1325   :  { %v26185_v32 = vpop.f32.mrb[180].mxu0 }
0x1326   :  { %v36678_v34 = vadd.f32 %v40163_v23, %v26185_v32  ;;  %v35754_v2 = vpop.f32.mrb[181].mxu0 }
0x1328   :  { %v26198_v27 = vsel %vm875_vm3, %v36678_v34, -inf }
0x1329   :  { %26199 = vmax.xlane.f32.xlu0 %v26198_v27 }
0x1383   :  { %v26191_v55 = vpop.xlane.xlu0 %26190 }
0x1384   :  { %v26201_v38 = vsub.f32 %v36675_v40, %v26191_v55 }
0x1386   :  { %v26205_v37 = vmul.f32 1.442695, %v26201_v38 }
0x1388   :  { %37272 = vpow2.f32 %v26205_v37 }
0x138a   :  { %v26194_v35 = vpop.xlane.xlu1 %26193 }
0x138b   :  { %v26202_v20 = vsub.f32 %v36676_v52, %v26194_v35 }
0x138d   :  { %v26207_v28 = vmul.f32 1.442695, %v26202_v20 }
0x138f   :  { %37274 = vpow2.f32 %v26207_v28 }
0x1392   :  { %v37273_v16 = vpop.eup %37272 }
0x1393   :  { %v26213_v60 = vsel %vm875_vm3, %v37273_v16, 0.0 }
0x1394   :  { %26214 = vadd.xlane.f32.xlu1 %v26213_v60 }
0x1399   :  { %v37275_v3 = vpop.eup %37274 }
0x139a   :  { %v26216_v39 = vsel %vm875_vm3, %v37275_v3, 0.0 }
0x139b   :  { %26217 = vadd.xlane.f32.xlu0 %v26216_v39 }
0x13af   :  { %v26197_v46 = vpop.xlane.xlu0 %26196 }
0x13b0   :  { %v26203_v8 = vsub.f32 %v36677_v59, %v26197_v46 }
0x13b1   :  { %26237 = vrot.lane.b32.xlu0 %v39340_v57, %s37402_s12 }
0x13b2   :  { %v26209_v15 = vmul.f32 1.442695, %v26203_v8 }
0x13b5   :  { %27141 = vrot.lane.b32.xlu0 %v39356_v42, %s37402_s12 }
0x13b6   :  { %v26200_v44 = vpop.xlane.xlu0 %26199 }
0x13b7   :  { %v26204_v29 = vsub.f32 %v36678_v34, %v26200_v44 }
0x13b9   :  { %v26211_v21 = vmul.f32 1.442695, %v26204_v29  ;;  %28049 = vrot.lane.b32.xlu0 %v39375_v17, %s37411_s14 }
0x13bb   :  { %37276 = vpow2.f32 %v26211_v21 }
0x13bc   :  { %37278 = vpow2.f32 %v26209_v15 }
0x13bd   :  { %28503 = vrot.lane.b32.xlu0 %v39386_v47, %s37411_s14 }
0x13c1   :  { %28957 = vrot.lane.b32.xlu0 %v39396_v14, %s37411_s14 }
0x13c5   :  { %v40179_v40 = vpop.eup %37276  ;;  %29411 = vrot.lane.b32.xlu0 %v39384_v58, %s37411_s14 }
0x13c6   :  { %v26222_v45 = vsel %vm875_vm3, %v40179_v40, 0.0  ;;  %v40185_v56 = vpop.eup %37278 }
0x13c7   :  { %26223 = vadd.xlane.f32.xlu1 %v26222_v45  ;;  %v26219_v17 = vsel %vm875_vm3, %v40185_v56, 0.0 }
0x13cb   :  { %26220 = vadd.xlane.f32.xlu1 %v26219_v17 }
0x13dc   :  { %26689 = vrot.lane.b32.xlu1 %v39348_v11, %s37402_s12 }
0x13e0   :  { %27593 = vrot.lane.b32.xlu1 %v39362_v51, %s37402_s12 }
0x13e4   :  { %28051 = vrot.lane.b32.xlu1 %v39340_v57, %s37411_s14 }
0x13e8   :  { %28505 = vrot.lane.b32.xlu1 %v39348_v11, %s37411_s14 }
0x13ec   :  { %28959 = vrot.lane.b32.xlu1 %v39356_v42, %s37411_s14 }
0x13f0   :  { %29413 = vrot.lane.b32.xlu1 %v39362_v51, %s37411_s14 }
0x1421   :  { %v26215_v58 = vpop.xlane.xlu1 %26214 }
0x1422   :  { %37280 = vrcp.f32 %v26215_v58 }
0x1428   :  { %v26218_v47 = vpop.xlane.xlu0 %26217 }
0x1429   :  { %37282 = vrcp.f32 %v26218_v47 }
0x142c   :  { %v37281_v14 = vpop.eup %37280  ;;  %v26238_v9 = vpop.permute.xlu0 %26237 }
0x142d   :  { %v26244_v52 = vand.u32 4294901760, %v26238_v9  ;;  %v26226_v61 = vmul.f32 %v37281_v14, %v37273_v16 }
0x142f   :  { %v26321_v33 = vsub.f32 %v26238_v9, %v26244_v52  ;;  %35756 = vmatpush3.msra.mxu1 %v26244_v52  ;;  %v40202_v57 = vadd.f32 %v26226_v61, %v39782_v49  ;;  %v26241_v11 = vsel %vm875_vm3, %v26226_v61, 0 }
0x1430   :  { %v26309_v31 = vand.u32 4294901760, %v26241_v11  ;;  %35765 = vmatprep.subr.mxu1 %v37403_v24  ;;  %v27142_v16 = vpop.permute.xlu0 %27141 }
0x1431   :  { %v26322_v42 = vand.u32 4294901760, %v26321_v33  ;;  %v40231_v8 = vand.u32 4294901760, %v27142_v16 }
0x1432   :  { %v26310_v51 = vsub.f32 %v26241_v11, %v26309_v31 }
0x1433   :  { %v37283_v59 = vpop.eup %37282  ;;  %v26323_v41 = vsub.f32 %v26321_v33, %v26322_v42  ;;  %v27225_v17 = vsub.f32 %v27142_v16, %v40231_v8 }
0x1434   :  { %v26228_v32 = vmul.f32 %v37283_v59, %v37275_v3  ;;  %v26311_v34 = vand.u32 4294901760, %v26310_v51 }
0x1435   :  { %v26324_v2 = vand.u32 4294901760, %v26323_v41  ;;  %v27226_v9 = vand.u32 4294901760, %v27225_v17 }
0x1436   :  { %v40208_v27 = vadd.f32 %v26228_v32, %v20754_v26  ;;  %v26312_v55 = vsub.f32 %v26310_v51, %v26311_v34  ;;  %v26693_v54 = vsel %vm875_vm3, %v26228_v32, 0 }
0x1437   :  { %35761 = vmatpush3.msra.mxu0 %v26324_v2  ;;  %v40228_v53 = vand.u32 4294901760, %v26693_v54 }
0x1438   :  { %35763 = vmatmul.mubr.f32.vlgmr.msra.gmra.mrb[182].mxu0 %v26309_v31  ;;  %35770 = vmatprep.subr.mxu0 %v37403_v24  ;;  %v26313_v49 = vand.u32 4294901760, %v26312_v55 }
0x1439   :  { %35771 = vmatpush3.msra.mxu0 %v26244_v52  ;;  %35772 = vmatprep.mubr.msk.f32.mxu0 %vm37404_vm2, %v37403_v24  ;;  %v26762_v38 = vsub.f32 %v26693_v54, %v40228_v53 }
0x143a   :  { %35758 = vmatmul.mubr.f32.vlgmr.msra.gmra.mrb[190].mxu1 %v26313_v49  ;;  %35780 = vmatprep.subr.mxu0 %v37403_v24 }
0x143b   :  { %35766 = vmatpush3.msra.mxu1 %v26321_v33  ;;  %35767 = vmatprep.mubr.msk.f32.mxu1 %vm37404_vm2, %v37403_v24  ;;  %v26763_v35 = vand.u32 4294901760, %v26762_v38  ;;  %v27227_v33 = vsub.f32 %v27225_v17, %v27226_v9 }
0x143c   :  { %35773 = vmatmul.mubr.f32.vlgmr.msra.gmra.mrb[184].mxu0 %v26311_v34  ;;  %35775 = vmatprep.subr.mxu1 %v37403_v24  ;;  %v28050_v34 = vpop.permute.xlu0 %28049 }
0x143d   :  { %35781 = vmatpush3.msra.mxu0 %v26244_v52  ;;  %35782 = vmatprep.mubr.msk.f32.mxu0 %vm37404_vm2, %v37403_v24  ;;  %v26764_v28 = vsub.f32 %v26762_v38, %v26763_v35  ;;  %v27228_v59 = vand.u32 4294901760, %v27227_v33  ;;  %v28053_v54 = vsel %vm875_vm3, %v28050_v34, 0 }
0x143e   :  { %35768 = vmatmul.mubr.f32.vlgmr.msra.gmra.mrb[192].mxu1 %v26310_v51  ;;  %35790 = vmatprep.subr.mxu0 %v37403_v24 }
0x143f   :  { %35776 = vmatpush3.msra.mxu1 %v26322_v42  ;;  %35777 = vmatprep.mubr.msk.f32.mxu1 %vm37404_vm2, %v37403_v24  ;;  %v26765_v39 = vand.u32 4294901760, %v26764_v28  ;;  %v40296_v28 = vand.u32 4294901760, %v28053_v54 }
0x1440   :  { %35783 = vmatmul.mubr.f32.vlgmr.msra.gmra.mrb[186].mxu0 %v26309_v31  ;;  %35785 = vmatprep.subr.mxu1 %v37403_v24 }
0x1441   :  { %35792 = vmatprep.mubr.msk.f32.mxu0 %vm37404_vm2, %v37403_v24 }
0x1442   :  { %35778 = vmatmul.mubr.f32.vlgmr.msra.gmra.mrb[194].mxu1 %v26309_v31 }
0x1443   :  { %35787 = vmatprep.mubr.msk.f32.mxu1 %vm37404_vm2, %v37403_v24 }
0x1454   :  { %v26224_v37 = vpop.xlane.xlu1 %26223 }
0x1455   :  { %37284 = vrcp.f32 %v26224_v37 }
0x1458   :  { %v26221_v20 = vpop.xlane.xlu1 %26220 }
0x1459   :  { %37286 = vrcp.f32 %v26221_v20 }
0x145c   :  { %v26690_v60 = vpop.permute.xlu1 %26689 }
0x145d   :  { %v26696_v3 = vand.u32 4294901760, %v26690_v60 }
0x145f   :  { %v37285_v46 = vpop.eup %37284  ;;  %v26773_v44 = vsub.f32 %v26690_v60, %v26696_v3  ;;  %35786 = vmatpush3.msra.mxu1 %v26696_v3 }
0x1460   :  { %v26232_v29 = vmul.f32 %v37285_v46, %v40179_v40  ;;  %35788 = vmatmul.mubr.f32.vlgmr.msra.gmra.mrb[196].mxu1 %v26765_v39  ;;  %35795 = vmatprep.subr.mxu1 %v37403_v24  ;;  %v27594_v61 = vpop.permute.xlu1 %27593 }
0x1461   :  { %v26774_v15 = vand.u32 4294901760, %v26773_v44  ;;  %35796 = vmatpush3.msra.mxu1 %v26773_v44  ;;  %35797 = vmatprep.mubr.msk.f32.mxu1 %vm37404_vm2, %v37403_v24  ;;  %v40260_v11 = vand.u32 4294901760, %v27594_v61 }
0x1462   :  { %v40238_v21 = vadd.f32 %v26232_v29, %v39836_v50  ;;  %35805 = vmatprep.subr.mxu1 %v37403_v24 }
0x1463   :  { %v37287_v45 = vpop.eup %37286  ;;  %v26775_v58 = vsub.f32 %v26773_v44, %v26774_v15  ;;  %v27677_v41 = vsub.f32 %v27594_v61, %v40260_v11  ;;  %v40313_v44 = vsub.f32 %v28053_v54, %v40296_v28 }
0x1464   :  { %v26230_v47 = vmul.f32 %v37287_v45, %v40185_v56  ;;  %35798 = vmatmul.mubr.f32.vlgmr.msra.gmra.mrb[198].mxu1 %v26762_v38  ;;  %v27597_v56 = vsel %vm875_vm3, %v26232_v29, 0  ;;  %v28052_v2 = vpop.permute.xlu1 %28051 }
0x1465   :  { %v26776_v40 = vand.u32 4294901760, %v26775_v58  ;;  %35806 = vmatpush3.msra.mxu1 %v26774_v15  ;;  %35807 = vmatprep.mubr.msk.f32.mxu1 %vm37404_vm2, %v37403_v24  ;;  %v40265_v42 = vand.u32 4294901760, %v27597_v56  ;;  %v27678_v55 = vand.u32 4294901760, %v27677_v41 }
0x1466   :  { %v40246_v14 = vadd.f32 %v26230_v47, %v39857_v30  ;;  %35815 = vmatprep.subr.mxu1 %v37403_v24  ;;  %v27145_v50 = vsel %vm875_vm3, %v26230_v47, 0 }
0x1467   :  { %35791 = vmatpush3.msra.mxu0 %v26776_v40  ;;  %v40250_v52 = vand.u32 4294901760, %v27145_v50  ;;  %v40273_v32 = vsub.f32 %v27597_v56, %v40265_v42  ;;  %v27679_v38 = vsub.f32 %v27677_v41, %v27678_v55 }
0x1468   :  { %35793 = vmatmul.mubr.f32.vlgmr.msra.gmra.mrb[188].mxu0 %v40228_v53  ;;  %35800 = vmatprep.subr.mxu0 %v37403_v24  ;;  %v28506_v20 = vpop.permute.xlu1 %28505 }
0x1469   :  { %35808 = vmatmul.mubr.f32.vlgmr.msra.gmra.mrb[200].mxu1 %v40228_v53  ;;  %35801 = vmatpush3.msra.mxu0 %v26696_v3  ;;  %v27214_v30 = vsub.f32 %v27145_v50, %v40250_v52  ;;  %v27667_v49 = vand.u32 4294901760, %v40273_v32  ;;  %v27680_v60 = vand.u32 4294901760, %v27679_v38  ;;  %v28509_v39 = vsel %vm875_vm3, %v28506_v20, 0 }
0x146a   :  { %35816 = vmatpush3.msra.mxu1 %v40231_v8  ;;  %35802 = vmatprep.mubr.msk.f32.mxu0 %vm37404_vm2, %v37403_v24  ;;  %v40315_v29 = vand.u32 4294901760, %v28509_v39 }
0x146b   :  { %35810 = vmatprep.subr.mxu0 %v37403_v24  ;;  %35817 = vmatprep.mubr.msk.f32.mxu1 %vm37404_vm2, %v37403_v24  ;;  %v27215_v31 = vand.u32 4294901760, %v27214_v30  ;;  %v27668_v37 = vsub.f32 %v40273_v32, %v27667_v49 }
0x146c   :  { %35803 = vmatmul.mubr.f32.vlgmr.msra.gmra.mrb[190].mxu0 %v26763_v35  ;;  %35825 = vmatprep.subr.mxu1 %v37403_v24  ;;  %v28055_v35 = vsel %vm875_vm3, %v28052_v2, 0  ;;  %v40334_v58 = vsub.f32 %v28509_v39, %v40315_v29 }
0x146d   :  { %35811 = vmatpush3.msra.mxu0 %v26696_v3  ;;  %35812 = vmatprep.mubr.msk.f32.mxu0 %vm37404_vm2, %v37403_v24  ;;  %v27216_v51 = vsub.f32 %v27214_v30, %v27215_v31  ;;  %v40302_v3 = vand.u32 4294901760, %v28055_v35  ;;  %v27669_v46 = vand.u32 4294901760, %v27668_v37 }
0x146e   :  { %35820 = vmatprep.subr.mxu0 %v37403_v24 }
0x146f   :  { %v27217_v26 = vand.u32 4294901760, %v27216_v51  ;;  %v40320_v15 = vsub.f32 %v28055_v35, %v40302_v3  ;;  %v28960_v51 = vpop.permute.xlu1 %28959 }
0x1470   :  { %35813 = vmatmul.mubr.f32.vlgmr.msra.gmra.mrb[192].mxu0 %v40228_v53  ;;  %v28504_v53 = vpop.permute.xlu0 %28503 }
0x1471   :  { %35821 = vmatpush3.msra.mxu0 %v27228_v59  ;;  %35818 = vmatmul.mubr.f32.vlgmr.msra.gmra.mrb[202].mxu1 %v27217_v26  ;;  %v28507_v16 = vsel %vm875_vm3, %v28504_v53, 0  ;;  %v28136_v47 = vand.u32 4294901760, %v40320_v15  ;;  %v28963_v26 = vsel %vm875_vm3, %v28960_v51, 0 }
0x1472   :  { %35826 = vmatpush3.msra.mxu1 %v27225_v17  ;;  %35822 = vmatprep.mubr.msk.f32.mxu0 %vm37404_vm2, %v37403_v24  ;;  %v28125_v17 = vand.u32 4294901760, %v40313_v44 }
0x1473   :  { %35830 = vmatprep.subr.mxu0 %v37403_v24  ;;  %35827 = vmatprep.mubr.msk.f32.mxu1 %vm37404_vm2, %v37403_v24 }
0x1474   :  { %35823 = vmatmul.mubr.f32.vlgmr.msra.gmra.mrb[194].mxu0 %v40250_v52  ;;  %35835 = vmatprep.subr.mxu1 %v37403_v24  ;;  %v28126_v50 = vsub.f32 %v40313_v44, %v28125_v17 }
0x1475   :  { %35831 = vmatpush3.msra.mxu0 %v40231_v8  ;;  %35828 = vmatmul.mubr.f32.vlgmr.msra.gmra.mrb[204].mxu1 %v27214_v30 }
0x1476   :  { %35836 = vmatpush3.msra.mxu1 %v27226_v9  ;;  %35832 = vmatprep.mubr.msk.f32.mxu0 %vm37404_vm2, %v37403_v24  ;;  %v28590_v9 = vand.u32 4294901760, %v40334_v58  ;;  %v28127_v56 = vand.u32 4294901760, %v28126_v50 }
0x1477   :  { %35840 = vmatprep.subr.mxu0 %v37403_v24  ;;  %35837 = vmatprep.mubr.msk.f32.mxu1 %vm37404_vm2, %v37403_v24 }
0x1478   :  { %35833 = vmatmul.mubr.f32.vlgmr.msra.gmra.mrb[196].mxu0 %v27215_v31  ;;  %35845 = vmatprep.subr.mxu1 %v37403_v24  ;;  %v28591_v30 = vsub.f32 %v40334_v58, %v28590_v9 }
0x1479   :  { %35841 = vmatpush3.msra.mxu0 %v40231_v8  ;;  %35838 = vmatmul.mubr.f32.vlgmr.msra.gmra.mrb[206].mxu1 %v40250_v52  ;;  %v40310_v8 = vand.u32 4294901760, %v28507_v16 }
0x147a   :  { %35846 = vmatpush3.msra.mxu1 %v40260_v11  ;;  %35842 = vmatprep.mubr.msk.f32.mxu0 %vm37404_vm2, %v37403_v24  ;;  %v28592_v31 = vand.u32 4294901760, %v28591_v30 }
0x147b   :  { %35850 = vmatprep.subr.mxu0 %v37403_v24  ;;  %35847 = vmatprep.mubr.msk.f32.mxu1 %vm37404_vm2, %v37403_v24  ;;  %v40328_v45 = vsub.f32 %v28507_v16, %v40310_v8 }
0x147c   :  { %35843 = vmatmul.mubr.f32.vlgmr.msra.gmra.mrb[198].mxu0 %v40250_v52  ;;  %35855 = vmatprep.subr.mxu1 %v37403_v24  ;;  %v28137_v52 = vsub.f32 %v40320_v15, %v28136_v47 }
0x147d   :  { %35851 = vmatpush3.msra.mxu0 %v27680_v60  ;;  %35848 = vmatmul.mubr.f32.vlgmr.msra.gmra.mrb[208].mxu1 %v27669_v46  ;;  %v28579_v40 = vand.u32 4294901760, %v40328_v45 }
0x147e   :  { %35856 = vmatpush3.msra.mxu1 %v27677_v41  ;;  %35852 = vmatprep.mubr.msk.f32.mxu0 %vm37404_vm2, %v37403_v24  ;;  %v28138_v33 = vand.u32 4294901760, %v28137_v52 }
0x147f   :  { %35860 = vmatprep.subr.mxu0 %v37403_v24  ;;  %35857 = vmatprep.mubr.msk.f32.mxu1 %vm37404_vm2, %v37403_v24  ;;  %v28580_v61 = vsub.f32 %v40328_v45, %v28579_v40 }
0x1480   :  { %35853 = vmatmul.mubr.f32.vlgmr.msra.gmra.mrb[200].mxu0 %v40265_v42  ;;  %35865 = vmatprep.subr.mxu1 %v37403_v24 }
0x1481   :  { %35861 = vmatpush3.msra.mxu0 %v40260_v11  ;;  %35858 = vmatmul.mubr.f32.vlgmr.msra.gmra.mrb[210].mxu1 %v40273_v32  ;;  %v29414_v32 = vpop.permute.xlu1 %29413 }
0x1482   :  { %35866 = vmatpush3.msra.mxu1 %v27678_v55  ;;  %35862 = vmatprep.mubr.msk.f32.mxu0 %vm37404_vm2, %v37403_v24  ;;  %v40397_v55 = vand.u32 4294901760, %v28963_v26 }
0x1483   :  { %35870 = vmatprep.subr.mxu0 %v37403_v24  ;;  %35867 = vmatprep.mubr.msk.f32.mxu1 %vm37404_vm2, %v37403_v24 }
0x1484   :  { %35863 = vmatmul.mubr.f32.vlgmr.msra.gmra.mrb[202].mxu0 %v27667_v49  ;;  %35875 = vmatprep.subr.mxu1 %v37403_v24  ;;  %v29417_v49 = vsel %vm875_vm3, %v29414_v32, 0  ;;  %v29043_v37 = vsub.f32 %v28963_v26, %v40397_v55 }
0x1485   :  { %35871 = vmatpush3.msra.mxu0 %v40260_v11  ;;  %35868 = vmatmul.mubr.f32.vlgmr.msra.gmra.mrb[212].mxu1 %v40265_v42  ;;  %v28581_v11 = vand.u32 4294901760, %v28580_v61  ;;  %v40406_v38 = vand.u32 4294901760, %v29417_v49 }
0x1486   :  { %35872 = vmatprep.mubr.msk.f32.mxu0 %vm37404_vm2, %v37403_v24  ;;  %35877 = vmatprep.mubr.msk.f32.mxu1 %vm37404_vm2, %v37403_v24  ;;  %v29044_v60 = vand.u32 4294901760, %v29043_v37 }
0x1487   :  { %35905 = vmatprep.subr.mxu0 %v37403_v24  ;;  %v29497_v16 = vsub.f32 %v29417_v49, %v40406_v38 }
0x1488   :  { %35873 = vmatmul.mubr.f32.vlgmr.msra.gmra.mrb[204].mxu0 %v40265_v42  ;;  %v28958_v42 = vpop.permute.xlu0 %28957 }
0x1489   :  { %35876 = vmatpush3.xpose.msra.mxu1 %v40302_v3  ;;  %35907 = vmatprep.mubr.msk.f32.mxu0 %vm37404_vm2, %v37403_v24  ;;  %v28961_v59 = vsel %vm875_vm3, %v28958_v42, 0  ;;  %v29498_v46 = vand.u32 4294901760, %v29497_v16 }
0x148a   :  { %35880 = vmatprep.subr.mxu1 %v37403_v24  ;;  %v40393_v34 = vand.u32 4294901760, %v28961_v59 }
0x148c   :  { %35878 = vmatmul.mubr.f32.vlgmr.msra.gmra.mrb[214].mxu1 %v28127_v56  ;;  %35906 = vmatpush3.xpose.msra.mxu0 %v40315_v29  ;;  %v29412_v41 = vpop.permute.xlu0 %29411  ;;  %v29032_v53 = vsub.f32 %v28961_v59, %v40393_v34 }
0x148d   :  { %35881 = vmatpush3.xpose.msra.mxu1 %v28138_v33  ;;  %35910 = vmatprep.subr.mxu0 %v37403_v24  ;;  %v29415_v2 = vsel %vm875_vm3, %v29412_v41, 0 }
0x148e   :  { %35882 = vmatprep.mubr.msk.f32.mxu1 %vm37404_vm2, %v37403_v24  ;;  %35885 = vmatprep.subr.mxu1 %v37403_v24  ;;  %v40402_v54 = vand.u32 4294901760, %v29415_v2  ;;  %v29033_v20 = vand.u32 4294901760, %v29032_v53 }
0x148f   :  { %35908 = vmatmul.mubr.f32.vlgmr.msra.gmra.mrb[206].mxu0 %v28581_v11 }
0x1490   :  { %35911 = vmatpush3.xpose.msra.mxu0 %v28592_v31  ;;  %35912 = vmatprep.mubr.msk.f32.mxu0 %vm37404_vm2, %v37403_v24  ;;  %v29486_v35 = vsub.f32 %v29415_v2, %v40402_v54 }
0x1491   :  { %35915 = vmatprep.subr.mxu0 %v37403_v24 }
0x1492   :  { %v29487_v39 = vand.u32 4294901760, %v29486_v35 }
0x1494   :  { %35883 = vmatmul.mubr.f32.vlgmr.msra.gmra.mrb[214].mxu1 %v40296_v28 }
0x1495   :  { %35886 = vmatpush3.xpose.msra.mxu1 %v40320_v15  ;;  %35887 = vmatprep.mubr.msk.f32.mxu1 %vm37404_vm2, %v37403_v24  ;;  %v29488_v15 = vsub.f32 %v29486_v35, %v29487_v39 }
0x1496   :  { %35890 = vmatprep.subr.mxu1 %v37403_v24 }
0x1497   :  { %35913 = vmatmul.mubr.f32.vlgmr.msra.gmra.mrb[206].mxu0 %v40310_v8 }
0x1498   :  { %35916 = vmatpush3.xpose.msra.mxu0 %v40334_v58  ;;  %35917 = vmatprep.mubr.msk.f32.mxu0 %vm37404_vm2, %v37403_v24  ;;  %v29489_v58 = vand.u32 4294901760, %v29488_v15 }
0x1499   :  { %35920 = vmatprep.subr.mxu0 %v37403_v24 }
0x149c   :  { %35888 = vmatmul.mubr.f32.vlgmr.msra.gmra.mrb[214].mxu1 %v40313_v44  ;;  %v29045_v44 = vsub.f32 %v29043_v37, %v29044_v60 }
0x149d   :  { %35891 = vmatpush3.xpose.msra.mxu1 %v40302_v3  ;;  %35892 = vmatprep.mubr.msk.f32.mxu1 %vm37404_vm2, %v37403_v24 }
0x149e   :  { %35895 = vmatprep.subr.mxu1 %v37403_v24 }
0x149f   :  { %35918 = vmatmul.mubr.f32.vlgmr.msra.gmra.mrb[206].mxu0 %v40328_v45 }
0x14a0   :  { %35921 = vmatpush3.xpose.msra.mxu0 %v40315_v29  ;;  %35922 = vmatprep.mubr.msk.f32.mxu0 %vm37404_vm2, %v37403_v24 }
0x14a1   :  { %35925 = vmatprep.subr.mxu0 %v37403_v24 }
0x14a4   :  { %35893 = vmatmul.mubr.f32.vlgmr.msra.gmra.mrb[214].mxu1 %v28125_v17  ;;  %v29499_v17 = vsub.f32 %v29497_v16, %v29498_v46 }
0x14a5   :  { %35896 = vmatpush3.xpose.msra.mxu1 %v28136_v47  ;;  %35897 = vmatprep.mubr.msk.f32.mxu1 %vm37404_vm2, %v37403_v24 }
0x14a6   :  { %35900 = vmatprep.subr.mxu1 %v37403_v24 }
0x14a7   :  { %35923 = vmatmul.mubr.f32.vlgmr.msra.gmra.mrb[206].mxu0 %v28579_v40 }
0x14a8   :  { %35926 = vmatpush3.xpose.msra.mxu0 %v28590_v9  ;;  %35927 = vmatprep.mubr.msk.f32.mxu0 %vm37404_vm2, %v37403_v24 }
0x14a9   :  { %35930 = vmatprep.subr.mxu0 %v37403_v24 }
0x14ac   :  { %35898 = vmatmul.mubr.f32.vlgmr.msra.gmra.mrb[214].mxu1 %v40296_v28 }
0x14ad   :  { %35901 = vmatpush3.xpose.msra.mxu1 %v40302_v3  ;;  %35902 = vmatprep.mubr.msk.f32.mxu1 %vm37404_vm2, %v37403_v24  ;;  %v29034_v3 = vsub.f32 %v29032_v53, %v29033_v20 }
0x14ae   :  { %35935 = vmatprep.subr.mxu1 %v37403_v24 }
0x14af   :  { %35928 = vmatmul.mubr.f32.vlgmr.msra.gmra.mrb[206].mxu0 %v40310_v8  ;;  %v29035_v45 = vand.u32 4294901760, %v29034_v3 }
0x14b0   :  { %35931 = vmatpush3.xpose.msra.mxu0 %v40315_v29  ;;  %35932 = vmatprep.mubr.msk.f32.mxu0 %vm37404_vm2, %v37403_v24  ;;  %v29046_v29 = vand.u32 4294901760, %v29045_v44 }
0x14b1   :  { %35965 = vmatprep.subr.mxu0 %v37403_v24 }
0x14b4   :  { %35903 = vmatmul.mubr.f32.vlgmr.msra.gmra.mrb[214].mxu1 %v40296_v28  ;;  %v29500_v28 = vand.u32 4294901760, %v29499_v17 }
0x14b5   :  { %35936 = vmatpush3.xpose.msra.mxu1 %v40397_v55  ;;  %35937 = vmatprep.mubr.msk.f32.mxu1 %vm37404_vm2, %v37403_v24 }
0x14b6   :  { %35940 = vmatprep.subr.mxu1 %v37403_v24 }
0x14b7   :  { %35933 = vmatmul.mubr.f32.vlgmr.msra.gmra.mrb[206].mxu0 %v40310_v8  ;;  %v36660_v8 = vadd.f32 %v39338_v7, %v39334_v1 }
0x14b8   :  { %35966 = vmatpush3.xpose.msra.mxu0 %v40406_v38  ;;  %35938 = vmatmul.mubr.f32.vlgmr.msra.gmra.mrb[216].mxu1 %v29035_v45 }
0x14b9   :  { %35941 = vmatpush3.xpose.msra.mxu1 %v29046_v29  ;;  %35967 = vmatprep.mubr.msk.f32.mxu0 %vm37404_vm2, %v37403_v24  ;;  %v40457_v47 = vand.u32 4294901760, %v36660_v8 }
0x14ba   :  { %35970 = vmatprep.subr.mxu0 %v37403_v24  ;;  %35942 = vmatprep.mubr.msk.f32.mxu1 %vm37404_vm2, %v37403_v24 }
0x14bb   :  { %35968 = vmatmul.mubr.f32.vlgmr.msra.gmra.mrb[208].mxu0 %v29489_v58  ;;  %35945 = vmatprep.subr.mxu1 %v37403_v24  ;;  %v40464_v40 = vsub.f32 %v36660_v8, %v40457_v47 }
0x14bc   :  { %35971 = vmatpush3.xpose.msra.mxu0 %v29500_v28  ;;  %35972 = vmatprep.mubr.msk.f32.mxu0 %vm37404_vm2, %v37403_v24 }
0x14bd   :  { %35975 = vmatprep.subr.mxu0 %v37403_v24  ;;  %v29995_v7 = vand.u32 4294901760, %v40464_v40 }
0x14bf   :  { %v29996_v50 = vsub.f32 %v40464_v40, %v29995_v7 }
0x14c0   :  { %35943 = vmatmul.mubr.f32.vlgmr.msra.gmra.mrb[216].mxu1 %v40393_v34 }
0x14c1   :  { %35946 = vmatpush3.xpose.msra.mxu1 %v29043_v37  ;;  %35947 = vmatprep.mubr.msk.f32.mxu1 %vm37404_vm2, %v37403_v24  ;;  %v29997_v9 = vand.u32 4294901760, %v29996_v50 }
0x14c2   :  { %35950 = vmatprep.subr.mxu1 %v37403_v24 }
0x14c3   :  { %35973 = vmatmul.mubr.f32.vlgmr.msra.gmra.mrb[208].mxu0 %v40402_v54 }
0x14c4   :  { %35976 = vmatpush3.xpose.msra.mxu0 %v29497_v16  ;;  %35977 = vmatprep.mubr.msk.f32.mxu0 %vm37404_vm2, %v37403_v24 }
0x14c5   :  { %35980 = vmatprep.subr.mxu0 %v37403_v24 }
0x14c8   :  { %35948 = vmatmul.mubr.f32.vlgmr.msra.gmra.mrb[216].mxu1 %v29032_v53 }
0x14c9   :  { %35951 = vmatpush3.xpose.msra.mxu1 %v40397_v55  ;;  %35952 = vmatprep.mubr.msk.f32.mxu1 %vm37404_vm2, %v37403_v24 }
0x14ca   :  { %35955 = vmatprep.subr.mxu1 %v37403_v24 }
0x14cb   :  { %35978 = vmatmul.mubr.f32.vlgmr.msra.gmra.mrb[208].mxu0 %v29486_v35 }
0x14cc   :  { %35981 = vmatpush3.xpose.msra.mxu0 %v40406_v38  ;;  %35982 = vmatprep.mubr.msk.f32.mxu0 %vm37404_vm2, %v37403_v24 }
0x14cd   :  { %35985 = vmatprep.subr.mxu0 %v37403_v24 }
0x14d0   :  { %35953 = vmatmul.mubr.f32.vlgmr.msra.gmra.mrb[216].mxu1 %v29033_v20 }
0x14d1   :  { %35956 = vmatpush3.xpose.msra.mxu1 %v29044_v60  ;;  %35957 = vmatprep.mubr.msk.f32.mxu1 %vm37404_vm2, %v37403_v24 }
0x14d2   :  { %35960 = vmatprep.subr.mxu1 %v37403_v24 }
0x14d3   :  { %35983 = vmatmul.mubr.f32.vlgmr.msra.gmra.mrb[208].mxu0 %v29487_v39 }
0x14d4   :  { %35986 = vmatpush3.xpose.msra.mxu0 %v29498_v46  ;;  %35987 = vmatprep.mubr.msk.f32.mxu0 %vm37404_vm2, %v37403_v24 }
0x14d5   :  { %35990 = vmatprep.subr.mxu0 %v37403_v24 }
0x14d8   :  { %35958 = vmatmul.mubr.f32.vlgmr.msra.gmra.mrb[216].mxu1 %v40393_v34 }
0x14d9   :  { %35961 = vmatpush3.xpose.msra.mxu1 %v40397_v55  ;;  %35962 = vmatprep.mubr.msk.f32.mxu1 %vm37404_vm2, %v37403_v24 }
0x14da   :  { %35995 = vmatprep.subr.mxu1 %v37403_v24 }
0x14db   :  { %35988 = vmatmul.mubr.f32.vlgmr.msra.gmra.mrb[208].mxu0 %v40402_v54 }
0x14dc   :  { %35991 = vmatpush3.xpose.msra.mxu0 %v40406_v38  ;;  %35992 = vmatprep.mubr.msk.f32.mxu0 %vm37404_vm2, %v37403_v24 }
0x14dd   :  { %36000 = vmatprep.subr.mxu0 %v37403_v24 }
0x14e0   :  { %35963 = vmatmul.mubr.f32.vlgmr.msra.gmra.mrb[216].mxu1 %v40393_v34 }
0x14e1   :  { %35996 = vmatpush3.msra.mxu1 %v40457_v47  ;;  %35997 = vmatprep.mubr.msk.f32.mxu1 %vm37404_vm2, %v37403_v24 }
0x14e2   :  { %36005 = vmatprep.subr.mxu1 %v37403_v24 }
0x14e3   :  { %35993 = vmatmul.mubr.f32.vlgmr.msra.gmra.mrb[208].mxu0 %v40402_v54 }
0x14e4   :  { %36001 = vmatpush3.msra.mxu0 %v29997_v9  ;;  %36002 = vmatprep.mubr.msk.f32.mxu0 %vm37404_vm2, %v37403_v24 }
0x14e5   :  { %36010 = vmatprep.subr.mxu0 %v37403_v24 }
0x150b   :  { %v26391_v52 = vpop.f32.mrb[182].mxu0 }
0x150c   :  { %v35764_v61 = vpop.f32.mrb[183].mxu0 }
0x150d   :  { %v26315_v56 = vpop.f32.mrb[190].mxu1 }
0x150e   :  { %v26392_v30 = vadd.f32 %v26391_v52, %v26315_v56  ;;  %v35759_v33 = vpop.f32.mrb[191].mxu1 }
0x150f   :  { %v26539_v11 = vpop.f32.mrb[184].mxu0 }
0x1510   :  { %v35774_v31 = vpop.f32.mrb[185].mxu0 }
0x1511   :  { %v26465_v42 = vpop.f32.mrb[192].mxu1 }
0x1512   :  { %v26466_v51 = vadd.f32 %v26465_v42, %v26392_v30  ;;  %v35769_v59 = vpop.f32.mrb[193].mxu1 }
0x1513   :  { %v26685_v41 = vpop.f32.mrb[186].mxu0 }
0x1514   :  { %v35784_v26 = vpop.f32.mrb[187].mxu0  ;;  %v26540_v32 = vadd.f32 %v26539_v11, %v26466_v51 }
0x1515   :  { %v26613_v34 = vpop.f32.mrb[194].mxu1 }
0x1516   :  { %v26614_v2 = vadd.f32 %v26613_v34, %v26540_v32  ;;  %v35779_v55 = vpop.f32.mrb[195].mxu1 }
0x1518   :  { %v26686_v49 = vadd.f32 %v26685_v41, %v26614_v2 }
0x151a   :  { %v40490_v54 = vadd.f32 %v26686_v49, %v40131_v4 }
0x1533   :  { %v26767_v53 = vpop.f32.mrb[196].mxu1 }
0x1534   :  { %v35789_v38 = vpop.f32.mrb[197].mxu1 }
0x1537   :  { %v26917_v37 = vpop.f32.mrb[198].mxu1 }
0x1538   :  { %v35799_v35 = vpop.f32.mrb[199].mxu1 }
0x153b   :  { %v26843_v20 = vpop.f32.mrb[188].mxu0 }
0x153c   :  { %v26844_v16 = vadd.f32 %v26843_v20, %v26767_v53  ;;  %v27065_v60 = vpop.f32.mrb[200].mxu1  ;;  %v35794_v39 = vpop.f32.mrb[189].mxu0 }
0x153d   :  { %v35809_v3 = vpop.f32.mrb[201].mxu1 }
0x153e   :  { %v26918_v46 = vadd.f32 %v26917_v37, %v26844_v16 }
0x153f   :  { %v26991_v44 = vpop.f32.mrb[190].mxu0 }
0x1540   :  { %v26992_v15 = vadd.f32 %v26991_v44, %v26918_v46  ;;  %v35804_v45 = vpop.f32.mrb[191].mxu0 }
0x1542   :  { %v27066_v17 = vadd.f32 %v27065_v60, %v26992_v15 }
0x1543   :  { %v27137_v29 = vpop.f32.mrb[192].mxu0 }
0x1544   :  { %v27138_v58 = vadd.f32 %v27137_v29, %v27066_v17  ;;  %v35814_v28 = vpop.f32.mrb[193].mxu0  ;;  %v27219_v8 = vpop.f32.mrb[202].mxu1 }
0x1545   :  { %v35819_v4 = vpop.f32.mrb[203].mxu1 }
0x1546   :  { %v40493_v50 = vadd.f32 %v27138_v58, %v40133_v5 }
0x1547   :  { %v27295_v9 = vpop.f32.mrb[194].mxu0 }
0x1548   :  { %v27296_v52 = vadd.f32 %v27295_v9, %v27219_v8  ;;  %v35824_v61 = vpop.f32.mrb[195].mxu0  ;;  %v27369_v56 = vpop.f32.mrb[204].mxu1 }
0x1549   :  { %v35829_v30 = vpop.f32.mrb[205].mxu1 }
0x154a   :  { %v27370_v33 = vadd.f32 %v27369_v56, %v27296_v52 }
0x154b   :  { %v27443_v11 = vpop.f32.mrb[196].mxu0 }
0x154c   :  { %v27444_v31 = vadd.f32 %v27443_v11, %v27370_v33  ;;  %v35834_v42 = vpop.f32.mrb[197].mxu0  ;;  %v27517_v51 = vpop.f32.mrb[206].mxu1 }
0x154d   :  { %v35839_v59 = vpop.f32.mrb[207].mxu1 }
0x154e   :  { %v27518_v41 = vadd.f32 %v27517_v51, %v27444_v31 }
0x154f   :  { %v27589_v26 = vpop.f32.mrb[198].mxu0 }
0x1550   :  { %v27590_v32 = vadd.f32 %v27589_v26, %v27518_v41  ;;  %v35844_v34 = vpop.f32.mrb[199].mxu0  ;;  %v27671_v2 = vpop.f32.mrb[208].mxu1 }
0x1551   :  { %v35849_v55 = vpop.f32.mrb[209].mxu1 }
0x1552   :  { %v40496_v5 = vadd.f32 %v27590_v32, %v40135_v22 }
0x1553   :  { %v27747_v49 = vpop.f32.mrb[200].mxu0 }
0x1554   :  { %v27748_v53 = vadd.f32 %v27747_v49, %v27671_v2  ;;  %v35854_v38 = vpop.f32.mrb[201].mxu0  ;;  %v27821_v37 = vpop.f32.mrb[210].mxu1 }
0x1555   :  { %v35859_v35 = vpop.f32.mrb[211].mxu1 }
0x1556   :  { %v27822_v20 = vadd.f32 %v27821_v37, %v27748_v53 }
0x1557   :  { %v27895_v16 = vpop.f32.mrb[202].mxu0 }
0x1558   :  { %v27896_v60 = vadd.f32 %v27895_v16, %v27822_v20  ;;  %v35864_v39 = vpop.f32.mrb[203].mxu0  ;;  %v27969_v3 = vpop.f32.mrb[212].mxu1 }
0x1559   :  { %v35869_v46 = vpop.f32.mrb[213].mxu1 }
0x155a   :  { %v27970_v44 = vadd.f32 %v27969_v3, %v27896_v60 }
0x155b   :  { %v28041_v15 = vpop.f32.mrb[204].mxu0 }
0x155c   :  { %v28042_v45 = vadd.f32 %v28041_v15, %v27970_v44  ;;  %v35874_v17 = vpop.f32.mrb[205].mxu0  ;;  %v36662_v44 = vadd.f32 %v39350_v25, %v39334_v1 }
0x155e   :  { %v40499_v29 = vadd.f32 %v28042_v45, %v40137_v6  ;;  %v30366_v15 = vand.u32 4294901760, %v36662_v44 }
0x1560   :  { %v40521_v17 = vsub.f32 %v36662_v44, %v30366_v15 }
0x1587   :  { %v28499_v22 = vpop.f32.mrb[214].mxu1 }
0x1588   :  { %v36679_v58 = vadd.f32 %v40142_v18, %v28499_v22  ;;  %v35904_v28 = vpop.f32.mrb[215].mxu1 }
0x158a   :  { %v28953_v8 = vpop.f32.mrb[206].mxu0  ;;  %v29865_v4 = vsel %vm875_vm3, %v36679_v58, -inf }
0x158b   :  { %v36680_v9 = vadd.f32 %v40149_v10, %v28953_v8  ;;  %v35934_v52 = vpop.f32.mrb[207].mxu0  ;;  %29866 = vmax.xlane.f32.xlu0 %v29865_v4 }
0x158c   :  { %v30444_v52 = vand.u32 4294901760, %v40521_v17 }
0x158d   :  { %v29868_v61 = vsel %vm875_vm3, %v36680_v9, -inf }
0x158e   :  { %29869 = vmax.xlane.f32.xlu1 %v29868_v61  ;;  %v36664_v61 = vadd.f32 %v39358_v43, %v39334_v1  ;;  %v30445_v43 = vsub.f32 %v40521_v17, %v30444_v52 }
0x15b3   :  { %v29407_v56 = vpop.f32.mrb[216].mxu1 }
0x15b4   :  { %v36681_v30 = vadd.f32 %v40156_v62, %v29407_v56  ;;  %v35964_v33 = vpop.f32.mrb[217].mxu1 }
0x15b6   :  { %v29861_v6 = vpop.f32.mrb[208].mxu0  ;;  %v29871_v11 = vsel %vm875_vm3, %v36681_v30, -inf }
0x15b7   :  { %v36682_v18 = vadd.f32 %v40163_v23, %v29861_v6  ;;  %v35994_v31 = vpop.f32.mrb[209].mxu0  ;;  %29872 = vmax.xlane.f32.xlu0 %v29871_v11 }
0x15b9   :  { %v29874_v42 = vsel %vm875_vm3, %v36682_v18, -inf }
0x15bb   :  { %29875 = vmax.xlane.f32.xlu0 %v29874_v42 }
0x1618   :  { %v29867_v10 = vpop.xlane.xlu0 %29866 }
0x1619   :  { %v29877_v51 = vsub.f32 %v36679_v58, %v29867_v10 }
0x161b   :  { %v29881_v59 = vmul.f32 1.442695, %v29877_v51  ;;  %v29870_v41 = vpop.xlane.xlu1 %29869  ;;  %v30446_v51 = vand.u32 4294901760, %v30445_v43 }
0x161c   :  { %v29878_v26 = vsub.f32 %v36680_v9, %v29870_v41 }
0x161d   :  { %37288 = vpow2.f32 %v29881_v59 }
0x161e   :  { %v29883_v32 = vmul.f32 1.442695, %v29878_v26 }
0x1620   :  { %37290 = vpow2.f32 %v29883_v32 }
0x1627   :  { %v37289_v62 = vpop.eup %37288 }
0x1628   :  { %v29889_v34 = vsel %vm875_vm3, %v37289_v62, 0.0 }
0x1629   :  { %29890 = vadd.xlane.f32.xlu1 %v29889_v34 }
0x162a   :  { %v37291_v2 = vpop.eup %37290 }
0x162b   :  { %v29892_v23 = vsel %vm875_vm3, %v37291_v2, 0.0 }
0x162c   :  { %29893 = vadd.xlane.f32.xlu0 %v29892_v23 }
0x1644   :  { %v29873_v55 = vpop.xlane.xlu0 %29872 }
0x1645   :  { %v29879_v49 = vsub.f32 %v36681_v30, %v29873_v55 }
0x1647   :  { %v29885_v53 = vmul.f32 1.442695, %v29879_v49 }
0x1648   :  { %v29876_v38 = vpop.xlane.xlu0 %29875 }
0x1649   :  { %37292 = vpow2.f32 %v29885_v53  ;;  %v29880_v37 = vsub.f32 %v36682_v18, %v29876_v38  ;;  %v40538_v18 = vand.u32 4294901760, %v36664_v61 }
0x164b   :  { %v29887_v35 = vmul.f32 1.442695, %v29880_v37  ;;  %v40546_v10 = vsub.f32 %v36664_v61, %v40538_v18 }
0x164d   :  { %37294 = vpow2.f32 %v29887_v35  ;;  %v30893_v59 = vand.u32 4294901760, %v40546_v10 }
0x164f   :  { %v30894_v26 = vsub.f32 %v40546_v10, %v30893_v59 }
0x1653   :  { %v40511_v20 = vpop.eup %37292 }
0x1654   :  { %v29895_v16 = vsel %vm875_vm3, %v40511_v20, 0.0 }
0x1655   :  { %29896 = vadd.xlane.f32.xlu1 %v29895_v16 }
0x1657   :  { %v40515_v60 = vpop.eup %37294 }
0x1658   :  { %v29898_v39 = vsel %vm875_vm3, %v40515_v60, 0.0 }
0x1659   :  { %29899 = vadd.xlane.f32.xlu0 %v29898_v39 }
0x16b6   :  { %v29891_v3 = vpop.xlane.xlu1 %29890 }
0x16b7   :  { %37296 = vrcp.f32 %v29891_v3 }
0x16b9   :  { %v29894_v46 = vpop.xlane.xlu0 %29893 }
0x16ba   :  { %37298 = vrcp.f32 %v29894_v46 }
0x16c1   :  { %v37297_v45 = vpop.eup %37296 }
0x16c2   :  { %v29902_v22 = vmul.f32 %v37297_v45, %v37289_v62  ;;  %v36666_v62 = vadd.f32 %v39364_v19, %v39334_v1 }
0x16c4   :  { %v37299_v58 = vpop.eup %37298  ;;  %v29909_v28 = vadd.f32 %v29902_v22, %v40202_v57  ;;  %v29914_v8 = vsel %vm875_vm3, %v29902_v22, 0 }
0x16c5   :  { %v29982_v4 = vand.u32 4294901760, %v29914_v8  ;;  %v29904_v9 = vmul.f32 %v37299_v58, %v37291_v2  ;;  %v31264_v2 = vand.u32 4294901760, %v36666_v62 }
0x16c6   :  { %v31713_v56 = vmul.f32 0.25, %v29909_v28 }
0x16c7   :  { %v29983_v25 = vsub.f32 %v29914_v8, %v29982_v4  ;;  %36003 = vmatmul.mubr.f32.vlgmr.msra.gmra.mrb[210].mxu0 %v29982_v4  ;;  %v29910_v30 = vadd.f32 %v29904_v9, %v40208_v27  ;;  %v30363_v33 = vsel %vm875_vm3, %v29904_v9, 0  ;;  %v31341_v55 = vsub.f32 %v36666_v62, %v31264_v2 }
0x16c8   :  { %33130 = vst.msk [vmem:[#allocation6] sm:$0xff] %vm875_vm3, %v31713_v56  ;;  %36011 = vmatpush3.msra.mxu0 %v40457_v47  ;;  %36012 = vmatprep.mubr.msk.f32.mxu0 %vm37404_vm2, %v37403_v24  ;;  %v30431_v6 = vand.u32 4294901760, %v30363_v33 }
0x16c9   :  { %36020 = vmatprep.subr.mxu0 %v37403_v24  ;;  %v29984_v57 = vand.u32 4294901760, %v29983_v25  ;;  %v31714_v11 = vmul.f32 0.25, %v29910_v30  ;;  %v31342_v16 = vand.u32 4294901760, %v31341_v55 }
0x16ca   :  { %v30432_v42 = vsub.f32 %v30363_v33, %v30431_v6 }
0x16cb   :  { %36013 = vmatmul.mubr.f32.vlgmr.msra.gmra.mrb[212].mxu0 %v29984_v57  ;;  %v29985_v27 = vsub.f32 %v29983_v25, %v29984_v57  ;;  %33131 = vst.msk [vmem:[#allocation6 + $0x8] sm:$0xff] %vm875_vm3, %v31714_v11  ;;  %v31343_v44 = vsub.f32 %v31341_v55, %v31342_v16 }
0x16cc   :  { %36021 = vmatpush3.msra.mxu0 %v40457_v47  ;;  %36022 = vmatprep.mubr.msk.f32.mxu0 %vm37404_vm2, %v37403_v24  ;;  %v30433_v47 = vand.u32 4294901760, %v30432_v42 }
0x16cd   :  { %36030 = vmatprep.subr.mxu0 %v37403_v24  ;;  %v29986_v31 = vand.u32 4294901760, %v29985_v27 }
0x16ce   :  { %v30434_v41 = vsub.f32 %v30432_v42, %v30433_v47 }
0x16cf   :  { %35998 = vmatmul.mubr.f32.vlgmr.msra.gmra.mrb[218].mxu1 %v29986_v31  ;;  %36023 = vmatmul.mubr.f32.vlgmr.msra.gmra.mrb[214].mxu0 %v29982_v4 }
0x16d0   :  { %36006 = vmatpush3.msra.mxu1 %v40464_v40  ;;  %36031 = vmatpush3.msra.mxu0 %v30446_v51  ;;  %v30435_v40 = vand.u32 4294901760, %v30434_v41 }
0x16d1   :  { %36007 = vmatprep.mubr.msk.f32.mxu1 %vm37404_vm2, %v37403_v24  ;;  %36015 = vmatprep.subr.mxu1 %v37403_v24 }
0x16d2   :  { %36032 = vmatprep.mubr.msk.f32.mxu0 %vm37404_vm2, %v37403_v24  ;;  %36040 = vmatprep.subr.mxu0 %v37403_v24 }
0x16d3   :  { %36008 = vmatmul.mubr.f32.vlgmr.msra.gmra.mrb[220].mxu1 %v29983_v25  ;;  %36033 = vmatmul.mubr.f32.vlgmr.msra.gmra.mrb[216].mxu0 %v30431_v6 }
0x16d4   :  { %36016 = vmatpush3.msra.mxu1 %v29995_v7  ;;  %36041 = vmatpush3.msra.mxu0 %v30366_v15  ;;  %v30895_v7 = vand.u32 4294901760, %v30894_v26 }
0x16d5   :  { %36017 = vmatprep.mubr.msk.f32.mxu1 %vm37404_vm2, %v37403_v24  ;;  %36025 = vmatprep.subr.mxu1 %v37403_v24 }
0x16d6   :  { %36042 = vmatprep.mubr.msk.f32.mxu0 %vm37404_vm2, %v37403_v24  ;;  %36050 = vmatprep.subr.mxu0 %v37403_v24 }
0x16d7   :  { %36018 = vmatmul.mubr.f32.vlgmr.msra.gmra.mrb[222].mxu1 %v29982_v4  ;;  %36043 = vmatmul.mubr.f32.vlgmr.msra.gmra.mrb[218].mxu0 %v30433_v47  ;;  %v31723_v47 = vsub.s32 7, %v37594_v36 }
0x16d8   :  { %36026 = vmatpush3.msra.mxu1 %v30366_v15  ;;  %36051 = vmatpush3.msra.mxu0 %v30366_v15 }
0x16d9   :  { %36027 = vmatprep.mubr.msk.f32.mxu1 %vm37404_vm2, %v37403_v24  ;;  %36035 = vmatprep.subr.mxu1 %v37403_v24 }
0x16da   :  { %36052 = vmatprep.mubr.msk.f32.mxu0 %vm37404_vm2, %v37403_v24  ;;  %36060 = vmatprep.subr.mxu0 %v37403_v24 }
0x16db   :  { %36028 = vmatmul.mubr.f32.vlgmr.msra.gmra.mrb[224].mxu1 %v30435_v40  ;;  %36053 = vmatmul.mubr.f32.vlgmr.msra.gmra.mrb[220].mxu0 %v30431_v6 }
0x16dc   :  { %36036 = vmatpush3.msra.mxu1 %v40521_v17  ;;  %36061 = vmatpush3.msra.mxu0 %v30895_v7  ;;  %v31344_v17 = vand.u32 4294901760, %v31343_v44 }
0x16dd   :  { %36037 = vmatprep.mubr.msk.f32.mxu1 %vm37404_vm2, %v37403_v24  ;;  %36045 = vmatprep.subr.mxu1 %v37403_v24 }
0x16de   :  { %36062 = vmatprep.mubr.msk.f32.mxu0 %vm37404_vm2, %v37403_v24  ;;  %36070 = vmatprep.subr.mxu0 %v37403_v24 }
0x16df   :  { %36038 = vmatmul.mubr.f32.vlgmr.msra.gmra.mrb[226].mxu1 %v30432_v42 }
0x16e0   :  { %36046 = vmatpush3.msra.mxu1 %v30444_v52  ;;  %36047 = vmatprep.mubr.msk.f32.mxu1 %vm37404_vm2, %v37403_v24 }
0x16e1   :  { %36055 = vmatprep.subr.mxu1 %v37403_v24 }
0x16e2   :  { %v29897_v32 = vpop.xlane.xlu1 %29896 }
0x16e3   :  { %37300 = vrcp.f32 %v29897_v32  ;;  %36048 = vmatmul.mubr.f32.vlgmr.msra.gmra.mrb[228].mxu1 %v30431_v6 }
0x16e4   :  { %36056 = vmatpush3.msra.mxu1 %v40538_v18  ;;  %36057 = vmatprep.mubr.msk.f32.mxu1 %vm37404_vm2, %v37403_v24 }
0x16e5   :  { %36065 = vmatprep.subr.mxu1 %v37403_v24 }
0x16e6   :  { %v29900_v34 = vpop.xlane.xlu0 %29899 }
0x16e7   :  { %37302 = vrcp.f32 %v29900_v34  ;;  %v40637_v34 = vld [vmem:[%s40908_s5] sm:$0xff] }
0x16ed   :  { %v37301_v23 = vpop.eup %37300 }
0x16ee   :  { %v29906_v49 = vmul.f32 %v37301_v23, %v40511_v20 }
0x16f0   :  { %v29911_v53 = vadd.f32 %v29906_v49, %v40246_v14  ;;  %v30812_v38 = vsel %vm875_vm3, %v29906_v49, 0 }
0x16f1   :  { %v37303_v37 = vpop.eup %37302  ;;  %v30880_v35 = vand.u32 4294901760, %v30812_v38 }
0x16f2   :  { %v31715_v39 = vmul.f32 0.25, %v29911_v53  ;;  %v29908_v3 = vmul.f32 %v37303_v37, %v40515_v60 }
0x16f3   :  { %v30881_v46 = vsub.f32 %v30812_v38, %v30880_v35  ;;  %36063 = vmatmul.mubr.f32.vlgmr.msra.gmra.mrb[222].mxu0 %v30880_v35 }
0x16f4   :  { %33132 = vst.msk [vmem:[#allocation6 + $0x10] sm:$0xff] %vm875_vm3, %v31715_v39  ;;  %36071 = vmatpush3.msra.mxu0 %v40538_v18  ;;  %36072 = vmatprep.mubr.msk.f32.mxu0 %vm37404_vm2, %v37403_v24  ;;  %v29912_v1 = vadd.f32 %v29908_v3, %v40238_v21  ;;  %v31261_v19 = vsel %vm875_vm3, %v29908_v3, 0 }
0x16f5   :  { %36080 = vmatprep.subr.mxu0 %v37403_v24  ;;  %v30882_v14 = vand.u32 4294901760, %v30881_v46  ;;  %v31329_v20 = vand.u32 4294901760, %v31261_v19 }
0x16f6   :  { %v31716_v15 = vmul.f32 0.25, %v29912_v1 }
0x16f7   :  { %36073 = vmatmul.mubr.f32.vlgmr.msra.gmra.mrb[224].mxu0 %v30882_v14  ;;  %v30883_v60 = vsub.f32 %v30881_v46, %v30882_v14  ;;  %v31330_v45 = vsub.f32 %v31261_v19, %v31329_v20 }
0x16f8   :  { %36081 = vmatpush3.msra.mxu0 %v40538_v18  ;;  %36082 = vmatprep.mubr.msk.f32.mxu0 %vm37404_vm2, %v37403_v24  ;;  %33133 = vst.msk [vmem:[#allocation6 + $0x18] sm:$0xff] %vm875_vm3, %v31716_v15 }
0x16f9   :  { %36090 = vmatprep.subr.mxu0 %v37403_v24  ;;  %v30884_v21 = vand.u32 4294901760, %v30883_v60  ;;  %v31331_v22 = vand.u32 4294901760, %v31330_v45 }
0x16fb   :  { %36058 = vmatmul.mubr.f32.vlgmr.msra.gmra.mrb[230].mxu1 %v30884_v21  ;;  %36083 = vmatmul.mubr.f32.vlgmr.msra.gmra.mrb[226].mxu0 %v30880_v35  ;;  %v31332_v58 = vsub.f32 %v31330_v45, %v31331_v22 }
0x16fc   :  { %36066 = vmatpush3.msra.mxu1 %v40546_v10  ;;  %36091 = vmatpush3.msra.mxu0 %v31344_v17 }
0x16fd   :  { %36067 = vmatprep.mubr.msk.f32.mxu1 %vm37404_vm2, %v37403_v24  ;;  %36075 = vmatprep.subr.mxu1 %v37403_v24  ;;  %v31333_v28 = vand.u32 4294901760, %v31332_v58 }
0x16fe   :  { %36092 = vmatprep.mubr.msk.f32.mxu0 %vm37404_vm2, %v37403_v24  ;;  %36100 = vmatprep.subr.mxu0 %v37403_v24 }
0x16ff   :  { %36068 = vmatmul.mubr.f32.vlgmr.msra.gmra.mrb[232].mxu1 %v30881_v46  ;;  %36093 = vmatmul.mubr.f32.vlgmr.msra.gmra.mrb[228].mxu0 %v31329_v20 }
0x1700   :  { %36076 = vmatpush3.msra.mxu1 %v30893_v59  ;;  %36101 = vmatpush3.msra.mxu0 %v31264_v2 }
0x1701   :  { %36077 = vmatprep.mubr.msk.f32.mxu1 %vm37404_vm2, %v37403_v24  ;;  %36085 = vmatprep.subr.mxu1 %v37403_v24 }
0x1702   :  { %36102 = vmatprep.mubr.msk.f32.mxu0 %vm37404_vm2, %v37403_v24  ;;  %36110 = vmatprep.subr.mxu0 %v37403_v24 }
0x1703   :  { %36078 = vmatmul.mubr.f32.vlgmr.msra.gmra.mrb[234].mxu1 %v30880_v35  ;;  %36103 = vmatmul.mubr.f32.vlgmr.msra.gmra.mrb[230].mxu0 %v31331_v22 }
0x1704   :  { %36086 = vmatpush3.msra.mxu1 %v31264_v2  ;;  %36111 = vmatpush3.msra.mxu0 %v31264_v2  ;;  %v31724_v2 = vrot.slane %v40637_v34, %v31723_v47 }
0x1705   :  { %36087 = vmatprep.mubr.msk.f32.mxu1 %vm37404_vm2, %v37403_v24  ;;  %36095 = vmatprep.subr.mxu1 %v37403_v24 }
0x1706   :  { %36112 = vmatprep.mubr.msk.f32.mxu0 %vm37404_vm2, %v37403_v24 }
0x1707   :  { %36088 = vmatmul.mubr.f32.vlgmr.msra.gmra.mrb[236].mxu1 %v31333_v28  ;;  %36113 = vmatmul.mubr.f32.vlgmr.msra.gmra.mrb[232].mxu0 %v31329_v20 }
0x1708   :  { %36096 = vmatpush3.msra.mxu1 %v31341_v55  ;;  %36097 = vmatprep.mubr.msk.f32.mxu1 %vm37404_vm2, %v37403_v24 }
0x1709   :  { %36105 = vmatprep.subr.mxu1 %v37403_v24 }
0x170b   :  { %36098 = vmatmul.mubr.f32.vlgmr.msra.gmra.mrb[238].mxu1 %v31330_v45 }
0x170c   :  { %36106 = vmatpush3.msra.mxu1 %v31342_v16  ;;  %36107 = vmatprep.mubr.msk.f32.mxu1 %vm37404_vm2, %v37403_v24 }
0x170f   :  { %36108 = vmatmul.mubr.f32.vlgmr.msra.gmra.mrb[240].mxu1 %v31329_v20 }
0x179a   :  { %v30064_v8 = vpop.f32.mrb[210].mxu0 }
0x179b   :  { %v36004_v4 = vpop.f32.mrb[211].mxu0 }
0x179e   :  { %v30212_v9 = vpop.f32.mrb[212].mxu0 }
0x179f   :  { %v36014_v52 = vpop.f32.mrb[213].mxu0 }
0x17a2   :  { %v29988_v61 = vpop.f32.mrb[218].mxu1  ;;  %v30358_v56 = vpop.f32.mrb[214].mxu0 }
0x17a3   :  { %v30065_v25 = vadd.f32 %v30064_v8, %v29988_v61  ;;  %v35999_v30 = vpop.f32.mrb[219].mxu1  ;;  %v36024_v33 = vpop.f32.mrb[215].mxu0 }
0x17a6   :  { %v30138_v57 = vpop.f32.mrb[220].mxu1  ;;  %v30513_v6 = vpop.f32.mrb[216].mxu0 }
0x17a7   :  { %v30139_v11 = vadd.f32 %v30138_v57, %v30065_v25  ;;  %v36009_v43 = vpop.f32.mrb[221].mxu1  ;;  %v36034_v18 = vpop.f32.mrb[217].mxu0 }
0x17a9   :  { %v30213_v27 = vadd.f32 %v30212_v9, %v30139_v11 }
0x17aa   :  { %v30286_v31 = vpop.f32.mrb[222].mxu1  ;;  %v30661_v42 = vpop.f32.mrb[218].mxu0 }
0x17ab   :  { %v30287_v10 = vadd.f32 %v30286_v31, %v30213_v27  ;;  %v36019_v24 = vpop.f32.mrb[223].mxu1  ;;  %v36044_v51 = vpop.f32.mrb[219].mxu0 }
0x17ad   :  { %v30359_v59 = vadd.f32 %v30358_v56, %v30287_v10 }
0x17ae   :  { %v30437_v41 = vpop.f32.mrb[224].mxu1  ;;  %v30807_v26 = vpop.f32.mrb[220].mxu0 }
0x17af   :  { %v31709_v40 = vadd.f32 %v30359_v59, %v40490_v54  ;;  %v30514_v7 = vadd.f32 %v30513_v6, %v30437_v41  ;;  %v36029_v32 = vpop.f32.mrb[225].mxu1  ;;  %v36054_v62 = vpop.f32.mrb[221].mxu0 }
0x17b1   :  { %v31717_v23 = vadd.f32 %v31709_v40, %v38954_v12 }
0x17b2   :  { %v30587_v55 = vpop.f32.mrb[226].mxu1 }
0x17b3   :  { %v30588_v49 = vadd.f32 %v30587_v55, %v30514_v7  ;;  %v36039_v53 = vpop.f32.mrb[227].mxu1  ;;  %v40641_v38 = vadd.f32 %v31724_v2, %v31717_v23 }
0x17b5   :  { %v31729_v54 = vsel %vm77_vm0, %v40641_v38, 0.0  ;;  %v30662_v37 = vadd.f32 %v30661_v42, %v30588_v49 }
0x17b6   :  { %31730 = vadd.xlane.f32.xlu1 %v31729_v54  ;;  %v30735_v35 = vpop.f32.mrb[228].mxu1 }
0x17b7   :  { %v30736_v16 = vadd.f32 %v30735_v35, %v30662_v37  ;;  %v36049_v39 = vpop.f32.mrb[229].mxu1 }
0x17b9   :  { %v30808_v3 = vadd.f32 %v30807_v26, %v30736_v16 }
0x17bb   :  { %v31710_v46 = vadd.f32 %v30808_v3, %v40493_v50 }
0x17bd   :  { %v31718_v1 = vadd.f32 %v31710_v46, %v38963_v63 }
0x17bf   :  { %v40647_v19 = vadd.f32 %v31724_v2, %v31718_v1  ;;  %v56_v1 = vld [vmem:[#allocation2 + $0x18] sm:$0xff] }
0x17c1   :  { %v31732_v12 = vsel %vm77_vm0, %v40647_v19, 0.0 }
0x17c2   :  { %31733 = vadd.xlane.f32.xlu0 %v31732_v12  ;;  %v60_v12 = vld [vmem:[#allocation2 + $0x38] sm:$0xff] }
0x17c6   :  { %v30962_v14 = vpop.f32.mrb[222].mxu0 }
0x17c7   :  { %v36064_v20 = vpop.f32.mrb[223].mxu0 }
0x17c8   :  { %v31814_v20 = vand.u32 4294901760, %v56_v1 }
0x17ca   :  { %v31110_v44 = vpop.f32.mrb[224].mxu0 }
0x17cb   :  { %v36074_v15 = vpop.f32.mrb[225].mxu0 }
0x17cc   :  { %v68_v15 = vld [vmem:[#allocation2 + $0x78] sm:$0xff] }
0x17ce   :  { %v30886_v60 = vpop.f32.mrb[230].mxu1  ;;  %v31256_v21 = vpop.f32.mrb[226].mxu0 }
0x17cf   :  { %v30963_v45 = vadd.f32 %v30962_v14, %v30886_v60  ;;  %v36059_v17 = vpop.f32.mrb[231].mxu1  ;;  %v36084_v22 = vpop.f32.mrb[227].mxu0  ;;  %v64_v14 = vld [vmem:[#allocation2 + $0x58] sm:$0xff] }
0x17d0   :  { %v31820_v60 = vand.u32 4294901760, %v64_v14 }
0x17d2   :  { %v31036_v58 = vpop.f32.mrb[232].mxu1  ;;  %v31411_v28 = vpop.f32.mrb[228].mxu0 }
0x17d3   :  { %v31037_v50 = vadd.f32 %v31036_v58, %v30963_v45  ;;  %v36069_v8 = vpop.f32.mrb[233].mxu1  ;;  %v36094_v63 = vpop.f32.mrb[229].mxu0  ;;  %v31823_v45 = vand.u32 4294901760, %v68_v15 }
0x17d4   :  { %v31924_v63 = vsub.f32 %v56_v1, %v31814_v20 }
0x17d5   :  { %v31111_v4 = vadd.f32 %v31110_v44, %v31037_v50  ;;  %v31817_v44 = vand.u32 4294901760, %v60_v12  ;;  %v40683_v58 = vpack.c.bf16 %v31823_v45, %v31820_v60 }
0x17d6   :  { %v31184_v9 = vpop.f32.mrb[234].mxu1  ;;  %v31559_v52 = vpop.f32.mrb[230].mxu0 }
0x17d7   :  { %v31185_v61 = vadd.f32 %v31184_v9, %v31111_v4  ;;  %v36079_v56 = vpop.f32.mrb[235].mxu1  ;;  %v36104_v25 = vpop.f32.mrb[231].mxu0  ;;  %v40681_v22 = vpack.c.bf16 %v31817_v44, %v31814_v20  ;;  %v31931_v4 = vsub.f32 %v60_v12, %v31817_v44  ;;  %v31925_v9 = vand.u32 4294901760, %v31924_v63 }
0x17d8   :  { %v31938_v25 = vsub.f32 %v64_v14, %v31820_v60 }
0x17d9   :  { %v31257_v30 = vadd.f32 %v31256_v21, %v31185_v61  ;;  %36476 = vmatprep.subr.bf16.mxu1 %v40681_v22  ;;  %v31926_v61 = vsub.f32 %v31924_v63, %v31925_v9 }
0x17da   :  { %v31335_v33 = vpop.f32.mrb[236].mxu1  ;;  %v31705_v57 = vpop.f32.mrb[232].mxu0  ;;  %36478 = vmatpush3.bf16.msra.mxu1 %v40681_v22 }
0x17db   :  { %v31711_v6 = vadd.f32 %v31257_v30, %v40496_v5  ;;  %v31412_v11 = vadd.f32 %v31411_v28, %v31335_v33  ;;  %v36089_v43 = vpop.f32.mrb[237].mxu1  ;;  %v36114_v18 = vpop.f32.mrb[233].mxu0  ;;  %36480 = vmatprep.subr.bf16.mxu1 %v40683_v58  ;;  %v31945_v30 = vsub.f32 %v68_v15, %v31823_v45  ;;  %v31927_v33 = vand.u32 4294901760, %v31926_v61 }
0x17dd   :  { %v31719_v27 = vadd.f32 %v31711_v6, %v38972_v13  ;;  %v31939_v6 = vand.u32 4294901760, %v31938_v25 }
0x17de   :  { %v31485_v31 = vpop.f32.mrb[238].mxu1  ;;  %36482 = vmatpush3.bf16.msra.mxu1 %v40683_v58 }
0x17df   :  { %v31486_v42 = vadd.f32 %v31485_v31, %v31412_v11  ;;  %v36099_v10 = vpop.f32.mrb[239].mxu1  ;;  %v40653_v24 = vadd.f32 %v31724_v2, %v31719_v27  ;;  %v31946_v11 = vand.u32 4294901760, %v31945_v30  ;;  %v31940_v18 = vsub.f32 %v31938_v25, %v31939_v6 }
0x17e1   :  { %v31735_v51 = vsel %vm77_vm0, %v40653_v24, 0.0  ;;  %v31560_v47 = vadd.f32 %v31559_v52, %v31486_v42  ;;  %v31932_v52 = vand.u32 4294901760, %v31931_v4  ;;  %v31947_v27 = vsub.f32 %v31945_v30, %v31946_v11 }
0x17e2   :  { %31736 = vadd.xlane.f32.xlu1 %v31735_v51  ;;  %v31633_v59 = vpop.f32.mrb[240].mxu1  ;;  %v31941_v31 = vand.u32 4294901760, %v31940_v18  ;;  %v40695_v51 = vpack.c.bf16 %v31931_v4, %v31924_v63 }
0x17e3   :  { %v31634_v41 = vadd.f32 %v31633_v59, %v31560_v47  ;;  %v36109_v26 = vpop.f32.mrb[241].mxu1  ;;  %v31933_v56 = vsub.f32 %v31931_v4, %v31932_v52  ;;  %v31948_v42 = vand.u32 4294901760, %v31947_v27  ;;  %v40697_v47 = vpack.c.bf16 %v31945_v30, %v31938_v25 }
0x17e4   :  { %v40699_v59 = vpack.c.bf16 %v31932_v52, %v31925_v9 }
0x17e5   :  { %v31706_v40 = vadd.f32 %v31705_v57, %v31634_v41  ;;  %v31934_v57 = vand.u32 4294901760, %v31933_v56  ;;  %v36487_v10 = vpack.c.bf16 %v31948_v42, %v31941_v31  ;;  %v40701_v41 = vpack.c.bf16 %v31946_v11, %v31939_v6 }
0x17e7   :  { %v31712_v5 = vadd.f32 %v31706_v40, %v40499_v29  ;;  %v36483_v43 = vpack.c.bf16 %v31934_v57, %v31927_v33 }
0x17e9   :  { %v31720_v7 = vadd.f32 %v31712_v5, %v38985_v0  ;;  %36484 = vmatprep.subr.bf16.mxu1 %v36483_v43 }
0x17eb   :  { %v40659_v32 = vadd.f32 %v31724_v2, %v31720_v7  ;;  %v31783_v7 = vsub.s32 4, %v37594_v36 }
0x17ed   :  { %v31738_v13 = vsel %vm77_vm0, %v40659_v32, 0.0 }
0x17ee   :  { %31739 = vadd.xlane.f32.xlu0 %v31738_v13 }
0x1843   :  { %v31731_v62 = vpop.xlane.xlu1 %31730 }
0x1844   :  { %v31741_v23 = vmul.f32 0.03125, %v31731_v62  ;;  %v31791_v62 = vsub.s32 5, %v37594_v36 }
0x1846   :  { %v40664_v55 = vsub.f32 %v40641_v38, %v31741_v23 }
0x1848   :  { %v31749_v49 = vmul.f32 %v40664_v55, %v40664_v55 }
0x184a   :  { %v31753_v53 = vsel %vm77_vm0, %v31749_v49, 0.0  ;;  %v31784_v49 = vrot.slane %v40637_v34, %v31783_v7 }
0x184b   :  { %31754 = vadd.xlane.f32.xlu1 %v31753_v53 }
0x184f   :  { %v31734_v29 = vpop.xlane.xlu0 %31733 }
0x1850   :  { %v31742_v54 = vmul.f32 0.03125, %v31734_v29 }
0x1852   :  { %v40670_v0 = vsub.f32 %v40647_v19, %v31742_v54 }
0x1854   :  { %v31750_v2 = vmul.f32 %v40670_v0, %v40670_v0 }
0x1856   :  { %v31756_v37 = vsel %vm77_vm0, %v31750_v2, 0.0  ;;  %v31792_v2 = vrot.slane %v40637_v34, %v31791_v62 }
0x1857   :  { %31757 = vadd.xlane.f32.xlu0 %v31756_v37 }
0x186f   :  { %v31737_v35 = vpop.xlane.xlu1 %31736 }
0x1870   :  { %v31743_v16 = vmul.f32 0.03125, %v31737_v35 }
0x1872   :  { %v40676_v39 = vsub.f32 %v40653_v24, %v31743_v16 }
0x1874   :  { %v31751_v3 = vmul.f32 %v40676_v39, %v40676_v39 }
0x1876   :  { %v31759_v46 = vsel %vm77_vm0, %v31751_v3, 0.0 }
0x1877   :  { %31760 = vadd.xlane.f32.xlu1 %v31759_v46 }
0x187b   :  { %v31740_v21 = vpop.xlane.xlu0 %31739 }
0x187c   :  { %v31744_v17 = vmul.f32 0.03125, %v31740_v21 }
0x187e   :  { %v40686_v28 = vsub.f32 %v40659_v32, %v31744_v17 }
0x1880   :  { %v31752_v50 = vmul.f32 %v40686_v28, %v40686_v28 }
0x1882   :  { %v31762_v8 = vsel %vm77_vm0, %v31752_v50, 0.0 }
0x1883   :  { %31763 = vadd.xlane.f32.xlu0 %v31762_v8 }
0x18d8   :  { %v31755_v26 = vpop.xlane.xlu1 %31754 }
0x18d9   :  { %v31765_v40 = vmul.f32 0.03125, %v31755_v26 }
0x18db   :  { %v31769_v5 = vadd.f32 1e-05, %v31765_v40 }
0x18dd   :  { %37304 = vrsqrt.f32 %v31769_v5 }
0x18e4   :  { %v31758_v13 = vpop.xlane.xlu0 %31757 }
0x18e5   :  { %v31766_v23 = vmul.f32 0.03125, %v31758_v13 }
0x18e7   :  { %v37305_v53 = vpop.eup %37304  ;;  %v31770_v29 = vadd.f32 1e-05, %v31766_v23 }
0x18e8   :  { %v31777_v54 = vmul.f32 %v37305_v53, %v40664_v55  ;;  %v32435_v53 = vld [vmem:[%s40907_s4 + $0x20] sm:$0xff] }
0x18e9   :  { %37306 = vrsqrt.f32 %v31770_v29  ;;  %v32436_v29 = vld [vmem:[%s40907_s4 + $0x28] sm:$0xff] }
0x18ea   :  { %v31785_v37 = vmul.f32 %v31784_v49, %v31777_v54  ;;  %v32469_v54 = vand.u32 4294901760, %v32435_v53 }
0x18ec   :  { %v31793_v35 = vadd.f32 %v31792_v2, %v31785_v37 }
0x18ee   :  { %v31802_v16 = vsel %vm77_vm0, %v31793_v35, 0 }
0x18ef   :  { %v40709_v3 = vand.u32 4294901760, %v31802_v16 }
0x18f1   :  { %v40712_v46 = vsub.f32 %v31802_v16, %v40709_v3 }
0x18f3   :  { %v37307_v1 = vpop.eup %37306  ;;  %v31884_v12 = vand.u32 4294901760, %v40712_v46 }
0x18f4   :  { %v31778_v14 = vmul.f32 %v37307_v1, %v40670_v0 }
0x18f5   :  { %v31885_v20 = vsub.f32 %v40712_v46, %v31884_v12 }
0x18f6   :  { %v31786_v55 = vmul.f32 %v31784_v49, %v31778_v14 }
0x18f7   :  { %v31886_v44 = vand.u32 4294901760, %v31885_v20 }
0x18f8   :  { %v31794_v34 = vadd.f32 %v31792_v2, %v31786_v55 }
0x18f9   :  { %36123 = vmatprep.mubr.f32.mxu1 %v31886_v44 }
0x18fa   :  { %v31805_v15 = vsel %vm77_vm0, %v31794_v34, 0 }
0x18fb   :  { %v40718_v60 = vand.u32 4294901760, %v31805_v15 }
0x18fd   :  { %v31893_v21 = vsub.f32 %v31805_v15, %v40718_v60 }
0x18ff   :  { %v31894_v45 = vand.u32 4294901760, %v31893_v21 }
0x1901   :  { %v31895_v17 = vsub.f32 %v31893_v21, %v31894_v45 }
0x1903   :  { %v31896_v50 = vand.u32 4294901760, %v31895_v17 }
0x1904   :  { %v31761_v8 = vpop.xlane.xlu1 %31760 }
0x1905   :  { %v31767_v63 = vmul.f32 0.03125, %v31761_v8  ;;  %36124 = vmatmul.mubr.f32.vlgmr.msra.gmra.mrb[242].mxu1 %v31896_v50 }
0x1906   :  { %36486 = vmatpush3.bf16.msra.mxu1 %v36483_v43 }
0x1907   :  { %v31771_v0 = vadd.f32 1e-05, %v31767_v63  ;;  %36488 = vmatprep.subr.bf16.mxu1 %v36487_v10 }
0x1909   :  { %37308 = vrsqrt.f32 %v31771_v0  ;;  %v32599_v0 = vsub.f32 %v32435_v53, %v32469_v54 }
0x190a   :  { %36490 = vmatpush3.bf16.msra.mxu1 %v36487_v10 }
0x190b   :  { %36492 = vmatprep.subr.bf16.mxu1 %v40695_v51 }
0x1910   :  { %v31764_v4 = vpop.xlane.xlu0 %31763 }
0x1911   :  { %v31768_v9 = vmul.f32 0.03125, %v31764_v4 }
0x1913   :  { %v37309_v52 = vpop.eup %37308  ;;  %v31772_v61 = vadd.f32 1e-05, %v31768_v9 }
0x1914   :  { %v31779_v56 = vmul.f32 %v37309_v52, %v40676_v39 }
0x1915   :  { %37310 = vrsqrt.f32 %v31772_v61  ;;  %v32600_v61 = vand.u32 4294901760, %v32599_v0 }
0x1916   :  { %v31787_v25 = vmul.f32 %v31784_v49, %v31779_v56 }
0x1918   :  { %v31795_v30 = vadd.f32 %v31792_v2, %v31787_v25 }
0x191a   :  { %v31808_v33 = vsel %vm77_vm0, %v31795_v30, 0  ;;  %v32601_v30 = vsub.f32 %v32599_v0, %v32600_v61 }
0x191b   :  { %v31902_v57 = vand.u32 4294901760, %v31808_v33 }
0x191d   :  { %v31903_v6 = vsub.f32 %v31808_v33, %v31902_v57 }
0x191f   :  { %v37311_v11 = vpop.eup %37310  ;;  %v31904_v43 = vand.u32 4294901760, %v31903_v6 }
0x1920   :  { %v31780_v18 = vmul.f32 %v37311_v11, %v40686_v28  ;;  %v32431_v28 = vld [vmem:[%s40907_s4] sm:$0xff] }
0x1921   :  { %v31905_v27 = vsub.f32 %v31903_v6, %v31904_v43 }
0x1922   :  { %v31788_v31 = vmul.f32 %v31784_v49, %v31780_v18 }
0x1923   :  { %v31906_v42 = vand.u32 4294901760, %v31905_v27 }
0x1924   :  { %v31796_v10 = vadd.f32 %v31792_v2, %v31788_v31  ;;  %v32472_v2 = vand.u32 4294901760, %v32436_v29 }
0x1925   :  { %36126 = vmatprep.mubr.f32.mxu1 %v31906_v42 }
0x1926   :  { %v31811_v26 = vsel %vm77_vm0, %v31796_v10, 0  ;;  %v40774_v37 = vpack.c.bf16 %v32472_v2, %v32469_v54  ;;  %v32606_v4 = vsub.f32 %v32436_v29, %v32472_v2 }
0x1927   :  { %v31912_v40 = vand.u32 4294901760, %v31811_v26 }
0x1928   :  { %v32607_v56 = vand.u32 4294901760, %v32606_v4 }
0x1929   :  { %v31913_v39 = vsub.f32 %v31811_v26, %v31912_v40 }
0x192a   :  { %v32608_v33 = vsub.f32 %v32606_v4, %v32607_v56 }
0x192b   :  { %v31914_v5 = vand.u32 4294901760, %v31913_v39 }
0x192c   :  { %v32609_v18 = vand.u32 4294901760, %v32608_v33 }
0x192d   :  { %v31915_v7 = vsub.f32 %v31913_v39, %v31914_v5 }
0x192f   :  { %v31916_v13 = vand.u32 4294901760, %v31915_v7 }
0x1931   :  { %36127 = vmatmul.mubr.f32.gmra.mrb[244].mxu1 %v31916_v13 }
0x1932   :  { %36137 = vmatprep.mubr.f32.mxu1 %v40709_v3 }
0x1935   :  { %36138 = vmatmul.mubr.f32.vlgmr.msra.gmra.mrb[242].mxu1 %v40718_v60 }
0x1936   :  { %36140 = vmatprep.mubr.f32.mxu1 %v31902_v57  ;;  %36494 = vmatpush3.bf16.msra.mxu1 %v40695_v51  ;;  %v32432_v51 = vld [vmem:[%s40907_s4 + $0x8] sm:$0xff] }
0x1937   :  { %36496 = vmatprep.subr.bf16.mxu1 %v40697_v47 }
0x1939   :  { %36141 = vmatmul.mubr.f32.gmra.mrb[244].mxu1 %v31912_v40 }
0x193a   :  { %36498 = vmatpush3.bf16.msra.mxu1 %v40697_v47  ;;  %36151 = vmatprep.mubr.f32.mxu1 %v40712_v46  ;;  %v32460_v47 = vand.u32 4294901760, %v32432_v51  ;;  %v32438_v46 = vld [vmem:[%s40907_s4 + $0x38] sm:$0xff] }
0x193b   :  { %36500 = vmatprep.subr.bf16.mxu1 %v40681_v22 }
0x193c   :  { %v32578_v16 = vsub.f32 %v32432_v51, %v32460_v47 }
0x193d   :  { %36152 = vmatmul.mubr.f32.vlgmr.msra.gmra.mrb[242].mxu1 %v31893_v21 }
0x193e   :  { %36154 = vmatprep.mubr.f32.mxu1 %v31903_v6  ;;  %36502 = vmatpush3.bf16.msra.mxu1 %v40681_v22  ;;  %v32579_v20 = vand.u32 4294901760, %v32578_v16 }
0x193f   :  { %36504 = vmatprep.subr.bf16.mxu1 %v40683_v58 }
0x1940   :  { %v32580_v34 = vsub.f32 %v32578_v16, %v32579_v20 }
0x1941   :  { %36155 = vmatmul.mubr.f32.gmra.mrb[244].mxu1 %v31913_v39 }
0x1942   :  { %36506 = vmatpush3.bf16.msra.mxu1 %v40683_v58  ;;  %36165 = vmatprep.mubr.f32.mxu1 %v31884_v12  ;;  %v32478_v12 = vand.u32 4294901760, %v32438_v46 }
0x1943   :  { %36508 = vmatprep.subr.bf16.mxu1 %v40699_v59 }
0x1944   :  { %v32620_v6 = vsub.f32 %v32438_v46, %v32478_v12 }
0x1945   :  { %36166 = vmatmul.mubr.f32.vlgmr.msra.gmra.mrb[242].mxu1 %v31894_v45  ;;  %v32581_v45 = vand.u32 4294901760, %v32580_v34 }
0x1946   :  { %36168 = vmatprep.mubr.f32.mxu1 %v31904_v43  ;;  %36510 = vmatpush3.bf16.msra.mxu1 %v40699_v59  ;;  %v32602_v43 = vand.u32 4294901760, %v32601_v30  ;;  %v32621_v31 = vand.u32 4294901760, %v32620_v6 }
0x1947   :  { %36512 = vmatprep.subr.bf16.mxu1 %v40701_v41 }
0x1948   :  { %v36547_v42 = vpack.c.bf16 %v32609_v18, %v32602_v43  ;;  %v32622_v26 = vsub.f32 %v32620_v6, %v32621_v31 }
0x1949   :  { %36169 = vmatmul.mubr.f32.gmra.mrb[244].mxu1 %v31914_v5 }
0x194a   :  { %36514 = vmatpush3.bf16.msra.mxu1 %v40701_v41  ;;  %36179 = vmatprep.mubr.f32.mxu1 %v40709_v3  ;;  %v32434_v41 = vld [vmem:[%s40907_s4 + $0x18] sm:$0xff]  ;;  %v32623_v39 = vand.u32 4294901760, %v32622_v26 }
0x194b   :  { %36516 = vmatprep.subr.bf16.mxu1 %v40681_v22  ;;  %v32466_v23 = vand.u32 4294901760, %v32434_v41 }
0x194d   :  { %36180 = vmatmul.mubr.f32.vlgmr.msra.gmra.mrb[242].mxu1 %v40718_v60 }
0x194e   :  { %36182 = vmatprep.mubr.f32.mxu1 %v31902_v57  ;;  %36518 = vmatpush3.bf16.msra.mxu1 %v40681_v22  ;;  %v32457_v22 = vand.u32 4294901760, %v32431_v28 }
0x194f   :  { %36520 = vmatprep.subr.bf16.mxu1 %v40683_v58 }
0x1950   :  { %v40754_v59 = vpack.c.bf16 %v32460_v47, %v32457_v22  ;;  %v32571_v35 = vsub.f32 %v32431_v28, %v32457_v22  ;;  %v40791_v28 = vpack.c.bf16 %v32606_v4, %v32599_v0 }
0x1951   :  { %36183 = vmatmul.mubr.f32.gmra.mrb[244].mxu1 %v31912_v40 }
0x1952   :  { %36522 = vmatpush3.bf16.msra.mxu1 %v40683_v58  ;;  %36193 = vmatprep.mubr.f32.mxu1 %v40709_v3  ;;  %v32433_v58 = vld [vmem:[%s40907_s4 + $0x10] sm:$0xff]  ;;  %v32572_v14 = vand.u32 4294901760, %v32571_v35  ;;  %v36555_v7 = vpack.c.bf16 %v32578_v16, %v32571_v35 }
0x1953   :  { %36524 = vmatprep.subr.bf16.mxu0 %v40754_v59  ;;  %v32463_v62 = vand.u32 4294901760, %v32433_v58  ;;  %v32437_v3 = vld [vmem:[%s40907_s4 + $0x30] sm:$0xff]  ;;  %s37413_s4 = smov [#allocation6]  }
0x1954   :  { %36526 = vmatpush3.bf16.msra.mxu0 %v40754_v59  ;;  %v32475_v1 = vand.u32 4294901760, %v32437_v3  ;;  %v32573_v44 = vsub.f32 %v32571_v35, %v32572_v14  ;;  %v40795_v22 = vpack.c.bf16 %v32579_v20, %v32572_v14  ;;  %s33151_s20 = sshll.u32 %s37413_s4, 4  ;;  %s33152_s20 = int_to_ptr.vmem [resolvable:$true] %s33151_s20 }
0x1955   :  { %36194 = vmatmul.mubr.f32.vlgmr.msra.gmra.mrb[242].mxu1 %v40718_v60  ;;  %v40764_v49 = vpack.c.bf16 %v32466_v23, %v32463_v62  ;;  %v32585_v15 = vsub.f32 %v32433_v58, %v32463_v62  ;;  %v32592_v60 = vsub.f32 %v32434_v41, %v32466_v23  ;;  %v40799_v58 = vpack.c.bf16 %v32607_v56, %v32600_v61  ;;  %v33174_v62 = vld [vmem:[#allocation2 + $0x98] ss:$0 sm:$0xff]  ;;  %s37350_s30 = scalar_lea.vmem %s33152_s20, 512  ;;  %p37355_p9 = scmp.lt.s32.totalorder %s33152_s20, %s33152_s20 }
0x1956   :  { %36196 = vmatprep.mubr.f32.mxu1 %v31902_v57  ;;  %v40784_v55 = vpack.c.bf16 %v32478_v12, %v32475_v1  ;;  %v32574_v21 = vand.u32 4294901760, %v32573_v44  ;;  %v32613_v57 = vsub.f32 %v32437_v3, %v32475_v1  ;;  %p37351_p8 = scmp.ne.s32.totalorder %s33152_s20, %s37350_s30  ;;  %p37356_p10 = scmp.lt.s32.totalorder %s37350_s30, %s37350_s30 }
0x1957   :  { %36528 = vmatprep.subr.bf16.mxu0 %v40764_v49  ;;  %v32586_v17 = vand.u32 4294901760, %v32585_v15  ;;  %v32593_v50 = vand.u32 4294901760, %v32592_v60  ;;  %v36559_v13 = vpack.c.bf16 %v32592_v60, %v32585_v15 }
0x1958   :  { %36530 = vmatpush3.bf16.msra.mxu0 %v40764_v49  ;;  %v40788_v8 = vpack.c.bf16 %v32581_v45, %v32574_v21  ;;  %v32614_v27 = vand.u32 4294901760, %v32613_v57  ;;  %v40793_v51 = vpack.c.bf16 %v32620_v6, %v32613_v57  ;;  %p37357_p11 = por %p37356_p10, %p37355_p9 }
0x1959   :  { %36197 = vmatmul.mubr.f32.gmra.mrb[244].mxu1 %v31912_v40  ;;  %36532 = vmatprep.subr.bf16.mxu0 %v40774_v37  ;;  %v32587_v63 = vsub.f32 %v32585_v15, %v32586_v17  ;;  %v32594_v9 = vsub.f32 %v32592_v60, %v32593_v50  ;;  %v40797_v47 = vpack.c.bf16 %v32593_v50, %v32586_v17 }
0x195a   :  { %v32615_v10 = vsub.f32 %v32613_v57, %v32614_v27  ;;  %v40801_v41 = vpack.c.bf16 %v32621_v31, %v32614_v27  ;;  %p37358_p12 = pnand %p37357_p11, %p37351_p8 }
0x195b   :  { %v32588_v52 = vand.u32 4294901760, %v32587_v63  ;;  %v32595_v25 = vand.u32 4294901760, %v32594_v9 }
0x195c   :  { %36534 = vmatpush3.bf16.msra.mxu0 %v40774_v37  ;;  %v32616_v40 = vand.u32 4294901760, %v32615_v10 }
0x195d   :  { %36536 = vmatprep.subr.bf16.mxu0 %v40784_v55  ;;  %v36543_v11 = vpack.c.bf16 %v32595_v25, %v32588_v52 }
0x195e   :  { %v36551_v5 = vpack.c.bf16 %v32623_v39, %v32616_v40 }
0x1960   :  { %36538 = vmatpush3.bf16.msra.mxu0 %v40784_v55 }
0x1961   :  { %36540 = vmatprep.subr.bf16.mxu0 %v40788_v8 }
0x1a28   :  { %v36195_v23 = vpop.f32.mrb[242].mxu1 }
0x1a29   :  { %v36683_v53 = vadd.f32 %v36195_v23, %v33174_v62  ;;  %v32405_v29 = vpop.f32.mrb[243].mxu1 }
0x1a2a   :  { %v36684_v54 = vadd.f32 %v33174_v62, %v32405_v29 }
0x1a2b   :  { %v32428_v2 = vmax.f32 %v36683_v53, 0.0 }
0x1a2c   :  { %v32427_v35 = vmax.f32 %v36684_v54, 0.0  ;;  %v36198_v16 = vpop.f32.mrb[244].mxu1 }
0x1a2d   :  { %v32448_v3 = vsel %vm32443_vm4, %v32428_v2, 0  ;;  %v36685_v46 = vadd.f32 %v36198_v16, %v33174_v62  ;;  %v32417_v1 = vpop.f32.mrb[245].mxu1 }
0x1a2e   :  { %v40804_v12 = vand.u32 4294901760, %v32448_v3  ;;  %v32445_v14 = vsel %vm32443_vm4, %v32427_v35, 0  ;;  %v36686_v20 = vadd.f32 %v33174_v62, %v32417_v1 }
0x1a2f   :  { %v40807_v44 = vand.u32 4294901760, %v32445_v14  ;;  %v32430_v34 = vmax.f32 %v36685_v46, 0.0 }
0x1a30   :  { %v32540_v15 = vsub.f32 %v32448_v3, %v40804_v12  ;;  %v32429_v60 = vmax.f32 %v36686_v20, 0.0 }
0x1a31   :  { %v32530_v21 = vsub.f32 %v32445_v14, %v40807_v44  ;;  %v32454_v45 = vsel %vm32443_vm4, %v32430_v34, 0 }
0x1a32   :  { %v32541_v17 = vand.u32 4294901760, %v32540_v15  ;;  %v40812_v50 = vand.u32 4294901760, %v32454_v45  ;;  %v32451_v63 = vsel %vm32443_vm4, %v32429_v60, 0 }
0x1a33   :  { %v40815_v0 = vand.u32 4294901760, %v32451_v63  ;;  %v32531_v4 = vand.u32 4294901760, %v32530_v21 }
0x1a34   :  { %v32560_v9 = vsub.f32 %v32454_v45, %v40812_v50  ;;  %v32542_v52 = vsub.f32 %v32540_v15, %v32541_v17 }
0x1a35   :  { %v32550_v61 = vsub.f32 %v32451_v63, %v40815_v0  ;;  %v32532_v56 = vsub.f32 %v32530_v21, %v32531_v4 }
0x1a36   :  { %v32561_v25 = vand.u32 4294901760, %v32560_v9  ;;  %v32543_v57 = vand.u32 4294901760, %v32542_v52 }
0x1a37   :  { %v32533_v30 = vand.u32 4294901760, %v32532_v56  ;;  %v32551_v33 = vand.u32 4294901760, %v32550_v61 }
0x1a38   :  { %v32562_v6 = vsub.f32 %v32560_v9, %v32561_v25 }
0x1a39   :  { %36215 = vmatprep.mubr.f32.mxu0 %v32533_v30  ;;  %v32552_v43 = vsub.f32 %v32550_v61, %v32551_v33 }
0x1a3a   :  { %36216 = vmatmul.mubr.f32.vlgmr.msra.gmra.mrb[234].mxu0 %v32543_v57  ;;  %v32563_v27 = vand.u32 4294901760, %v32562_v6 }
0x1a3b   :  { %36542 = vmatpush3.bf16.msra.mxu0 %v40788_v8  ;;  %v32553_v18 = vand.u32 4294901760, %v32552_v43 }
0x1a3c   :  { %36544 = vmatprep.subr.bf16.mxu0 %v36543_v11 }
0x1a3d   :  { %36218 = vmatprep.mubr.f32.mxu0 %v32553_v18 }
0x1a3e   :  { %36219 = vmatmul.mubr.f32.gmra.mrb[236].mxu0 %v32563_v27 }
0x1a3f   :  { %36546 = vmatpush3.bf16.msra.mxu0 %v36543_v11  ;;  %36237 = vmatprep.mubr.f32.mxu0 %v40807_v44 }
0x1a40   :  { %36548 = vmatprep.subr.bf16.mxu0 %v36547_v42 }
0x1a43   :  { %36550 = vmatpush3.bf16.msra.mxu0 %v36547_v42 }
0x1a44   :  { %36552 = vmatprep.subr.bf16.mxu0 %v36551_v5 }
0x1a47   :  { %36554 = vmatpush3.bf16.msra.mxu0 %v36551_v5 }
0x1a48   :  { %36556 = vmatprep.subr.bf16.mxu0 %v36555_v7 }
0x1a4a   :  { %36238 = vmatmul.mubr.f32.vlgmr.msra.gmra.mrb[234].mxu0 %v40804_v12 }
0x1a4b   :  { %36240 = vmatprep.mubr.f32.mxu0 %v40815_v0  ;;  %36558 = vmatpush3.bf16.msra.mxu0 %v36555_v7 }
0x1a4c   :  { %36560 = vmatprep.subr.bf16.mxu0 %v36559_v13 }
0x1a4e   :  { %36241 = vmatmul.mubr.f32.gmra.mrb[236].mxu0 %v40812_v50 }
0x1a4f   :  { %36562 = vmatpush3.bf16.msra.mxu0 %v36559_v13  ;;  %36259 = vmatprep.mubr.f32.mxu0 %v32530_v21 }
0x1a50   :  { %36564 = vmatprep.subr.bf16.mxu0 %v40791_v28 }
0x1a53   :  { %36566 = vmatpush3.bf16.msra.mxu0 %v40791_v28 }
0x1a54   :  { %36568 = vmatprep.subr.bf16.mxu0 %v40793_v51 }
0x1a57   :  { %36570 = vmatpush3.bf16.msra.mxu0 %v40793_v51 }
0x1a58   :  { %36572 = vmatprep.subr.bf16.mxu0 %v40754_v59 }
0x1a5a   :  { %36260 = vmatmul.mubr.f32.vlgmr.msra.gmra.mrb[234].mxu0 %v32540_v15 }
0x1a5b   :  { %36262 = vmatprep.mubr.f32.mxu0 %v32550_v61  ;;  %36574 = vmatpush3.bf16.msra.mxu0 %v40754_v59 }
0x1a5c   :  { %36576 = vmatprep.subr.bf16.mxu0 %v40764_v49 }
0x1a5e   :  { %36263 = vmatmul.mubr.f32.gmra.mrb[236].mxu0 %v32560_v9 }
0x1a5f   :  { %36578 = vmatpush3.bf16.msra.mxu0 %v40764_v49  ;;  %36281 = vmatprep.mubr.f32.mxu0 %v32531_v4 }
0x1a60   :  { %36580 = vmatprep.subr.bf16.mxu0 %v40774_v37 }
0x1a63   :  { %36582 = vmatpush3.bf16.msra.mxu0 %v40774_v37 }
0x1a64   :  { %36584 = vmatprep.subr.bf16.mxu0 %v40784_v55 }
0x1a67   :  { %36586 = vmatpush3.bf16.msra.mxu0 %v40784_v55 }
0x1a68   :  { %36588 = vmatprep.subr.bf16.mxu0 %v40795_v22 }
0x1a6a   :  { %36282 = vmatmul.mubr.f32.vlgmr.msra.gmra.mrb[234].mxu0 %v32541_v17 }
0x1a6b   :  { %36284 = vmatprep.mubr.f32.mxu0 %v32551_v33  ;;  %36590 = vmatpush3.bf16.msra.mxu0 %v40795_v22 }
0x1a6c   :  { %36592 = vmatprep.subr.bf16.mxu0 %v40797_v47 }
0x1a6e   :  { %36285 = vmatmul.mubr.f32.gmra.mrb[236].mxu0 %v32561_v25 }
0x1a6f   :  { %36594 = vmatpush3.bf16.msra.mxu0 %v40797_v47  ;;  %36303 = vmatprep.mubr.f32.mxu0 %v40807_v44 }
0x1a70   :  { %36596 = vmatprep.subr.bf16.mxu0 %v40799_v58 }
0x1a73   :  { %36598 = vmatpush3.bf16.msra.mxu0 %v40799_v58 }
0x1a74   :  { %36600 = vmatprep.subr.bf16.mxu0 %v40801_v41 }
0x1a77   :  { %36602 = vmatpush3.bf16.msra.mxu0 %v40801_v41 }
0x1a78   :  { %36604 = vmatprep.subr.bf16.mxu0 %v40754_v59 }
0x1a7a   :  { %36304 = vmatmul.mubr.f32.vlgmr.msra.gmra.mrb[234].mxu0 %v40804_v12 }
0x1a7b   :  { %36306 = vmatprep.mubr.f32.mxu0 %v40815_v0  ;;  %36606 = vmatpush3.bf16.msra.mxu0 %v40754_v59 }
0x1a7c   :  { %36608 = vmatprep.subr.bf16.mxu0 %v40764_v49 }
0x1a7e   :  { %36307 = vmatmul.mubr.f32.gmra.mrb[236].mxu0 %v40812_v50 }
0x1a7f   :  { %36610 = vmatpush3.bf16.msra.mxu0 %v40764_v49  ;;  %36325 = vmatprep.mubr.f32.mxu0 %v40807_v44 }
0x1a80   :  { %36612 = vmatprep.subr.bf16.mxu0 %v40774_v37 }
0x1a83   :  { %36614 = vmatpush3.bf16.msra.mxu0 %v40774_v37 }
0x1a84   :  { %36616 = vmatprep.subr.bf16.mxu0 %v40784_v55 }
0x1a87   :  { %36618 = vmatpush3.bf16.msra.mxu0 %v40784_v55 }
0x1a8a   :  { %36326 = vmatmul.mubr.f32.vlgmr.msra.gmra.mrb[234].mxu0 %v40804_v12 }
0x1a8b   :  { %36328 = vmatprep.mubr.f32.mxu0 %v40815_v0 }
0x1a8e   :  { %36329 = vmatmul.mubr.f32.gmra.mrb[236].mxu0 %v40812_v50 }
0x1a8f   :  { %37361 = shalt.err (!%p37358_p12)
}
0x1a90   :  { %s37362_s3 = scalar_lea.hbm %s40910_s7, 512 }
0x1a91   :  { %p37363_p13 = scmp.ne.s32.totalorder %s40910_s7, %s37362_s3  ;;  %p37366_p0 = scmp.lt.u32.totalorder %s37362_s3, %s40910_s7 }
0x1a93   :  { %p37368_p1 = pnand %p37366_p0, %p37363_p13 }
0x1a95   :  { %37371 = shalt.err (!%p37368_p1)
}
0x1a96   :  { %s37414_s2 = smov 128   ;;  %s37415_s12 = smov 8   ;;  %v37327_v59 = vld [vmem:[%s40908_s5 + $0x8] sm:$0xff] }
0x1a97   :  { %33157 = dma.vmem_to_hbm [thread:$0]  %s33152_s20, 512, %s40910_s7, [#allocation7], %s37414_s2, %s37414_s2, %s37415_s12   ;;  %v32442_v49 = vrot.slane %v37327_v59, %v133_v48 }
0x1a98   :  { %s37416_s7 = smov [#allocation5]  }
0x1a99   :  { %s33139_s27 = sshll.u32 %s37416_s7, 4  ;;  %s33140_s27 = int_to_ptr.vmem [resolvable:$true] %s33139_s27 }
0x1a9a   :  { %s37372_s5 = scalar_lea.vmem %s33140_s27, 512  ;;  %p37377_p3 = scmp.lt.s32.totalorder %s33140_s27, %s33140_s27 }
0x1a9b   :  { %p37373_p2 = scmp.ne.s32.totalorder %s33140_s27, %s37372_s5  ;;  %p37378_p4 = scmp.lt.s32.totalorder %s37372_s5, %s37372_s5 }
0x1a9d   :  { %p37379_p5 = por %p37378_p4, %p37377_p3 }
0x1a9f   :  { %p37380_p6 = pnand %p37379_p5, %p37373_p2 }
0x1b5d   :  { %v36327_v37 = vpop.f32.mrb[234].mxu0 }
0x1b5e   :  { %v36687_v55 = vadd.f32 %v36327_v37, %v32442_v49  ;;  %v33100_v8 = vpop.f32.mrb[235].mxu0 }
0x1b5f   :  { %v36688_v11 = vadd.f32 %v33100_v8, %v32442_v49 }
0x1b60   :  { %v33123_v31 = vadd.f32 %v36687_v55, %v40647_v19 }
0x1b61   :  { %v33122_v42 = vadd.f32 %v36688_v11, %v40641_v38  ;;  %v36330_v10 = vpop.f32.mrb[236].mxu0 }
0x1b62   :  { %33127 = vst.msk [vmem:[#allocation5 + $0x8] sm:$0xff] %vm77_vm0, %v33123_v31  ;;  %v36689_v26 = vadd.f32 %v36330_v10, %v32442_v49  ;;  %v33112_v40 = vpop.f32.mrb[237].mxu0 }
0x1b63   :  { %33126 = vst.msk [vmem:[#allocation5] sm:$0xff] %vm77_vm0, %v33122_v42  ;;  %v36690_v39 = vadd.f32 %v33112_v40, %v32442_v49 }
0x1b64   :  { %v33125_v36 = vadd.f32 %v36689_v26, %v40659_v32 }
0x1b65   :  { %v33124_v48 = vadd.f32 %v36690_v39, %v40653_v24 }
0x1b66   :  { %33129 = vst.msk [vmem:[#allocation5 + $0x18] sm:$0xff] %vm77_vm0, %v33125_v36 }
0x1b67   :  { %33128 = vst.msk [vmem:[#allocation5 + $0x10] sm:$0xff] %vm77_vm0, %v33124_v48 }
0x1b68   :  { %37383 = shalt.err (!%p37380_p6)
}
0x1b69   :  { %s37384_s9 = scalar_lea.hbm %s40909_s6, 512 }
0x1b6a   :  { %p37385_p7 = scmp.ne.s32.totalorder %s40909_s6, %s37384_s9  ;;  %p37388_p8 = scmp.lt.u32.totalorder %s37384_s9, %s40909_s6 }
0x1b6c   :  { %p37390_p9 = pnand %p37388_p8, %p37385_p7 }
0x1b6e   :  { %37393 = shalt.err (!%p37390_p9)
}
0x1b6f   :  { %33145 = dma.vmem_to_hbm [thread:$0]  %s33140_s27, 512, %s40909_s6, [#allocation4], %s37414_s2, %s37414_s2, %s37415_s12  }
0x1b70   :  { %37396 = dma.done.wait [#allocation4], 512  }
0x1b71   :  { %37397 = vsyncadd [#allocation4], 4294966784 }
0x1b72   :  { %37398 = dma.done.wait [#allocation7], 512  }
0x1b73   :  { %37399 = vsyncadd [#allocation7], 4294966784 }
0x1b74   :  { %33164 = vsyncpa [#allocation3], 1 }
0x1b75   :  { %33165 = vsyncpa [#allocation4], 1 }
0x1b76   :  { %33166 = vsyncpa [#allocation7], 1 }

</bundles_post_ra>
